<compile_context>
chip_gen: v7x
topology: tpu7x:2x2x1
jax: 0.10.0
libtpu: 0.0.40
codegen_flags: <defaults>
</compile_context>

<pallas_src>
from functools import partial

import jax
import jax.numpy as jnp
from jax.experimental import pallas as pl
from jax.experimental.pallas import tpu as pltpu


# ----------------------------------------------------------------------------
# In-kernel helpers (pure functions, traced inside the Pallas kernels)
# ----------------------------------------------------------------------------
def _lrelu(y):
    return jnp.where(y >= 0.0, y, 0.2 * y)


def _mm(a, b):
    """bf16 x bf16 MXU matmul with f32 accumulation."""
    return jnp.dot(a.astype(jnp.bfloat16), b.astype(jnp.bfloat16),
                   preferred_element_type=jnp.float32)


def _sel(rows, cols, rmul, roff, cmul):
    """0/1 selection matrix S[r, c] = (rmul*r + roff == cmul*c), f32."""
    r = jax.lax.broadcasted_iota(jnp.int32, (rows, cols), 0)
    c = jax.lax.broadcasted_iota(jnp.int32, (rows, cols), 1)
    return (rmul * r + roff == cmul * c).astype(jnp.float32)


def _conv_taps(x, w_cat, sels):
    """Tap conv with all K tap weights fused into one MXU matmul.

    x: (Cin, L_in) f32, w_cat: (K*Cout, Cin) bf16, sels[k]: (L_in, L_out) 0/1 f32.
    out = sum_k (W_k @ x) @ sels[k]   (boundary zero-padding / stride handled by sels).
    """
    k_taps = len(sels)
    y = _mm(w_cat, x)                                   # (K*Cout, L_in) f32
    c = y.shape[0] // k_taps
    out = jnp.dot(y[0:c], sels[0], preferred_element_type=jnp.float32)
    for k in range(1, k_taps):
        out = out + jnp.dot(y[k * c:(k + 1) * c], sels[k],
                            preferred_element_type=jnp.float32)
    return out


def _res_stack(h, ws, ss, bs, wf, sf, bf, sels3, nrl):
    """Res_CNR_Stack: nrl x [lrelu(bn(conv3(h)) + h)], then relu(bn(conv3(h)) + x0)."""
    x0 = h
    for i in range(nrl):
        t = _conv_taps(h, ws[i], sels3) * ss[i] + bs[i]
        h = _lrelu(t + h)
    t = _conv_taps(h, wf[...], sels3) * sf[...] + bf[...]
    return jnp.maximum(t + x0, 0.0)


# ----------------------------------------------------------------------------
# Fused macro-stage kernel (one batch element per grid step)
# ----------------------------------------------------------------------------
def _stage_kernel(*refs, head, has_tail, nrl, L):
    """refs = (x_ref, <head weights>, ws, ss, bs, wf, sf, bf, [wt, bt], o_ref).

      head == "conv3": wh (3C, Cin), sh, bh (C, 1)             [CNR conv3 + BN + lrelu]
      head == "conv1": wh (C, Cin),  bh (C, 1)                  [plain 1x1 conv]
      head == "down" : wh (4C, Cin), sh, bh, wr (4C, Cin), br   [conv k4 s2 + BN + res + lrelu]
      head == "up"   : wh (4C, Cin), sh, bh, wr (C, Cin),  br   [convT k4 s2 + BN + res + lrelu]
      stack: ws (nrl, 3C, C), ss/bs (nrl, C, 1), wf (3C, C), sf/bf (C, 1)
      tail : wt (Ct, C), bt (Ct, 1)                             [plain 1x1 conv]
    """
    it = iter(refs)
    x_ref = next(it)
    if head == "conv3":
        wh, sh, bh = next(it), next(it), next(it)
    elif head == "conv1":
        wh, bh = next(it), next(it)
    else:  # "down" / "up"
        wh, sh, bh = next(it), next(it), next(it)
        wr, br = next(it), next(it)
    ws, ss, bs = next(it), next(it), next(it)
    wf, sf, bf = next(it), next(it), next(it)
    if has_tail:
        wt, bt = next(it), next(it)
    o_ref = next(it)

    x = x_ref[...].astype(jnp.float32)

    if head == "conv3":
        # conv(k=3, s=1, p=1): out[:, l] uses x[:, l + k - 1]
        sels = [_sel(L, L, 1, 1 - k, 1) for k in range(3)]
        h = _lrelu(_conv_taps(x, wh[...], sels) * sh[...] + bh[...])
        Lc = L
    elif head == "conv1":
        h = _mm(wh[...], x) + bh[...]
        Lc = L
    elif head == "down":
        # conv(k=4, s=2, p=1): out[:, m] uses x[:, 2m + k - 1]; residual conv same shape.
        sels = [_sel(L, L // 2, 1, 1 - k, 2) for k in range(4)]
        main = _conv_taps(x, wh[...], sels) * sh[...] + bh[...]
        res = _conv_taps(x, wr[...], sels) + br[...]
        h = _lrelu(main + res)
        Lc = L // 2
    else:  # "up": ConvTranspose1d(k=4, s=2, p=1) + BN; residual = conv1(nearest-up x2)
        usel = [_sel(L, 2 * L, 2, k - 1, 1) for k in range(4)]   # out[:, 2m+k-1] += W_k^T x[:, m]
        main = _conv_taps(x, wh[...], usel) * sh[...] + bh[...]
        rep2 = _sel(L, 2 * L, 2, 0, 1) + _sel(L, 2 * L, 2, 1, 1)  # nearest-neighbour x2
        res = jnp.dot(_mm(wr[...], x) + br[...], rep2,
                      preferred_element_type=jnp.float32)
        h = _lrelu(main + res)
        Lc = 2 * L

    sels3 = [_sel(Lc, Lc, 1, 1 - k, 1) for k in range(3)]
    h = _res_stack(h, ws, ss, bs, wf, sf, bf, sels3, nrl)

    if has_tail:
        h = _mm(wt[...], h) + bt[...]

    o_ref[...] = h.astype(o_ref.dtype)


def _vq_kernel(z_ref, emb_ref, esq_ref, q_ref):
    """Nearest-codebook lookup for one batch element.

    z_ref: (L, D) latents, emb_ref: (N, D) codebook, esq_ref: (1, N) = ||e||^2.
    Distance d = ||e||^2 - 2 z.e^T  (||z||^2 dropped: per-row constant, argmin-invariant).
    """
    z = z_ref[...]
    emb = emb_ref[...]
    ze = jax.lax.dot_general(z.astype(jnp.bfloat16), emb.astype(jnp.bfloat16),
                             (((1,), (1,)), ((), ())),
                             preferred_element_type=jnp.float32)       # (L, N)
    d = esq_ref[...] - 2.0 * ze
    idx = jnp.argmin(d, axis=-1)
    onehot = (jax.lax.broadcasted_iota(jnp.int32, d.shape, 1)
              == idx[:, None]).astype(jnp.float32)
    q_ref[...] = jnp.dot(onehot, emb, preferred_element_type=jnp.float32)


# ----------------------------------------------------------------------------
# pallas_call wrappers
# ----------------------------------------------------------------------------
def _const_spec(a):
    """Whole-array VMEM-resident block (same block for every grid step)."""
    return pl.BlockSpec(a.shape, lambda b, _nd=a.ndim: (0,) * _nd)


def _run_stage(x, weights, head, has_tail, nrl, out_c, l_out, out_dtype):
    b, c_in, l_in = x.shape
    kernel = partial(_stage_kernel, head=head, has_tail=has_tail, nrl=nrl, L=l_in)
    in_specs = [pl.BlockSpec((None, c_in, l_in), lambda i: (i, 0, 0))]
    in_specs += [_const_spec(w) for w in weights]
    return pl.pallas_call(
        kernel,
        grid=(b,),
        out_shape=jax.ShapeDtypeStruct((b, out_c, l_out), out_dtype),
        in_specs=in_specs,
        out_specs=pl.BlockSpec((None, out_c, l_out), lambda i: (i, 0, 0)),
        compiler_params=pltpu.CompilerParams(
            dimension_semantics=("parallel",),
            vmem_limit_bytes=32 * 1024 * 1024),
    )(x, *weights)


def vq_forward(embeddings, z):
    """z: (B, D, L) channels-first latents -> quantized e: (B, D, L) f32."""
    b, d, l = z.shape
    zt = jnp.transpose(z, (0, 2, 1)).astype(jnp.float32)               # (B, L, D)
    esq = jnp.sum(embeddings * embeddings, axis=-1, keepdims=True).T   # (1, N)
    q = pl.pallas_call(
        _vq_kernel,
        grid=(b,),
        out_shape=jax.ShapeDtypeStruct((b, l, d), jnp.float32),
        in_specs=[pl.BlockSpec((None, l, d), lambda i: (i, 0, 0)),
                  _const_spec(embeddings), _const_spec(esq)],
        out_specs=pl.BlockSpec((None, l, d), lambda i: (i, 0, 0)),
        compiler_params=pltpu.CompilerParams(
            dimension_semantics=("parallel",)),
    )(zt, embeddings, esq)
    return jnp.transpose(q, (0, 2, 1))


# ----------------------------------------------------------------------------
# Parameter init (deterministic, synthetic) -- same structure as the PyTorch module
# ----------------------------------------------------------------------------
class ParamInit:
    def __init__(self, seed=0):
        self.key = jax.random.PRNGKey(seed)

    def _next(self):
        self.key, sub = jax.random.split(self.key)
        return sub

    def normal(self, shape, std=0.05):
        return std * jax.random.normal(self._next(), shape, jnp.float32)


def init_conv(pi, cout, cin, k):
    return {"w": pi.normal((cout, cin, k)), "b": pi.normal((cout,), 0.01)}


def init_convT(pi, cin, cout, k):
    return {"w": pi.normal((cin, cout, k)), "b": pi.normal((cout,), 0.01)}


def init_bn(pi, c):
    return {"gamma": 1.0 + pi.normal((c,), 0.01),
            "beta": pi.normal((c,), 0.01),
            "mean": pi.normal((c,), 0.01),
            "var": 1.0 + jnp.abs(pi.normal((c,), 0.01))}


def init_cnr(pi, cin, cout, sample="none", residual=False):
    p = {"sample": sample, "residual": residual}
    if sample == "up":
        p["conv"] = init_convT(pi, cin, cout, 4)
    elif sample == "down":
        p["conv"] = init_conv(pi, cout, cin, 4)
    else:
        p["conv"] = init_conv(pi, cout, cin, 3)
    p["bn"] = init_bn(pi, cout)
    if residual:
        if sample == "down":
            p["res"] = init_conv(pi, cout, cin, 4)
        elif sample == "up":
            p["res"] = init_conv(pi, cout, cin, 1)
        elif cin != cout:
            p["res"] = init_conv(pi, cout, cin, 1)
        else:
            p["res"] = None  # identity residual
    return p


def init_res_stack(pi, channels, layers):
    return {"layers": [init_cnr(pi, channels, channels, "none", True) for _ in range(layers)],
            "conv": init_conv(pi, channels, channels, 3),
            "bn": init_bn(pi, channels)}


def init_encoder(pi, in_dim, embedding_dim, nh, nrl):
    return {"project": init_cnr(pi, in_dim, nh // 4, "none", False),
            "enc_1": init_res_stack(pi, nh // 4, nrl),
            "down_1": init_cnr(pi, nh // 4, nh // 2, "down", True),
            "enc_2": init_res_stack(pi, nh // 2, nrl),
            "down_2": init_cnr(pi, nh // 2, nh, "down", True),
            "enc_3": init_res_stack(pi, nh, nrl),
            "pre_vq": init_conv(pi, embedding_dim, nh, 1)}


def init_decoder(pi, out_dim, embedding_dim, nh, nrl):
    return {"aft_vq": init_conv(pi, nh, embedding_dim, 1),
            "dec_1": init_res_stack(pi, nh, nrl),
            "up_2": init_cnr(pi, nh, nh // 2, "up", True),
            "dec_2": init_res_stack(pi, nh // 2, nrl),
            "up_3": init_cnr(pi, nh // 2, nh // 4, "up", True),
            "dec_3": init_res_stack(pi, nh // 4, nrl),
            "project": init_conv(pi, out_dim, nh // 4, 1)}


def init_vqvae(seed, in_dim, embedding_dim, num_embeddings, nh, nrl):
    pi = ParamInit(seed)
    return {"encoder": init_encoder(pi, in_dim, embedding_dim, nh, nrl),
            "vq": {"embeddings": pi.normal((num_embeddings, embedding_dim), 0.05)},
            "decoder": init_decoder(pi, in_dim, embedding_dim, nh, nrl)}


# ----------------------------------------------------------------------------
# Host-side weight packing: fold BN(eval)+bias, concat conv taps, cast to bf16
# ----------------------------------------------------------------------------
def _fold_bn(bn, bias, eps=1e-5):
    scale = bn["gamma"] / jnp.sqrt(bn["var"] + eps)
    shift = bn["beta"] - bn["mean"] * scale + bias * scale   # conv bias folded in
    return (scale.reshape(-1, 1).astype(jnp.float32),
            shift.reshape(-1, 1).astype(jnp.float32))


def _cat_taps(w):        # Conv1d weight (Cout, Cin, K) -> (K*Cout, Cin) bf16
    return jnp.concatenate([w[:, :, k] for k in range(w.shape[-1])],
                           axis=0).astype(jnp.bfloat16)


def _cat_taps_T(w):      # ConvTranspose1d weight (Cin, Cout, K) -> (K*Cout, Cin) bf16
    return jnp.concatenate([w[:, :, k].T for k in range(w.shape[-1])],
                           axis=0).astype(jnp.bfloat16)


def _w_point(w):         # (Cout, Cin, 1) -> (Cout, Cin) bf16
    return w[:, :, 0].astype(jnp.bfloat16)


def _col(b):
    return b.reshape(-1, 1).astype(jnp.float32)


def _pack_stack(sp):
    ws = jnp.stack([_cat_taps(lp["conv"]["w"]) for lp in sp["layers"]], 0)
    sc, sh = [], []
    for lp in sp["layers"]:
        s_, h_ = _fold_bn(lp["bn"], lp["conv"]["b"])
        sc.append(s_)
        sh.append(h_)
    wf = _cat_taps(sp["conv"]["w"])
    sf, bf = _fold_bn(sp["bn"], sp["conv"]["b"])
    return [ws, jnp.stack(sc, 0), jnp.stack(sh, 0), wf, sf, bf]


def _pack_cnr_head(cp):
    s, b = _fold_bn(cp["bn"], cp["conv"]["b"])
    if cp["sample"] == "down":
        return [_cat_taps(cp["conv"]["w"]), s, b,
                _cat_taps(cp["res"]["w"]), _col(cp["res"]["b"])]
    if cp["sample"] == "up":
        return [_cat_taps_T(cp["conv"]["w"]), s, b,
                _w_point(cp["res"]["w"]), _col(cp["res"]["b"])]
    return [_cat_taps(cp["conv"]["w"]), s, b]   # plain conv3 CNR (no residual branch)


def pack_vqvae(params):
    enc, dec, vq = params["encoder"], params["decoder"], params["vq"]
    return {
        "s1": _pack_cnr_head(enc["project"]) + _pack_stack(enc["enc_1"]),
        "s2": _pack_cnr_head(enc["down_1"]) + _pack_stack(enc["enc_2"]),
        "s3": (_pack_cnr_head(enc["down_2"]) + _pack_stack(enc["enc_3"])
               + [_w_point(enc["pre_vq"]["w"]), _col(enc["pre_vq"]["b"])]),
        "emb": vq["embeddings"].astype(jnp.float32),
        "s4": ([_w_point(dec["aft_vq"]["w"]), _col(dec["aft_vq"]["b"])]
               + _pack_stack(dec["dec_1"])),
        "s5": _pack_cnr_head(dec["up_2"]) + _pack_stack(dec["dec_2"]),
        "s6": (_pack_cnr_head(dec["up_3"]) + _pack_stack(dec["dec_3"])
               + [_w_point(dec["project"]["w"]), _col(dec["project"]["b"])]),
    }


# ----------------------------------------------------------------------------
# Forward (eval mode)
# ----------------------------------------------------------------------------
def vqvae_forward(packed, gt_poses, *, num_hiddens, nrl):
    """Eval-mode VQVAE.forward.

    gt_poses: (B, T, in_dim)  (PyTorch input before its internal .transpose(1, 2)).
    Returns (e, x_recon) in PyTorch NCW convention:
      e       : (B, embedding_dim, T // 4)
      x_recon : (B, in_dim, T)
    """
    b, t, in_dim = gt_poses.shape
    c1, c2, c3 = num_hiddens // 4, num_hiddens // 2, num_hiddens
    d = packed["emb"].shape[1]
    x = jnp.transpose(gt_poses, (0, 2, 1)).astype(jnp.bfloat16)        # NCW

    h = _run_stage(x, packed["s1"], "conv3", False, nrl, c1, t, jnp.bfloat16)
    h = _run_stage(h, packed["s2"], "down", False, nrl, c2, t // 2, jnp.bfloat16)
    z = _run_stage(h, packed["s3"], "down", True, nrl, d, t // 4, jnp.float32)
    e = vq_forward(packed["emb"], z)                                   # (B, D, T//4) f32
    h = _run_stage(e.astype(jnp.bfloat16), packed["s4"], "conv1", False, nrl,
                   c3, t // 4, jnp.bfloat16)
    h = _run_stage(h, packed["s5"], "up", False, nrl, c2, t // 2, jnp.bfloat16)
    recon = _run_stage(h, packed["s6"], "up", True, nrl, in_dim, t, jnp.float32)
    return e, recon


# ----------------------------------------------------------------------------
if __name__ == "__main__":
    # Small synthetic configuration.
    B, T = 2, 16
    in_dim = 6
    embedding_dim = 64
    num_embeddings = 128
    num_hiddens = 64
    num_residual_layers = 2

    params = init_vqvae(0, in_dim, embedding_dim, num_embeddings,
                        num_hiddens, num_residual_layers)
    packed = pack_vqvae(params)

    key = jax.random.PRNGKey(0)
    gt_poses = jax.random.normal(key, (B, T, in_dim), jnp.float32)

    fwd = jax.jit(partial(vqvae_forward, num_hiddens=num_hiddens,
                          nrl=num_residual_layers))
    e, x_recon = fwd(packed, gt_poses)
    jax.block_until_ready((e, x_recon))

    assert e.shape == (B, embedding_dim, T // 4), e.shape
    assert x_recon.shape == (B, in_dim, T), x_recon.shape
    assert bool(jnp.all(jnp.isfinite(e))) and bool(jnp.all(jnp.isfinite(x_recon)))

    print("KERNEL_OK")
</pallas_src>

<mosaic_0001>
module attributes {stable_mosaic.version = 11 : i64} {
  func.func @_stage_kernel(%arg0: i32, %arg1: memref<1x6x16xbf16, #tpu.memory_space<vmem>>, %arg2: memref<48x6xbf16, #tpu.memory_space<vmem>>, %arg3: memref<16x1xf32, #tpu.memory_space<vmem>>, %arg4: memref<16x1xf32, #tpu.memory_space<vmem>>, %arg5: memref<2x48x16xbf16, #tpu.memory_space<vmem>>, %arg6: memref<2x16x1xf32, #tpu.memory_space<vmem>>, %arg7: memref<2x16x1xf32, #tpu.memory_space<vmem>>, %arg8: memref<48x16xbf16, #tpu.memory_space<vmem>>, %arg9: memref<16x1xf32, #tpu.memory_space<vmem>>, %arg10: memref<16x1xf32, #tpu.memory_space<vmem>>, %arg11: memref<1x16x16xbf16, #tpu.memory_space<vmem>>) attributes {dimension_semantics = [#tpu.dimension_semantics<parallel>], iteration_bounds = array<i64: 2>, scalar_prefetch = 0 : i64, scratch_operands = 0 : i64, tpu.core_type = #tpu.core_type<tc>, window_params = [{transform_indices = @transform_0, window_bounds = array<i64: 1, 6, 16>}, {pipeline_mode = #tpu.pipeline_mode<synchronous>, transform_indices = @transform_1, window_bounds = array<i64: 48, 6>}, {pipeline_mode = #tpu.pipeline_mode<synchronous>, transform_indices = @transform_2, window_bounds = array<i64: 16, 1>}, {pipeline_mode = #tpu.pipeline_mode<synchronous>, transform_indices = @transform_3, window_bounds = array<i64: 16, 1>}, {pipeline_mode = #tpu.pipeline_mode<synchronous>, transform_indices = @transform_4, window_bounds = array<i64: 2, 48, 16>}, {pipeline_mode = #tpu.pipeline_mode<synchronous>, transform_indices = @transform_5, window_bounds = array<i64: 2, 16, 1>}, {pipeline_mode = #tpu.pipeline_mode<synchronous>, transform_indices = @transform_6, window_bounds = array<i64: 2, 16, 1>}, {pipeline_mode = #tpu.pipeline_mode<synchronous>, transform_indices = @transform_7, window_bounds = array<i64: 48, 16>}, {pipeline_mode = #tpu.pipeline_mode<synchronous>, transform_indices = @transform_8, window_bounds = array<i64: 16, 1>}, {pipeline_mode = #tpu.pipeline_mode<synchronous>, transform_indices = @transform_9, window_bounds = array<i64: 16, 1>}, {transform_indices = @transform_10, window_bounds = array<i64: 1, 16, 16>}]} {
    %c0 = arith.constant 0 : index
    %c0_0 = arith.constant 0 : index
    %c0_1 = arith.constant 0 : index
    %0 = vector.load %arg1[%c0, %c0_0, %c0_1] : memref<1x6x16xbf16, #tpu.memory_space<vmem>>, vector<1x6x16xbf16>
    %1 = vector.shape_cast %0 : vector<1x6x16xbf16> to vector<6x16xbf16>
    %2 = arith.extf %1 : vector<6x16xbf16> to vector<6x16xf32>
    %3 = tpu.iota {dimensions = array<i32: 0>} : vector<16x16xi32>
    %4 = tpu.iota {dimensions = array<i32: 1>} : vector<16x16xi32>
    %c1_i32 = arith.constant 1 : i32
    %5 = vector.broadcast %c1_i32 : i32 to vector<16x16xi32>
    %6 = arith.muli %5, %3 : vector<16x16xi32>
    %c1_i32_2 = arith.constant 1 : i32
    %7 = vector.broadcast %c1_i32_2 : i32 to vector<16x16xi32>
    %8 = arith.addi %6, %7 : vector<16x16xi32>
    %c1_i32_3 = arith.constant 1 : i32
    %9 = vector.broadcast %c1_i32_3 : i32 to vector<16x16xi32>
    %10 = arith.muli %9, %4 : vector<16x16xi32>
    %11 = arith.cmpi eq, %8, %10 : vector<16x16xi32>
    %12 = arith.extui %11 : vector<16x16xi1> to vector<16x16xi32>
    %13 = arith.sitofp %12 : vector<16x16xi32> to vector<16x16xf32>
    %14 = tpu.iota {dimensions = array<i32: 0>} : vector<16x16xi32>
    %15 = tpu.iota {dimensions = array<i32: 1>} : vector<16x16xi32>
    %c1_i32_4 = arith.constant 1 : i32
    %16 = vector.broadcast %c1_i32_4 : i32 to vector<16x16xi32>
    %17 = arith.muli %16, %14 : vector<16x16xi32>
    %c0_i32 = arith.constant 0 : i32
    %18 = vector.broadcast %c0_i32 : i32 to vector<16x16xi32>
    %19 = arith.addi %17, %18 : vector<16x16xi32>
    %c1_i32_5 = arith.constant 1 : i32
    %20 = vector.broadcast %c1_i32_5 : i32 to vector<16x16xi32>
    %21 = arith.muli %20, %15 : vector<16x16xi32>
    %22 = arith.cmpi eq, %19, %21 : vector<16x16xi32>
    %23 = arith.extui %22 : vector<16x16xi1> to vector<16x16xi32>
    %24 = arith.sitofp %23 : vector<16x16xi32> to vector<16x16xf32>
    %25 = tpu.iota {dimensions = array<i32: 0>} : vector<16x16xi32>
    %26 = tpu.iota {dimensions = array<i32: 1>} : vector<16x16xi32>
    %c1_i32_6 = arith.constant 1 : i32
    %27 = vector.broadcast %c1_i32_6 : i32 to vector<16x16xi32>
    %28 = arith.muli %27, %25 : vector<16x16xi32>
    %c-1_i32 = arith.constant -1 : i32
    %29 = vector.broadcast %c-1_i32 : i32 to vector<16x16xi32>
    %30 = arith.addi %28, %29 : vector<16x16xi32>
    %c1_i32_7 = arith.constant 1 : i32
    %31 = vector.broadcast %c1_i32_7 : i32 to vector<16x16xi32>
    %32 = arith.muli %31, %26 : vector<16x16xi32>
    %33 = arith.cmpi eq, %30, %32 : vector<16x16xi32>
    %34 = arith.extui %33 : vector<16x16xi1> to vector<16x16xi32>
    %35 = arith.sitofp %34 : vector<16x16xi32> to vector<16x16xf32>
    %c0_8 = arith.constant 0 : index
    %c0_9 = arith.constant 0 : index
    %36 = vector.load %arg2[%c0_8, %c0_9] : memref<48x6xbf16, #tpu.memory_space<vmem>>, vector<48x6xbf16>
    %37 = arith.truncf %2 : vector<6x16xf32> to vector<6x16xbf16>
    %cst = arith.constant dense<0.000000e+00> : vector<48x16xf32>
    %38 = tpu.matmul %36, %37, %cst {dimension_numbers = #tpu.dot_dimension_numbers<[1], [0], [0], [1], [0, 0, 1, 1], [], []>} : vector<48x6xbf16>, vector<6x16xbf16>, vector<48x16xf32> -> vector<48x16xf32>
    %39 = vector.extract_strided_slice %38 {offsets = [0, 0], sizes = [16, 16], strides = [1, 1]} : vector<48x16xf32> to vector<16x16xf32>
    %cst_10 = arith.constant dense<0.000000e+00> : vector<16x16xf32>
    %40 = tpu.matmul %39, %13, %cst_10 {dimension_numbers = #tpu.dot_dimension_numbers<[1], [0], [0], [1], [0, 0, 1, 1], [], []>} : vector<16x16xf32>, vector<16x16xf32>, vector<16x16xf32> -> vector<16x16xf32>
    %41 = vector.extract_strided_slice %38 {offsets = [16, 0], sizes = [16, 16], strides = [1, 1]} : vector<48x16xf32> to vector<16x16xf32>
    %cst_11 = arith.constant dense<0.000000e+00> : vector<16x16xf32>
    %42 = tpu.matmul %41, %24, %cst_11 {dimension_numbers = #tpu.dot_dimension_numbers<[1], [0], [0], [1], [0, 0, 1, 1], [], []>} : vector<16x16xf32>, vector<16x16xf32>, vector<16x16xf32> -> vector<16x16xf32>
    %43 = arith.addf %40, %42 : vector<16x16xf32>
    %44 = vector.extract_strided_slice %38 {offsets = [32, 0], sizes = [16, 16], strides = [1, 1]} : vector<48x16xf32> to vector<16x16xf32>
    %cst_12 = arith.constant dense<0.000000e+00> : vector<16x16xf32>
    %45 = tpu.matmul %44, %35, %cst_12 {dimension_numbers = #tpu.dot_dimension_numbers<[1], [0], [0], [1], [0, 0, 1, 1], [], []>} : vector<16x16xf32>, vector<16x16xf32>, vector<16x16xf32> -> vector<16x16xf32>
    %46 = arith.addf %43, %45 : vector<16x16xf32>
    %c0_13 = arith.constant 0 : index
    %c0_14 = arith.constant 0 : index
    %47 = vector.load %arg3[%c0_13, %c0_14] : memref<16x1xf32, #tpu.memory_space<vmem>>, vector<16x1xf32>
    %48 = vector.broadcast %47 : vector<16x1xf32> to vector<16x16xf32>
    %49 = arith.mulf %46, %48 : vector<16x16xf32>
    %c0_15 = arith.constant 0 : index
    %c0_16 = arith.constant 0 : index
    %50 = vector.load %arg4[%c0_15, %c0_16] : memref<16x1xf32, #tpu.memory_space<vmem>>, vector<16x1xf32>
    %51 = vector.broadcast %50 : vector<16x1xf32> to vector<16x16xf32>
    %52 = arith.addf %49, %51 : vector<16x16xf32>
    %cst_17 = arith.constant 0.000000e+00 : f32
    %53 = vector.broadcast %cst_17 : f32 to vector<16x16xf32>
    %54 = arith.cmpf oge, %52, %53 : vector<16x16xf32>
    %cst_18 = arith.constant 2.000000e-01 : f32
    %55 = vector.broadcast %cst_18 : f32 to vector<16x16xf32>
    %56 = arith.mulf %55, %52 : vector<16x16xf32>
    %57 = arith.select %54, %52, %56 : vector<16x16xi1>, vector<16x16xf32>
    %58 = tpu.iota {dimensions = array<i32: 0>} : vector<16x16xi32>
    %59 = tpu.iota {dimensions = array<i32: 1>} : vector<16x16xi32>
    %c1_i32_19 = arith.constant 1 : i32
    %60 = vector.broadcast %c1_i32_19 : i32 to vector<16x16xi32>
    %61 = arith.muli %60, %58 : vector<16x16xi32>
    %c1_i32_20 = arith.constant 1 : i32
    %62 = vector.broadcast %c1_i32_20 : i32 to vector<16x16xi32>
    %63 = arith.addi %61, %62 : vector<16x16xi32>
    %c1_i32_21 = arith.constant 1 : i32
    %64 = vector.broadcast %c1_i32_21 : i32 to vector<16x16xi32>
    %65 = arith.muli %64, %59 : vector<16x16xi32>
    %66 = arith.cmpi eq, %63, %65 : vector<16x16xi32>
    %67 = arith.extui %66 : vector<16x16xi1> to vector<16x16xi32>
    %68 = arith.sitofp %67 : vector<16x16xi32> to vector<16x16xf32>
    %69 = tpu.iota {dimensions = array<i32: 0>} : vector<16x16xi32>
    %70 = tpu.iota {dimensions = array<i32: 1>} : vector<16x16xi32>
    %c1_i32_22 = arith.constant 1 : i32
    %71 = vector.broadcast %c1_i32_22 : i32 to vector<16x16xi32>
    %72 = arith.muli %71, %69 : vector<16x16xi32>
    %c0_i32_23 = arith.constant 0 : i32
    %73 = vector.broadcast %c0_i32_23 : i32 to vector<16x16xi32>
    %74 = arith.addi %72, %73 : vector<16x16xi32>
    %c1_i32_24 = arith.constant 1 : i32
    %75 = vector.broadcast %c1_i32_24 : i32 to vector<16x16xi32>
    %76 = arith.muli %75, %70 : vector<16x16xi32>
    %77 = arith.cmpi eq, %74, %76 : vector<16x16xi32>
    %78 = arith.extui %77 : vector<16x16xi1> to vector<16x16xi32>
    %79 = arith.sitofp %78 : vector<16x16xi32> to vector<16x16xf32>
    %80 = tpu.iota {dimensions = array<i32: 0>} : vector<16x16xi32>
    %81 = tpu.iota {dimensions = array<i32: 1>} : vector<16x16xi32>
    %c1_i32_25 = arith.constant 1 : i32
    %82 = vector.broadcast %c1_i32_25 : i32 to vector<16x16xi32>
    %83 = arith.muli %82, %80 : vector<16x16xi32>
    %c-1_i32_26 = arith.constant -1 : i32
    %84 = vector.broadcast %c-1_i32_26 : i32 to vector<16x16xi32>
    %85 = arith.addi %83, %84 : vector<16x16xi32>
    %c1_i32_27 = arith.constant 1 : i32
    %86 = vector.broadcast %c1_i32_27 : i32 to vector<16x16xi32>
    %87 = arith.muli %86, %81 : vector<16x16xi32>
    %88 = arith.cmpi eq, %85, %87 : vector<16x16xi32>
    %89 = arith.extui %88 : vector<16x16xi1> to vector<16x16xi32>
    %90 = arith.sitofp %89 : vector<16x16xi32> to vector<16x16xf32>
    %c0_28 = arith.constant 0 : index
    %c0_29 = arith.constant 0 : index
    %c0_30 = arith.constant 0 : index
    %91 = vector.load %arg5[%c0_28, %c0_29, %c0_30] : memref<2x48x16xbf16, #tpu.memory_space<vmem>>, vector<1x48x16xbf16>
    %92 = vector.shape_cast %91 : vector<1x48x16xbf16> to vector<48x16xbf16>
    %93 = arith.truncf %57 : vector<16x16xf32> to vector<16x16xbf16>
    %cst_31 = arith.constant dense<0.000000e+00> : vector<48x16xf32>
    %94 = tpu.matmul %92, %93, %cst_31 {dimension_numbers = #tpu.dot_dimension_numbers<[1], [0], [0], [1], [0, 0, 1, 1], [], []>} : vector<48x16xbf16>, vector<16x16xbf16>, vector<48x16xf32> -> vector<48x16xf32>
    %95 = vector.extract_strided_slice %94 {offsets = [0, 0], sizes = [16, 16], strides = [1, 1]} : vector<48x16xf32> to vector<16x16xf32>
    %cst_32 = arith.constant dense<0.000000e+00> : vector<16x16xf32>
    %96 = tpu.matmul %95, %68, %cst_32 {dimension_numbers = #tpu.dot_dimension_numbers<[1], [0], [0], [1], [0, 0, 1, 1], [], []>} : vector<16x16xf32>, vector<16x16xf32>, vector<16x16xf32> -> vector<16x16xf32>
    %97 = vector.extract_strided_slice %94 {offsets = [16, 0], sizes = [16, 16], strides = [1, 1]} : vector<48x16xf32> to vector<16x16xf32>
    %cst_33 = arith.constant dense<0.000000e+00> : vector<16x16xf32>
    %98 = tpu.matmul %97, %79, %cst_33 {dimension_numbers = #tpu.dot_dimension_numbers<[1], [0], [0], [1], [0, 0, 1, 1], [], []>} : vector<16x16xf32>, vector<16x16xf32>, vector<16x16xf32> -> vector<16x16xf32>
    %99 = arith.addf %96, %98 : vector<16x16xf32>
    %100 = vector.extract_strided_slice %94 {offsets = [32, 0], sizes = [16, 16], strides = [1, 1]} : vector<48x16xf32> to vector<16x16xf32>
    %cst_34 = arith.constant dense<0.000000e+00> : vector<16x16xf32>
    %101 = tpu.matmul %100, %90, %cst_34 {dimension_numbers = #tpu.dot_dimension_numbers<[1], [0], [0], [1], [0, 0, 1, 1], [], []>} : vector<16x16xf32>, vector<16x16xf32>, vector<16x16xf32> -> vector<16x16xf32>
    %102 = arith.addf %99, %101 : vector<16x16xf32>
    %c0_35 = arith.constant 0 : index
    %c0_36 = arith.constant 0 : index
    %c0_37 = arith.constant 0 : index
    %103 = vector.load %arg6[%c0_35, %c0_36, %c0_37] : memref<2x16x1xf32, #tpu.memory_space<vmem>>, vector<1x16x1xf32>
    %104 = vector.shape_cast %103 : vector<1x16x1xf32> to vector<16x1xf32>
    %105 = vector.broadcast %104 : vector<16x1xf32> to vector<16x16xf32>
    %106 = arith.mulf %102, %105 : vector<16x16xf32>
    %c0_38 = arith.constant 0 : index
    %c0_39 = arith.constant 0 : index
    %c0_40 = arith.constant 0 : index
    %107 = vector.load %arg7[%c0_38, %c0_39, %c0_40] : memref<2x16x1xf32, #tpu.memory_space<vmem>>, vector<1x16x1xf32>
    %108 = vector.shape_cast %107 : vector<1x16x1xf32> to vector<16x1xf32>
    %109 = vector.broadcast %108 : vector<16x1xf32> to vector<16x16xf32>
    %110 = arith.addf %106, %109 : vector<16x16xf32>
    %111 = arith.addf %110, %57 : vector<16x16xf32>
    %cst_41 = arith.constant 0.000000e+00 : f32
    %112 = vector.broadcast %cst_41 : f32 to vector<16x16xf32>
    %113 = arith.cmpf oge, %111, %112 : vector<16x16xf32>
    %cst_42 = arith.constant 2.000000e-01 : f32
    %114 = vector.broadcast %cst_42 : f32 to vector<16x16xf32>
    %115 = arith.mulf %114, %111 : vector<16x16xf32>
    %116 = arith.select %113, %111, %115 : vector<16x16xi1>, vector<16x16xf32>
    %c1 = arith.constant 1 : index
    %c0_43 = arith.constant 0 : index
    %c0_44 = arith.constant 0 : index
    %117 = vector.load %arg5[%c1, %c0_43, %c0_44] : memref<2x48x16xbf16, #tpu.memory_space<vmem>>, vector<1x48x16xbf16>
    %118 = vector.shape_cast %117 : vector<1x48x16xbf16> to vector<48x16xbf16>
    %119 = arith.truncf %116 : vector<16x16xf32> to vector<16x16xbf16>
    %cst_45 = arith.constant dense<0.000000e+00> : vector<48x16xf32>
    %120 = tpu.matmul %118, %119, %cst_45 {dimension_numbers = #tpu.dot_dimension_numbers<[1], [0], [0], [1], [0, 0, 1, 1], [], []>} : vector<48x16xbf16>, vector<16x16xbf16>, vector<48x16xf32> -> vector<48x16xf32>
    %121 = vector.extract_strided_slice %120 {offsets = [0, 0], sizes = [16, 16], strides = [1, 1]} : vector<48x16xf32> to vector<16x16xf32>
    %cst_46 = arith.constant dense<0.000000e+00> : vector<16x16xf32>
    %122 = tpu.matmul %121, %68, %cst_46 {dimension_numbers = #tpu.dot_dimension_numbers<[1], [0], [0], [1], [0, 0, 1, 1], [], []>} : vector<16x16xf32>, vector<16x16xf32>, vector<16x16xf32> -> vector<16x16xf32>
    %123 = vector.extract_strided_slice %120 {offsets = [16, 0], sizes = [16, 16], strides = [1, 1]} : vector<48x16xf32> to vector<16x16xf32>
    %cst_47 = arith.constant dense<0.000000e+00> : vector<16x16xf32>
    %124 = tpu.matmul %123, %79, %cst_47 {dimension_numbers = #tpu.dot_dimension_numbers<[1], [0], [0], [1], [0, 0, 1, 1], [], []>} : vector<16x16xf32>, vector<16x16xf32>, vector<16x16xf32> -> vector<16x16xf32>
    %125 = arith.addf %122, %124 : vector<16x16xf32>
    %126 = vector.extract_strided_slice %120 {offsets = [32, 0], sizes = [16, 16], strides = [1, 1]} : vector<48x16xf32> to vector<16x16xf32>
    %cst_48 = arith.constant dense<0.000000e+00> : vector<16x16xf32>
    %127 = tpu.matmul %126, %90, %cst_48 {dimension_numbers = #tpu.dot_dimension_numbers<[1], [0], [0], [1], [0, 0, 1, 1], [], []>} : vector<16x16xf32>, vector<16x16xf32>, vector<16x16xf32> -> vector<16x16xf32>
    %128 = arith.addf %125, %127 : vector<16x16xf32>
    %c1_49 = arith.constant 1 : index
    %c0_50 = arith.constant 0 : index
    %c0_51 = arith.constant 0 : index
    %129 = vector.load %arg6[%c1_49, %c0_50, %c0_51] : memref<2x16x1xf32, #tpu.memory_space<vmem>>, vector<1x16x1xf32>
    %130 = vector.shape_cast %129 : vector<1x16x1xf32> to vector<16x1xf32>
    %131 = vector.broadcast %130 : vector<16x1xf32> to vector<16x16xf32>
    %132 = arith.mulf %128, %131 : vector<16x16xf32>
    %c1_52 = arith.constant 1 : index
    %c0_53 = arith.constant 0 : index
    %c0_54 = arith.constant 0 : index
    %133 = vector.load %arg7[%c1_52, %c0_53, %c0_54] : memref<2x16x1xf32, #tpu.memory_space<vmem>>, vector<1x16x1xf32>
    %134 = vector.shape_cast %133 : vector<1x16x1xf32> to vector<16x1xf32>
    %135 = vector.broadcast %134 : vector<16x1xf32> to vector<16x16xf32>
    %136 = arith.addf %132, %135 : vector<16x16xf32>
    %137 = arith.addf %136, %116 : vector<16x16xf32>
    %cst_55 = arith.constant 0.000000e+00 : f32
    %138 = vector.broadcast %cst_55 : f32 to vector<16x16xf32>
    %139 = arith.cmpf oge, %137, %138 : vector<16x16xf32>
    %cst_56 = arith.constant 2.000000e-01 : f32
    %140 = vector.broadcast %cst_56 : f32 to vector<16x16xf32>
    %141 = arith.mulf %140, %137 : vector<16x16xf32>
    %142 = arith.select %139, %137, %141 : vector<16x16xi1>, vector<16x16xf32>
    %c0_57 = arith.constant 0 : index
    %c0_58 = arith.constant 0 : index
    %143 = vector.load %arg8[%c0_57, %c0_58] : memref<48x16xbf16, #tpu.memory_space<vmem>>, vector<48x16xbf16>
    %144 = arith.truncf %142 : vector<16x16xf32> to vector<16x16xbf16>
    %cst_59 = arith.constant dense<0.000000e+00> : vector<48x16xf32>
    %145 = tpu.matmul %143, %144, %cst_59 {dimension_numbers = #tpu.dot_dimension_numbers<[1], [0], [0], [1], [0, 0, 1, 1], [], []>} : vector<48x16xbf16>, vector<16x16xbf16>, vector<48x16xf32> -> vector<48x16xf32>
    %146 = vector.extract_strided_slice %145 {offsets = [0, 0], sizes = [16, 16], strides = [1, 1]} : vector<48x16xf32> to vector<16x16xf32>
    %cst_60 = arith.constant dense<0.000000e+00> : vector<16x16xf32>
    %147 = tpu.matmul %146, %68, %cst_60 {dimension_numbers = #tpu.dot_dimension_numbers<[1], [0], [0], [1], [0, 0, 1, 1], [], []>} : vector<16x16xf32>, vector<16x16xf32>, vector<16x16xf32> -> vector<16x16xf32>
    %148 = vector.extract_strided_slice %145 {offsets = [16, 0], sizes = [16, 16], strides = [1, 1]} : vector<48x16xf32> to vector<16x16xf32>
    %cst_61 = arith.constant dense<0.000000e+00> : vector<16x16xf32>
    %149 = tpu.matmul %148, %79, %cst_61 {dimension_numbers = #tpu.dot_dimension_numbers<[1], [0], [0], [1], [0, 0, 1, 1], [], []>} : vector<16x16xf32>, vector<16x16xf32>, vector<16x16xf32> -> vector<16x16xf32>
    %150 = arith.addf %147, %149 : vector<16x16xf32>
    %151 = vector.extract_strided_slice %145 {offsets = [32, 0], sizes = [16, 16], strides = [1, 1]} : vector<48x16xf32> to vector<16x16xf32>
    %cst_62 = arith.constant dense<0.000000e+00> : vector<16x16xf32>
    %152 = tpu.matmul %151, %90, %cst_62 {dimension_numbers = #tpu.dot_dimension_numbers<[1], [0], [0], [1], [0, 0, 1, 1], [], []>} : vector<16x16xf32>, vector<16x16xf32>, vector<16x16xf32> -> vector<16x16xf32>
    %153 = arith.addf %150, %152 : vector<16x16xf32>
    %c0_63 = arith.constant 0 : index
    %c0_64 = arith.constant 0 : index
    %154 = vector.load %arg9[%c0_63, %c0_64] : memref<16x1xf32, #tpu.memory_space<vmem>>, vector<16x1xf32>
    %155 = vector.broadcast %154 : vector<16x1xf32> to vector<16x16xf32>
    %156 = arith.mulf %153, %155 : vector<16x16xf32>
    %c0_65 = arith.constant 0 : index
    %c0_66 = arith.constant 0 : index
    %157 = vector.load %arg10[%c0_65, %c0_66] : memref<16x1xf32, #tpu.memory_space<vmem>>, vector<16x1xf32>
    %158 = vector.broadcast %157 : vector<16x1xf32> to vector<16x16xf32>
    %159 = arith.addf %156, %158 : vector<16x16xf32>
    %160 = arith.addf %159, %57 : vector<16x16xf32>
    %cst_67 = arith.constant 0.000000e+00 : f32
    %161 = vector.broadcast %cst_67 : f32 to vector<16x16xf32>
    %162 = arith.maximumf %160, %161 : vector<16x16xf32>
    %163 = arith.truncf %162 : vector<16x16xf32> to vector<16x16xbf16>
    %c0_68 = arith.constant 0 : index
    %c0_69 = arith.constant 0 : index
    %c0_70 = arith.constant 0 : index
    %164 = vector.load %arg11[%c0_68, %c0_69, %c0_70] : memref<1x16x16xbf16, #tpu.memory_space<vmem>>, vector<1x16x16xbf16>
    %165 = vector.shape_cast %164 : vector<1x16x16xbf16> to vector<16x16xbf16>
    %166 = vector.shape_cast %163 : vector<16x16xbf16> to vector<1x16x16xbf16>
    tpu.vector_store %arg11[%c0_68, %c0_69, %c0_70], %166 {strides = array<i32>} : memref<1x16x16xbf16, #tpu.memory_space<vmem>>, vector<1x16x16xbf16>,
    return
  }
  func.func @transform_0(%arg0: i32) -> (i32, i32, i32) {
    %c0_i32 = arith.constant 0 : i32
    %c0_i32_0 = arith.constant 0 : i32
    %c0_i32_1 = arith.constant 0 : i32
    return %arg0, %c0_i32, %c0_i32_0 : i32, i32, i32
  }
  func.func @transform_1(%arg0: i32) -> (i32, i32) {
    %c0_i32 = arith.constant 0 : i32
    %c0_i32_0 = arith.constant 0 : i32
    %c0_i32_1 = arith.constant 0 : i32
    return %c0_i32, %c0_i32_0 : i32, i32
  }
  func.func @transform_2(%arg0: i32) -> (i32, i32) {
    %c0_i32 = arith.constant 0 : i32
    %c0_i32_0 = arith.constant 0 : i32
    %c0_i32_1 = arith.constant 0 : i32
    return %c0_i32, %c0_i32_0 : i32, i32
  }
  func.func @transform_3(%arg0: i32) -> (i32, i32) {
    %c0_i32 = arith.constant 0 : i32
    %c0_i32_0 = arith.constant 0 : i32
    %c0_i32_1 = arith.constant 0 : i32
    return %c0_i32, %c0_i32_0 : i32, i32
  }
  func.func @transform_4(%arg0: i32) -> (i32, i32, i32) {
    %c0_i32 = arith.constant 0 : i32
    %c0_i32_0 = arith.constant 0 : i32
    %c0_i32_1 = arith.constant 0 : i32
    %c0_i32_2 = arith.constant 0 : i32
    return %c0_i32, %c0_i32_0, %c0_i32_1 : i32, i32, i32
  }
  func.func @transform_5(%arg0: i32) -> (i32, i32, i32) {
    %c0_i32 = arith.constant 0 : i32
    %c0_i32_0 = arith.constant 0 : i32
    %c0_i32_1 = arith.constant 0 : i32
    %c0_i32_2 = arith.constant 0 : i32
    return %c0_i32, %c0_i32_0, %c0_i32_1 : i32, i32, i32
  }
  func.func @transform_6(%arg0: i32) -> (i32, i32, i32) {
    %c0_i32 = arith.constant 0 : i32
    %c0_i32_0 = arith.constant 0 : i32
    %c0_i32_1 = arith.constant 0 : i32
    %c0_i32_2 = arith.constant 0 : i32
    return %c0_i32, %c0_i32_0, %c0_i32_1 : i32, i32, i32
  }
  func.func @transform_7(%arg0: i32) -> (i32, i32) {
    %c0_i32 = arith.constant 0 : i32
    %c0_i32_0 = arith.constant 0 : i32
    %c0_i32_1 = arith.constant 0 : i32
    return %c0_i32, %c0_i32_0 : i32, i32
  }
  func.func @transform_8(%arg0: i32) -> (i32, i32) {
    %c0_i32 = arith.constant 0 : i32
    %c0_i32_0 = arith.constant 0 : i32
    %c0_i32_1 = arith.constant 0 : i32
    return %c0_i32, %c0_i32_0 : i32, i32
  }
  func.func @transform_9(%arg0: i32) -> (i32, i32) {
    %c0_i32 = arith.constant 0 : i32
    %c0_i32_0 = arith.constant 0 : i32
    %c0_i32_1 = arith.constant 0 : i32
    return %c0_i32, %c0_i32_0 : i32, i32
  }
  func.func @transform_10(%arg0: i32) -> (i32, i32, i32) {
    %c0_i32 = arith.constant 0 : i32
    %c0_i32_0 = arith.constant 0 : i32
    %c0_i32_1 = arith.constant 0 : i32
    return %arg0, %c0_i32, %c0_i32_0 : i32, i32, i32
  }
}

module attributes {stable_mosaic.version = 11 : i64} {
  func.func @_stage_kernel(%arg0: i32, %arg1: memref<1x16x16xbf16, #tpu.memory_space<vmem>>, %arg2: memref<128x16xbf16, #tpu.memory_space<vmem>>, %arg3: memref<32x1xf32, #tpu.memory_space<vmem>>, %arg4: memref<32x1xf32, #tpu.memory_space<vmem>>, %arg5: memref<128x16xbf16, #tpu.memory_space<vmem>>, %arg6: memref<32x1xf32, #tpu.memory_space<vmem>>, %arg7: memref<2x96x32xbf16, #tpu.memory_space<vmem>>, %arg8: memref<2x32x1xf32, #tpu.memory_space<vmem>>, %arg9: memref<2x32x1xf32, #tpu.memory_space<vmem>>, %arg10: memref<96x32xbf16, #tpu.memory_space<vmem>>, %arg11: memref<32x1xf32, #tpu.memory_space<vmem>>, %arg12: memref<32x1xf32, #tpu.memory_space<vmem>>, %arg13: memref<1x32x8xbf16, #tpu.memory_space<vmem>>) attributes {dimension_semantics = [#tpu.dimension_semantics<parallel>], iteration_bounds = array<i64: 2>, scalar_prefetch = 0 : i64, scratch_operands = 0 : i64, tpu.core_type = #tpu.core_type<tc>, window_params = [{transform_indices = @transform_0, window_bounds = array<i64: 1, 16, 16>}, {pipeline_mode = #tpu.pipeline_mode<synchronous>, transform_indices = @transform_1, window_bounds = array<i64: 128, 16>}, {pipeline_mode = #tpu.pipeline_mode<synchronous>, transform_indices = @transform_2, window_bounds = array<i64: 32, 1>}, {pipeline_mode = #tpu.pipeline_mode<synchronous>, transform_indices = @transform_3, window_bounds = array<i64: 32, 1>}, {pipeline_mode = #tpu.pipeline_mode<synchronous>, transform_indices = @transform_4, window_bounds = array<i64: 128, 16>}, {pipeline_mode = #tpu.pipeline_mode<synchronous>, transform_indices = @transform_5, window_bounds = array<i64: 32, 1>}, {pipeline_mode = #tpu.pipeline_mode<synchronous>, transform_indices = @transform_6, window_bounds = array<i64: 2, 96, 32>}, {pipeline_mode = #tpu.pipeline_mode<synchronous>, transform_indices = @transform_7, window_bounds = array<i64: 2, 32, 1>}, {pipeline_mode = #tpu.pipeline_mode<synchronous>, transform_indices = @transform_8, window_bounds = array<i64: 2, 32, 1>}, {pipeline_mode = #tpu.pipeline_mode<synchronous>, transform_indices = @transform_9, window_bounds = array<i64: 96, 32>}, {pipeline_mode = #tpu.pipeline_mode<synchronous>, transform_indices = @transform_10, window_bounds = array<i64: 32, 1>}, {pipeline_mode = #tpu.pipeline_mode<synchronous>, transform_indices = @transform_11, window_bounds = array<i64: 32, 1>}, {transform_indices = @transform_12, window_bounds = array<i64: 1, 32, 8>}]} {
    %c0 = arith.constant 0 : index
    %c0_0 = arith.constant 0 : index
    %c0_1 = arith.constant 0 : index
    %0 = vector.load %arg1[%c0, %c0_0, %c0_1] : memref<1x16x16xbf16, #tpu.memory_space<vmem>>, vector<1x16x16xbf16>
    %1 = vector.shape_cast %0 : vector<1x16x16xbf16> to vector<16x16xbf16>
    %2 = arith.extf %1 : vector<16x16xbf16> to vector<16x16xf32>
    %3 = tpu.iota {dimensions = array<i32: 0>} : vector<16x8xi32>
    %4 = tpu.iota {dimensions = array<i32: 1>} : vector<16x8xi32>
    %c1_i32 = arith.constant 1 : i32
    %5 = vector.broadcast %c1_i32 : i32 to vector<16x8xi32>
    %6 = arith.muli %5, %3 : vector<16x8xi32>
    %c1_i32_2 = arith.constant 1 : i32
    %7 = vector.broadcast %c1_i32_2 : i32 to vector<16x8xi32>
    %8 = arith.addi %6, %7 : vector<16x8xi32>
    %c2_i32 = arith.constant 2 : i32
    %9 = vector.broadcast %c2_i32 : i32 to vector<16x8xi32>
    %10 = arith.muli %9, %4 : vector<16x8xi32>
    %11 = arith.cmpi eq, %8, %10 : vector<16x8xi32>
    %12 = arith.extui %11 : vector<16x8xi1> to vector<16x8xi32>
    %13 = arith.sitofp %12 : vector<16x8xi32> to vector<16x8xf32>
    %14 = tpu.iota {dimensions = array<i32: 0>} : vector<16x8xi32>
    %15 = tpu.iota {dimensions = array<i32: 1>} : vector<16x8xi32>
    %c1_i32_3 = arith.constant 1 : i32
    %16 = vector.broadcast %c1_i32_3 : i32 to vector<16x8xi32>
    %17 = arith.muli %16, %14 : vector<16x8xi32>
    %c0_i32 = arith.constant 0 : i32
    %18 = vector.broadcast %c0_i32 : i32 to vector<16x8xi32>
    %19 = arith.addi %17, %18 : vector<16x8xi32>
    %c2_i32_4 = arith.constant 2 : i32
    %20 = vector.broadcast %c2_i32_4 : i32 to vector<16x8xi32>
    %21 = arith.muli %20, %15 : vector<16x8xi32>
    %22 = arith.cmpi eq, %19, %21 : vector<16x8xi32>
    %23 = arith.extui %22 : vector<16x8xi1> to vector<16x8xi32>
    %24 = arith.sitofp %23 : vector<16x8xi32> to vector<16x8xf32>
    %25 = tpu.iota {dimensions = array<i32: 0>} : vector<16x8xi32>
    %26 = tpu.iota {dimensions = array<i32: 1>} : vector<16x8xi32>
    %c1_i32_5 = arith.constant 1 : i32
    %27 = vector.broadcast %c1_i32_5 : i32 to vector<16x8xi32>
    %28 = arith.muli %27, %25 : vector<16x8xi32>
    %c-1_i32 = arith.constant -1 : i32
    %29 = vector.broadcast %c-1_i32 : i32 to vector<16x8xi32>
    %30 = arith.addi %28, %29 : vector<16x8xi32>
    %c2_i32_6 = arith.constant 2 : i32
    %31 = vector.broadcast %c2_i32_6 : i32 to vector<16x8xi32>
    %32 = arith.muli %31, %26 : vector<16x8xi32>
    %33 = arith.cmpi eq, %30, %32 : vector<16x8xi32>
    %34 = arith.extui %33 : vector<16x8xi1> to vector<16x8xi32>
    %35 = arith.sitofp %34 : vector<16x8xi32> to vector<16x8xf32>
    %36 = tpu.iota {dimensions = array<i32: 0>} : vector<16x8xi32>
    %37 = tpu.iota {dimensions = array<i32: 1>} : vector<16x8xi32>
    %c1_i32_7 = arith.constant 1 : i32
    %38 = vector.broadcast %c1_i32_7 : i32 to vector<16x8xi32>
    %39 = arith.muli %38, %36 : vector<16x8xi32>
    %c-2_i32 = arith.constant -2 : i32
    %40 = vector.broadcast %c-2_i32 : i32 to vector<16x8xi32>
    %41 = arith.addi %39, %40 : vector<16x8xi32>
    %c2_i32_8 = arith.constant 2 : i32
    %42 = vector.broadcast %c2_i32_8 : i32 to vector<16x8xi32>
    %43 = arith.muli %42, %37 : vector<16x8xi32>
    %44 = arith.cmpi eq, %41, %43 : vector<16x8xi32>
    %45 = arith.extui %44 : vector<16x8xi1> to vector<16x8xi32>
    %46 = arith.sitofp %45 : vector<16x8xi32> to vector<16x8xf32>
    %c0_9 = arith.constant 0 : index
    %c0_10 = arith.constant 0 : index
    %47 = vector.load %arg2[%c0_9, %c0_10] : memref<128x16xbf16, #tpu.memory_space<vmem>>, vector<128x16xbf16>
    %48 = arith.truncf %2 : vector<16x16xf32> to vector<16x16xbf16>
    %cst = arith.constant dense<0.000000e+00> : vector<128x16xf32>
    %49 = tpu.matmul %47, %48, %cst {dimension_numbers = #tpu.dot_dimension_numbers<[1], [0], [0], [1], [0, 0, 1, 1], [], []>} : vector<128x16xbf16>, vector<16x16xbf16>, vector<128x16xf32> -> vector<128x16xf32>
    %50 = vector.extract_strided_slice %49 {offsets = [0, 0], sizes = [32, 16], strides = [1, 1]} : vector<128x16xf32> to vector<32x16xf32>
    %cst_11 = arith.constant dense<0.000000e+00> : vector<32x8xf32>
    %51 = tpu.matmul %50, %13, %cst_11 {dimension_numbers = #tpu.dot_dimension_numbers<[1], [0], [0], [1], [0, 0, 1, 1], [], []>} : vector<32x16xf32>, vector<16x8xf32>, vector<32x8xf32> -> vector<32x8xf32>
    %52 = vector.extract_strided_slice %49 {offsets = [32, 0], sizes = [32, 16], strides = [1, 1]} : vector<128x16xf32> to vector<32x16xf32>
    %cst_12 = arith.constant dense<0.000000e+00> : vector<32x8xf32>
    %53 = tpu.matmul %52, %24, %cst_12 {dimension_numbers = #tpu.dot_dimension_numbers<[1], [0], [0], [1], [0, 0, 1, 1], [], []>} : vector<32x16xf32>, vector<16x8xf32>, vector<32x8xf32> -> vector<32x8xf32>
    %54 = arith.addf %51, %53 : vector<32x8xf32>
    %55 = vector.extract_strided_slice %49 {offsets = [64, 0], sizes = [32, 16], strides = [1, 1]} : vector<128x16xf32> to vector<32x16xf32>
    %cst_13 = arith.constant dense<0.000000e+00> : vector<32x8xf32>
    %56 = tpu.matmul %55, %35, %cst_13 {dimension_numbers = #tpu.dot_dimension_numbers<[1], [0], [0], [1], [0, 0, 1, 1], [], []>} : vector<32x16xf32>, vector<16x8xf32>, vector<32x8xf32> -> vector<32x8xf32>
    %57 = arith.addf %54, %56 : vector<32x8xf32>
    %58 = vector.extract_strided_slice %49 {offsets = [96, 0], sizes = [32, 16], strides = [1, 1]} : vector<128x16xf32> to vector<32x16xf32>
    %cst_14 = arith.constant dense<0.000000e+00> : vector<32x8xf32>
    %59 = tpu.matmul %58, %46, %cst_14 {dimension_numbers = #tpu.dot_dimension_numbers<[1], [0], [0], [1], [0, 0, 1, 1], [], []>} : vector<32x16xf32>, vector<16x8xf32>, vector<32x8xf32> -> vector<32x8xf32>
    %60 = arith.addf %57, %59 : vector<32x8xf32>
    %c0_15 = arith.constant 0 : index
    %c0_16 = arith.constant 0 : index
    %61 = vector.load %arg3[%c0_15, %c0_16] : memref<32x1xf32, #tpu.memory_space<vmem>>, vector<32x1xf32>
    %62 = vector.broadcast %61 : vector<32x1xf32> to vector<32x8xf32>
    %63 = arith.mulf %60, %62 : vector<32x8xf32>
    %c0_17 = arith.constant 0 : index
    %c0_18 = arith.constant 0 : index
    %64 = vector.load %arg4[%c0_17, %c0_18] : memref<32x1xf32, #tpu.memory_space<vmem>>, vector<32x1xf32>
    %65 = vector.broadcast %64 : vector<32x1xf32> to vector<32x8xf32>
    %66 = arith.addf %63, %65 : vector<32x8xf32>
    %c0_19 = arith.constant 0 : index
    %c0_20 = arith.constant 0 : index
    %67 = vector.load %arg5[%c0_19, %c0_20] : memref<128x16xbf16, #tpu.memory_space<vmem>>, vector<128x16xbf16>
    %68 = arith.truncf %2 : vector<16x16xf32> to vector<16x16xbf16>
    %cst_21 = arith.constant dense<0.000000e+00> : vector<128x16xf32>
    %69 = tpu.matmul %67, %68, %cst_21 {dimension_numbers = #tpu.dot_dimension_numbers<[1], [0], [0], [1], [0, 0, 1, 1], [], []>} : vector<128x16xbf16>, vector<16x16xbf16>, vector<128x16xf32> -> vector<128x16xf32>
    %70 = vector.extract_strided_slice %69 {offsets = [0, 0], sizes = [32, 16], strides = [1, 1]} : vector<128x16xf32> to vector<32x16xf32>
    %cst_22 = arith.constant dense<0.000000e+00> : vector<32x8xf32>
    %71 = tpu.matmul %70, %13, %cst_22 {dimension_numbers = #tpu.dot_dimension_numbers<[1], [0], [0], [1], [0, 0, 1, 1], [], []>} : vector<32x16xf32>, vector<16x8xf32>, vector<32x8xf32> -> vector<32x8xf32>
    %72 = vector.extract_strided_slice %69 {offsets = [32, 0], sizes = [32, 16], strides = [1, 1]} : vector<128x16xf32> to vector<32x16xf32>
    %cst_23 = arith.constant dense<0.000000e+00> : vector<32x8xf32>
    %73 = tpu.matmul %72, %24, %cst_23 {dimension_numbers = #tpu.dot_dimension_numbers<[1], [0], [0], [1], [0, 0, 1, 1], [], []>} : vector<32x16xf32>, vector<16x8xf32>, vector<32x8xf32> -> vector<32x8xf32>
    %74 = arith.addf %71, %73 : vector<32x8xf32>
    %75 = vector.extract_strided_slice %69 {offsets = [64, 0], sizes = [32, 16], strides = [1, 1]} : vector<128x16xf32> to vector<32x16xf32>
    %cst_24 = arith.constant dense<0.000000e+00> : vector<32x8xf32>
    %76 = tpu.matmul %75, %35, %cst_24 {dimension_numbers = #tpu.dot_dimension_numbers<[1], [0], [0], [1], [0, 0, 1, 1], [], []>} : vector<32x16xf32>, vector<16x8xf32>, vector<32x8xf32> -> vector<32x8xf32>
    %77 = arith.addf %74, %76 : vector<32x8xf32>
    %78 = vector.extract_strided_slice %69 {offsets = [96, 0], sizes = [32, 16], strides = [1, 1]} : vector<128x16xf32> to vector<32x16xf32>
    %cst_25 = arith.constant dense<0.000000e+00> : vector<32x8xf32>
    %79 = tpu.matmul %78, %46, %cst_25 {dimension_numbers = #tpu.dot_dimension_numbers<[1], [0], [0], [1], [0, 0, 1, 1], [], []>} : vector<32x16xf32>, vector<16x8xf32>, vector<32x8xf32> -> vector<32x8xf32>
    %80 = arith.addf %77, %79 : vector<32x8xf32>
    %c0_26 = arith.constant 0 : index
    %c0_27 = arith.constant 0 : index
    %81 = vector.load %arg6[%c0_26, %c0_27] : memref<32x1xf32, #tpu.memory_space<vmem>>, vector<32x1xf32>
    %82 = vector.broadcast %81 : vector<32x1xf32> to vector<32x8xf32>
    %83 = arith.addf %80, %82 : vector<32x8xf32>
    %84 = arith.addf %66, %83 : vector<32x8xf32>
    %cst_28 = arith.constant 0.000000e+00 : f32
    %85 = vector.broadcast %cst_28 : f32 to vector<32x8xf32>
    %86 = arith.cmpf oge, %84, %85 : vector<32x8xf32>
    %cst_29 = arith.constant 2.000000e-01 : f32
    %87 = vector.broadcast %cst_29 : f32 to vector<32x8xf32>
    %88 = arith.mulf %87, %84 : vector<32x8xf32>
    %89 = arith.select %86, %84, %88 : vector<32x8xi1>, vector<32x8xf32>
    %90 = tpu.iota {dimensions = array<i32: 0>} : vector<8x8xi32>
    %91 = tpu.iota {dimensions = array<i32: 1>} : vector<8x8xi32>
    %c1_i32_30 = arith.constant 1 : i32
    %92 = vector.broadcast %c1_i32_30 : i32 to vector<8x8xi32>
    %93 = arith.muli %92, %90 : vector<8x8xi32>
    %c1_i32_31 = arith.constant 1 : i32
    %94 = vector.broadcast %c1_i32_31 : i32 to vector<8x8xi32>
    %95 = arith.addi %93, %94 : vector<8x8xi32>
    %c1_i32_32 = arith.constant 1 : i32
    %96 = vector.broadcast %c1_i32_32 : i32 to vector<8x8xi32>
    %97 = arith.muli %96, %91 : vector<8x8xi32>
    %98 = arith.cmpi eq, %95, %97 : vector<8x8xi32>
    %99 = arith.extui %98 : vector<8x8xi1> to vector<8x8xi32>
    %100 = arith.sitofp %99 : vector<8x8xi32> to vector<8x8xf32>
    %101 = tpu.iota {dimensions = array<i32: 0>} : vector<8x8xi32>
    %102 = tpu.iota {dimensions = array<i32: 1>} : vector<8x8xi32>
    %c1_i32_33 = arith.constant 1 : i32
    %103 = vector.broadcast %c1_i32_33 : i32 to vector<8x8xi32>
    %104 = arith.muli %103, %101 : vector<8x8xi32>
    %c0_i32_34 = arith.constant 0 : i32
    %105 = vector.broadcast %c0_i32_34 : i32 to vector<8x8xi32>
    %106 = arith.addi %104, %105 : vector<8x8xi32>
    %c1_i32_35 = arith.constant 1 : i32
    %107 = vector.broadcast %c1_i32_35 : i32 to vector<8x8xi32>
    %108 = arith.muli %107, %102 : vector<8x8xi32>
    %109 = arith.cmpi eq, %106, %108 : vector<8x8xi32>
    %110 = arith.extui %109 : vector<8x8xi1> to vector<8x8xi32>
    %111 = arith.sitofp %110 : vector<8x8xi32> to vector<8x8xf32>
    %112 = tpu.iota {dimensions = array<i32: 0>} : vector<8x8xi32>
    %113 = tpu.iota {dimensions = array<i32: 1>} : vector<8x8xi32>
    %c1_i32_36 = arith.constant 1 : i32
    %114 = vector.broadcast %c1_i32_36 : i32 to vector<8x8xi32>
    %115 = arith.muli %114, %112 : vector<8x8xi32>
    %c-1_i32_37 = arith.constant -1 : i32
    %116 = vector.broadcast %c-1_i32_37 : i32 to vector<8x8xi32>
    %117 = arith.addi %115, %116 : vector<8x8xi32>
    %c1_i32_38 = arith.constant 1 : i32
    %118 = vector.broadcast %c1_i32_38 : i32 to vector<8x8xi32>
    %119 = arith.muli %118, %113 : vector<8x8xi32>
    %120 = arith.cmpi eq, %117, %119 : vector<8x8xi32>
    %121 = arith.extui %120 : vector<8x8xi1> to vector<8x8xi32>
    %122 = arith.sitofp %121 : vector<8x8xi32> to vector<8x8xf32>
    %c0_39 = arith.constant 0 : index
    %c0_40 = arith.constant 0 : index
    %c0_41 = arith.constant 0 : index
    %123 = vector.load %arg7[%c0_39, %c0_40, %c0_41] : memref<2x96x32xbf16, #tpu.memory_space<vmem>>, vector<1x96x32xbf16>
    %124 = vector.shape_cast %123 : vector<1x96x32xbf16> to vector<96x32xbf16>
    %125 = arith.truncf %89 : vector<32x8xf32> to vector<32x8xbf16>
    %cst_42 = arith.constant dense<0.000000e+00> : vector<96x8xf32>
    %126 = tpu.matmul %124, %125, %cst_42 {dimension_numbers = #tpu.dot_dimension_numbers<[1], [0], [0], [1], [0, 0, 1, 1], [], []>} : vector<96x32xbf16>, vector<32x8xbf16>, vector<96x8xf32> -> vector<96x8xf32>
    %127 = vector.extract_strided_slice %126 {offsets = [0, 0], sizes = [32, 8], strides = [1, 1]} : vector<96x8xf32> to vector<32x8xf32>
    %cst_43 = arith.constant dense<0.000000e+00> : vector<32x8xf32>
    %128 = tpu.matmul %127, %100, %cst_43 {dimension_numbers = #tpu.dot_dimension_numbers<[1], [0], [0], [1], [0, 0, 1, 1], [], []>} : vector<32x8xf32>, vector<8x8xf32>, vector<32x8xf32> -> vector<32x8xf32>
    %129 = vector.extract_strided_slice %126 {offsets = [32, 0], sizes = [32, 8], strides = [1, 1]} : vector<96x8xf32> to vector<32x8xf32>
    %cst_44 = arith.constant dense<0.000000e+00> : vector<32x8xf32>
    %130 = tpu.matmul %129, %111, %cst_44 {dimension_numbers = #tpu.dot_dimension_numbers<[1], [0], [0], [1], [0, 0, 1, 1], [], []>} : vector<32x8xf32>, vector<8x8xf32>, vector<32x8xf32> -> vector<32x8xf32>
    %131 = arith.addf %128, %130 : vector<32x8xf32>
    %132 = vector.extract_strided_slice %126 {offsets = [64, 0], sizes = [32, 8], strides = [1, 1]} : vector<96x8xf32> to vector<32x8xf32>
    %cst_45 = arith.constant dense<0.000000e+00> : vector<32x8xf32>
    %133 = tpu.matmul %132, %122, %cst_45 {dimension_numbers = #tpu.dot_dimension_numbers<[1], [0], [0], [1], [0, 0, 1, 1], [], []>} : vector<32x8xf32>, vector<8x8xf32>, vector<32x8xf32> -> vector<32x8xf32>
    %134 = arith.addf %131, %133 : vector<32x8xf32>
    %c0_46 = arith.constant 0 : index
    %c0_47 = arith.constant 0 : index
    %c0_48 = arith.constant 0 : index
    %135 = vector.load %arg8[%c0_46, %c0_47, %c0_48] : memref<2x32x1xf32, #tpu.memory_space<vmem>>, vector<1x32x1xf32>
    %136 = vector.shape_cast %135 : vector<1x32x1xf32> to vector<32x1xf32>
    %137 = vector.broadcast %136 : vector<32x1xf32> to vector<32x8xf32>
    %138 = arith.mulf %134, %137 : vector<32x8xf32>
    %c0_49 = arith.constant 0 : index
    %c0_50 = arith.constant 0 : index
    %c0_51 = arith.constant 0 : index
    %139 = vector.load %arg9[%c0_49, %c0_50, %c0_51] : memref<2x32x1xf32, #tpu.memory_space<vmem>>, vector<1x32x1xf32>
    %140 = vector.shape_cast %139 : vector<1x32x1xf32> to vector<32x1xf32>
    %141 = vector.broadcast %140 : vector<32x1xf32> to vector<32x8xf32>
    %142 = arith.addf %138, %141 : vector<32x8xf32>
    %143 = arith.addf %142, %89 : vector<32x8xf32>
    %cst_52 = arith.constant 0.000000e+00 : f32
    %144 = vector.broadcast %cst_52 : f32 to vector<32x8xf32>
    %145 = arith.cmpf oge, %143, %144 : vector<32x8xf32>
    %cst_53 = arith.constant 2.000000e-01 : f32
    %146 = vector.broadcast %cst_53 : f32 to vector<32x8xf32>
    %147 = arith.mulf %146, %143 : vector<32x8xf32>
    %148 = arith.select %145, %143, %147 : vector<32x8xi1>, vector<32x8xf32>
    %c1 = arith.constant 1 : index
    %c0_54 = arith.constant 0 : index
    %c0_55 = arith.constant 0 : index
    %149 = vector.load %arg7[%c1, %c0_54, %c0_55] : memref<2x96x32xbf16, #tpu.memory_space<vmem>>, vector<1x96x32xbf16>
    %150 = vector.shape_cast %149 : vector<1x96x32xbf16> to vector<96x32xbf16>
    %151 = arith.truncf %148 : vector<32x8xf32> to vector<32x8xbf16>
    %cst_56 = arith.constant dense<0.000000e+00> : vector<96x8xf32>
    %152 = tpu.matmul %150, %151, %cst_56 {dimension_numbers = #tpu.dot_dimension_numbers<[1], [0], [0], [1], [0, 0, 1, 1], [], []>} : vector<96x32xbf16>, vector<32x8xbf16>, vector<96x8xf32> -> vector<96x8xf32>
    %153 = vector.extract_strided_slice %152 {offsets = [0, 0], sizes = [32, 8], strides = [1, 1]} : vector<96x8xf32> to vector<32x8xf32>
    %cst_57 = arith.constant dense<0.000000e+00> : vector<32x8xf32>
    %154 = tpu.matmul %153, %100, %cst_57 {dimension_numbers = #tpu.dot_dimension_numbers<[1], [0], [0], [1], [0, 0, 1, 1], [], []>} : vector<32x8xf32>, vector<8x8xf32>, vector<32x8xf32> -> vector<32x8xf32>
    %155 = vector.extract_strided_slice %152 {offsets = [32, 0], sizes = [32, 8], strides = [1, 1]} : vector<96x8xf32> to vector<32x8xf32>
    %cst_58 = arith.constant dense<0.000000e+00> : vector<32x8xf32>
    %156 = tpu.matmul %155, %111, %cst_58 {dimension_numbers = #tpu.dot_dimension_numbers<[1], [0], [0], [1], [0, 0, 1, 1], [], []>} : vector<32x8xf32>, vector<8x8xf32>, vector<32x8xf32> -> vector<32x8xf32>
    %157 = arith.addf %154, %156 : vector<32x8xf32>
    %158 = vector.extract_strided_slice %152 {offsets = [64, 0], sizes = [32, 8], strides = [1, 1]} : vector<96x8xf32> to vector<32x8xf32>
    %cst_59 = arith.constant dense<0.000000e+00> : vector<32x8xf32>
    %159 = tpu.matmul %158, %122, %cst_59 {dimension_numbers = #tpu.dot_dimension_numbers<[1], [0], [0], [1], [0, 0, 1, 1], [], []>} : vector<32x8xf32>, vector<8x8xf32>, vector<32x8xf32> -> vector<32x8xf32>
    %160 = arith.addf %157, %159 : vector<32x8xf32>
    %c1_60 = arith.constant 1 : index
    %c0_61 = arith.constant 0 : index
    %c0_62 = arith.constant 0 : index
    %161 = vector.load %arg8[%c1_60, %c0_61, %c0_62] : memref<2x32x1xf32, #tpu.memory_space<vmem>>, vector<1x32x1xf32>
    %162 = vector.shape_cast %161 : vector<1x32x1xf32> to vector<32x1xf32>
    %163 = vector.broadcast %162 : vector<32x1xf32> to vector<32x8xf32>
    %164 = arith.mulf %160, %163 : vector<32x8xf32>
    %c1_63 = arith.constant 1 : index
    %c0_64 = arith.constant 0 : index
    %c0_65 = arith.constant 0 : index
    %165 = vector.load %arg9[%c1_63, %c0_64, %c0_65] : memref<2x32x1xf32, #tpu.memory_space<vmem>>, vector<1x32x1xf32>
    %166 = vector.shape_cast %165 : vector<1x32x1xf32> to vector<32x1xf32>
    %167 = vector.broadcast %166 : vector<32x1xf32> to vector<32x8xf32>
    %168 = arith.addf %164, %167 : vector<32x8xf32>
    %169 = arith.addf %168, %148 : vector<32x8xf32>
    %cst_66 = arith.constant 0.000000e+00 : f32
    %170 = vector.broadcast %cst_66 : f32 to vector<32x8xf32>
    %171 = arith.cmpf oge, %169, %170 : vector<32x8xf32>
    %cst_67 = arith.constant 2.000000e-01 : f32
    %172 = vector.broadcast %cst_67 : f32 to vector<32x8xf32>
    %173 = arith.mulf %172, %169 : vector<32x8xf32>
    %174 = arith.select %171, %169, %173 : vector<32x8xi1>, vector<32x8xf32>
    %c0_68 = arith.constant 0 : index
    %c0_69 = arith.constant 0 : index
    %175 = vector.load %arg10[%c0_68, %c0_69] : memref<96x32xbf16, #tpu.memory_space<vmem>>, vector<96x32xbf16>
    %176 = arith.truncf %174 : vector<32x8xf32> to vector<32x8xbf16>
    %cst_70 = arith.constant dense<0.000000e+00> : vector<96x8xf32>
    %177 = tpu.matmul %175, %176, %cst_70 {dimension_numbers = #tpu.dot_dimension_numbers<[1], [0], [0], [1], [0, 0, 1, 1], [], []>} : vector<96x32xbf16>, vector<32x8xbf16>, vector<96x8xf32> -> vector<96x8xf32>
    %178 = vector.extract_strided_slice %177 {offsets = [0, 0], sizes = [32, 8], strides = [1, 1]} : vector<96x8xf32> to vector<32x8xf32>
    %cst_71 = arith.constant dense<0.000000e+00> : vector<32x8xf32>
    %179 = tpu.matmul %178, %100, %cst_71 {dimension_numbers = #tpu.dot_dimension_numbers<[1], [0], [0], [1], [0, 0, 1, 1], [], []>} : vector<32x8xf32>, vector<8x8xf32>, vector<32x8xf32> -> vector<32x8xf32>
    %180 = vector.extract_strided_slice %177 {offsets = [32, 0], sizes = [32, 8], strides = [1, 1]} : vector<96x8xf32> to vector<32x8xf32>
    %cst_72 = arith.constant dense<0.000000e+00> : vector<32x8xf32>
    %181 = tpu.matmul %180, %111, %cst_72 {dimension_numbers = #tpu.dot_dimension_numbers<[1], [0], [0], [1], [0, 0, 1, 1], [], []>} : vector<32x8xf32>, vector<8x8xf32>, vector<32x8xf32> -> vector<32x8xf32>
    %182 = arith.addf %179, %181 : vector<32x8xf32>
    %183 = vector.extract_strided_slice %177 {offsets = [64, 0], sizes = [32, 8], strides = [1, 1]} : vector<96x8xf32> to vector<32x8xf32>
    %cst_73 = arith.constant dense<0.000000e+00> : vector<32x8xf32>
    %184 = tpu.matmul %183, %122, %cst_73 {dimension_numbers = #tpu.dot_dimension_numbers<[1], [0], [0], [1], [0, 0, 1, 1], [], []>} : vector<32x8xf32>, vector<8x8xf32>, vector<32x8xf32> -> vector<32x8xf32>
    %185 = arith.addf %182, %184 : vector<32x8xf32>
    %c0_74 = arith.constant 0 : index
    %c0_75 = arith.constant 0 : index
    %186 = vector.load %arg11[%c0_74, %c0_75] : memref<32x1xf32, #tpu.memory_space<vmem>>, vector<32x1xf32>
    %187 = vector.broadcast %186 : vector<32x1xf32> to vector<32x8xf32>
    %188 = arith.mulf %185, %187 : vector<32x8xf32>
    %c0_76 = arith.constant 0 : index
    %c0_77 = arith.constant 0 : index
    %189 = vector.load %arg12[%c0_76, %c0_77] : memref<32x1xf32, #tpu.memory_space<vmem>>, vector<32x1xf32>
    %190 = vector.broadcast %189 : vector<32x1xf32> to vector<32x8xf32>
    %191 = arith.addf %188, %190 : vector<32x8xf32>
    %192 = arith.addf %191, %89 : vector<32x8xf32>
    %cst_78 = arith.constant 0.000000e+00 : f32
    %193 = vector.broadcast %cst_78 : f32 to vector<32x8xf32>
    %194 = arith.maximumf %192, %193 : vector<32x8xf32>
    %195 = arith.truncf %194 : vector<32x8xf32> to vector<32x8xbf16>
    %c0_79 = arith.constant 0 : index
    %c0_80 = arith.constant 0 : index
    %c0_81 = arith.constant 0 : index
    %196 = vector.load %arg13[%c0_79, %c0_80, %c0_81] : memref<1x32x8xbf16, #tpu.memory_space<vmem>>, vector<1x32x8xbf16>
    %197 = vector.shape_cast %196 : vector<1x32x8xbf16> to vector<32x8xbf16>
    %198 = vector.shape_cast %195 : vector<32x8xbf16> to vector<1x32x8xbf16>
    tpu.vector_store %arg13[%c0_79, %c0_80, %c0_81], %198 {strides = array<i32>} : memref<1x32x8xbf16, #tpu.memory_space<vmem>>, vector<1x32x8xbf16>,
    return
  }
  func.func @transform_0(%arg0: i32) -> (i32, i32, i32) {
    %c0_i32 = arith.constant 0 : i32
    %c0_i32_0 = arith.constant 0 : i32
    %c0_i32_1 = arith.constant 0 : i32
    return %arg0, %c0_i32, %c0_i32_0 : i32, i32, i32
  }
  func.func @transform_1(%arg0: i32) -> (i32, i32) {
    %c0_i32 = arith.constant 0 : i32
    %c0_i32_0 = arith.constant 0 : i32
    %c0_i32_1 = arith.constant 0 : i32
    return %c0_i32, %c0_i32_0 : i32, i32
  }
  func.func @transform_2(%arg0: i32) -> (i32, i32) {
    %c0_i32 = arith.constant 0 : i32
    %c0_i32_0 = arith.constant 0 : i32
    %c0_i32_1 = arith.constant 0 : i32
    return %c0_i32, %c0_i32_0 : i32, i32
  }
  func.func @transform_3(%arg0: i32) -> (i32, i32) {
    %c0_i32 = arith.constant 0 : i32
    %c0_i32_0 = arith.constant 0 : i32
    %c0_i32_1 = arith.constant 0 : i32
    return %c0_i32, %c0_i32_0 : i32, i32
  }
  func.func @transform_4(%arg0: i32) -> (i32, i32) {
    %c0_i32 = arith.constant 0 : i32
    %c0_i32_0 = arith.constant 0 : i32
    %c0_i32_1 = arith.constant 0 : i32
    return %c0_i32, %c0_i32_0 : i32, i32
  }
  func.func @transform_5(%arg0: i32) -> (i32, i32) {
    %c0_i32 = arith.constant 0 : i32
    %c0_i32_0 = arith.constant 0 : i32
    %c0_i32_1 = arith.constant 0 : i32
    return %c0_i32, %c0_i32_0 : i32, i32
  }
  func.func @transform_6(%arg0: i32) -> (i32, i32, i32) {
    %c0_i32 = arith.constant 0 : i32
    %c0_i32_0 = arith.constant 0 : i32
    %c0_i32_1 = arith.constant 0 : i32
    %c0_i32_2 = arith.constant 0 : i32
    return %c0_i32, %c0_i32_0, %c0_i32_1 : i32, i32, i32
  }
  func.func @transform_7(%arg0: i32) -> (i32, i32, i32) {
    %c0_i32 = arith.constant 0 : i32
    %c0_i32_0 = arith.constant 0 : i32
    %c0_i32_1 = arith.constant 0 : i32
    %c0_i32_2 = arith.constant 0 : i32
    return %c0_i32, %c0_i32_0, %c0_i32_1 : i32, i32, i32
  }
  func.func @transform_8(%arg0: i32) -> (i32, i32, i32) {
    %c0_i32 = arith.constant 0 : i32
    %c0_i32_0 = arith.constant 0 : i32
    %c0_i32_1 = arith.constant 0 : i32
    %c0_i32_2 = arith.constant 0 : i32
    return %c0_i32, %c0_i32_0, %c0_i32_1 : i32, i32, i32
  }
  func.func @transform_9(%arg0: i32) -> (i32, i32) {
    %c0_i32 = arith.constant 0 : i32
    %c0_i32_0 = arith.constant 0 : i32
    %c0_i32_1 = arith.constant 0 : i32
    return %c0_i32, %c0_i32_0 : i32, i32
  }
  func.func @transform_10(%arg0: i32) -> (i32, i32) {
    %c0_i32 = arith.constant 0 : i32
    %c0_i32_0 = arith.constant 0 : i32
    %c0_i32_1 = arith.constant 0 : i32
    return %c0_i32, %c0_i32_0 : i32, i32
  }
  func.func @transform_11(%arg0: i32) -> (i32, i32) {
    %c0_i32 = arith.constant 0 : i32
    %c0_i32_0 = arith.constant 0 : i32
    %c0_i32_1 = arith.constant 0 : i32
    return %c0_i32, %c0_i32_0 : i32, i32
  }
  func.func @transform_12(%arg0: i32) -> (i32, i32, i32) {
    %c0_i32 = arith.constant 0 : i32
    %c0_i32_0 = arith.constant 0 : i32
    %c0_i32_1 = arith.constant 0 : i32
    return %arg0, %c0_i32, %c0_i32_0 : i32, i32, i32
  }
}

module attributes {stable_mosaic.version = 11 : i64} {
  func.func @_stage_kernel(%arg0: i32, %arg1: memref<1x32x8xbf16, #tpu.memory_space<vmem>>, %arg2: memref<256x32xbf16, #tpu.memory_space<vmem>>, %arg3: memref<64x1xf32, #tpu.memory_space<vmem>>, %arg4: memref<64x1xf32, #tpu.memory_space<vmem>>, %arg5: memref<256x32xbf16, #tpu.memory_space<vmem>>, %arg6: memref<64x1xf32, #tpu.memory_space<vmem>>, %arg7: memref<2x192x64xbf16, #tpu.memory_space<vmem>>, %arg8: memref<2x64x1xf32, #tpu.memory_space<vmem>>, %arg9: memref<2x64x1xf32, #tpu.memory_space<vmem>>, %arg10: memref<192x64xbf16, #tpu.memory_space<vmem>>, %arg11: memref<64x1xf32, #tpu.memory_space<vmem>>, %arg12: memref<64x1xf32, #tpu.memory_space<vmem>>, %arg13: memref<64x64xbf16, #tpu.memory_space<vmem>>, %arg14: memref<64x1xf32, #tpu.memory_space<vmem>>, %arg15: memref<1x64x4xf32, #tpu.memory_space<vmem>>) attributes {dimension_semantics = [#tpu.dimension_semantics<parallel>], iteration_bounds = array<i64: 2>, scalar_prefetch = 0 : i64, scratch_operands = 0 : i64, tpu.core_type = #tpu.core_type<tc>, window_params = [{transform_indices = @transform_0, window_bounds = array<i64: 1, 32, 8>}, {pipeline_mode = #tpu.pipeline_mode<synchronous>, transform_indices = @transform_1, window_bounds = array<i64: 256, 32>}, {pipeline_mode = #tpu.pipeline_mode<synchronous>, transform_indices = @transform_2, window_bounds = array<i64: 64, 1>}, {pipeline_mode = #tpu.pipeline_mode<synchronous>, transform_indices = @transform_3, window_bounds = array<i64: 64, 1>}, {pipeline_mode = #tpu.pipeline_mode<synchronous>, transform_indices = @transform_4, window_bounds = array<i64: 256, 32>}, {pipeline_mode = #tpu.pipeline_mode<synchronous>, transform_indices = @transform_5, window_bounds = array<i64: 64, 1>}, {pipeline_mode = #tpu.pipeline_mode<synchronous>, transform_indices = @transform_6, window_bounds = array<i64: 2, 192, 64>}, {pipeline_mode = #tpu.pipeline_mode<synchronous>, transform_indices = @transform_7, window_bounds = array<i64: 2, 64, 1>}, {pipeline_mode = #tpu.pipeline_mode<synchronous>, transform_indices = @transform_8, window_bounds = array<i64: 2, 64, 1>}, {pipeline_mode = #tpu.pipeline_mode<synchronous>, transform_indices = @transform_9, window_bounds = array<i64: 192, 64>}, {pipeline_mode = #tpu.pipeline_mode<synchronous>, transform_indices = @transform_10, window_bounds = array<i64: 64, 1>}, {pipeline_mode = #tpu.pipeline_mode<synchronous>, transform_indices = @transform_11, window_bounds = array<i64: 64, 1>}, {pipeline_mode = #tpu.pipeline_mode<synchronous>, transform_indices = @transform_12, window_bounds = array<i64: 64, 64>}, {pipeline_mode = #tpu.pipeline_mode<synchronous>, transform_indices = @transform_13, window_bounds = array<i64: 64, 1>}, {transform_indices = @transform_14, window_bounds = array<i64: 1, 64, 4>}]} {
    %c0 = arith.constant 0 : index
    %c0_0 = arith.constant 0 : index
    %c0_1 = arith.constant 0 : index
    %0 = vector.load %arg1[%c0, %c0_0, %c0_1] : memref<1x32x8xbf16, #tpu.memory_space<vmem>>, vector<1x32x8xbf16>
    %1 = vector.shape_cast %0 : vector<1x32x8xbf16> to vector<32x8xbf16>
    %2 = arith.extf %1 : vector<32x8xbf16> to vector<32x8xf32>
    %3 = tpu.iota {dimensions = array<i32: 0>} : vector<8x4xi32>
    %4 = tpu.iota {dimensions = array<i32: 1>} : vector<8x4xi32>
    %c1_i32 = arith.constant 1 : i32
    %5 = vector.broadcast %c1_i32 : i32 to vector<8x4xi32>
    %6 = arith.muli %5, %3 : vector<8x4xi32>
    %c1_i32_2 = arith.constant 1 : i32
    %7 = vector.broadcast %c1_i32_2 : i32 to vector<8x4xi32>
    %8 = arith.addi %6, %7 : vector<8x4xi32>
    %c2_i32 = arith.constant 2 : i32
    %9 = vector.broadcast %c2_i32 : i32 to vector<8x4xi32>
    %10 = arith.muli %9, %4 : vector<8x4xi32>
    %11 = arith.cmpi eq, %8, %10 : vector<8x4xi32>
    %12 = arith.extui %11 : vector<8x4xi1> to vector<8x4xi32>
    %13 = arith.sitofp %12 : vector<8x4xi32> to vector<8x4xf32>
    %14 = tpu.iota {dimensions = array<i32: 0>} : vector<8x4xi32>
    %15 = tpu.iota {dimensions = array<i32: 1>} : vector<8x4xi32>
    %c1_i32_3 = arith.constant 1 : i32
    %16 = vector.broadcast %c1_i32_3 : i32 to vector<8x4xi32>
    %17 = arith.muli %16, %14 : vector<8x4xi32>
    %c0_i32 = arith.constant 0 : i32
    %18 = vector.broadcast %c0_i32 : i32 to vector<8x4xi32>
    %19 = arith.addi %17, %18 : vector<8x4xi32>
    %c2_i32_4 = arith.constant 2 : i32
    %20 = vector.broadcast %c2_i32_4 : i32 to vector<8x4xi32>
    %21 = arith.muli %20, %15 : vector<8x4xi32>
    %22 = arith.cmpi eq, %19, %21 : vector<8x4xi32>
    %23 = arith.extui %22 : vector<8x4xi1> to vector<8x4xi32>
    %24 = arith.sitofp %23 : vector<8x4xi32> to vector<8x4xf32>
    %25 = tpu.iota {dimensions = array<i32: 0>} : vector<8x4xi32>
    %26 = tpu.iota {dimensions = array<i32: 1>} : vector<8x4xi32>
    %c1_i32_5 = arith.constant 1 : i32
    %27 = vector.broadcast %c1_i32_5 : i32 to vector<8x4xi32>
    %28 = arith.muli %27, %25 : vector<8x4xi32>
    %c-1_i32 = arith.constant -1 : i32
    %29 = vector.broadcast %c-1_i32 : i32 to vector<8x4xi32>
    %30 = arith.addi %28, %29 : vector<8x4xi32>
    %c2_i32_6 = arith.constant 2 : i32
    %31 = vector.broadcast %c2_i32_6 : i32 to vector<8x4xi32>
    %32 = arith.muli %31, %26 : vector<8x4xi32>
    %33 = arith.cmpi eq, %30, %32 : vector<8x4xi32>
    %34 = arith.extui %33 : vector<8x4xi1> to vector<8x4xi32>
    %35 = arith.sitofp %34 : vector<8x4xi32> to vector<8x4xf32>
    %36 = tpu.iota {dimensions = array<i32: 0>} : vector<8x4xi32>
    %37 = tpu.iota {dimensions = array<i32: 1>} : vector<8x4xi32>
    %c1_i32_7 = arith.constant 1 : i32
    %38 = vector.broadcast %c1_i32_7 : i32 to vector<8x4xi32>
    %39 = arith.muli %38, %36 : vector<8x4xi32>
    %c-2_i32 = arith.constant -2 : i32
    %40 = vector.broadcast %c-2_i32 : i32 to vector<8x4xi32>
    %41 = arith.addi %39, %40 : vector<8x4xi32>
    %c2_i32_8 = arith.constant 2 : i32
    %42 = vector.broadcast %c2_i32_8 : i32 to vector<8x4xi32>
    %43 = arith.muli %42, %37 : vector<8x4xi32>
    %44 = arith.cmpi eq, %41, %43 : vector<8x4xi32>
    %45 = arith.extui %44 : vector<8x4xi1> to vector<8x4xi32>
    %46 = arith.sitofp %45 : vector<8x4xi32> to vector<8x4xf32>
    %c0_9 = arith.constant 0 : index
    %c0_10 = arith.constant 0 : index
    %47 = vector.load %arg2[%c0_9, %c0_10] : memref<256x32xbf16, #tpu.memory_space<vmem>>, vector<256x32xbf16>
    %48 = arith.truncf %2 : vector<32x8xf32> to vector<32x8xbf16>
    %cst = arith.constant dense<0.000000e+00> : vector<256x8xf32>
    %49 = tpu.matmul %47, %48, %cst {dimension_numbers = #tpu.dot_dimension_numbers<[1], [0], [0], [1], [0, 0, 1, 1], [], []>} : vector<256x32xbf16>, vector<32x8xbf16>, vector<256x8xf32> -> vector<256x8xf32>
    %50 = vector.extract_strided_slice %49 {offsets = [0, 0], sizes = [64, 8], strides = [1, 1]} : vector<256x8xf32> to vector<64x8xf32>
    %cst_11 = arith.constant dense<0.000000e+00> : vector<64x4xf32>
    %51 = tpu.matmul %50, %13, %cst_11 {dimension_numbers = #tpu.dot_dimension_numbers<[1], [0], [0], [1], [0, 0, 1, 1], [], []>} : vector<64x8xf32>, vector<8x4xf32>, vector<64x4xf32> -> vector<64x4xf32>
    %52 = vector.extract_strided_slice %49 {offsets = [64, 0], sizes = [64, 8], strides = [1, 1]} : vector<256x8xf32> to vector<64x8xf32>
    %cst_12 = arith.constant dense<0.000000e+00> : vector<64x4xf32>
    %53 = tpu.matmul %52, %24, %cst_12 {dimension_numbers = #tpu.dot_dimension_numbers<[1], [0], [0], [1], [0, 0, 1, 1], [], []>} : vector<64x8xf32>, vector<8x4xf32>, vector<64x4xf32> -> vector<64x4xf32>
    %54 = arith.addf %51, %53 : vector<64x4xf32>
    %55 = vector.extract_strided_slice %49 {offsets = [128, 0], sizes = [64, 8], strides = [1, 1]} : vector<256x8xf32> to vector<64x8xf32>
    %cst_13 = arith.constant dense<0.000000e+00> : vector<64x4xf32>
    %56 = tpu.matmul %55, %35, %cst_13 {dimension_numbers = #tpu.dot_dimension_numbers<[1], [0], [0], [1], [0, 0, 1, 1], [], []>} : vector<64x8xf32>, vector<8x4xf32>, vector<64x4xf32> -> vector<64x4xf32>
    %57 = arith.addf %54, %56 : vector<64x4xf32>
    %58 = vector.extract_strided_slice %49 {offsets = [192, 0], sizes = [64, 8], strides = [1, 1]} : vector<256x8xf32> to vector<64x8xf32>
    %cst_14 = arith.constant dense<0.000000e+00> : vector<64x4xf32>
    %59 = tpu.matmul %58, %46, %cst_14 {dimension_numbers = #tpu.dot_dimension_numbers<[1], [0], [0], [1], [0, 0, 1, 1], [], []>} : vector<64x8xf32>, vector<8x4xf32>, vector<64x4xf32> -> vector<64x4xf32>
    %60 = arith.addf %57, %59 : vector<64x4xf32>
    %c0_15 = arith.constant 0 : index
    %c0_16 = arith.constant 0 : index
    %61 = vector.load %arg3[%c0_15, %c0_16] : memref<64x1xf32, #tpu.memory_space<vmem>>, vector<64x1xf32>
    %62 = vector.broadcast %61 : vector<64x1xf32> to vector<64x4xf32>
    %63 = arith.mulf %60, %62 : vector<64x4xf32>
    %c0_17 = arith.constant 0 : index
    %c0_18 = arith.constant 0 : index
    %64 = vector.load %arg4[%c0_17, %c0_18] : memref<64x1xf32, #tpu.memory_space<vmem>>, vector<64x1xf32>
    %65 = vector.broadcast %64 : vector<64x1xf32> to vector<64x4xf32>
    %66 = arith.addf %63, %65 : vector<64x4xf32>
    %c0_19 = arith.constant 0 : index
    %c0_20 = arith.constant 0 : index
    %67 = vector.load %arg5[%c0_19, %c0_20] : memref<256x32xbf16, #tpu.memory_space<vmem>>, vector<256x32xbf16>
    %68 = arith.truncf %2 : vector<32x8xf32> to vector<32x8xbf16>
    %cst_21 = arith.constant dense<0.000000e+00> : vector<256x8xf32>
    %69 = tpu.matmul %67, %68, %cst_21 {dimension_numbers = #tpu.dot_dimension_numbers<[1], [0], [0], [1], [0, 0, 1, 1], [], []>} : vector<256x32xbf16>, vector<32x8xbf16>, vector<256x8xf32> -> vector<256x8xf32>
    %70 = vector.extract_strided_slice %69 {offsets = [0, 0], sizes = [64, 8], strides = [1, 1]} : vector<256x8xf32> to vector<64x8xf32>
    %cst_22 = arith.constant dense<0.000000e+00> : vector<64x4xf32>
    %71 = tpu.matmul %70, %13, %cst_22 {dimension_numbers = #tpu.dot_dimension_numbers<[1], [0], [0], [1], [0, 0, 1, 1], [], []>} : vector<64x8xf32>, vector<8x4xf32>, vector<64x4xf32> -> vector<64x4xf32>
    %72 = vector.extract_strided_slice %69 {offsets = [64, 0], sizes = [64, 8], strides = [1, 1]} : vector<256x8xf32> to vector<64x8xf32>
    %cst_23 = arith.constant dense<0.000000e+00> : vector<64x4xf32>
    %73 = tpu.matmul %72, %24, %cst_23 {dimension_numbers = #tpu.dot_dimension_numbers<[1], [0], [0], [1], [0, 0, 1, 1], [], []>} : vector<64x8xf32>, vector<8x4xf32>, vector<64x4xf32> -> vector<64x4xf32>
    %74 = arith.addf %71, %73 : vector<64x4xf32>
    %75 = vector.extract_strided_slice %69 {offsets = [128, 0], sizes = [64, 8], strides = [1, 1]} : vector<256x8xf32> to vector<64x8xf32>
    %cst_24 = arith.constant dense<0.000000e+00> : vector<64x4xf32>
    %76 = tpu.matmul %75, %35, %cst_24 {dimension_numbers = #tpu.dot_dimension_numbers<[1], [0], [0], [1], [0, 0, 1, 1], [], []>} : vector<64x8xf32>, vector<8x4xf32>, vector<64x4xf32> -> vector<64x4xf32>
    %77 = arith.addf %74, %76 : vector<64x4xf32>
    %78 = vector.extract_strided_slice %69 {offsets = [192, 0], sizes = [64, 8], strides = [1, 1]} : vector<256x8xf32> to vector<64x8xf32>
    %cst_25 = arith.constant dense<0.000000e+00> : vector<64x4xf32>
    %79 = tpu.matmul %78, %46, %cst_25 {dimension_numbers = #tpu.dot_dimension_numbers<[1], [0], [0], [1], [0, 0, 1, 1], [], []>} : vector<64x8xf32>, vector<8x4xf32>, vector<64x4xf32> -> vector<64x4xf32>
    %80 = arith.addf %77, %79 : vector<64x4xf32>
    %c0_26 = arith.constant 0 : index
    %c0_27 = arith.constant 0 : index
    %81 = vector.load %arg6[%c0_26, %c0_27] : memref<64x1xf32, #tpu.memory_space<vmem>>, vector<64x1xf32>
    %82 = vector.broadcast %81 : vector<64x1xf32> to vector<64x4xf32>
    %83 = arith.addf %80, %82 : vector<64x4xf32>
    %84 = arith.addf %66, %83 : vector<64x4xf32>
    %cst_28 = arith.constant 0.000000e+00 : f32
    %85 = vector.broadcast %cst_28 : f32 to vector<64x4xf32>
    %86 = arith.cmpf oge, %84, %85 : vector<64x4xf32>
    %cst_29 = arith.constant 2.000000e-01 : f32
    %87 = vector.broadcast %cst_29 : f32 to vector<64x4xf32>
    %88 = arith.mulf %87, %84 : vector<64x4xf32>
    %89 = arith.select %86, %84, %88 : vector<64x4xi1>, vector<64x4xf32>
    %90 = tpu.iota {dimensions = array<i32: 0>} : vector<4x4xi32>
    %91 = tpu.iota {dimensions = array<i32: 1>} : vector<4x4xi32>
    %c1_i32_30 = arith.constant 1 : i32
    %92 = vector.broadcast %c1_i32_30 : i32 to vector<4x4xi32>
    %93 = arith.muli %92, %90 : vector<4x4xi32>
    %c1_i32_31 = arith.constant 1 : i32
    %94 = vector.broadcast %c1_i32_31 : i32 to vector<4x4xi32>
    %95 = arith.addi %93, %94 : vector<4x4xi32>
    %c1_i32_32 = arith.constant 1 : i32
    %96 = vector.broadcast %c1_i32_32 : i32 to vector<4x4xi32>
    %97 = arith.muli %96, %91 : vector<4x4xi32>
    %98 = arith.cmpi eq, %95, %97 : vector<4x4xi32>
    %99 = arith.extui %98 : vector<4x4xi1> to vector<4x4xi32>
    %100 = arith.sitofp %99 : vector<4x4xi32> to vector<4x4xf32>
    %101 = tpu.iota {dimensions = array<i32: 0>} : vector<4x4xi32>
    %102 = tpu.iota {dimensions = array<i32: 1>} : vector<4x4xi32>
    %c1_i32_33 = arith.constant 1 : i32
    %103 = vector.broadcast %c1_i32_33 : i32 to vector<4x4xi32>
    %104 = arith.muli %103, %101 : vector<4x4xi32>
    %c0_i32_34 = arith.constant 0 : i32
    %105 = vector.broadcast %c0_i32_34 : i32 to vector<4x4xi32>
    %106 = arith.addi %104, %105 : vector<4x4xi32>
    %c1_i32_35 = arith.constant 1 : i32
    %107 = vector.broadcast %c1_i32_35 : i32 to vector<4x4xi32>
    %108 = arith.muli %107, %102 : vector<4x4xi32>
    %109 = arith.cmpi eq, %106, %108 : vector<4x4xi32>
    %110 = arith.extui %109 : vector<4x4xi1> to vector<4x4xi32>
    %111 = arith.sitofp %110 : vector<4x4xi32> to vector<4x4xf32>
    %112 = tpu.iota {dimensions = array<i32: 0>} : vector<4x4xi32>
    %113 = tpu.iota {dimensions = array<i32: 1>} : vector<4x4xi32>
    %c1_i32_36 = arith.constant 1 : i32
    %114 = vector.broadcast %c1_i32_36 : i32 to vector<4x4xi32>
    %115 = arith.muli %114, %112 : vector<4x4xi32>
    %c-1_i32_37 = arith.constant -1 : i32
    %116 = vector.broadcast %c-1_i32_37 : i32 to vector<4x4xi32>
    %117 = arith.addi %115, %116 : vector<4x4xi32>
    %c1_i32_38 = arith.constant 1 : i32
    %118 = vector.broadcast %c1_i32_38 : i32 to vector<4x4xi32>
    %119 = arith.muli %118, %113 : vector<4x4xi32>
    %120 = arith.cmpi eq, %117, %119 : vector<4x4xi32>
    %121 = arith.extui %120 : vector<4x4xi1> to vector<4x4xi32>
    %122 = arith.sitofp %121 : vector<4x4xi32> to vector<4x4xf32>
    %c0_39 = arith.constant 0 : index
    %c0_40 = arith.constant 0 : index
    %c0_41 = arith.constant 0 : index
    %123 = vector.load %arg7[%c0_39, %c0_40, %c0_41] : memref<2x192x64xbf16, #tpu.memory_space<vmem>>, vector<1x192x64xbf16>
    %124 = vector.shape_cast %123 : vector<1x192x64xbf16> to vector<192x64xbf16>
    %125 = arith.truncf %89 : vector<64x4xf32> to vector<64x4xbf16>
    %cst_42 = arith.constant dense<0.000000e+00> : vector<192x4xf32>
    %126 = tpu.matmul %124, %125, %cst_42 {dimension_numbers = #tpu.dot_dimension_numbers<[1], [0], [0], [1], [0, 0, 1, 1], [], []>} : vector<192x64xbf16>, vector<64x4xbf16>, vector<192x4xf32> -> vector<192x4xf32>
    %127 = vector.extract_strided_slice %126 {offsets = [0, 0], sizes = [64, 4], strides = [1, 1]} : vector<192x4xf32> to vector<64x4xf32>
    %cst_43 = arith.constant dense<0.000000e+00> : vector<64x4xf32>
    %128 = tpu.matmul %127, %100, %cst_43 {dimension_numbers = #tpu.dot_dimension_numbers<[1], [0], [0], [1], [0, 0, 1, 1], [], []>} : vector<64x4xf32>, vector<4x4xf32>, vector<64x4xf32> -> vector<64x4xf32>
    %129 = vector.extract_strided_slice %126 {offsets = [64, 0], sizes = [64, 4], strides = [1, 1]} : vector<192x4xf32> to vector<64x4xf32>
    %cst_44 = arith.constant dense<0.000000e+00> : vector<64x4xf32>
    %130 = tpu.matmul %129, %111, %cst_44 {dimension_numbers = #tpu.dot_dimension_numbers<[1], [0], [0], [1], [0, 0, 1, 1], [], []>} : vector<64x4xf32>, vector<4x4xf32>, vector<64x4xf32> -> vector<64x4xf32>
    %131 = arith.addf %128, %130 : vector<64x4xf32>
    %132 = vector.extract_strided_slice %126 {offsets = [128, 0], sizes = [64, 4], strides = [1, 1]} : vector<192x4xf32> to vector<64x4xf32>
    %cst_45 = arith.constant dense<0.000000e+00> : vector<64x4xf32>
    %133 = tpu.matmul %132, %122, %cst_45 {dimension_numbers = #tpu.dot_dimension_numbers<[1], [0], [0], [1], [0, 0, 1, 1], [], []>} : vector<64x4xf32>, vector<4x4xf32>, vector<64x4xf32> -> vector<64x4xf32>
    %134 = arith.addf %131, %133 : vector<64x4xf32>
    %c0_46 = arith.constant 0 : index
    %c0_47 = arith.constant 0 : index
    %c0_48 = arith.constant 0 : index
    %135 = vector.load %arg8[%c0_46, %c0_47, %c0_48] : memref<2x64x1xf32, #tpu.memory_space<vmem>>, vector<1x64x1xf32>
    %136 = vector.shape_cast %135 : vector<1x64x1xf32> to vector<64x1xf32>
    %137 = vector.broadcast %136 : vector<64x1xf32> to vector<64x4xf32>
    %138 = arith.mulf %134, %137 : vector<64x4xf32>
    %c0_49 = arith.constant 0 : index
    %c0_50 = arith.constant 0 : index
    %c0_51 = arith.constant 0 : index
    %139 = vector.load %arg9[%c0_49, %c0_50, %c0_51] : memref<2x64x1xf32, #tpu.memory_space<vmem>>, vector<1x64x1xf32>
    %140 = vector.shape_cast %139 : vector<1x64x1xf32> to vector<64x1xf32>
    %141 = vector.broadcast %140 : vector<64x1xf32> to vector<64x4xf32>
    %142 = arith.addf %138, %141 : vector<64x4xf32>
    %143 = arith.addf %142, %89 : vector<64x4xf32>
    %cst_52 = arith.constant 0.000000e+00 : f32
    %144 = vector.broadcast %cst_52 : f32 to vector<64x4xf32>
    %145 = arith.cmpf oge, %143, %144 : vector<64x4xf32>
    %cst_53 = arith.constant 2.000000e-01 : f32
    %146 = vector.broadcast %cst_53 : f32 to vector<64x4xf32>
    %147 = arith.mulf %146, %143 : vector<64x4xf32>
    %148 = arith.select %145, %143, %147 : vector<64x4xi1>, vector<64x4xf32>
    %c1 = arith.constant 1 : index
    %c0_54 = arith.constant 0 : index
    %c0_55 = arith.constant 0 : index
    %149 = vector.load %arg7[%c1, %c0_54, %c0_55] : memref<2x192x64xbf16, #tpu.memory_space<vmem>>, vector<1x192x64xbf16>
    %150 = vector.shape_cast %149 : vector<1x192x64xbf16> to vector<192x64xbf16>
    %151 = arith.truncf %148 : vector<64x4xf32> to vector<64x4xbf16>
    %cst_56 = arith.constant dense<0.000000e+00> : vector<192x4xf32>
    %152 = tpu.matmul %150, %151, %cst_56 {dimension_numbers = #tpu.dot_dimension_numbers<[1], [0], [0], [1], [0, 0, 1, 1], [], []>} : vector<192x64xbf16>, vector<64x4xbf16>, vector<192x4xf32> -> vector<192x4xf32>
    %153 = vector.extract_strided_slice %152 {offsets = [0, 0], sizes = [64, 4], strides = [1, 1]} : vector<192x4xf32> to vector<64x4xf32>
    %cst_57 = arith.constant dense<0.000000e+00> : vector<64x4xf32>
    %154 = tpu.matmul %153, %100, %cst_57 {dimension_numbers = #tpu.dot_dimension_numbers<[1], [0], [0], [1], [0, 0, 1, 1], [], []>} : vector<64x4xf32>, vector<4x4xf32>, vector<64x4xf32> -> vector<64x4xf32>
    %155 = vector.extract_strided_slice %152 {offsets = [64, 0], sizes = [64, 4], strides = [1, 1]} : vector<192x4xf32> to vector<64x4xf32>
    %cst_58 = arith.constant dense<0.000000e+00> : vector<64x4xf32>
    %156 = tpu.matmul %155, %111, %cst_58 {dimension_numbers = #tpu.dot_dimension_numbers<[1], [0], [0], [1], [0, 0, 1, 1], [], []>} : vector<64x4xf32>, vector<4x4xf32>, vector<64x4xf32> -> vector<64x4xf32>
    %157 = arith.addf %154, %156 : vector<64x4xf32>
    %158 = vector.extract_strided_slice %152 {offsets = [128, 0], sizes = [64, 4], strides = [1, 1]} : vector<192x4xf32> to vector<64x4xf32>
    %cst_59 = arith.constant dense<0.000000e+00> : vector<64x4xf32>
    %159 = tpu.matmul %158, %122, %cst_59 {dimension_numbers = #tpu.dot_dimension_numbers<[1], [0], [0], [1], [0, 0, 1, 1], [], []>} : vector<64x4xf32>, vector<4x4xf32>, vector<64x4xf32> -> vector<64x4xf32>
    %160 = arith.addf %157, %159 : vector<64x4xf32>
    %c1_60 = arith.constant 1 : index
    %c0_61 = arith.constant 0 : index
    %c0_62 = arith.constant 0 : index
    %161 = vector.load %arg8[%c1_60, %c0_61, %c0_62] : memref<2x64x1xf32, #tpu.memory_space<vmem>>, vector<1x64x1xf32>
    %162 = vector.shape_cast %161 : vector<1x64x1xf32> to vector<64x1xf32>
    %163 = vector.broadcast %162 : vector<64x1xf32> to vector<64x4xf32>
    %164 = arith.mulf %160, %163 : vector<64x4xf32>
    %c1_63 = arith.constant 1 : index
    %c0_64 = arith.constant 0 : index
    %c0_65 = arith.constant 0 : index
    %165 = vector.load %arg9[%c1_63, %c0_64, %c0_65] : memref<2x64x1xf32, #tpu.memory_space<vmem>>, vector<1x64x1xf32>
    %166 = vector.shape_cast %165 : vector<1x64x1xf32> to vector<64x1xf32>
    %167 = vector.broadcast %166 : vector<64x1xf32> to vector<64x4xf32>
    %168 = arith.addf %164, %167 : vector<64x4xf32>
    %169 = arith.addf %168, %148 : vector<64x4xf32>
    %cst_66 = arith.constant 0.000000e+00 : f32
    %170 = vector.broadcast %cst_66 : f32 to vector<64x4xf32>
    %171 = arith.cmpf oge, %169, %170 : vector<64x4xf32>
    %cst_67 = arith.constant 2.000000e-01 : f32
    %172 = vector.broadcast %cst_67 : f32 to vector<64x4xf32>
    %173 = arith.mulf %172, %169 : vector<64x4xf32>
    %174 = arith.select %171, %169, %173 : vector<64x4xi1>, vector<64x4xf32>
    %c0_68 = arith.constant 0 : index
    %c0_69 = arith.constant 0 : index
    %175 = vector.load %arg10[%c0_68, %c0_69] : memref<192x64xbf16, #tpu.memory_space<vmem>>, vector<192x64xbf16>
    %176 = arith.truncf %174 : vector<64x4xf32> to vector<64x4xbf16>
    %cst_70 = arith.constant dense<0.000000e+00> : vector<192x4xf32>
    %177 = tpu.matmul %175, %176, %cst_70 {dimension_numbers = #tpu.dot_dimension_numbers<[1], [0], [0], [1], [0, 0, 1, 1], [], []>} : vector<192x64xbf16>, vector<64x4xbf16>, vector<192x4xf32> -> vector<192x4xf32>
    %178 = vector.extract_strided_slice %177 {offsets = [0, 0], sizes = [64, 4], strides = [1, 1]} : vector<192x4xf32> to vector<64x4xf32>
    %cst_71 = arith.constant dense<0.000000e+00> : vector<64x4xf32>
    %179 = tpu.matmul %178, %100, %cst_71 {dimension_numbers = #tpu.dot_dimension_numbers<[1], [0], [0], [1], [0, 0, 1, 1], [], []>} : vector<64x4xf32>, vector<4x4xf32>, vector<64x4xf32> -> vector<64x4xf32>
    %180 = vector.extract_strided_slice %177 {offsets = [64, 0], sizes = [64, 4], strides = [1, 1]} : vector<192x4xf32> to vector<64x4xf32>
    %cst_72 = arith.constant dense<0.000000e+00> : vector<64x4xf32>
    %181 = tpu.matmul %180, %111, %cst_72 {dimension_numbers = #tpu.dot_dimension_numbers<[1], [0], [0], [1], [0, 0, 1, 1], [], []>} : vector<64x4xf32>, vector<4x4xf32>, vector<64x4xf32> -> vector<64x4xf32>
    %182 = arith.addf %179, %181 : vector<64x4xf32>
    %183 = vector.extract_strided_slice %177 {offsets = [128, 0], sizes = [64, 4], strides = [1, 1]} : vector<192x4xf32> to vector<64x4xf32>
    %cst_73 = arith.constant dense<0.000000e+00> : vector<64x4xf32>
    %184 = tpu.matmul %183, %122, %cst_73 {dimension_numbers = #tpu.dot_dimension_numbers<[1], [0], [0], [1], [0, 0, 1, 1], [], []>} : vector<64x4xf32>, vector<4x4xf32>, vector<64x4xf32> -> vector<64x4xf32>
    %185 = arith.addf %182, %184 : vector<64x4xf32>
    %c0_74 = arith.constant 0 : index
    %c0_75 = arith.constant 0 : index
    %186 = vector.load %arg11[%c0_74, %c0_75] : memref<64x1xf32, #tpu.memory_space<vmem>>, vector<64x1xf32>
    %187 = vector.broadcast %186 : vector<64x1xf32> to vector<64x4xf32>
    %188 = arith.mulf %185, %187 : vector<64x4xf32>
    %c0_76 = arith.constant 0 : index
    %c0_77 = arith.constant 0 : index
    %189 = vector.load %arg12[%c0_76, %c0_77] : memref<64x1xf32, #tpu.memory_space<vmem>>, vector<64x1xf32>
    %190 = vector.broadcast %189 : vector<64x1xf32> to vector<64x4xf32>
    %191 = arith.addf %188, %190 : vector<64x4xf32>
    %192 = arith.addf %191, %89 : vector<64x4xf32>
    %cst_78 = arith.constant 0.000000e+00 : f32
    %193 = vector.broadcast %cst_78 : f32 to vector<64x4xf32>
    %194 = arith.maximumf %192, %193 : vector<64x4xf32>
    %c0_79 = arith.constant 0 : index
    %c0_80 = arith.constant 0 : index
    %195 = vector.load %arg13[%c0_79, %c0_80] : memref<64x64xbf16, #tpu.memory_space<vmem>>, vector<64x64xbf16>
    %196 = arith.truncf %194 : vector<64x4xf32> to vector<64x4xbf16>
    %cst_81 = arith.constant dense<0.000000e+00> : vector<64x4xf32>
    %197 = tpu.matmul %195, %196, %cst_81 {dimension_numbers = #tpu.dot_dimension_numbers<[1], [0], [0], [1], [0, 0, 1, 1], [], []>} : vector<64x64xbf16>, vector<64x4xbf16>, vector<64x4xf32> -> vector<64x4xf32>
    %c0_82 = arith.constant 0 : index
    %c0_83 = arith.constant 0 : index
    %198 = vector.load %arg14[%c0_82, %c0_83] : memref<64x1xf32, #tpu.memory_space<vmem>>, vector<64x1xf32>
    %199 = vector.broadcast %198 : vector<64x1xf32> to vector<64x4xf32>
    %200 = arith.addf %197, %199 : vector<64x4xf32>
    %c0_84 = arith.constant 0 : index
    %c0_85 = arith.constant 0 : index
    %c0_86 = arith.constant 0 : index
    %201 = vector.load %arg15[%c0_84, %c0_85, %c0_86] : memref<1x64x4xf32, #tpu.memory_space<vmem>>, vector<1x64x4xf32>
    %202 = vector.shape_cast %201 : vector<1x64x4xf32> to vector<64x4xf32>
    %203 = vector.shape_cast %200 : vector<64x4xf32> to vector<1x64x4xf32>
    tpu.vector_store %arg15[%c0_84, %c0_85, %c0_86], %203 {strides = array<i32>} : memref<1x64x4xf32, #tpu.memory_space<vmem>>, vector<1x64x4xf32>,
    return
  }
  func.func @transform_0(%arg0: i32) -> (i32, i32, i32) {
    %c0_i32 = arith.constant 0 : i32
    %c0_i32_0 = arith.constant 0 : i32
    %c0_i32_1 = arith.constant 0 : i32
    return %arg0, %c0_i32, %c0_i32_0 : i32, i32, i32
  }
  func.func @transform_1(%arg0: i32) -> (i32, i32) {
    %c0_i32 = arith.constant 0 : i32
    %c0_i32_0 = arith.constant 0 : i32
    %c0_i32_1 = arith.constant 0 : i32
    return %c0_i32, %c0_i32_0 : i32, i32
  }
  func.func @transform_2(%arg0: i32) -> (i32, i32) {
    %c0_i32 = arith.constant 0 : i32
    %c0_i32_0 = arith.constant 0 : i32
    %c0_i32_1 = arith.constant 0 : i32
    return %c0_i32, %c0_i32_0 : i32, i32
  }
  func.func @transform_3(%arg0: i32) -> (i32, i32) {
    %c0_i32 = arith.constant 0 : i32
    %c0_i32_0 = arith.constant 0 : i32
    %c0_i32_1 = arith.constant 0 : i32
    return %c0_i32, %c0_i32_0 : i32, i32
  }
  func.func @transform_4(%arg0: i32) -> (i32, i32) {
    %c0_i32 = arith.constant 0 : i32
    %c0_i32_0 = arith.constant 0 : i32
    %c0_i32_1 = arith.constant 0 : i32
    return %c0_i32, %c0_i32_0 : i32, i32
  }
  func.func @transform_5(%arg0: i32) -> (i32, i32) {
    %c0_i32 = arith.constant 0 : i32
    %c0_i32_0 = arith.constant 0 : i32
    %c0_i32_1 = arith.constant 0 : i32
    return %c0_i32, %c0_i32_0 : i32, i32
  }
  func.func @transform_6(%arg0: i32) -> (i32, i32, i32) {
    %c0_i32 = arith.constant 0 : i32
    %c0_i32_0 = arith.constant 0 : i32
    %c0_i32_1 = arith.constant 0 : i32
    %c0_i32_2 = arith.constant 0 : i32
    return %c0_i32, %c0_i32_0, %c0_i32_1 : i32, i32, i32
  }
  func.func @transform_7(%arg0: i32) -> (i32, i32, i32) {
    %c0_i32 = arith.constant 0 : i32
    %c0_i32_0 = arith.constant 0 : i32
    %c0_i32_1 = arith.constant 0 : i32
    %c0_i32_2 = arith.constant 0 : i32
    return %c0_i32, %c0_i32_0, %c0_i32_1 : i32, i32, i32
  }
  func.func @transform_8(%arg0: i32) -> (i32, i32, i32) {
    %c0_i32 = arith.constant 0 : i32
    %c0_i32_0 = arith.constant 0 : i32
    %c0_i32_1 = arith.constant 0 : i32
    %c0_i32_2 = arith.constant 0 : i32
    return %c0_i32, %c0_i32_0, %c0_i32_1 : i32, i32, i32
  }
  func.func @transform_9(%arg0: i32) -> (i32, i32) {
    %c0_i32 = arith.constant 0 : i32
    %c0_i32_0 = arith.constant 0 : i32
    %c0_i32_1 = arith.constant 0 : i32
    return %c0_i32, %c0_i32_0 : i32, i32
  }
  func.func @transform_10(%arg0: i32) -> (i32, i32) {
    %c0_i32 = arith.constant 0 : i32
    %c0_i32_0 = arith.constant 0 : i32
    %c0_i32_1 = arith.constant 0 : i32
    return %c0_i32, %c0_i32_0 : i32, i32
  }
  func.func @transform_11(%arg0: i32) -> (i32, i32) {
    %c0_i32 = arith.constant 0 : i32
    %c0_i32_0 = arith.constant 0 : i32
    %c0_i32_1 = arith.constant 0 : i32
    return %c0_i32, %c0_i32_0 : i32, i32
  }
  func.func @transform_12(%arg0: i32) -> (i32, i32) {
    %c0_i32 = arith.constant 0 : i32
    %c0_i32_0 = arith.constant 0 : i32
    %c0_i32_1 = arith.constant 0 : i32
    return %c0_i32, %c0_i32_0 : i32, i32
  }
  func.func @transform_13(%arg0: i32) -> (i32, i32) {
    %c0_i32 = arith.constant 0 : i32
    %c0_i32_0 = arith.constant 0 : i32
    %c0_i32_1 = arith.constant 0 : i32
    return %c0_i32, %c0_i32_0 : i32, i32
  }
  func.func @transform_14(%arg0: i32) -> (i32, i32, i32) {
    %c0_i32 = arith.constant 0 : i32
    %c0_i32_0 = arith.constant 0 : i32
    %c0_i32_1 = arith.constant 0 : i32
    return %arg0, %c0_i32, %c0_i32_0 : i32, i32, i32
  }
}

module attributes {stable_mosaic.version = 11 : i64} {
  func.func @_vq_kernel(%arg0: i32, %arg1: memref<1x4x64xf32, #tpu.memory_space<vmem>>, %arg2: memref<128x64xf32, #tpu.memory_space<vmem>>, %arg3: memref<1x128xf32, #tpu.memory_space<vmem>>, %arg4: memref<1x4x64xf32, #tpu.memory_space<vmem>>) attributes {dimension_semantics = [#tpu.dimension_semantics<parallel>], iteration_bounds = array<i64: 2>, scalar_prefetch = 0 : i64, scratch_operands = 0 : i64, tpu.core_type = #tpu.core_type<tc>, window_params = [{transform_indices = @transform_0, window_bounds = array<i64: 1, 4, 64>}, {pipeline_mode = #tpu.pipeline_mode<synchronous>, transform_indices = @transform_1, window_bounds = array<i64: 128, 64>}, {pipeline_mode = #tpu.pipeline_mode<synchronous>, transform_indices = @transform_2, window_bounds = array<i64: 1, 128>}, {transform_indices = @transform_3, window_bounds = array<i64: 1, 4, 64>}]} {
    %c0 = arith.constant 0 : index
    %c0_0 = arith.constant 0 : index
    %c0_1 = arith.constant 0 : index
    %0 = vector.load %arg1[%c0, %c0_0, %c0_1] : memref<1x4x64xf32, #tpu.memory_space<vmem>>, vector<1x4x64xf32>
    %1 = vector.shape_cast %0 : vector<1x4x64xf32> to vector<4x64xf32>
    %c0_2 = arith.constant 0 : index
    %c0_3 = arith.constant 0 : index
    %2 = vector.load %arg2[%c0_2, %c0_3] : memref<128x64xf32, #tpu.memory_space<vmem>>, vector<128x64xf32>
    %3 = arith.truncf %1 : vector<4x64xf32> to vector<4x64xbf16>
    %4 = arith.truncf %2 : vector<128x64xf32> to vector<128x64xbf16>
    %cst = arith.constant dense<0.000000e+00> : vector<4x128xf32>
    %5 = tpu.matmul %3, %4, %cst {dimension_numbers = #tpu.dot_dimension_numbers<[1], [1], [0], [0], [0, 0, 1, 0], [], []>} : vector<4x64xbf16>, vector<128x64xbf16>, vector<4x128xf32> -> vector<4x128xf32>
    %c0_4 = arith.constant 0 : index
    %c0_5 = arith.constant 0 : index
    %6 = vector.load %arg3[%c0_4, %c0_5] : memref<1x128xf32, #tpu.memory_space<vmem>>, vector<1x128xf32>
    %cst_6 = arith.constant 2.000000e+00 : f32
    %7 = vector.broadcast %cst_6 : f32 to vector<4x128xf32>
    %8 = arith.mulf %7, %5 : vector<4x128xf32>
    %9 = vector.broadcast %6 : vector<1x128xf32> to vector<4x128xf32>
    %10 = arith.subf %9, %8 : vector<4x128xf32>
    %11 = tpu.reduce_index %10 {axis = 1 : i32, kind = #tpu.reduction_kind<arg_min>} : vector<4x128xf32> -> vector<4xi32>
    %12 = tpu.iota {dimensions = array<i32: 1>} : vector<4x128xi32>
    %13 = vector.shape_cast %11 : vector<4xi32> to vector<4x1xi32>
    %14 = vector.broadcast %13 : vector<4x1xi32> to vector<4x128xi32>
    %15 = arith.cmpi eq, %12, %14 : vector<4x128xi32>
    %16 = arith.extui %15 : vector<4x128xi1> to vector<4x128xi32>
    %17 = arith.sitofp %16 : vector<4x128xi32> to vector<4x128xf32>
    %cst_7 = arith.constant dense<0.000000e+00> : vector<4x64xf32>
    %18 = tpu.matmul %17, %2, %cst_7 {dimension_numbers = #tpu.dot_dimension_numbers<[1], [0], [0], [1], [0, 0, 1, 1], [], []>} : vector<4x128xf32>, vector<128x64xf32>, vector<4x64xf32> -> vector<4x64xf32>
    %c0_8 = arith.constant 0 : index
    %c0_9 = arith.constant 0 : index
    %c0_10 = arith.constant 0 : index
    %19 = vector.load %arg4[%c0_8, %c0_9, %c0_10] : memref<1x4x64xf32, #tpu.memory_space<vmem>>, vector<1x4x64xf32>
    %20 = vector.shape_cast %19 : vector<1x4x64xf32> to vector<4x64xf32>
    %21 = vector.shape_cast %18 : vector<4x64xf32> to vector<1x4x64xf32>
    tpu.vector_store %arg4[%c0_8, %c0_9, %c0_10], %21 {strides = array<i32>} : memref<1x4x64xf32, #tpu.memory_space<vmem>>, vector<1x4x64xf32>,
    return
  }
  func.func @transform_0(%arg0: i32) -> (i32, i32, i32) {
    %c0_i32 = arith.constant 0 : i32
    %c0_i32_0 = arith.constant 0 : i32
    %c0_i32_1 = arith.constant 0 : i32
    return %arg0, %c0_i32, %c0_i32_0 : i32, i32, i32
  }
  func.func @transform_1(%arg0: i32) -> (i32, i32) {
    %c0_i32 = arith.constant 0 : i32
    %c0_i32_0 = arith.constant 0 : i32
    %c0_i32_1 = arith.constant 0 : i32
    return %c0_i32, %c0_i32_0 : i32, i32
  }
  func.func @transform_2(%arg0: i32) -> (i32, i32) {
    %c0_i32 = arith.constant 0 : i32
    %c0_i32_0 = arith.constant 0 : i32
    %c0_i32_1 = arith.constant 0 : i32
    return %c0_i32, %c0_i32_0 : i32, i32
  }
  func.func @transform_3(%arg0: i32) -> (i32, i32, i32) {
    %c0_i32 = arith.constant 0 : i32
    %c0_i32_0 = arith.constant 0 : i32
    %c0_i32_1 = arith.constant 0 : i32
    return %arg0, %c0_i32, %c0_i32_0 : i32, i32, i32
  }
}

module attributes {stable_mosaic.version = 11 : i64} {
  func.func @_stage_kernel(%arg0: i32, %arg1: memref<1x64x4xbf16, #tpu.memory_space<vmem>>, %arg2: memref<64x64xbf16, #tpu.memory_space<vmem>>, %arg3: memref<64x1xf32, #tpu.memory_space<vmem>>, %arg4: memref<2x192x64xbf16, #tpu.memory_space<vmem>>, %arg5: memref<2x64x1xf32, #tpu.memory_space<vmem>>, %arg6: memref<2x64x1xf32, #tpu.memory_space<vmem>>, %arg7: memref<192x64xbf16, #tpu.memory_space<vmem>>, %arg8: memref<64x1xf32, #tpu.memory_space<vmem>>, %arg9: memref<64x1xf32, #tpu.memory_space<vmem>>, %arg10: memref<1x64x4xbf16, #tpu.memory_space<vmem>>) attributes {dimension_semantics = [#tpu.dimension_semantics<parallel>], iteration_bounds = array<i64: 2>, scalar_prefetch = 0 : i64, scratch_operands = 0 : i64, tpu.core_type = #tpu.core_type<tc>, window_params = [{transform_indices = @transform_0, window_bounds = array<i64: 1, 64, 4>}, {pipeline_mode = #tpu.pipeline_mode<synchronous>, transform_indices = @transform_1, window_bounds = array<i64: 64, 64>}, {pipeline_mode = #tpu.pipeline_mode<synchronous>, transform_indices = @transform_2, window_bounds = array<i64: 64, 1>}, {pipeline_mode = #tpu.pipeline_mode<synchronous>, transform_indices = @transform_3, window_bounds = array<i64: 2, 192, 64>}, {pipeline_mode = #tpu.pipeline_mode<synchronous>, transform_indices = @transform_4, window_bounds = array<i64: 2, 64, 1>}, {pipeline_mode = #tpu.pipeline_mode<synchronous>, transform_indices = @transform_5, window_bounds = array<i64: 2, 64, 1>}, {pipeline_mode = #tpu.pipeline_mode<synchronous>, transform_indices = @transform_6, window_bounds = array<i64: 192, 64>}, {pipeline_mode = #tpu.pipeline_mode<synchronous>, transform_indices = @transform_7, window_bounds = array<i64: 64, 1>}, {pipeline_mode = #tpu.pipeline_mode<synchronous>, transform_indices = @transform_8, window_bounds = array<i64: 64, 1>}, {transform_indices = @transform_9, window_bounds = array<i64: 1, 64, 4>}]} {
    %c0 = arith.constant 0 : index
    %c0_0 = arith.constant 0 : index
    %c0_1 = arith.constant 0 : index
    %0 = vector.load %arg1[%c0, %c0_0, %c0_1] : memref<1x64x4xbf16, #tpu.memory_space<vmem>>, vector<1x64x4xbf16>
    %1 = vector.shape_cast %0 : vector<1x64x4xbf16> to vector<64x4xbf16>
    %2 = arith.extf %1 : vector<64x4xbf16> to vector<64x4xf32>
    %c0_2 = arith.constant 0 : index
    %c0_3 = arith.constant 0 : index
    %3 = vector.load %arg2[%c0_2, %c0_3] : memref<64x64xbf16, #tpu.memory_space<vmem>>, vector<64x64xbf16>
    %4 = arith.truncf %2 : vector<64x4xf32> to vector<64x4xbf16>
    %cst = arith.constant dense<0.000000e+00> : vector<64x4xf32>
    %5 = tpu.matmul %3, %4, %cst {dimension_numbers = #tpu.dot_dimension_numbers<[1], [0], [0], [1], [0, 0, 1, 1], [], []>} : vector<64x64xbf16>, vector<64x4xbf16>, vector<64x4xf32> -> vector<64x4xf32>
    %c0_4 = arith.constant 0 : index
    %c0_5 = arith.constant 0 : index
    %6 = vector.load %arg3[%c0_4, %c0_5] : memref<64x1xf32, #tpu.memory_space<vmem>>, vector<64x1xf32>
    %7 = vector.broadcast %6 : vector<64x1xf32> to vector<64x4xf32>
    %8 = arith.addf %5, %7 : vector<64x4xf32>
    %9 = tpu.iota {dimensions = array<i32: 0>} : vector<4x4xi32>
    %10 = tpu.iota {dimensions = array<i32: 1>} : vector<4x4xi32>
    %c1_i32 = arith.constant 1 : i32
    %11 = vector.broadcast %c1_i32 : i32 to vector<4x4xi32>
    %12 = arith.muli %11, %9 : vector<4x4xi32>
    %c1_i32_6 = arith.constant 1 : i32
    %13 = vector.broadcast %c1_i32_6 : i32 to vector<4x4xi32>
    %14 = arith.addi %12, %13 : vector<4x4xi32>
    %c1_i32_7 = arith.constant 1 : i32
    %15 = vector.broadcast %c1_i32_7 : i32 to vector<4x4xi32>
    %16 = arith.muli %15, %10 : vector<4x4xi32>
    %17 = arith.cmpi eq, %14, %16 : vector<4x4xi32>
    %18 = arith.extui %17 : vector<4x4xi1> to vector<4x4xi32>
    %19 = arith.sitofp %18 : vector<4x4xi32> to vector<4x4xf32>
    %20 = tpu.iota {dimensions = array<i32: 0>} : vector<4x4xi32>
    %21 = tpu.iota {dimensions = array<i32: 1>} : vector<4x4xi32>
    %c1_i32_8 = arith.constant 1 : i32
    %22 = vector.broadcast %c1_i32_8 : i32 to vector<4x4xi32>
    %23 = arith.muli %22, %20 : vector<4x4xi32>
    %c0_i32 = arith.constant 0 : i32
    %24 = vector.broadcast %c0_i32 : i32 to vector<4x4xi32>
    %25 = arith.addi %23, %24 : vector<4x4xi32>
    %c1_i32_9 = arith.constant 1 : i32
    %26 = vector.broadcast %c1_i32_9 : i32 to vector<4x4xi32>
    %27 = arith.muli %26, %21 : vector<4x4xi32>
    %28 = arith.cmpi eq, %25, %27 : vector<4x4xi32>
    %29 = arith.extui %28 : vector<4x4xi1> to vector<4x4xi32>
    %30 = arith.sitofp %29 : vector<4x4xi32> to vector<4x4xf32>
    %31 = tpu.iota {dimensions = array<i32: 0>} : vector<4x4xi32>
    %32 = tpu.iota {dimensions = array<i32: 1>} : vector<4x4xi32>
    %c1_i32_10 = arith.constant 1 : i32
    %33 = vector.broadcast %c1_i32_10 : i32 to vector<4x4xi32>
    %34 = arith.muli %33, %31 : vector<4x4xi32>
    %c-1_i32 = arith.constant -1 : i32
    %35 = vector.broadcast %c-1_i32 : i32 to vector<4x4xi32>
    %36 = arith.addi %34, %35 : vector<4x4xi32>
    %c1_i32_11 = arith.constant 1 : i32
    %37 = vector.broadcast %c1_i32_11 : i32 to vector<4x4xi32>
    %38 = arith.muli %37, %32 : vector<4x4xi32>
    %39 = arith.cmpi eq, %36, %38 : vector<4x4xi32>
    %40 = arith.extui %39 : vector<4x4xi1> to vector<4x4xi32>
    %41 = arith.sitofp %40 : vector<4x4xi32> to vector<4x4xf32>
    %c0_12 = arith.constant 0 : index
    %c0_13 = arith.constant 0 : index
    %c0_14 = arith.constant 0 : index
    %42 = vector.load %arg4[%c0_12, %c0_13, %c0_14] : memref<2x192x64xbf16, #tpu.memory_space<vmem>>, vector<1x192x64xbf16>
    %43 = vector.shape_cast %42 : vector<1x192x64xbf16> to vector<192x64xbf16>
    %44 = arith.truncf %8 : vector<64x4xf32> to vector<64x4xbf16>
    %cst_15 = arith.constant dense<0.000000e+00> : vector<192x4xf32>
    %45 = tpu.matmul %43, %44, %cst_15 {dimension_numbers = #tpu.dot_dimension_numbers<[1], [0], [0], [1], [0, 0, 1, 1], [], []>} : vector<192x64xbf16>, vector<64x4xbf16>, vector<192x4xf32> -> vector<192x4xf32>
    %46 = vector.extract_strided_slice %45 {offsets = [0, 0], sizes = [64, 4], strides = [1, 1]} : vector<192x4xf32> to vector<64x4xf32>
    %cst_16 = arith.constant dense<0.000000e+00> : vector<64x4xf32>
    %47 = tpu.matmul %46, %19, %cst_16 {dimension_numbers = #tpu.dot_dimension_numbers<[1], [0], [0], [1], [0, 0, 1, 1], [], []>} : vector<64x4xf32>, vector<4x4xf32>, vector<64x4xf32> -> vector<64x4xf32>
    %48 = vector.extract_strided_slice %45 {offsets = [64, 0], sizes = [64, 4], strides = [1, 1]} : vector<192x4xf32> to vector<64x4xf32>
    %cst_17 = arith.constant dense<0.000000e+00> : vector<64x4xf32>
    %49 = tpu.matmul %48, %30, %cst_17 {dimension_numbers = #tpu.dot_dimension_numbers<[1], [0], [0], [1], [0, 0, 1, 1], [], []>} : vector<64x4xf32>, vector<4x4xf32>, vector<64x4xf32> -> vector<64x4xf32>
    %50 = arith.addf %47, %49 : vector<64x4xf32>
    %51 = vector.extract_strided_slice %45 {offsets = [128, 0], sizes = [64, 4], strides = [1, 1]} : vector<192x4xf32> to vector<64x4xf32>
    %cst_18 = arith.constant dense<0.000000e+00> : vector<64x4xf32>
    %52 = tpu.matmul %51, %41, %cst_18 {dimension_numbers = #tpu.dot_dimension_numbers<[1], [0], [0], [1], [0, 0, 1, 1], [], []>} : vector<64x4xf32>, vector<4x4xf32>, vector<64x4xf32> -> vector<64x4xf32>
    %53 = arith.addf %50, %52 : vector<64x4xf32>
    %c0_19 = arith.constant 0 : index
    %c0_20 = arith.constant 0 : index
    %c0_21 = arith.constant 0 : index
    %54 = vector.load %arg5[%c0_19, %c0_20, %c0_21] : memref<2x64x1xf32, #tpu.memory_space<vmem>>, vector<1x64x1xf32>
    %55 = vector.shape_cast %54 : vector<1x64x1xf32> to vector<64x1xf32>
    %56 = vector.broadcast %55 : vector<64x1xf32> to vector<64x4xf32>
    %57 = arith.mulf %53, %56 : vector<64x4xf32>
    %c0_22 = arith.constant 0 : index
    %c0_23 = arith.constant 0 : index
    %c0_24 = arith.constant 0 : index
    %58 = vector.load %arg6[%c0_22, %c0_23, %c0_24] : memref<2x64x1xf32, #tpu.memory_space<vmem>>, vector<1x64x1xf32>
    %59 = vector.shape_cast %58 : vector<1x64x1xf32> to vector<64x1xf32>
    %60 = vector.broadcast %59 : vector<64x1xf32> to vector<64x4xf32>
    %61 = arith.addf %57, %60 : vector<64x4xf32>
    %62 = arith.addf %61, %8 : vector<64x4xf32>
    %cst_25 = arith.constant 0.000000e+00 : f32
    %63 = vector.broadcast %cst_25 : f32 to vector<64x4xf32>
    %64 = arith.cmpf oge, %62, %63 : vector<64x4xf32>
    %cst_26 = arith.constant 2.000000e-01 : f32
    %65 = vector.broadcast %cst_26 : f32 to vector<64x4xf32>
    %66 = arith.mulf %65, %62 : vector<64x4xf32>
    %67 = arith.select %64, %62, %66 : vector<64x4xi1>, vector<64x4xf32>
    %c1 = arith.constant 1 : index
    %c0_27 = arith.constant 0 : index
    %c0_28 = arith.constant 0 : index
    %68 = vector.load %arg4[%c1, %c0_27, %c0_28] : memref<2x192x64xbf16, #tpu.memory_space<vmem>>, vector<1x192x64xbf16>
    %69 = vector.shape_cast %68 : vector<1x192x64xbf16> to vector<192x64xbf16>
    %70 = arith.truncf %67 : vector<64x4xf32> to vector<64x4xbf16>
    %cst_29 = arith.constant dense<0.000000e+00> : vector<192x4xf32>
    %71 = tpu.matmul %69, %70, %cst_29 {dimension_numbers = #tpu.dot_dimension_numbers<[1], [0], [0], [1], [0, 0, 1, 1], [], []>} : vector<192x64xbf16>, vector<64x4xbf16>, vector<192x4xf32> -> vector<192x4xf32>
    %72 = vector.extract_strided_slice %71 {offsets = [0, 0], sizes = [64, 4], strides = [1, 1]} : vector<192x4xf32> to vector<64x4xf32>
    %cst_30 = arith.constant dense<0.000000e+00> : vector<64x4xf32>
    %73 = tpu.matmul %72, %19, %cst_30 {dimension_numbers = #tpu.dot_dimension_numbers<[1], [0], [0], [1], [0, 0, 1, 1], [], []>} : vector<64x4xf32>, vector<4x4xf32>, vector<64x4xf32> -> vector<64x4xf32>
    %74 = vector.extract_strided_slice %71 {offsets = [64, 0], sizes = [64, 4], strides = [1, 1]} : vector<192x4xf32> to vector<64x4xf32>
    %cst_31 = arith.constant dense<0.000000e+00> : vector<64x4xf32>
    %75 = tpu.matmul %74, %30, %cst_31 {dimension_numbers = #tpu.dot_dimension_numbers<[1], [0], [0], [1], [0, 0, 1, 1], [], []>} : vector<64x4xf32>, vector<4x4xf32>, vector<64x4xf32> -> vector<64x4xf32>
    %76 = arith.addf %73, %75 : vector<64x4xf32>
    %77 = vector.extract_strided_slice %71 {offsets = [128, 0], sizes = [64, 4], strides = [1, 1]} : vector<192x4xf32> to vector<64x4xf32>
    %cst_32 = arith.constant dense<0.000000e+00> : vector<64x4xf32>
    %78 = tpu.matmul %77, %41, %cst_32 {dimension_numbers = #tpu.dot_dimension_numbers<[1], [0], [0], [1], [0, 0, 1, 1], [], []>} : vector<64x4xf32>, vector<4x4xf32>, vector<64x4xf32> -> vector<64x4xf32>
    %79 = arith.addf %76, %78 : vector<64x4xf32>
    %c1_33 = arith.constant 1 : index
    %c0_34 = arith.constant 0 : index
    %c0_35 = arith.constant 0 : index
    %80 = vector.load %arg5[%c1_33, %c0_34, %c0_35] : memref<2x64x1xf32, #tpu.memory_space<vmem>>, vector<1x64x1xf32>
    %81 = vector.shape_cast %80 : vector<1x64x1xf32> to vector<64x1xf32>
    %82 = vector.broadcast %81 : vector<64x1xf32> to vector<64x4xf32>
    %83 = arith.mulf %79, %82 : vector<64x4xf32>
    %c1_36 = arith.constant 1 : index
    %c0_37 = arith.constant 0 : index
    %c0_38 = arith.constant 0 : index
    %84 = vector.load %arg6[%c1_36, %c0_37, %c0_38] : memref<2x64x1xf32, #tpu.memory_space<vmem>>, vector<1x64x1xf32>
    %85 = vector.shape_cast %84 : vector<1x64x1xf32> to vector<64x1xf32>
    %86 = vector.broadcast %85 : vector<64x1xf32> to vector<64x4xf32>
    %87 = arith.addf %83, %86 : vector<64x4xf32>
    %88 = arith.addf %87, %67 : vector<64x4xf32>
    %cst_39 = arith.constant 0.000000e+00 : f32
    %89 = vector.broadcast %cst_39 : f32 to vector<64x4xf32>
    %90 = arith.cmpf oge, %88, %89 : vector<64x4xf32>
    %cst_40 = arith.constant 2.000000e-01 : f32
    %91 = vector.broadcast %cst_40 : f32 to vector<64x4xf32>
    %92 = arith.mulf %91, %88 : vector<64x4xf32>
    %93 = arith.select %90, %88, %92 : vector<64x4xi1>, vector<64x4xf32>
    %c0_41 = arith.constant 0 : index
    %c0_42 = arith.constant 0 : index
    %94 = vector.load %arg7[%c0_41, %c0_42] : memref<192x64xbf16, #tpu.memory_space<vmem>>, vector<192x64xbf16>
    %95 = arith.truncf %93 : vector<64x4xf32> to vector<64x4xbf16>
    %cst_43 = arith.constant dense<0.000000e+00> : vector<192x4xf32>
    %96 = tpu.matmul %94, %95, %cst_43 {dimension_numbers = #tpu.dot_dimension_numbers<[1], [0], [0], [1], [0, 0, 1, 1], [], []>} : vector<192x64xbf16>, vector<64x4xbf16>, vector<192x4xf32> -> vector<192x4xf32>
    %97 = vector.extract_strided_slice %96 {offsets = [0, 0], sizes = [64, 4], strides = [1, 1]} : vector<192x4xf32> to vector<64x4xf32>
    %cst_44 = arith.constant dense<0.000000e+00> : vector<64x4xf32>
    %98 = tpu.matmul %97, %19, %cst_44 {dimension_numbers = #tpu.dot_dimension_numbers<[1], [0], [0], [1], [0, 0, 1, 1], [], []>} : vector<64x4xf32>, vector<4x4xf32>, vector<64x4xf32> -> vector<64x4xf32>
    %99 = vector.extract_strided_slice %96 {offsets = [64, 0], sizes = [64, 4], strides = [1, 1]} : vector<192x4xf32> to vector<64x4xf32>
    %cst_45 = arith.constant dense<0.000000e+00> : vector<64x4xf32>
    %100 = tpu.matmul %99, %30, %cst_45 {dimension_numbers = #tpu.dot_dimension_numbers<[1], [0], [0], [1], [0, 0, 1, 1], [], []>} : vector<64x4xf32>, vector<4x4xf32>, vector<64x4xf32> -> vector<64x4xf32>
    %101 = arith.addf %98, %100 : vector<64x4xf32>
    %102 = vector.extract_strided_slice %96 {offsets = [128, 0], sizes = [64, 4], strides = [1, 1]} : vector<192x4xf32> to vector<64x4xf32>
    %cst_46 = arith.constant dense<0.000000e+00> : vector<64x4xf32>
    %103 = tpu.matmul %102, %41, %cst_46 {dimension_numbers = #tpu.dot_dimension_numbers<[1], [0], [0], [1], [0, 0, 1, 1], [], []>} : vector<64x4xf32>, vector<4x4xf32>, vector<64x4xf32> -> vector<64x4xf32>
    %104 = arith.addf %101, %103 : vector<64x4xf32>
    %c0_47 = arith.constant 0 : index
    %c0_48 = arith.constant 0 : index
    %105 = vector.load %arg8[%c0_47, %c0_48] : memref<64x1xf32, #tpu.memory_space<vmem>>, vector<64x1xf32>
    %106 = vector.broadcast %105 : vector<64x1xf32> to vector<64x4xf32>
    %107 = arith.mulf %104, %106 : vector<64x4xf32>
    %c0_49 = arith.constant 0 : index
    %c0_50 = arith.constant 0 : index
    %108 = vector.load %arg9[%c0_49, %c0_50] : memref<64x1xf32, #tpu.memory_space<vmem>>, vector<64x1xf32>
    %109 = vector.broadcast %108 : vector<64x1xf32> to vector<64x4xf32>
    %110 = arith.addf %107, %109 : vector<64x4xf32>
    %111 = arith.addf %110, %8 : vector<64x4xf32>
    %cst_51 = arith.constant 0.000000e+00 : f32
    %112 = vector.broadcast %cst_51 : f32 to vector<64x4xf32>
    %113 = arith.maximumf %111, %112 : vector<64x4xf32>
    %114 = arith.truncf %113 : vector<64x4xf32> to vector<64x4xbf16>
    %c0_52 = arith.constant 0 : index
    %c0_53 = arith.constant 0 : index
    %c0_54 = arith.constant 0 : index
    %115 = vector.load %arg10[%c0_52, %c0_53, %c0_54] : memref<1x64x4xbf16, #tpu.memory_space<vmem>>, vector<1x64x4xbf16>
    %116 = vector.shape_cast %115 : vector<1x64x4xbf16> to vector<64x4xbf16>
    %117 = vector.shape_cast %114 : vector<64x4xbf16> to vector<1x64x4xbf16>
    tpu.vector_store %arg10[%c0_52, %c0_53, %c0_54], %117 {strides = array<i32>} : memref<1x64x4xbf16, #tpu.memory_space<vmem>>, vector<1x64x4xbf16>,
    return
  }
  func.func @transform_0(%arg0: i32) -> (i32, i32, i32) {
    %c0_i32 = arith.constant 0 : i32
    %c0_i32_0 = arith.constant 0 : i32
    %c0_i32_1 = arith.constant 0 : i32
    return %arg0, %c0_i32, %c0_i32_0 : i32, i32, i32
  }
  func.func @transform_1(%arg0: i32) -> (i32, i32) {
    %c0_i32 = arith.constant 0 : i32
    %c0_i32_0 = arith.constant 0 : i32
    %c0_i32_1 = arith.constant 0 : i32
    return %c0_i32, %c0_i32_0 : i32, i32
  }
  func.func @transform_2(%arg0: i32) -> (i32, i32) {
    %c0_i32 = arith.constant 0 : i32
    %c0_i32_0 = arith.constant 0 : i32
    %c0_i32_1 = arith.constant 0 : i32
    return %c0_i32, %c0_i32_0 : i32, i32
  }
  func.func @transform_3(%arg0: i32) -> (i32, i32, i32) {
    %c0_i32 = arith.constant 0 : i32
    %c0_i32_0 = arith.constant 0 : i32
    %c0_i32_1 = arith.constant 0 : i32
    %c0_i32_2 = arith.constant 0 : i32
    return %c0_i32, %c0_i32_0, %c0_i32_1 : i32, i32, i32
  }
  func.func @transform_4(%arg0: i32) -> (i32, i32, i32) {
    %c0_i32 = arith.constant 0 : i32
    %c0_i32_0 = arith.constant 0 : i32
    %c0_i32_1 = arith.constant 0 : i32
    %c0_i32_2 = arith.constant 0 : i32
    return %c0_i32, %c0_i32_0, %c0_i32_1 : i32, i32, i32
  }
  func.func @transform_5(%arg0: i32) -> (i32, i32, i32) {
    %c0_i32 = arith.constant 0 : i32
    %c0_i32_0 = arith.constant 0 : i32
    %c0_i32_1 = arith.constant 0 : i32
    %c0_i32_2 = arith.constant 0 : i32
    return %c0_i32, %c0_i32_0, %c0_i32_1 : i32, i32, i32
  }
  func.func @transform_6(%arg0: i32) -> (i32, i32) {
    %c0_i32 = arith.constant 0 : i32
    %c0_i32_0 = arith.constant 0 : i32
    %c0_i32_1 = arith.constant 0 : i32
    return %c0_i32, %c0_i32_0 : i32, i32
  }
  func.func @transform_7(%arg0: i32) -> (i32, i32) {
    %c0_i32 = arith.constant 0 : i32
    %c0_i32_0 = arith.constant 0 : i32
    %c0_i32_1 = arith.constant 0 : i32
    return %c0_i32, %c0_i32_0 : i32, i32
  }
  func.func @transform_8(%arg0: i32) -> (i32, i32) {
    %c0_i32 = arith.constant 0 : i32
    %c0_i32_0 = arith.constant 0 : i32
    %c0_i32_1 = arith.constant 0 : i32
    return %c0_i32, %c0_i32_0 : i32, i32
  }
  func.func @transform_9(%arg0: i32) -> (i32, i32, i32) {
    %c0_i32 = arith.constant 0 : i32
    %c0_i32_0 = arith.constant 0 : i32
    %c0_i32_1 = arith.constant 0 : i32
    return %arg0, %c0_i32, %c0_i32_0 : i32, i32, i32
  }
}

module attributes {stable_mosaic.version = 11 : i64} {
  func.func @_stage_kernel(%arg0: i32, %arg1: memref<1x64x4xbf16, #tpu.memory_space<vmem>>, %arg2: memref<128x64xbf16, #tpu.memory_space<vmem>>, %arg3: memref<32x1xf32, #tpu.memory_space<vmem>>, %arg4: memref<32x1xf32, #tpu.memory_space<vmem>>, %arg5: memref<32x64xbf16, #tpu.memory_space<vmem>>, %arg6: memref<32x1xf32, #tpu.memory_space<vmem>>, %arg7: memref<2x96x32xbf16, #tpu.memory_space<vmem>>, %arg8: memref<2x32x1xf32, #tpu.memory_space<vmem>>, %arg9: memref<2x32x1xf32, #tpu.memory_space<vmem>>, %arg10: memref<96x32xbf16, #tpu.memory_space<vmem>>, %arg11: memref<32x1xf32, #tpu.memory_space<vmem>>, %arg12: memref<32x1xf32, #tpu.memory_space<vmem>>, %arg13: memref<1x32x8xbf16, #tpu.memory_space<vmem>>) attributes {dimension_semantics = [#tpu.dimension_semantics<parallel>], iteration_bounds = array<i64: 2>, scalar_prefetch = 0 : i64, scratch_operands = 0 : i64, tpu.core_type = #tpu.core_type<tc>, window_params = [{transform_indices = @transform_0, window_bounds = array<i64: 1, 64, 4>}, {pipeline_mode = #tpu.pipeline_mode<synchronous>, transform_indices = @transform_1, window_bounds = array<i64: 128, 64>}, {pipeline_mode = #tpu.pipeline_mode<synchronous>, transform_indices = @transform_2, window_bounds = array<i64: 32, 1>}, {pipeline_mode = #tpu.pipeline_mode<synchronous>, transform_indices = @transform_3, window_bounds = array<i64: 32, 1>}, {pipeline_mode = #tpu.pipeline_mode<synchronous>, transform_indices = @transform_4, window_bounds = array<i64: 32, 64>}, {pipeline_mode = #tpu.pipeline_mode<synchronous>, transform_indices = @transform_5, window_bounds = array<i64: 32, 1>}, {pipeline_mode = #tpu.pipeline_mode<synchronous>, transform_indices = @transform_6, window_bounds = array<i64: 2, 96, 32>}, {pipeline_mode = #tpu.pipeline_mode<synchronous>, transform_indices = @transform_7, window_bounds = array<i64: 2, 32, 1>}, {pipeline_mode = #tpu.pipeline_mode<synchronous>, transform_indices = @transform_8, window_bounds = array<i64: 2, 32, 1>}, {pipeline_mode = #tpu.pipeline_mode<synchronous>, transform_indices = @transform_9, window_bounds = array<i64: 96, 32>}, {pipeline_mode = #tpu.pipeline_mode<synchronous>, transform_indices = @transform_10, window_bounds = array<i64: 32, 1>}, {pipeline_mode = #tpu.pipeline_mode<synchronous>, transform_indices = @transform_11, window_bounds = array<i64: 32, 1>}, {transform_indices = @transform_12, window_bounds = array<i64: 1, 32, 8>}]} {
    %c0 = arith.constant 0 : index
    %c0_0 = arith.constant 0 : index
    %c0_1 = arith.constant 0 : index
    %0 = vector.load %arg1[%c0, %c0_0, %c0_1] : memref<1x64x4xbf16, #tpu.memory_space<vmem>>, vector<1x64x4xbf16>
    %1 = vector.shape_cast %0 : vector<1x64x4xbf16> to vector<64x4xbf16>
    %2 = arith.extf %1 : vector<64x4xbf16> to vector<64x4xf32>
    %3 = tpu.iota {dimensions = array<i32: 0>} : vector<4x8xi32>
    %4 = tpu.iota {dimensions = array<i32: 1>} : vector<4x8xi32>
    %c2_i32 = arith.constant 2 : i32
    %5 = vector.broadcast %c2_i32 : i32 to vector<4x8xi32>
    %6 = arith.muli %5, %3 : vector<4x8xi32>
    %c-1_i32 = arith.constant -1 : i32
    %7 = vector.broadcast %c-1_i32 : i32 to vector<4x8xi32>
    %8 = arith.addi %6, %7 : vector<4x8xi32>
    %c1_i32 = arith.constant 1 : i32
    %9 = vector.broadcast %c1_i32 : i32 to vector<4x8xi32>
    %10 = arith.muli %9, %4 : vector<4x8xi32>
    %11 = arith.cmpi eq, %8, %10 : vector<4x8xi32>
    %12 = arith.extui %11 : vector<4x8xi1> to vector<4x8xi32>
    %13 = arith.sitofp %12 : vector<4x8xi32> to vector<4x8xf32>
    %14 = tpu.iota {dimensions = array<i32: 0>} : vector<4x8xi32>
    %15 = tpu.iota {dimensions = array<i32: 1>} : vector<4x8xi32>
    %c2_i32_2 = arith.constant 2 : i32
    %16 = vector.broadcast %c2_i32_2 : i32 to vector<4x8xi32>
    %17 = arith.muli %16, %14 : vector<4x8xi32>
    %c0_i32 = arith.constant 0 : i32
    %18 = vector.broadcast %c0_i32 : i32 to vector<4x8xi32>
    %19 = arith.addi %17, %18 : vector<4x8xi32>
    %c1_i32_3 = arith.constant 1 : i32
    %20 = vector.broadcast %c1_i32_3 : i32 to vector<4x8xi32>
    %21 = arith.muli %20, %15 : vector<4x8xi32>
    %22 = arith.cmpi eq, %19, %21 : vector<4x8xi32>
    %23 = arith.extui %22 : vector<4x8xi1> to vector<4x8xi32>
    %24 = arith.sitofp %23 : vector<4x8xi32> to vector<4x8xf32>
    %25 = tpu.iota {dimensions = array<i32: 0>} : vector<4x8xi32>
    %26 = tpu.iota {dimensions = array<i32: 1>} : vector<4x8xi32>
    %c2_i32_4 = arith.constant 2 : i32
    %27 = vector.broadcast %c2_i32_4 : i32 to vector<4x8xi32>
    %28 = arith.muli %27, %25 : vector<4x8xi32>
    %c1_i32_5 = arith.constant 1 : i32
    %29 = vector.broadcast %c1_i32_5 : i32 to vector<4x8xi32>
    %30 = arith.addi %28, %29 : vector<4x8xi32>
    %c1_i32_6 = arith.constant 1 : i32
    %31 = vector.broadcast %c1_i32_6 : i32 to vector<4x8xi32>
    %32 = arith.muli %31, %26 : vector<4x8xi32>
    %33 = arith.cmpi eq, %30, %32 : vector<4x8xi32>
    %34 = arith.extui %33 : vector<4x8xi1> to vector<4x8xi32>
    %35 = arith.sitofp %34 : vector<4x8xi32> to vector<4x8xf32>
    %36 = tpu.iota {dimensions = array<i32: 0>} : vector<4x8xi32>
    %37 = tpu.iota {dimensions = array<i32: 1>} : vector<4x8xi32>
    %c2_i32_7 = arith.constant 2 : i32
    %38 = vector.broadcast %c2_i32_7 : i32 to vector<4x8xi32>
    %39 = arith.muli %38, %36 : vector<4x8xi32>
    %c2_i32_8 = arith.constant 2 : i32
    %40 = vector.broadcast %c2_i32_8 : i32 to vector<4x8xi32>
    %41 = arith.addi %39, %40 : vector<4x8xi32>
    %c1_i32_9 = arith.constant 1 : i32
    %42 = vector.broadcast %c1_i32_9 : i32 to vector<4x8xi32>
    %43 = arith.muli %42, %37 : vector<4x8xi32>
    %44 = arith.cmpi eq, %41, %43 : vector<4x8xi32>
    %45 = arith.extui %44 : vector<4x8xi1> to vector<4x8xi32>
    %46 = arith.sitofp %45 : vector<4x8xi32> to vector<4x8xf32>
    %c0_10 = arith.constant 0 : index
    %c0_11 = arith.constant 0 : index
    %47 = vector.load %arg2[%c0_10, %c0_11] : memref<128x64xbf16, #tpu.memory_space<vmem>>, vector<128x64xbf16>
    %48 = arith.truncf %2 : vector<64x4xf32> to vector<64x4xbf16>
    %cst = arith.constant dense<0.000000e+00> : vector<128x4xf32>
    %49 = tpu.matmul %47, %48, %cst {dimension_numbers = #tpu.dot_dimension_numbers<[1], [0], [0], [1], [0, 0, 1, 1], [], []>} : vector<128x64xbf16>, vector<64x4xbf16>, vector<128x4xf32> -> vector<128x4xf32>
    %50 = vector.extract_strided_slice %49 {offsets = [0, 0], sizes = [32, 4], strides = [1, 1]} : vector<128x4xf32> to vector<32x4xf32>
    %cst_12 = arith.constant dense<0.000000e+00> : vector<32x8xf32>
    %51 = tpu.matmul %50, %13, %cst_12 {dimension_numbers = #tpu.dot_dimension_numbers<[1], [0], [0], [1], [0, 0, 1, 1], [], []>} : vector<32x4xf32>, vector<4x8xf32>, vector<32x8xf32> -> vector<32x8xf32>
    %52 = vector.extract_strided_slice %49 {offsets = [32, 0], sizes = [32, 4], strides = [1, 1]} : vector<128x4xf32> to vector<32x4xf32>
    %cst_13 = arith.constant dense<0.000000e+00> : vector<32x8xf32>
    %53 = tpu.matmul %52, %24, %cst_13 {dimension_numbers = #tpu.dot_dimension_numbers<[1], [0], [0], [1], [0, 0, 1, 1], [], []>} : vector<32x4xf32>, vector<4x8xf32>, vector<32x8xf32> -> vector<32x8xf32>
    %54 = arith.addf %51, %53 : vector<32x8xf32>
    %55 = vector.extract_strided_slice %49 {offsets = [64, 0], sizes = [32, 4], strides = [1, 1]} : vector<128x4xf32> to vector<32x4xf32>
    %cst_14 = arith.constant dense<0.000000e+00> : vector<32x8xf32>
    %56 = tpu.matmul %55, %35, %cst_14 {dimension_numbers = #tpu.dot_dimension_numbers<[1], [0], [0], [1], [0, 0, 1, 1], [], []>} : vector<32x4xf32>, vector<4x8xf32>, vector<32x8xf32> -> vector<32x8xf32>
    %57 = arith.addf %54, %56 : vector<32x8xf32>
    %58 = vector.extract_strided_slice %49 {offsets = [96, 0], sizes = [32, 4], strides = [1, 1]} : vector<128x4xf32> to vector<32x4xf32>
    %cst_15 = arith.constant dense<0.000000e+00> : vector<32x8xf32>
    %59 = tpu.matmul %58, %46, %cst_15 {dimension_numbers = #tpu.dot_dimension_numbers<[1], [0], [0], [1], [0, 0, 1, 1], [], []>} : vector<32x4xf32>, vector<4x8xf32>, vector<32x8xf32> -> vector<32x8xf32>
    %60 = arith.addf %57, %59 : vector<32x8xf32>
    %c0_16 = arith.constant 0 : index
    %c0_17 = arith.constant 0 : index
    %61 = vector.load %arg3[%c0_16, %c0_17] : memref<32x1xf32, #tpu.memory_space<vmem>>, vector<32x1xf32>
    %62 = vector.broadcast %61 : vector<32x1xf32> to vector<32x8xf32>
    %63 = arith.mulf %60, %62 : vector<32x8xf32>
    %c0_18 = arith.constant 0 : index
    %c0_19 = arith.constant 0 : index
    %64 = vector.load %arg4[%c0_18, %c0_19] : memref<32x1xf32, #tpu.memory_space<vmem>>, vector<32x1xf32>
    %65 = vector.broadcast %64 : vector<32x1xf32> to vector<32x8xf32>
    %66 = arith.addf %63, %65 : vector<32x8xf32>
    %67 = tpu.iota {dimensions = array<i32: 0>} : vector<4x8xi32>
    %68 = tpu.iota {dimensions = array<i32: 1>} : vector<4x8xi32>
    %c2_i32_20 = arith.constant 2 : i32
    %69 = vector.broadcast %c2_i32_20 : i32 to vector<4x8xi32>
    %70 = arith.muli %69, %67 : vector<4x8xi32>
    %c0_i32_21 = arith.constant 0 : i32
    %71 = vector.broadcast %c0_i32_21 : i32 to vector<4x8xi32>
    %72 = arith.addi %70, %71 : vector<4x8xi32>
    %c1_i32_22 = arith.constant 1 : i32
    %73 = vector.broadcast %c1_i32_22 : i32 to vector<4x8xi32>
    %74 = arith.muli %73, %68 : vector<4x8xi32>
    %75 = arith.cmpi eq, %72, %74 : vector<4x8xi32>
    %76 = arith.extui %75 : vector<4x8xi1> to vector<4x8xi32>
    %77 = arith.sitofp %76 : vector<4x8xi32> to vector<4x8xf32>
    %78 = tpu.iota {dimensions = array<i32: 0>} : vector<4x8xi32>
    %79 = tpu.iota {dimensions = array<i32: 1>} : vector<4x8xi32>
    %c2_i32_23 = arith.constant 2 : i32
    %80 = vector.broadcast %c2_i32_23 : i32 to vector<4x8xi32>
    %81 = arith.muli %80, %78 : vector<4x8xi32>
    %c1_i32_24 = arith.constant 1 : i32
    %82 = vector.broadcast %c1_i32_24 : i32 to vector<4x8xi32>
    %83 = arith.addi %81, %82 : vector<4x8xi32>
    %c1_i32_25 = arith.constant 1 : i32
    %84 = vector.broadcast %c1_i32_25 : i32 to vector<4x8xi32>
    %85 = arith.muli %84, %79 : vector<4x8xi32>
    %86 = arith.cmpi eq, %83, %85 : vector<4x8xi32>
    %87 = arith.extui %86 : vector<4x8xi1> to vector<4x8xi32>
    %88 = arith.sitofp %87 : vector<4x8xi32> to vector<4x8xf32>
    %89 = arith.addf %77, %88 : vector<4x8xf32>
    %c0_26 = arith.constant 0 : index
    %c0_27 = arith.constant 0 : index
    %90 = vector.load %arg5[%c0_26, %c0_27] : memref<32x64xbf16, #tpu.memory_space<vmem>>, vector<32x64xbf16>
    %91 = arith.truncf %2 : vector<64x4xf32> to vector<64x4xbf16>
    %cst_28 = arith.constant dense<0.000000e+00> : vector<32x4xf32>
    %92 = tpu.matmul %90, %91, %cst_28 {dimension_numbers = #tpu.dot_dimension_numbers<[1], [0], [0], [1], [0, 0, 1, 1], [], []>} : vector<32x64xbf16>, vector<64x4xbf16>, vector<32x4xf32> -> vector<32x4xf32>
    %c0_29 = arith.constant 0 : index
    %c0_30 = arith.constant 0 : index
    %93 = vector.load %arg6[%c0_29, %c0_30] : memref<32x1xf32, #tpu.memory_space<vmem>>, vector<32x1xf32>
    %94 = vector.broadcast %93 : vector<32x1xf32> to vector<32x4xf32>
    %95 = arith.addf %92, %94 : vector<32x4xf32>
    %cst_31 = arith.constant dense<0.000000e+00> : vector<32x8xf32>
    %96 = tpu.matmul %95, %89, %cst_31 {dimension_numbers = #tpu.dot_dimension_numbers<[1], [0], [0], [1], [0, 0, 1, 1], [], []>} : vector<32x4xf32>, vector<4x8xf32>, vector<32x8xf32> -> vector<32x8xf32>
    %97 = arith.addf %66, %96 : vector<32x8xf32>
    %cst_32 = arith.constant 0.000000e+00 : f32
    %98 = vector.broadcast %cst_32 : f32 to vector<32x8xf32>
    %99 = arith.cmpf oge, %97, %98 : vector<32x8xf32>
    %cst_33 = arith.constant 2.000000e-01 : f32
    %100 = vector.broadcast %cst_33 : f32 to vector<32x8xf32>
    %101 = arith.mulf %100, %97 : vector<32x8xf32>
    %102 = arith.select %99, %97, %101 : vector<32x8xi1>, vector<32x8xf32>
    %103 = tpu.iota {dimensions = array<i32: 0>} : vector<8x8xi32>
    %104 = tpu.iota {dimensions = array<i32: 1>} : vector<8x8xi32>
    %c1_i32_34 = arith.constant 1 : i32
    %105 = vector.broadcast %c1_i32_34 : i32 to vector<8x8xi32>
    %106 = arith.muli %105, %103 : vector<8x8xi32>
    %c1_i32_35 = arith.constant 1 : i32
    %107 = vector.broadcast %c1_i32_35 : i32 to vector<8x8xi32>
    %108 = arith.addi %106, %107 : vector<8x8xi32>
    %c1_i32_36 = arith.constant 1 : i32
    %109 = vector.broadcast %c1_i32_36 : i32 to vector<8x8xi32>
    %110 = arith.muli %109, %104 : vector<8x8xi32>
    %111 = arith.cmpi eq, %108, %110 : vector<8x8xi32>
    %112 = arith.extui %111 : vector<8x8xi1> to vector<8x8xi32>
    %113 = arith.sitofp %112 : vector<8x8xi32> to vector<8x8xf32>
    %114 = tpu.iota {dimensions = array<i32: 0>} : vector<8x8xi32>
    %115 = tpu.iota {dimensions = array<i32: 1>} : vector<8x8xi32>
    %c1_i32_37 = arith.constant 1 : i32
    %116 = vector.broadcast %c1_i32_37 : i32 to vector<8x8xi32>
    %117 = arith.muli %116, %114 : vector<8x8xi32>
    %c0_i32_38 = arith.constant 0 : i32
    %118 = vector.broadcast %c0_i32_38 : i32 to vector<8x8xi32>
    %119 = arith.addi %117, %118 : vector<8x8xi32>
    %c1_i32_39 = arith.constant 1 : i32
    %120 = vector.broadcast %c1_i32_39 : i32 to vector<8x8xi32>
    %121 = arith.muli %120, %115 : vector<8x8xi32>
    %122 = arith.cmpi eq, %119, %121 : vector<8x8xi32>
    %123 = arith.extui %122 : vector<8x8xi1> to vector<8x8xi32>
    %124 = arith.sitofp %123 : vector<8x8xi32> to vector<8x8xf32>
    %125 = tpu.iota {dimensions = array<i32: 0>} : vector<8x8xi32>
    %126 = tpu.iota {dimensions = array<i32: 1>} : vector<8x8xi32>
    %c1_i32_40 = arith.constant 1 : i32
    %127 = vector.broadcast %c1_i32_40 : i32 to vector<8x8xi32>
    %128 = arith.muli %127, %125 : vector<8x8xi32>
    %c-1_i32_41 = arith.constant -1 : i32
    %129 = vector.broadcast %c-1_i32_41 : i32 to vector<8x8xi32>
    %130 = arith.addi %128, %129 : vector<8x8xi32>
    %c1_i32_42 = arith.constant 1 : i32
    %131 = vector.broadcast %c1_i32_42 : i32 to vector<8x8xi32>
    %132 = arith.muli %131, %126 : vector<8x8xi32>
    %133 = arith.cmpi eq, %130, %132 : vector<8x8xi32>
    %134 = arith.extui %133 : vector<8x8xi1> to vector<8x8xi32>
    %135 = arith.sitofp %134 : vector<8x8xi32> to vector<8x8xf32>
    %c0_43 = arith.constant 0 : index
    %c0_44 = arith.constant 0 : index
    %c0_45 = arith.constant 0 : index
    %136 = vector.load %arg7[%c0_43, %c0_44, %c0_45] : memref<2x96x32xbf16, #tpu.memory_space<vmem>>, vector<1x96x32xbf16>
    %137 = vector.shape_cast %136 : vector<1x96x32xbf16> to vector<96x32xbf16>
    %138 = arith.truncf %102 : vector<32x8xf32> to vector<32x8xbf16>
    %cst_46 = arith.constant dense<0.000000e+00> : vector<96x8xf32>
    %139 = tpu.matmul %137, %138, %cst_46 {dimension_numbers = #tpu.dot_dimension_numbers<[1], [0], [0], [1], [0, 0, 1, 1], [], []>} : vector<96x32xbf16>, vector<32x8xbf16>, vector<96x8xf32> -> vector<96x8xf32>
    %140 = vector.extract_strided_slice %139 {offsets = [0, 0], sizes = [32, 8], strides = [1, 1]} : vector<96x8xf32> to vector<32x8xf32>
    %cst_47 = arith.constant dense<0.000000e+00> : vector<32x8xf32>
    %141 = tpu.matmul %140, %113, %cst_47 {dimension_numbers = #tpu.dot_dimension_numbers<[1], [0], [0], [1], [0, 0, 1, 1], [], []>} : vector<32x8xf32>, vector<8x8xf32>, vector<32x8xf32> -> vector<32x8xf32>
    %142 = vector.extract_strided_slice %139 {offsets = [32, 0], sizes = [32, 8], strides = [1, 1]} : vector<96x8xf32> to vector<32x8xf32>
    %cst_48 = arith.constant dense<0.000000e+00> : vector<32x8xf32>
    %143 = tpu.matmul %142, %124, %cst_48 {dimension_numbers = #tpu.dot_dimension_numbers<[1], [0], [0], [1], [0, 0, 1, 1], [], []>} : vector<32x8xf32>, vector<8x8xf32>, vector<32x8xf32> -> vector<32x8xf32>
    %144 = arith.addf %141, %143 : vector<32x8xf32>
    %145 = vector.extract_strided_slice %139 {offsets = [64, 0], sizes = [32, 8], strides = [1, 1]} : vector<96x8xf32> to vector<32x8xf32>
    %cst_49 = arith.constant dense<0.000000e+00> : vector<32x8xf32>
    %146 = tpu.matmul %145, %135, %cst_49 {dimension_numbers = #tpu.dot_dimension_numbers<[1], [0], [0], [1], [0, 0, 1, 1], [], []>} : vector<32x8xf32>, vector<8x8xf32>, vector<32x8xf32> -> vector<32x8xf32>
    %147 = arith.addf %144, %146 : vector<32x8xf32>
    %c0_50 = arith.constant 0 : index
    %c0_51 = arith.constant 0 : index
    %c0_52 = arith.constant 0 : index
    %148 = vector.load %arg8[%c0_50, %c0_51, %c0_52] : memref<2x32x1xf32, #tpu.memory_space<vmem>>, vector<1x32x1xf32>
    %149 = vector.shape_cast %148 : vector<1x32x1xf32> to vector<32x1xf32>
    %150 = vector.broadcast %149 : vector<32x1xf32> to vector<32x8xf32>
    %151 = arith.mulf %147, %150 : vector<32x8xf32>
    %c0_53 = arith.constant 0 : index
    %c0_54 = arith.constant 0 : index
    %c0_55 = arith.constant 0 : index
    %152 = vector.load %arg9[%c0_53, %c0_54, %c0_55] : memref<2x32x1xf32, #tpu.memory_space<vmem>>, vector<1x32x1xf32>
    %153 = vector.shape_cast %152 : vector<1x32x1xf32> to vector<32x1xf32>
    %154 = vector.broadcast %153 : vector<32x1xf32> to vector<32x8xf32>
    %155 = arith.addf %151, %154 : vector<32x8xf32>
    %156 = arith.addf %155, %102 : vector<32x8xf32>
    %cst_56 = arith.constant 0.000000e+00 : f32
    %157 = vector.broadcast %cst_56 : f32 to vector<32x8xf32>
    %158 = arith.cmpf oge, %156, %157 : vector<32x8xf32>
    %cst_57 = arith.constant 2.000000e-01 : f32
    %159 = vector.broadcast %cst_57 : f32 to vector<32x8xf32>
    %160 = arith.mulf %159, %156 : vector<32x8xf32>
    %161 = arith.select %158, %156, %160 : vector<32x8xi1>, vector<32x8xf32>
    %c1 = arith.constant 1 : index
    %c0_58 = arith.constant 0 : index
    %c0_59 = arith.constant 0 : index
    %162 = vector.load %arg7[%c1, %c0_58, %c0_59] : memref<2x96x32xbf16, #tpu.memory_space<vmem>>, vector<1x96x32xbf16>
    %163 = vector.shape_cast %162 : vector<1x96x32xbf16> to vector<96x32xbf16>
    %164 = arith.truncf %161 : vector<32x8xf32> to vector<32x8xbf16>
    %cst_60 = arith.constant dense<0.000000e+00> : vector<96x8xf32>
    %165 = tpu.matmul %163, %164, %cst_60 {dimension_numbers = #tpu.dot_dimension_numbers<[1], [0], [0], [1], [0, 0, 1, 1], [], []>} : vector<96x32xbf16>, vector<32x8xbf16>, vector<96x8xf32> -> vector<96x8xf32>
    %166 = vector.extract_strided_slice %165 {offsets = [0, 0], sizes = [32, 8], strides = [1, 1]} : vector<96x8xf32> to vector<32x8xf32>
    %cst_61 = arith.constant dense<0.000000e+00> : vector<32x8xf32>
    %167 = tpu.matmul %166, %113, %cst_61 {dimension_numbers = #tpu.dot_dimension_numbers<[1], [0], [0], [1], [0, 0, 1, 1], [], []>} : vector<32x8xf32>, vector<8x8xf32>, vector<32x8xf32> -> vector<32x8xf32>
    %168 = vector.extract_strided_slice %165 {offsets = [32, 0], sizes = [32, 8], strides = [1, 1]} : vector<96x8xf32> to vector<32x8xf32>
    %cst_62 = arith.constant dense<0.000000e+00> : vector<32x8xf32>
    %169 = tpu.matmul %168, %124, %cst_62 {dimension_numbers = #tpu.dot_dimension_numbers<[1], [0], [0], [1], [0, 0, 1, 1], [], []>} : vector<32x8xf32>, vector<8x8xf32>, vector<32x8xf32> -> vector<32x8xf32>
    %170 = arith.addf %167, %169 : vector<32x8xf32>
    %171 = vector.extract_strided_slice %165 {offsets = [64, 0], sizes = [32, 8], strides = [1, 1]} : vector<96x8xf32> to vector<32x8xf32>
    %cst_63 = arith.constant dense<0.000000e+00> : vector<32x8xf32>
    %172 = tpu.matmul %171, %135, %cst_63 {dimension_numbers = #tpu.dot_dimension_numbers<[1], [0], [0], [1], [0, 0, 1, 1], [], []>} : vector<32x8xf32>, vector<8x8xf32>, vector<32x8xf32> -> vector<32x8xf32>
    %173 = arith.addf %170, %172 : vector<32x8xf32>
    %c1_64 = arith.constant 1 : index
    %c0_65 = arith.constant 0 : index
    %c0_66 = arith.constant 0 : index
    %174 = vector.load %arg8[%c1_64, %c0_65, %c0_66] : memref<2x32x1xf32, #tpu.memory_space<vmem>>, vector<1x32x1xf32>
    %175 = vector.shape_cast %174 : vector<1x32x1xf32> to vector<32x1xf32>
    %176 = vector.broadcast %175 : vector<32x1xf32> to vector<32x8xf32>
    %177 = arith.mulf %173, %176 : vector<32x8xf32>
    %c1_67 = arith.constant 1 : index
    %c0_68 = arith.constant 0 : index
    %c0_69 = arith.constant 0 : index
    %178 = vector.load %arg9[%c1_67, %c0_68, %c0_69] : memref<2x32x1xf32, #tpu.memory_space<vmem>>, vector<1x32x1xf32>
    %179 = vector.shape_cast %178 : vector<1x32x1xf32> to vector<32x1xf32>
    %180 = vector.broadcast %179 : vector<32x1xf32> to vector<32x8xf32>
    %181 = arith.addf %177, %180 : vector<32x8xf32>
    %182 = arith.addf %181, %161 : vector<32x8xf32>
    %cst_70 = arith.constant 0.000000e+00 : f32
    %183 = vector.broadcast %cst_70 : f32 to vector<32x8xf32>
    %184 = arith.cmpf oge, %182, %183 : vector<32x8xf32>
    %cst_71 = arith.constant 2.000000e-01 : f32
    %185 = vector.broadcast %cst_71 : f32 to vector<32x8xf32>
    %186 = arith.mulf %185, %182 : vector<32x8xf32>
    %187 = arith.select %184, %182, %186 : vector<32x8xi1>, vector<32x8xf32>
    %c0_72 = arith.constant 0 : index
    %c0_73 = arith.constant 0 : index
    %188 = vector.load %arg10[%c0_72, %c0_73] : memref<96x32xbf16, #tpu.memory_space<vmem>>, vector<96x32xbf16>
    %189 = arith.truncf %187 : vector<32x8xf32> to vector<32x8xbf16>
    %cst_74 = arith.constant dense<0.000000e+00> : vector<96x8xf32>
    %190 = tpu.matmul %188, %189, %cst_74 {dimension_numbers = #tpu.dot_dimension_numbers<[1], [0], [0], [1], [0, 0, 1, 1], [], []>} : vector<96x32xbf16>, vector<32x8xbf16>, vector<96x8xf32> -> vector<96x8xf32>
    %191 = vector.extract_strided_slice %190 {offsets = [0, 0], sizes = [32, 8], strides = [1, 1]} : vector<96x8xf32> to vector<32x8xf32>
    %cst_75 = arith.constant dense<0.000000e+00> : vector<32x8xf32>
    %192 = tpu.matmul %191, %113, %cst_75 {dimension_numbers = #tpu.dot_dimension_numbers<[1], [0], [0], [1], [0, 0, 1, 1], [], []>} : vector<32x8xf32>, vector<8x8xf32>, vector<32x8xf32> -> vector<32x8xf32>
    %193 = vector.extract_strided_slice %190 {offsets = [32, 0], sizes = [32, 8], strides = [1, 1]} : vector<96x8xf32> to vector<32x8xf32>
    %cst_76 = arith.constant dense<0.000000e+00> : vector<32x8xf32>
    %194 = tpu.matmul %193, %124, %cst_76 {dimension_numbers = #tpu.dot_dimension_numbers<[1], [0], [0], [1], [0, 0, 1, 1], [], []>} : vector<32x8xf32>, vector<8x8xf32>, vector<32x8xf32> -> vector<32x8xf32>
    %195 = arith.addf %192, %194 : vector<32x8xf32>
    %196 = vector.extract_strided_slice %190 {offsets = [64, 0], sizes = [32, 8], strides = [1, 1]} : vector<96x8xf32> to vector<32x8xf32>
    %cst_77 = arith.constant dense<0.000000e+00> : vector<32x8xf32>
    %197 = tpu.matmul %196, %135, %cst_77 {dimension_numbers = #tpu.dot_dimension_numbers<[1], [0], [0], [1], [0, 0, 1, 1], [], []>} : vector<32x8xf32>, vector<8x8xf32>, vector<32x8xf32> -> vector<32x8xf32>
    %198 = arith.addf %195, %197 : vector<32x8xf32>
    %c0_78 = arith.constant 0 : index
    %c0_79 = arith.constant 0 : index
    %199 = vector.load %arg11[%c0_78, %c0_79] : memref<32x1xf32, #tpu.memory_space<vmem>>, vector<32x1xf32>
    %200 = vector.broadcast %199 : vector<32x1xf32> to vector<32x8xf32>
    %201 = arith.mulf %198, %200 : vector<32x8xf32>
    %c0_80 = arith.constant 0 : index
    %c0_81 = arith.constant 0 : index
    %202 = vector.load %arg12[%c0_80, %c0_81] : memref<32x1xf32, #tpu.memory_space<vmem>>, vector<32x1xf32>
    %203 = vector.broadcast %202 : vector<32x1xf32> to vector<32x8xf32>
    %204 = arith.addf %201, %203 : vector<32x8xf32>
    %205 = arith.addf %204, %102 : vector<32x8xf32>
    %cst_82 = arith.constant 0.000000e+00 : f32
    %206 = vector.broadcast %cst_82 : f32 to vector<32x8xf32>
    %207 = arith.maximumf %205, %206 : vector<32x8xf32>
    %208 = arith.truncf %207 : vector<32x8xf32> to vector<32x8xbf16>
    %c0_83 = arith.constant 0 : index
    %c0_84 = arith.constant 0 : index
    %c0_85 = arith.constant 0 : index
    %209 = vector.load %arg13[%c0_83, %c0_84, %c0_85] : memref<1x32x8xbf16, #tpu.memory_space<vmem>>, vector<1x32x8xbf16>
    %210 = vector.shape_cast %209 : vector<1x32x8xbf16> to vector<32x8xbf16>
    %211 = vector.shape_cast %208 : vector<32x8xbf16> to vector<1x32x8xbf16>
    tpu.vector_store %arg13[%c0_83, %c0_84, %c0_85], %211 {strides = array<i32>} : memref<1x32x8xbf16, #tpu.memory_space<vmem>>, vector<1x32x8xbf16>,
    return
  }
  func.func @transform_0(%arg0: i32) -> (i32, i32, i32) {
    %c0_i32 = arith.constant 0 : i32
    %c0_i32_0 = arith.constant 0 : i32
    %c0_i32_1 = arith.constant 0 : i32
    return %arg0, %c0_i32, %c0_i32_0 : i32, i32, i32
  }
  func.func @transform_1(%arg0: i32) -> (i32, i32) {
    %c0_i32 = arith.constant 0 : i32
    %c0_i32_0 = arith.constant 0 : i32
    %c0_i32_1 = arith.constant 0 : i32
    return %c0_i32, %c0_i32_0 : i32, i32
  }
  func.func @transform_2(%arg0: i32) -> (i32, i32) {
    %c0_i32 = arith.constant 0 : i32
    %c0_i32_0 = arith.constant 0 : i32
    %c0_i32_1 = arith.constant 0 : i32
    return %c0_i32, %c0_i32_0 : i32, i32
  }
  func.func @transform_3(%arg0: i32) -> (i32, i32) {
    %c0_i32 = arith.constant 0 : i32
    %c0_i32_0 = arith.constant 0 : i32
    %c0_i32_1 = arith.constant 0 : i32
    return %c0_i32, %c0_i32_0 : i32, i32
  }
  func.func @transform_4(%arg0: i32) -> (i32, i32) {
    %c0_i32 = arith.constant 0 : i32
    %c0_i32_0 = arith.constant 0 : i32
    %c0_i32_1 = arith.constant 0 : i32
    return %c0_i32, %c0_i32_0 : i32, i32
  }
  func.func @transform_5(%arg0: i32) -> (i32, i32) {
    %c0_i32 = arith.constant 0 : i32
    %c0_i32_0 = arith.constant 0 : i32
    %c0_i32_1 = arith.constant 0 : i32
    return %c0_i32, %c0_i32_0 : i32, i32
  }
  func.func @transform_6(%arg0: i32) -> (i32, i32, i32) {
    %c0_i32 = arith.constant 0 : i32
    %c0_i32_0 = arith.constant 0 : i32
    %c0_i32_1 = arith.constant 0 : i32
    %c0_i32_2 = arith.constant 0 : i32
    return %c0_i32, %c0_i32_0, %c0_i32_1 : i32, i32, i32
  }
  func.func @transform_7(%arg0: i32) -> (i32, i32, i32) {
    %c0_i32 = arith.constant 0 : i32
    %c0_i32_0 = arith.constant 0 : i32
    %c0_i32_1 = arith.constant 0 : i32
    %c0_i32_2 = arith.constant 0 : i32
    return %c0_i32, %c0_i32_0, %c0_i32_1 : i32, i32, i32
  }
  func.func @transform_8(%arg0: i32) -> (i32, i32, i32) {
    %c0_i32 = arith.constant 0 : i32
    %c0_i32_0 = arith.constant 0 : i32
    %c0_i32_1 = arith.constant 0 : i32
    %c0_i32_2 = arith.constant 0 : i32
    return %c0_i32, %c0_i32_0, %c0_i32_1 : i32, i32, i32
  }
  func.func @transform_9(%arg0: i32) -> (i32, i32) {
    %c0_i32 = arith.constant 0 : i32
    %c0_i32_0 = arith.constant 0 : i32
    %c0_i32_1 = arith.constant 0 : i32
    return %c0_i32, %c0_i32_0 : i32, i32
  }
  func.func @transform_10(%arg0: i32) -> (i32, i32) {
    %c0_i32 = arith.constant 0 : i32
    %c0_i32_0 = arith.constant 0 : i32
    %c0_i32_1 = arith.constant 0 : i32
    return %c0_i32, %c0_i32_0 : i32, i32
  }
  func.func @transform_11(%arg0: i32) -> (i32, i32) {
    %c0_i32 = arith.constant 0 : i32
    %c0_i32_0 = arith.constant 0 : i32
    %c0_i32_1 = arith.constant 0 : i32
    return %c0_i32, %c0_i32_0 : i32, i32
  }
  func.func @transform_12(%arg0: i32) -> (i32, i32, i32) {
    %c0_i32 = arith.constant 0 : i32
    %c0_i32_0 = arith.constant 0 : i32
    %c0_i32_1 = arith.constant 0 : i32
    return %arg0, %c0_i32, %c0_i32_0 : i32, i32, i32
  }
}

module attributes {stable_mosaic.version = 11 : i64} {
  func.func @_stage_kernel(%arg0: i32, %arg1: memref<1x32x8xbf16, #tpu.memory_space<vmem>>, %arg2: memref<64x32xbf16, #tpu.memory_space<vmem>>, %arg3: memref<16x1xf32, #tpu.memory_space<vmem>>, %arg4: memref<16x1xf32, #tpu.memory_space<vmem>>, %arg5: memref<16x32xbf16, #tpu.memory_space<vmem>>, %arg6: memref<16x1xf32, #tpu.memory_space<vmem>>, %arg7: memref<2x48x16xbf16, #tpu.memory_space<vmem>>, %arg8: memref<2x16x1xf32, #tpu.memory_space<vmem>>, %arg9: memref<2x16x1xf32, #tpu.memory_space<vmem>>, %arg10: memref<48x16xbf16, #tpu.memory_space<vmem>>, %arg11: memref<16x1xf32, #tpu.memory_space<vmem>>, %arg12: memref<16x1xf32, #tpu.memory_space<vmem>>, %arg13: memref<6x16xbf16, #tpu.memory_space<vmem>>, %arg14: memref<6x1xf32, #tpu.memory_space<vmem>>, %arg15: memref<1x6x16xf32, #tpu.memory_space<vmem>>) attributes {dimension_semantics = [#tpu.dimension_semantics<parallel>], iteration_bounds = array<i64: 2>, scalar_prefetch = 0 : i64, scratch_operands = 0 : i64, tpu.core_type = #tpu.core_type<tc>, window_params = [{transform_indices = @transform_0, window_bounds = array<i64: 1, 32, 8>}, {pipeline_mode = #tpu.pipeline_mode<synchronous>, transform_indices = @transform_1, window_bounds = array<i64: 64, 32>}, {pipeline_mode = #tpu.pipeline_mode<synchronous>, transform_indices = @transform_2, window_bounds = array<i64: 16, 1>}, {pipeline_mode = #tpu.pipeline_mode<synchronous>, transform_indices = @transform_3, window_bounds = array<i64: 16, 1>}, {pipeline_mode = #tpu.pipeline_mode<synchronous>, transform_indices = @transform_4, window_bounds = array<i64: 16, 32>}, {pipeline_mode = #tpu.pipeline_mode<synchronous>, transform_indices = @transform_5, window_bounds = array<i64: 16, 1>}, {pipeline_mode = #tpu.pipeline_mode<synchronous>, transform_indices = @transform_6, window_bounds = array<i64: 2, 48, 16>}, {pipeline_mode = #tpu.pipeline_mode<synchronous>, transform_indices = @transform_7, window_bounds = array<i64: 2, 16, 1>}, {pipeline_mode = #tpu.pipeline_mode<synchronous>, transform_indices = @transform_8, window_bounds = array<i64: 2, 16, 1>}, {pipeline_mode = #tpu.pipeline_mode<synchronous>, transform_indices = @transform_9, window_bounds = array<i64: 48, 16>}, {pipeline_mode = #tpu.pipeline_mode<synchronous>, transform_indices = @transform_10, window_bounds = array<i64: 16, 1>}, {pipeline_mode = #tpu.pipeline_mode<synchronous>, transform_indices = @transform_11, window_bounds = array<i64: 16, 1>}, {pipeline_mode = #tpu.pipeline_mode<synchronous>, transform_indices = @transform_12, window_bounds = array<i64: 6, 16>}, {pipeline_mode = #tpu.pipeline_mode<synchronous>, transform_indices = @transform_13, window_bounds = array<i64: 6, 1>}, {transform_indices = @transform_14, window_bounds = array<i64: 1, 6, 16>}]} {
    %c0 = arith.constant 0 : index
    %c0_0 = arith.constant 0 : index
    %c0_1 = arith.constant 0 : index
    %0 = vector.load %arg1[%c0, %c0_0, %c0_1] : memref<1x32x8xbf16, #tpu.memory_space<vmem>>, vector<1x32x8xbf16>
    %1 = vector.shape_cast %0 : vector<1x32x8xbf16> to vector<32x8xbf16>
    %2 = arith.extf %1 : vector<32x8xbf16> to vector<32x8xf32>
    %3 = tpu.iota {dimensions = array<i32: 0>} : vector<8x16xi32>
    %4 = tpu.iota {dimensions = array<i32: 1>} : vector<8x16xi32>
    %c2_i32 = arith.constant 2 : i32
    %5 = vector.broadcast %c2_i32 : i32 to vector<8x16xi32>
    %6 = arith.muli %5, %3 : vector<8x16xi32>
    %c-1_i32 = arith.constant -1 : i32
    %7 = vector.broadcast %c-1_i32 : i32 to vector<8x16xi32>
    %8 = arith.addi %6, %7 : vector<8x16xi32>
    %c1_i32 = arith.constant 1 : i32
    %9 = vector.broadcast %c1_i32 : i32 to vector<8x16xi32>
    %10 = arith.muli %9, %4 : vector<8x16xi32>
    %11 = arith.cmpi eq, %8, %10 : vector<8x16xi32>
    %12 = arith.extui %11 : vector<8x16xi1> to vector<8x16xi32>
    %13 = arith.sitofp %12 : vector<8x16xi32> to vector<8x16xf32>
    %14 = tpu.iota {dimensions = array<i32: 0>} : vector<8x16xi32>
    %15 = tpu.iota {dimensions = array<i32: 1>} : vector<8x16xi32>
    %c2_i32_2 = arith.constant 2 : i32
    %16 = vector.broadcast %c2_i32_2 : i32 to vector<8x16xi32>
    %17 = arith.muli %16, %14 : vector<8x16xi32>
    %c0_i32 = arith.constant 0 : i32
    %18 = vector.broadcast %c0_i32 : i32 to vector<8x16xi32>
    %19 = arith.addi %17, %18 : vector<8x16xi32>
    %c1_i32_3 = arith.constant 1 : i32
    %20 = vector.broadcast %c1_i32_3 : i32 to vector<8x16xi32>
    %21 = arith.muli %20, %15 : vector<8x16xi32>
    %22 = arith.cmpi eq, %19, %21 : vector<8x16xi32>
    %23 = arith.extui %22 : vector<8x16xi1> to vector<8x16xi32>
    %24 = arith.sitofp %23 : vector<8x16xi32> to vector<8x16xf32>
    %25 = tpu.iota {dimensions = array<i32: 0>} : vector<8x16xi32>
    %26 = tpu.iota {dimensions = array<i32: 1>} : vector<8x16xi32>
    %c2_i32_4 = arith.constant 2 : i32
    %27 = vector.broadcast %c2_i32_4 : i32 to vector<8x16xi32>
    %28 = arith.muli %27, %25 : vector<8x16xi32>
    %c1_i32_5 = arith.constant 1 : i32
    %29 = vector.broadcast %c1_i32_5 : i32 to vector<8x16xi32>
    %30 = arith.addi %28, %29 : vector<8x16xi32>
    %c1_i32_6 = arith.constant 1 : i32
    %31 = vector.broadcast %c1_i32_6 : i32 to vector<8x16xi32>
    %32 = arith.muli %31, %26 : vector<8x16xi32>
    %33 = arith.cmpi eq, %30, %32 : vector<8x16xi32>
    %34 = arith.extui %33 : vector<8x16xi1> to vector<8x16xi32>
    %35 = arith.sitofp %34 : vector<8x16xi32> to vector<8x16xf32>
    %36 = tpu.iota {dimensions = array<i32: 0>} : vector<8x16xi32>
    %37 = tpu.iota {dimensions = array<i32: 1>} : vector<8x16xi32>
    %c2_i32_7 = arith.constant 2 : i32
    %38 = vector.broadcast %c2_i32_7 : i32 to vector<8x16xi32>
    %39 = arith.muli %38, %36 : vector<8x16xi32>
    %c2_i32_8 = arith.constant 2 : i32
    %40 = vector.broadcast %c2_i32_8 : i32 to vector<8x16xi32>
    %41 = arith.addi %39, %40 : vector<8x16xi32>
    %c1_i32_9 = arith.constant 1 : i32
    %42 = vector.broadcast %c1_i32_9 : i32 to vector<8x16xi32>
    %43 = arith.muli %42, %37 : vector<8x16xi32>
    %44 = arith.cmpi eq, %41, %43 : vector<8x16xi32>
    %45 = arith.extui %44 : vector<8x16xi1> to vector<8x16xi32>
    %46 = arith.sitofp %45 : vector<8x16xi32> to vector<8x16xf32>
    %c0_10 = arith.constant 0 : index
    %c0_11 = arith.constant 0 : index
    %47 = vector.load %arg2[%c0_10, %c0_11] : memref<64x32xbf16, #tpu.memory_space<vmem>>, vector<64x32xbf16>
    %48 = arith.truncf %2 : vector<32x8xf32> to vector<32x8xbf16>
    %cst = arith.constant dense<0.000000e+00> : vector<64x8xf32>
    %49 = tpu.matmul %47, %48, %cst {dimension_numbers = #tpu.dot_dimension_numbers<[1], [0], [0], [1], [0, 0, 1, 1], [], []>} : vector<64x32xbf16>, vector<32x8xbf16>, vector<64x8xf32> -> vector<64x8xf32>
    %50 = vector.extract_strided_slice %49 {offsets = [0, 0], sizes = [16, 8], strides = [1, 1]} : vector<64x8xf32> to vector<16x8xf32>
    %cst_12 = arith.constant dense<0.000000e+00> : vector<16x16xf32>
    %51 = tpu.matmul %50, %13, %cst_12 {dimension_numbers = #tpu.dot_dimension_numbers<[1], [0], [0], [1], [0, 0, 1, 1], [], []>} : vector<16x8xf32>, vector<8x16xf32>, vector<16x16xf32> -> vector<16x16xf32>
    %52 = vector.extract_strided_slice %49 {offsets = [16, 0], sizes = [16, 8], strides = [1, 1]} : vector<64x8xf32> to vector<16x8xf32>
    %cst_13 = arith.constant dense<0.000000e+00> : vector<16x16xf32>
    %53 = tpu.matmul %52, %24, %cst_13 {dimension_numbers = #tpu.dot_dimension_numbers<[1], [0], [0], [1], [0, 0, 1, 1], [], []>} : vector<16x8xf32>, vector<8x16xf32>, vector<16x16xf32> -> vector<16x16xf32>
    %54 = arith.addf %51, %53 : vector<16x16xf32>
    %55 = vector.extract_strided_slice %49 {offsets = [32, 0], sizes = [16, 8], strides = [1, 1]} : vector<64x8xf32> to vector<16x8xf32>
    %cst_14 = arith.constant dense<0.000000e+00> : vector<16x16xf32>
    %56 = tpu.matmul %55, %35, %cst_14 {dimension_numbers = #tpu.dot_dimension_numbers<[1], [0], [0], [1], [0, 0, 1, 1], [], []>} : vector<16x8xf32>, vector<8x16xf32>, vector<16x16xf32> -> vector<16x16xf32>
    %57 = arith.addf %54, %56 : vector<16x16xf32>
    %58 = vector.extract_strided_slice %49 {offsets = [48, 0], sizes = [16, 8], strides = [1, 1]} : vector<64x8xf32> to vector<16x8xf32>
    %cst_15 = arith.constant dense<0.000000e+00> : vector<16x16xf32>
    %59 = tpu.matmul %58, %46, %cst_15 {dimension_numbers = #tpu.dot_dimension_numbers<[1], [0], [0], [1], [0, 0, 1, 1], [], []>} : vector<16x8xf32>, vector<8x16xf32>, vector<16x16xf32> -> vector<16x16xf32>
    %60 = arith.addf %57, %59 : vector<16x16xf32>
    %c0_16 = arith.constant 0 : index
    %c0_17 = arith.constant 0 : index
    %61 = vector.load %arg3[%c0_16, %c0_17] : memref<16x1xf32, #tpu.memory_space<vmem>>, vector<16x1xf32>
    %62 = vector.broadcast %61 : vector<16x1xf32> to vector<16x16xf32>
    %63 = arith.mulf %60, %62 : vector<16x16xf32>
    %c0_18 = arith.constant 0 : index
    %c0_19 = arith.constant 0 : index
    %64 = vector.load %arg4[%c0_18, %c0_19] : memref<16x1xf32, #tpu.memory_space<vmem>>, vector<16x1xf32>
    %65 = vector.broadcast %64 : vector<16x1xf32> to vector<16x16xf32>
    %66 = arith.addf %63, %65 : vector<16x16xf32>
    %67 = tpu.iota {dimensions = array<i32: 0>} : vector<8x16xi32>
    %68 = tpu.iota {dimensions = array<i32: 1>} : vector<8x16xi32>
    %c2_i32_20 = arith.constant 2 : i32
    %69 = vector.broadcast %c2_i32_20 : i32 to vector<8x16xi32>
    %70 = arith.muli %69, %67 : vector<8x16xi32>
    %c0_i32_21 = arith.constant 0 : i32
    %71 = vector.broadcast %c0_i32_21 : i32 to vector<8x16xi32>
    %72 = arith.addi %70, %71 : vector<8x16xi32>
    %c1_i32_22 = arith.constant 1 : i32
    %73 = vector.broadcast %c1_i32_22 : i32 to vector<8x16xi32>
    %74 = arith.muli %73, %68 : vector<8x16xi32>
    %75 = arith.cmpi eq, %72, %74 : vector<8x16xi32>
    %76 = arith.extui %75 : vector<8x16xi1> to vector<8x16xi32>
    %77 = arith.sitofp %76 : vector<8x16xi32> to vector<8x16xf32>
    %78 = tpu.iota {dimensions = array<i32: 0>} : vector<8x16xi32>
    %79 = tpu.iota {dimensions = array<i32: 1>} : vector<8x16xi32>
    %c2_i32_23 = arith.constant 2 : i32
    %80 = vector.broadcast %c2_i32_23 : i32 to vector<8x16xi32>
    %81 = arith.muli %80, %78 : vector<8x16xi32>
    %c1_i32_24 = arith.constant 1 : i32
    %82 = vector.broadcast %c1_i32_24 : i32 to vector<8x16xi32>
    %83 = arith.addi %81, %82 : vector<8x16xi32>
    %c1_i32_25 = arith.constant 1 : i32
    %84 = vector.broadcast %c1_i32_25 : i32 to vector<8x16xi32>
    %85 = arith.muli %84, %79 : vector<8x16xi32>
    %86 = arith.cmpi eq, %83, %85 : vector<8x16xi32>
    %87 = arith.extui %86 : vector<8x16xi1> to vector<8x16xi32>
    %88 = arith.sitofp %87 : vector<8x16xi32> to vector<8x16xf32>
    %89 = arith.addf %77, %88 : vector<8x16xf32>
    %c0_26 = arith.constant 0 : index
    %c0_27 = arith.constant 0 : index
    %90 = vector.load %arg5[%c0_26, %c0_27] : memref<16x32xbf16, #tpu.memory_space<vmem>>, vector<16x32xbf16>
    %91 = arith.truncf %2 : vector<32x8xf32> to vector<32x8xbf16>
    %cst_28 = arith.constant dense<0.000000e+00> : vector<16x8xf32>
    %92 = tpu.matmul %90, %91, %cst_28 {dimension_numbers = #tpu.dot_dimension_numbers<[1], [0], [0], [1], [0, 0, 1, 1], [], []>} : vector<16x32xbf16>, vector<32x8xbf16>, vector<16x8xf32> -> vector<16x8xf32>
    %c0_29 = arith.constant 0 : index
    %c0_30 = arith.constant 0 : index
    %93 = vector.load %arg6[%c0_29, %c0_30] : memref<16x1xf32, #tpu.memory_space<vmem>>, vector<16x1xf32>
    %94 = vector.broadcast %93 : vector<16x1xf32> to vector<16x8xf32>
    %95 = arith.addf %92, %94 : vector<16x8xf32>
    %cst_31 = arith.constant dense<0.000000e+00> : vector<16x16xf32>
    %96 = tpu.matmul %95, %89, %cst_31 {dimension_numbers = #tpu.dot_dimension_numbers<[1], [0], [0], [1], [0, 0, 1, 1], [], []>} : vector<16x8xf32>, vector<8x16xf32>, vector<16x16xf32> -> vector<16x16xf32>
    %97 = arith.addf %66, %96 : vector<16x16xf32>
    %cst_32 = arith.constant 0.000000e+00 : f32
    %98 = vector.broadcast %cst_32 : f32 to vector<16x16xf32>
    %99 = arith.cmpf oge, %97, %98 : vector<16x16xf32>
    %cst_33 = arith.constant 2.000000e-01 : f32
    %100 = vector.broadcast %cst_33 : f32 to vector<16x16xf32>
    %101 = arith.mulf %100, %97 : vector<16x16xf32>
    %102 = arith.select %99, %97, %101 : vector<16x16xi1>, vector<16x16xf32>
    %103 = tpu.iota {dimensions = array<i32: 0>} : vector<16x16xi32>
    %104 = tpu.iota {dimensions = array<i32: 1>} : vector<16x16xi32>
    %c1_i32_34 = arith.constant 1 : i32
    %105 = vector.broadcast %c1_i32_34 : i32 to vector<16x16xi32>
    %106 = arith.muli %105, %103 : vector<16x16xi32>
    %c1_i32_35 = arith.constant 1 : i32
    %107 = vector.broadcast %c1_i32_35 : i32 to vector<16x16xi32>
    %108 = arith.addi %106, %107 : vector<16x16xi32>
    %c1_i32_36 = arith.constant 1 : i32
    %109 = vector.broadcast %c1_i32_36 : i32 to vector<16x16xi32>
    %110 = arith.muli %109, %104 : vector<16x16xi32>
    %111 = arith.cmpi eq, %108, %110 : vector<16x16xi32>
    %112 = arith.extui %111 : vector<16x16xi1> to vector<16x16xi32>
    %113 = arith.sitofp %112 : vector<16x16xi32> to vector<16x16xf32>
    %114 = tpu.iota {dimensions = array<i32: 0>} : vector<16x16xi32>
    %115 = tpu.iota {dimensions = array<i32: 1>} : vector<16x16xi32>
    %c1_i32_37 = arith.constant 1 : i32
    %116 = vector.broadcast %c1_i32_37 : i32 to vector<16x16xi32>
    %117 = arith.muli %116, %114 : vector<16x16xi32>
    %c0_i32_38 = arith.constant 0 : i32
    %118 = vector.broadcast %c0_i32_38 : i32 to vector<16x16xi32>
    %119 = arith.addi %117, %118 : vector<16x16xi32>
    %c1_i32_39 = arith.constant 1 : i32
    %120 = vector.broadcast %c1_i32_39 : i32 to vector<16x16xi32>
    %121 = arith.muli %120, %115 : vector<16x16xi32>
    %122 = arith.cmpi eq, %119, %121 : vector<16x16xi32>
    %123 = arith.extui %122 : vector<16x16xi1> to vector<16x16xi32>
    %124 = arith.sitofp %123 : vector<16x16xi32> to vector<16x16xf32>
    %125 = tpu.iota {dimensions = array<i32: 0>} : vector<16x16xi32>
    %126 = tpu.iota {dimensions = array<i32: 1>} : vector<16x16xi32>
    %c1_i32_40 = arith.constant 1 : i32
    %127 = vector.broadcast %c1_i32_40 : i32 to vector<16x16xi32>
    %128 = arith.muli %127, %125 : vector<16x16xi32>
    %c-1_i32_41 = arith.constant -1 : i32
    %129 = vector.broadcast %c-1_i32_41 : i32 to vector<16x16xi32>
    %130 = arith.addi %128, %129 : vector<16x16xi32>
    %c1_i32_42 = arith.constant 1 : i32
    %131 = vector.broadcast %c1_i32_42 : i32 to vector<16x16xi32>
    %132 = arith.muli %131, %126 : vector<16x16xi32>
    %133 = arith.cmpi eq, %130, %132 : vector<16x16xi32>
    %134 = arith.extui %133 : vector<16x16xi1> to vector<16x16xi32>
    %135 = arith.sitofp %134 : vector<16x16xi32> to vector<16x16xf32>
    %c0_43 = arith.constant 0 : index
    %c0_44 = arith.constant 0 : index
    %c0_45 = arith.constant 0 : index
    %136 = vector.load %arg7[%c0_43, %c0_44, %c0_45] : memref<2x48x16xbf16, #tpu.memory_space<vmem>>, vector<1x48x16xbf16>
    %137 = vector.shape_cast %136 : vector<1x48x16xbf16> to vector<48x16xbf16>
    %138 = arith.truncf %102 : vector<16x16xf32> to vector<16x16xbf16>
    %cst_46 = arith.constant dense<0.000000e+00> : vector<48x16xf32>
    %139 = tpu.matmul %137, %138, %cst_46 {dimension_numbers = #tpu.dot_dimension_numbers<[1], [0], [0], [1], [0, 0, 1, 1], [], []>} : vector<48x16xbf16>, vector<16x16xbf16>, vector<48x16xf32> -> vector<48x16xf32>
    %140 = vector.extract_strided_slice %139 {offsets = [0, 0], sizes = [16, 16], strides = [1, 1]} : vector<48x16xf32> to vector<16x16xf32>
    %cst_47 = arith.constant dense<0.000000e+00> : vector<16x16xf32>
    %141 = tpu.matmul %140, %113, %cst_47 {dimension_numbers = #tpu.dot_dimension_numbers<[1], [0], [0], [1], [0, 0, 1, 1], [], []>} : vector<16x16xf32>, vector<16x16xf32>, vector<16x16xf32> -> vector<16x16xf32>
    %142 = vector.extract_strided_slice %139 {offsets = [16, 0], sizes = [16, 16], strides = [1, 1]} : vector<48x16xf32> to vector<16x16xf32>
    %cst_48 = arith.constant dense<0.000000e+00> : vector<16x16xf32>
    %143 = tpu.matmul %142, %124, %cst_48 {dimension_numbers = #tpu.dot_dimension_numbers<[1], [0], [0], [1], [0, 0, 1, 1], [], []>} : vector<16x16xf32>, vector<16x16xf32>, vector<16x16xf32> -> vector<16x16xf32>
    %144 = arith.addf %141, %143 : vector<16x16xf32>
    %145 = vector.extract_strided_slice %139 {offsets = [32, 0], sizes = [16, 16], strides = [1, 1]} : vector<48x16xf32> to vector<16x16xf32>
    %cst_49 = arith.constant dense<0.000000e+00> : vector<16x16xf32>
    %146 = tpu.matmul %145, %135, %cst_49 {dimension_numbers = #tpu.dot_dimension_numbers<[1], [0], [0], [1], [0, 0, 1, 1], [], []>} : vector<16x16xf32>, vector<16x16xf32>, vector<16x16xf32> -> vector<16x16xf32>
    %147 = arith.addf %144, %146 : vector<16x16xf32>
    %c0_50 = arith.constant 0 : index
    %c0_51 = arith.constant 0 : index
    %c0_52 = arith.constant 0 : index
    %148 = vector.load %arg8[%c0_50, %c0_51, %c0_52] : memref<2x16x1xf32, #tpu.memory_space<vmem>>, vector<1x16x1xf32>
    %149 = vector.shape_cast %148 : vector<1x16x1xf32> to vector<16x1xf32>
    %150 = vector.broadcast %149 : vector<16x1xf32> to vector<16x16xf32>
    %151 = arith.mulf %147, %150 : vector<16x16xf32>
    %c0_53 = arith.constant 0 : index
    %c0_54 = arith.constant 0 : index
    %c0_55 = arith.constant 0 : index
    %152 = vector.load %arg9[%c0_53, %c0_54, %c0_55] : memref<2x16x1xf32, #tpu.memory_space<vmem>>, vector<1x16x1xf32>
    %153 = vector.shape_cast %152 : vector<1x16x1xf32> to vector<16x1xf32>
    %154 = vector.broadcast %153 : vector<16x1xf32> to vector<16x16xf32>
    %155 = arith.addf %151, %154 : vector<16x16xf32>
    %156 = arith.addf %155, %102 : vector<16x16xf32>
    %cst_56 = arith.constant 0.000000e+00 : f32
    %157 = vector.broadcast %cst_56 : f32 to vector<16x16xf32>
    %158 = arith.cmpf oge, %156, %157 : vector<16x16xf32>
    %cst_57 = arith.constant 2.000000e-01 : f32
    %159 = vector.broadcast %cst_57 : f32 to vector<16x16xf32>
    %160 = arith.mulf %159, %156 : vector<16x16xf32>
    %161 = arith.select %158, %156, %160 : vector<16x16xi1>, vector<16x16xf32>
    %c1 = arith.constant 1 : index
    %c0_58 = arith.constant 0 : index
    %c0_59 = arith.constant 0 : index
    %162 = vector.load %arg7[%c1, %c0_58, %c0_59] : memref<2x48x16xbf16, #tpu.memory_space<vmem>>, vector<1x48x16xbf16>
    %163 = vector.shape_cast %162 : vector<1x48x16xbf16> to vector<48x16xbf16>
    %164 = arith.truncf %161 : vector<16x16xf32> to vector<16x16xbf16>
    %cst_60 = arith.constant dense<0.000000e+00> : vector<48x16xf32>
    %165 = tpu.matmul %163, %164, %cst_60 {dimension_numbers = #tpu.dot_dimension_numbers<[1], [0], [0], [1], [0, 0, 1, 1], [], []>} : vector<48x16xbf16>, vector<16x16xbf16>, vector<48x16xf32> -> vector<48x16xf32>
    %166 = vector.extract_strided_slice %165 {offsets = [0, 0], sizes = [16, 16], strides = [1, 1]} : vector<48x16xf32> to vector<16x16xf32>
    %cst_61 = arith.constant dense<0.000000e+00> : vector<16x16xf32>
    %167 = tpu.matmul %166, %113, %cst_61 {dimension_numbers = #tpu.dot_dimension_numbers<[1], [0], [0], [1], [0, 0, 1, 1], [], []>} : vector<16x16xf32>, vector<16x16xf32>, vector<16x16xf32> -> vector<16x16xf32>
    %168 = vector.extract_strided_slice %165 {offsets = [16, 0], sizes = [16, 16], strides = [1, 1]} : vector<48x16xf32> to vector<16x16xf32>
    %cst_62 = arith.constant dense<0.000000e+00> : vector<16x16xf32>
    %169 = tpu.matmul %168, %124, %cst_62 {dimension_numbers = #tpu.dot_dimension_numbers<[1], [0], [0], [1], [0, 0, 1, 1], [], []>} : vector<16x16xf32>, vector<16x16xf32>, vector<16x16xf32> -> vector<16x16xf32>
    %170 = arith.addf %167, %169 : vector<16x16xf32>
    %171 = vector.extract_strided_slice %165 {offsets = [32, 0], sizes = [16, 16], strides = [1, 1]} : vector<48x16xf32> to vector<16x16xf32>
    %cst_63 = arith.constant dense<0.000000e+00> : vector<16x16xf32>
    %172 = tpu.matmul %171, %135, %cst_63 {dimension_numbers = #tpu.dot_dimension_numbers<[1], [0], [0], [1], [0, 0, 1, 1], [], []>} : vector<16x16xf32>, vector<16x16xf32>, vector<16x16xf32> -> vector<16x16xf32>
    %173 = arith.addf %170, %172 : vector<16x16xf32>
    %c1_64 = arith.constant 1 : index
    %c0_65 = arith.constant 0 : index
    %c0_66 = arith.constant 0 : index
    %174 = vector.load %arg8[%c1_64, %c0_65, %c0_66] : memref<2x16x1xf32, #tpu.memory_space<vmem>>, vector<1x16x1xf32>
    %175 = vector.shape_cast %174 : vector<1x16x1xf32> to vector<16x1xf32>
    %176 = vector.broadcast %175 : vector<16x1xf32> to vector<16x16xf32>
    %177 = arith.mulf %173, %176 : vector<16x16xf32>
    %c1_67 = arith.constant 1 : index
    %c0_68 = arith.constant 0 : index
    %c0_69 = arith.constant 0 : index
    %178 = vector.load %arg9[%c1_67, %c0_68, %c0_69] : memref<2x16x1xf32, #tpu.memory_space<vmem>>, vector<1x16x1xf32>
    %179 = vector.shape_cast %178 : vector<1x16x1xf32> to vector<16x1xf32>
    %180 = vector.broadcast %179 : vector<16x1xf32> to vector<16x16xf32>
    %181 = arith.addf %177, %180 : vector<16x16xf32>
    %182 = arith.addf %181, %161 : vector<16x16xf32>
    %cst_70 = arith.constant 0.000000e+00 : f32
    %183 = vector.broadcast %cst_70 : f32 to vector<16x16xf32>
    %184 = arith.cmpf oge, %182, %183 : vector<16x16xf32>
    %cst_71 = arith.constant 2.000000e-01 : f32
    %185 = vector.broadcast %cst_71 : f32 to vector<16x16xf32>
    %186 = arith.mulf %185, %182 : vector<16x16xf32>
    %187 = arith.select %184, %182, %186 : vector<16x16xi1>, vector<16x16xf32>
    %c0_72 = arith.constant 0 : index
    %c0_73 = arith.constant 0 : index
    %188 = vector.load %arg10[%c0_72, %c0_73] : memref<48x16xbf16, #tpu.memory_space<vmem>>, vector<48x16xbf16>
    %189 = arith.truncf %187 : vector<16x16xf32> to vector<16x16xbf16>
    %cst_74 = arith.constant dense<0.000000e+00> : vector<48x16xf32>
    %190 = tpu.matmul %188, %189, %cst_74 {dimension_numbers = #tpu.dot_dimension_numbers<[1], [0], [0], [1], [0, 0, 1, 1], [], []>} : vector<48x16xbf16>, vector<16x16xbf16>, vector<48x16xf32> -> vector<48x16xf32>
    %191 = vector.extract_strided_slice %190 {offsets = [0, 0], sizes = [16, 16], strides = [1, 1]} : vector<48x16xf32> to vector<16x16xf32>
    %cst_75 = arith.constant dense<0.000000e+00> : vector<16x16xf32>
    %192 = tpu.matmul %191, %113, %cst_75 {dimension_numbers = #tpu.dot_dimension_numbers<[1], [0], [0], [1], [0, 0, 1, 1], [], []>} : vector<16x16xf32>, vector<16x16xf32>, vector<16x16xf32> -> vector<16x16xf32>
    %193 = vector.extract_strided_slice %190 {offsets = [16, 0], sizes = [16, 16], strides = [1, 1]} : vector<48x16xf32> to vector<16x16xf32>
    %cst_76 = arith.constant dense<0.000000e+00> : vector<16x16xf32>
    %194 = tpu.matmul %193, %124, %cst_76 {dimension_numbers = #tpu.dot_dimension_numbers<[1], [0], [0], [1], [0, 0, 1, 1], [], []>} : vector<16x16xf32>, vector<16x16xf32>, vector<16x16xf32> -> vector<16x16xf32>
    %195 = arith.addf %192, %194 : vector<16x16xf32>
    %196 = vector.extract_strided_slice %190 {offsets = [32, 0], sizes = [16, 16], strides = [1, 1]} : vector<48x16xf32> to vector<16x16xf32>
    %cst_77 = arith.constant dense<0.000000e+00> : vector<16x16xf32>
    %197 = tpu.matmul %196, %135, %cst_77 {dimension_numbers = #tpu.dot_dimension_numbers<[1], [0], [0], [1], [0, 0, 1, 1], [], []>} : vector<16x16xf32>, vector<16x16xf32>, vector<16x16xf32> -> vector<16x16xf32>
    %198 = arith.addf %195, %197 : vector<16x16xf32>
    %c0_78 = arith.constant 0 : index
    %c0_79 = arith.constant 0 : index
    %199 = vector.load %arg11[%c0_78, %c0_79] : memref<16x1xf32, #tpu.memory_space<vmem>>, vector<16x1xf32>
    %200 = vector.broadcast %199 : vector<16x1xf32> to vector<16x16xf32>
    %201 = arith.mulf %198, %200 : vector<16x16xf32>
    %c0_80 = arith.constant 0 : index
    %c0_81 = arith.constant 0 : index
    %202 = vector.load %arg12[%c0_80, %c0_81] : memref<16x1xf32, #tpu.memory_space<vmem>>, vector<16x1xf32>
    %203 = vector.broadcast %202 : vector<16x1xf32> to vector<16x16xf32>
    %204 = arith.addf %201, %203 : vector<16x16xf32>
    %205 = arith.addf %204, %102 : vector<16x16xf32>
    %cst_82 = arith.constant 0.000000e+00 : f32
    %206 = vector.broadcast %cst_82 : f32 to vector<16x16xf32>
    %207 = arith.maximumf %205, %206 : vector<16x16xf32>
    %c0_83 = arith.constant 0 : index
    %c0_84 = arith.constant 0 : index
    %208 = vector.load %arg13[%c0_83, %c0_84] : memref<6x16xbf16, #tpu.memory_space<vmem>>, vector<6x16xbf16>
    %209 = arith.truncf %207 : vector<16x16xf32> to vector<16x16xbf16>
    %cst_85 = arith.constant dense<0.000000e+00> : vector<6x16xf32>
    %210 = tpu.matmul %208, %209, %cst_85 {dimension_numbers = #tpu.dot_dimension_numbers<[1], [0], [0], [1], [0, 0, 1, 1], [], []>} : vector<6x16xbf16>, vector<16x16xbf16>, vector<6x16xf32> -> vector<6x16xf32>
    %c0_86 = arith.constant 0 : index
    %c0_87 = arith.constant 0 : index
    %211 = vector.load %arg14[%c0_86, %c0_87] : memref<6x1xf32, #tpu.memory_space<vmem>>, vector<6x1xf32>
    %212 = vector.broadcast %211 : vector<6x1xf32> to vector<6x16xf32>
    %213 = arith.addf %210, %212 : vector<6x16xf32>
    %c0_88 = arith.constant 0 : index
    %c0_89 = arith.constant 0 : index
    %c0_90 = arith.constant 0 : index
    %214 = vector.load %arg15[%c0_88, %c0_89, %c0_90] : memref<1x6x16xf32, #tpu.memory_space<vmem>>, vector<1x6x16xf32>
    %215 = vector.shape_cast %214 : vector<1x6x16xf32> to vector<6x16xf32>
    %216 = vector.shape_cast %213 : vector<6x16xf32> to vector<1x6x16xf32>
    tpu.vector_store %arg15[%c0_88, %c0_89, %c0_90], %216 {strides = array<i32>} : memref<1x6x16xf32, #tpu.memory_space<vmem>>, vector<1x6x16xf32>,
    return
  }
  func.func @transform_0(%arg0: i32) -> (i32, i32, i32) {
    %c0_i32 = arith.constant 0 : i32
    %c0_i32_0 = arith.constant 0 : i32
    %c0_i32_1 = arith.constant 0 : i32
    return %arg0, %c0_i32, %c0_i32_0 : i32, i32, i32
  }
  func.func @transform_1(%arg0: i32) -> (i32, i32) {
    %c0_i32 = arith.constant 0 : i32
    %c0_i32_0 = arith.constant 0 : i32
    %c0_i32_1 = arith.constant 0 : i32
    return %c0_i32, %c0_i32_0 : i32, i32
  }
  func.func @transform_2(%arg0: i32) -> (i32, i32) {
    %c0_i32 = arith.constant 0 : i32
    %c0_i32_0 = arith.constant 0 : i32
    %c0_i32_1 = arith.constant 0 : i32
    return %c0_i32, %c0_i32_0 : i32, i32
  }
  func.func @transform_3(%arg0: i32) -> (i32, i32) {
    %c0_i32 = arith.constant 0 : i32
    %c0_i32_0 = arith.constant 0 : i32
    %c0_i32_1 = arith.constant 0 : i32
    return %c0_i32, %c0_i32_0 : i32, i32
  }
  func.func @transform_4(%arg0: i32) -> (i32, i32) {
    %c0_i32 = arith.constant 0 : i32
    %c0_i32_0 = arith.constant 0 : i32
    %c0_i32_1 = arith.constant 0 : i32
    return %c0_i32, %c0_i32_0 : i32, i32
  }
  func.func @transform_5(%arg0: i32) -> (i32, i32) {
    %c0_i32 = arith.constant 0 : i32
    %c0_i32_0 = arith.constant 0 : i32
    %c0_i32_1 = arith.constant 0 : i32
    return %c0_i32, %c0_i32_0 : i32, i32
  }
  func.func @transform_6(%arg0: i32) -> (i32, i32, i32) {
    %c0_i32 = arith.constant 0 : i32
    %c0_i32_0 = arith.constant 0 : i32
    %c0_i32_1 = arith.constant 0 : i32
    %c0_i32_2 = arith.constant 0 : i32
    return %c0_i32, %c0_i32_0, %c0_i32_1 : i32, i32, i32
  }
  func.func @transform_7(%arg0: i32) -> (i32, i32, i32) {
    %c0_i32 = arith.constant 0 : i32
    %c0_i32_0 = arith.constant 0 : i32
    %c0_i32_1 = arith.constant 0 : i32
    %c0_i32_2 = arith.constant 0 : i32
    return %c0_i32, %c0_i32_0, %c0_i32_1 : i32, i32, i32
  }
  func.func @transform_8(%arg0: i32) -> (i32, i32, i32) {
    %c0_i32 = arith.constant 0 : i32
    %c0_i32_0 = arith.constant 0 : i32
    %c0_i32_1 = arith.constant 0 : i32
    %c0_i32_2 = arith.constant 0 : i32
    return %c0_i32, %c0_i32_0, %c0_i32_1 : i32, i32, i32
  }
  func.func @transform_9(%arg0: i32) -> (i32, i32) {
    %c0_i32 = arith.constant 0 : i32
    %c0_i32_0 = arith.constant 0 : i32
    %c0_i32_1 = arith.constant 0 : i32
    return %c0_i32, %c0_i32_0 : i32, i32
  }
  func.func @transform_10(%arg0: i32) -> (i32, i32) {
    %c0_i32 = arith.constant 0 : i32
    %c0_i32_0 = arith.constant 0 : i32
    %c0_i32_1 = arith.constant 0 : i32
    return %c0_i32, %c0_i32_0 : i32, i32
  }
  func.func @transform_11(%arg0: i32) -> (i32, i32) {
    %c0_i32 = arith.constant 0 : i32
    %c0_i32_0 = arith.constant 0 : i32
    %c0_i32_1 = arith.constant 0 : i32
    return %c0_i32, %c0_i32_0 : i32, i32
  }
  func.func @transform_12(%arg0: i32) -> (i32, i32) {
    %c0_i32 = arith.constant 0 : i32
    %c0_i32_0 = arith.constant 0 : i32
    %c0_i32_1 = arith.constant 0 : i32
    return %c0_i32, %c0_i32_0 : i32, i32
  }
  func.func @transform_13(%arg0: i32) -> (i32, i32) {
    %c0_i32 = arith.constant 0 : i32
    %c0_i32_0 = arith.constant 0 : i32
    %c0_i32_1 = arith.constant 0 : i32
    return %c0_i32, %c0_i32_0 : i32, i32
  }
  func.func @transform_14(%arg0: i32) -> (i32, i32, i32) {
    %c0_i32 = arith.constant 0 : i32
    %c0_i32_0 = arith.constant 0 : i32
    %c0_i32_1 = arith.constant 0 : i32
    return %arg0, %c0_i32, %c0_i32_0 : i32, i32, i32
  }
}

</mosaic_0001>

<bundles_post_ra>
// kernel: vqvae_forward.10
= control target key start
LH: loop header
LB: loop body
LE: loop exit
PB: predicated region body
PF: predicated region fallthrough
CT: control target
= control target key end

     0   :  { %s566_s12 = smov 0   ;;  %s654_s0 = inlined_call_operand.vmem [shape: f32[2,4,64], index: 0, kind: input, shape index: {}]   ;;  %s655_s1 = inlined_call_operand.vmem [shape: f32[128,64], index: 1, kind: input, shape index: {}]   ;;  %s656_s2 = inlined_call_operand.vmem [shape: f32[1,128], index: 2, kind: input, shape index: {}]   ;;  %s657_s3 = inlined_call_operand.vmem [shape: f32[2,4,64], index: 3, kind: output, shape index: {}]  }
   0x1 LB: > { %s404_s13 = sadd.s32 4294967295, %s540_s12   ;;  %p408_p0 = scmp.ge.s32.totalorder %s540_s12, 1  ;;  %s540_s12 = sphi %s566_s12, %s13_s12  }
   0x2   : > { %p136_p1 = scmp.lt.s32.totalorder %s540_s12, 3 }
   0x4   : > { %p137_p2 = pnand %p408_p0, %p136_p1 }
   0x5   : > { %v168_v0 = vld [vmem:[%s655_s1] sm:$0xff] (!%p137_p2)  ;;  %v169_v1 = vld [vmem:[%s655_s1 + $0x8] sm:$0xff] (!%p137_p2)  ;;  %vm193_vm0 = vcmask (!%p137_p2), 523264   ;;  %v542_v2 = vmov (!%p137_p2), 0.0   ;;  %vm543_vm1 = vmmov (!%p137_p2), 0   ;;  %v170_v4 = vld [vmem:[%s655_s1 + $0x10] sm:$0xff] (!%p137_p2)  ;;  %v274_v44 = vlaneseq (!%p137_p2) }
   0x6   : > { %140 = sbr.rel (%p137_p2) target bundleno = 645 (0x285), region = 32  ;;  %443 = vmatprep.subr.bf16.mxu0 (!%p137_p2), %v542_v2  ;;  %v185_v3 = vpack.c.bf16 (!%p137_p2), %v169_v1, %v168_v0  ;;  %459 = vmatprep.mubr.msk.bf16.mxu0 (!%p137_p2), %vm543_vm1, %v542_v2  ;;  %v171_v5 = vld [vmem:[%s655_s1 + $0x18] sm:$0xff] (!%p137_p2)  ;;  %v172_v9 = vld [vmem:[%s655_s1 + $0x20] sm:$0xff] (!%p137_p2)  ;;  %v173_v10 = vld [vmem:[%s655_s1 + $0x28] sm:$0xff] (!%p137_p2)  ;;  %p158_p3 = scmp.lt.s32.totalorder (!%p137_p2), %s404_s13, 1  ;;  %v544_v35 = vmov (!%p137_p2), 0.0|0.0  }
   0x7   : > { %495 = vmatprep.mubr.msk.f32.mxu1 (!%p137_p2), %vm543_vm1, %v542_v2  ;;  %v186_v7 = vpack.c.bf16 (!%p137_p2), %v171_v5, %v170_v4  ;;  %v187_v11 = vpack.c.bf16 (!%p137_p2), %v173_v10, %v172_v9  ;;  %v174_v13 = vld [vmem:[%s655_s1 + $0x30] sm:$0xff] (!%p137_p2)  ;;  %v175_v14 = vld [vmem:[%s655_s1 + $0x38] sm:$0xff] (!%p137_p2)  ;;  %v176_v17 = vld [vmem:[%s655_s1 + $0x40] sm:$0xff] (!%p137_p2)  ;;  %498 = vmatprep.subr.bf16.mxu1 (!%p137_p2), %v544_v35  ;;  %vm270_vm2 = vcmask (!%p137_p2), 1043456   ;;  %v275_v45 = vand.u32 (!%p137_p2), 127, %v274_v44 }
   0x8   : > { %v198_v6 = vsel (!%p137_p2), %vm193_vm0, %v185_v3, 0  ;;  %v188_v15 = vpack.c.bf16 (!%p137_p2), %v175_v14, %v174_v13  ;;  %v177_v18 = vld [vmem:[%s655_s1 + $0x48] sm:$0xff] (!%p137_p2)  ;;  %v178_v21 = vld [vmem:[%s655_s1 + $0x50] sm:$0xff] (!%p137_p2)  ;;  %v179_v22 = vld [vmem:[%s655_s1 + $0x58] sm:$0xff] (!%p137_p2)  ;;  %500 = vmatpush3.bf16.msra.mxu1 (!%p137_p2), %v185_v3  ;;  %v545_v47 = vmov (!%p137_p2), 1.0   ;;  %vm349_vm4 = vcmask (!%p137_p2), 519168  }
   0x9   : > { %444 = vmatpush3.bf16.xpose.msra.mxu0 (!%p137_p2), %v198_v6  ;;  %v201_v8 = vsel (!%p137_p2), %vm193_vm0, %v186_v7, 0  ;;  %v204_v12 = vsel (!%p137_p2), %vm193_vm0, %v187_v11, 0  ;;  %v189_v19 = vpack.c.bf16 (!%p137_p2), %v177_v18, %v176_v17  ;;  %v190_v23 = vpack.c.bf16 (!%p137_p2), %v179_v22, %v178_v21  ;;  %v180_v25 = vld [vmem:[%s655_s1 + $0x60] sm:$0xff] (!%p137_p2)  ;;  %v181_v26 = vld [vmem:[%s655_s1 + $0x68] sm:$0xff] (!%p137_p2)  ;;  %v182_v29 = vld [vmem:[%s655_s1 + $0x70] sm:$0xff] (!%p137_p2)  ;;  %501 = vmatprep.subr.bf16.mxu1 (!%p137_p2), %v544_v35 }
   0xa   : > { %445 = vmatprep.subr.bf16.mxu0 (!%p137_p2), %v542_v2  ;;  %v207_v16 = vsel (!%p137_p2), %vm193_vm0, %v188_v15, 0  ;;  %v191_v27 = vpack.c.bf16 (!%p137_p2), %v181_v26, %v180_v25  ;;  %v183_v30 = vld [vmem:[%s655_s1 + $0x78] sm:$0xff] (!%p137_p2)  ;;  %v412_v37 = vld [vmem:[%s656_s2] ss:$0 sm:$0xff] (!%p137_p2) }
   0xb   : > { %v210_v20 = vsel (!%p137_p2), %vm193_vm0, %v189_v19, 0  ;;  %v213_v24 = vsel (!%p137_p2), %vm193_vm0, %v190_v23, 0  ;;  %v192_v31 = vpack.c.bf16 (!%p137_p2), %v183_v30, %v182_v29 }
   0xc   : > { %v216_v28 = vsel (!%p137_p2), %vm193_vm0, %v191_v27, 0  ;;  %503 = vmatpush3.bf16.msra.mxu1 (!%p137_p2), %v186_v7 }
   0xd   : > { %s659_s13 = smov (!%p158_p3, %s404_s13), 1  ;;  %v219_v32 = vsel %vm193_vm0, %v192_v31, 0  ;;  %504 = vmatprep.subr.bf16.mxu1 %v544_v35 }
   0xe   : > { %s409_s21 = sshll.u32 %s659_s13, 2 }
   0xf   : > { %s161_s24 = scalar_lea.vmem %s654_s0, %s409_s21  ;;  %s165_s29 = scalar_lea.vmem %s657_s3, %s409_s21 }
  0x10   : > { %v167_v33 = vld [vmem:[%s161_s24] sm:$0xf]  ;;  %506 = vmatpush3.bf16.msra.mxu1 %v187_v11 }
  0x11   : > { %446 = vmatpush3.bf16.xpose.msra.mxu0 %v201_v8  ;;  %v184_v34 = vpack.c.bf16 %v167_v33, %v167_v33  ;;  %507 = vmatprep.subr.bf16.mxu1 %v544_v35 }
  0x12   : > { %447 = vmatprep.subr.bf16.mxu0 %v542_v2 }
  0x14   : > { %509 = vmatpush3.bf16.msra.mxu1 %v188_v15 }
  0x15   : > { %510 = vmatprep.subr.bf16.mxu1 %v544_v35 }
  0x18   : > { %512 = vmatpush3.bf16.msra.mxu1 %v189_v19 }
  0x19   : > { %448 = vmatpush3.bf16.xpose.msra.mxu0 %v204_v12  ;;  %513 = vmatprep.subr.bf16.mxu1 %v544_v35 }
  0x1a   : > { %449 = vmatprep.subr.bf16.mxu0 %v542_v2 }
  0x1c   : > { %515 = vmatpush3.bf16.msra.mxu1 %v190_v23 }
  0x1d   : > { %516 = vmatprep.subr.bf16.mxu1 %v544_v35 }
  0x20   : > { %518 = vmatpush3.bf16.msra.mxu1 %v191_v27 }
  0x21   : > { %450 = vmatpush3.bf16.xpose.msra.mxu0 %v207_v16  ;;  %519 = vmatprep.subr.bf16.mxu1 %v544_v35 }
  0x22   : > { %451 = vmatprep.subr.bf16.mxu0 %v542_v2 }
  0x24   : > { %521 = vmatpush3.bf16.msra.mxu1 %v192_v31 }
  0x29   : > { %452 = vmatpush3.bf16.xpose.msra.mxu0 %v210_v20 }
  0x2a   : > { %453 = vmatprep.subr.bf16.mxu0 %v542_v2 }
  0x31   : > { %454 = vmatpush3.bf16.xpose.msra.mxu0 %v213_v24 }
  0x32   : > { %455 = vmatprep.subr.bf16.mxu0 %v542_v2 }
  0x39   : > { %456 = vmatpush3.bf16.xpose.msra.mxu0 %v216_v28 }
  0x3a   : > { %457 = vmatprep.subr.bf16.mxu0 %v542_v2 }
  0x41   : > { %458 = vmatpush3.bf16.xpose.msra.mxu0 %v219_v32 }
  0x48   : > { %460 = vmatmul.mubr.msk.bf16.vlgmr.msra.gmra.mrb[0].mxu0 %vm193_vm0, %v184_v34 }
 0x11b   : > { %v255_v36 = vpop.f32.mrb[0].mxu0 }
 0x11c   : > { %v262_v38 = vmul.f32 2.0, %v255_v36  ;;  %v461_v39 = vpop.f32.mrb[1].mxu0 }
 0x11d   : > { %v258_v40 = vpop.f32.mrb[2].mxu0 }
 0x11e   : > { %v462_v41 = vpop.f32.mrb[3].mxu0  ;;  %v269_v42 = vsub.f32 %v412_v37, %v262_v38 }
 0x120   : > { %v271_v43 = vsel %vm270_vm2, %v269_v42, inf }
 0x121   : > { %272 = vmin.index.xlane.f32.xlu0 %v271_v43 }
 0x1ae   : > { %v273_v46 = vpop.xlane.xlu0 %272 }
 0x1af   : > { %vm276_vm3 = vcmp.eq.s32.totalorder %v275_v45, %v273_v46 }
 0x1b0   : > { %496 = vmatmul.mubr.msk.f32.vlgmr.msra.gmra.mrb[0].mxu1 %vm276_vm3, %v545_v47 }
 0x283   : > { %v345_v48 = vpop.f32.mrb[0].mxu1 }
 0x284   : > { %350 = vst.msk [vmem:[%s165_s29] sm:$0xf] %vm349_vm4, %v345_v48  ;;  %v497_v49 = vpop.f32.mrb[1].mxu1 }
 0x285 PF: > { %s13_s12 = sadd.s32 1, %s540_s12  }
 0x286   : > { %p10_p4 = scmp.ge.s32.totalorder %s13_s12, 4  }
 0x288   :  { %12 = sbr.rel (!%p10_p4) target bundleno = 1 (0x1), region = 62 }

// kernel: vqvae_forward.7
= control target key start
LH: loop header
LB: loop body
LE: loop exit
PB: predicated region body
PF: predicated region fallthrough
CT: control target
= control target key end

     0   :  { %s2394_s13 = smov 0   ;;  %s2654_s0 = inlined_call_operand.vmem [shape: bf16[2,6,16], index: 0, kind: input, shape index: {}]   ;;  %s2655_s1 = inlined_call_operand.vmem [shape: bf16[48,6], index: 1, kind: input, shape index: {}]   ;;  %s2656_s2 = inlined_call_operand.vmem [shape: f32[16,1], index: 2, kind: input, shape index: {}]   ;;  %s2657_s3 = inlined_call_operand.vmem [shape: f32[16,1], index: 3, kind: input, shape index: {}]   ;;  %s2658_s4 = inlined_call_operand.vmem [shape: bf16[2,48,16], index: 4, kind: input, shape index: {}]   ;;  %s2659_s5 = inlined_call_operand.vmem [shape: f32[2,16,1], index: 5, kind: input, shape index: {}]   ;;  %s2660_s6 = inlined_call_operand.vmem [shape: f32[2,16,1], index: 6, kind: input, shape index: {}]   ;;  %s2661_s7 = inlined_call_operand.vmem [shape: bf16[48,16], index: 7, kind: input, shape index: {}]   ;;  %s2662_s8 = inlined_call_operand.vmem [shape: f32[16,1], index: 8, kind: input, shape index: {}]   ;;  %s2663_s9 = inlined_call_operand.vmem [shape: f32[16,1], index: 9, kind: input, shape index: {}]   ;;  %s2664_s10 = inlined_call_operand.vmem [shape: bf16[2,16,16], index: 10, kind: output, shape index: {}]  }
   0x1 LB: > { %s1930_s14 = sadd.s32 4294967295, %s2333_s13   ;;  %p1934_p0 = scmp.ge.s32.totalorder %s2333_s13, 1  ;;  %s2333_s13 = sphi %s2394_s13, %s20_s13  }
   0x2   : > { %p311_p1 = scmp.lt.s32.totalorder %s2333_s13, 3 }
   0x4   : > { %p312_p2 = pnand %p1934_p0, %p311_p1 }
   0x5   : > { %p348_p3 = scmp.lt.s32.totalorder (!%p312_p2), %s1930_s14, 1  ;;  %v2335_v0 = vmov (!%p312_p2), 0.0   ;;  %vm2336_vm0 = vmmov (!%p312_p2), 0   ;;  %vm417_vm1 = vcmask (!%p312_p2), 1042432   ;;  %v2315_v1 = vld [vmem:[%s2655_s1] sm:$0xff] (!%p312_p2)   ;;  %vm407_vm2 = vcmask (!%p312_p2), 48128  }
   0x6   : > { %315 = sbr.rel (%p312_p2) target bundleno = 1876 (0x754), region = 60  ;;  %2097 = vmatprep.subr.bf16.mxu0 (!%p312_p2), %v2335_v0  ;;  %2099 = vmatprep.mubr.msk.bf16.mxu0 (!%p312_p2), %vm2336_vm0, %v2335_v0  ;;  %v2316_v4 = vld [vmem:[%s2655_s1 + $0x8] sm:$0xff] (!%p312_p2)   ;;  %v2317_v5 = vld [vmem:[%s2655_s1 + $0x10] sm:$0xff] (!%p312_p2)   ;;  %v359_v6 = vlaneseq (!%p312_p2)  ;;  %v2337_v11 = vmov (!%p312_p2), 1.0|1.0   ;;  %v724_v18 = vld [vmem:[%s2656_s2] sm:$0xff] (!%p312_p2) }
   0x7   : > { %v738_v19 = vld [vmem:[%s2657_s3] sm:$0xff] (!%p312_p2)  ;;  %v2338_v20 = vmov (!%p312_p2), 0   ;;  %v725_v21 = vld [vmem:[%s2656_s2 + $0x8] sm:$0xff] (!%p312_p2)  ;;  %v2004_v27 = vld [vmem:[%s2659_s5 + $0x10] sm:$0xff] (!%p312_p2)  ;;  %vm478_vm12 = vcmask (!%p312_p2), 130048  }
   0x8   : > { %v360_v7 = vshrl.u32 (!%p312_p2), %v359_v6, 7  ;;  %v363_v9 = vand.u32 (!%p312_p2), 127, %v359_v6  ;;  %2313 = vset.pattern.permute.xlu0 (!%p312_p2), %v2338_v20  ;;  %2314 = vset.pattern.permute.xlu1 (!%p312_p2), %v2338_v20  ;;  %v739_v22 = vld [vmem:[%s2657_s3 + $0x8] sm:$0xff] (!%p312_p2)  ;;  %v1091_v23 = vld [vmem:[%s2659_s5] sm:$0xff] (!%p312_p2)  ;;  %v2005_v28 = vld [vmem:[%s2659_s5 + $0x18] sm:$0xff] (!%p312_p2) }
   0x9   : > { %728 = vperm.xlu0 (!%p312_p2), %2313, %v724_v18   ;;  %742 = vperm.xlu1 (!%p312_p2), %2314, %v738_v19   ;;  %v1092_v24 = vld [vmem:[%s2659_s5 + $0x8] sm:$0xff] (!%p312_p2)  ;;  %v1105_v25 = vld [vmem:[%s2660_s6] sm:$0xff] (!%p312_p2)  ;;  %v2006_v29 = vld [vmem:[%s2660_s6 + $0x10] sm:$0xff] (!%p312_p2) }
   0xa   : > { %v361_v8 = vadd.s32 (!%p312_p2), 8, %v360_v7  ;;  %vm372_vm3 = vcmp.eq.s32.totalorder (!%p312_p2), %v360_v7, %v363_v9  ;;  %v364_v12 = vadd.s32 (!%p312_p2), 1, %v360_v7  ;;  %v378_v15 = vadd.s32 (!%p312_p2), 4294967295, %v360_v7  ;;  %v1106_v26 = vld [vmem:[%s2660_s6 + $0x8] sm:$0xff] (!%p312_p2)  ;;  %v2007_v30 = vld [vmem:[%s2660_s6 + $0x18] sm:$0xff] (!%p312_p2)  ;;  %v1832_v31 = vld [vmem:[%s2662_s8] sm:$0xff] (!%p312_p2) }
   0xb   : > { %v1833_v32 = vld [vmem:[%s2662_s8 + $0x8] sm:$0xff] (!%p312_p2)  ;;  %v1846_v33 = vld [vmem:[%s2663_s9] sm:$0xff] (!%p312_p2) }
   0xc   : > { %vm373_vm4 = vcmp.eq.s32.totalorder (!%p312_p2), %v361_v8, %v363_v9  ;;  %v365_v13 = vadd.s32 (!%p312_p2), 1, %v361_v8  ;;  %vm366_vm6 = vcmp.eq.s32.totalorder (!%p312_p2), %v364_v12, %v363_v9  ;;  %v379_v16 = vadd.s32 (!%p312_p2), 4294967295, %v361_v8  ;;  %v1847_v34 = vld [vmem:[%s2663_s9 + $0x8] sm:$0xff] (!%p312_p2)  ;;  %v2318_v62 = vld [vmem:[%s2658_s4] sm:$0xff] (!%p312_p2)  }
   0xd   : > { %s2672_s14 = smov (!%p348_p3, %s1930_s14), 1  ;;  %vm2424_vm5 = vmpackc.low %vm373_vm4, %vm372_vm3  ;;  %vm380_vm9 = vcmp.eq.s32.totalorder %v378_v15, %v363_v9  ;;  %733 = vperm.xlu0 %2313, %v725_v21   ;;  %747 = vperm.xlu1 %2314, %v739_v22   ;;  %v2319_v63 = vld [vmem:[%s2658_s4 + $0x8] sm:$0xff]  }
   0xe   : > { %s1935_s15 = sshll.u32 %s2672_s14, 2  ;;  %2238 = vmatprep.subr.msk.bf16.mxu1 %vm2424_vm5, %v2337_v11  ;;  %vm367_vm7 = vcmp.eq.s32.totalorder %v365_v13, %v363_v9  ;;  %vm381_vm10 = vcmp.eq.s32.totalorder %v379_v16, %v363_v9  ;;  %s2030_s21 = sshll.u32 %s2672_s14, 3 }
   0xf   : > { %s351_s18 = scalar_lea.vmem %s2654_s0, %s1935_s15  ;;  %2240 = vmatpush3.bf16.msk.msra.mxu1 %vm2424_vm5, %v2337_v11  ;;  %vm2440_vm8 = vmpackc.low %vm367_vm7, %vm366_vm6  ;;  %s356_s24 = scalar_lea.vmem %s2664_s10, %s2030_s21 }
  0x10   : > { %v358_v2 = vld [vmem:[%s351_s18] sm:$0x7]  ;;  %2242 = vmatprep.subr.msk.bf16.mxu1 %vm2440_vm8, %v2337_v11  ;;  %vm2450_vm11 = vmpackc.low %vm381_vm10, %vm380_vm9 }
  0x11   : > { %v419_v3 = vsel %vm417_vm1, %v358_v2, 0  ;;  %1095 = vperm.xlu0 %2313, %v1091_v23   ;;  %1100 = vperm.xlu1 %2314, %v1092_v24  }
  0x12   : > { %2098 = vmatpush3.bf16.msra.mxu0 %v419_v3 }
  0x13   : > { %2250 = vmatprep.subr.msk.bf16.mxu0 %vm2424_vm5, %v2337_v11 }
  0x15   : > { %2100 = vmatmul.mubr.msk.bf16.vlgmr.msra.gmra.mrb[0].mxu0 %vm407_vm2, %v2315_v1  ;;  %1109 = vperm.xlu0 %2313, %v1105_v25   ;;  %v2320_v1 = vld [vmem:[%s2658_s4 + $0x10] sm:$0xff]  }
  0x16   : > { %2103 = vmatprep.mubr.msk.bf16.mxu0 %vm2336_vm0, %v2335_v0  ;;  %2252 = vmatpush3.bf16.msk.msra.mxu0 %vm2424_vm5, %v2337_v11 }
  0x17   : > { %2254 = vmatprep.subr.msk.bf16.mxu0 %vm2440_vm8, %v2337_v11  ;;  %1114 = vperm.xlu1 %2314, %v1106_v26  }
  0x19   : > { %1466 = vperm.xlu0 %2313, %v2004_v27  }
  0x1b   : > { %1471 = vperm.xlu1 %2314, %v2005_v28  }
  0x1d   : > { %2104 = vmatmul.mubr.msk.bf16.gmra.mrb[4].mxu0 %vm407_vm2, %v2316_v4  ;;  %1481 = vperm.xlu0 %2313, %v2006_v29  }
  0x1e   : > { %2107 = vmatprep.mubr.msk.bf16.mxu0 %vm2336_vm0, %v2335_v0 }
  0x1f   : > { %1486 = vperm.xlu1 %2314, %v2007_v30  }
  0x21   : > { %1836 = vperm.xlu0 %2313, %v1832_v31  }
  0x23   : > { %1841 = vperm.xlu1 %2314, %v1833_v32  }
  0x25   : > { %2108 = vmatmul.mubr.msk.bf16.gmra.mrb[8].mxu0 %vm407_vm2, %v2317_v5  ;;  %1850 = vperm.xlu0 %2313, %v1846_v33  }
  0x27   : > { %1855 = vperm.xlu1 %2314, %v1847_v34  }
  0x88   : > { %v729_v47 = vpop.permute.xlu0 %728  ;;  %v743_v48 = vpop.permute.xlu1 %742 }
  0x8c   : > { %v734_v49 = vpop.permute.xlu0 %733  ;;  %v748_v53 = vpop.permute.xlu1 %747 }
  0x90   : > { %v1101_v18 = vpop.permute.xlu1 %1100  ;;  %v1096_v19 = vpop.permute.xlu0 %1095 }
  0x94   : > { %v1110_v25 = vpop.permute.xlu0 %1109 }
  0x96   : > { %v1115_v23 = vpop.permute.xlu1 %1114 }
  0xe8   : > { %v455_v35 = vpop.f32.mrb[0].mxu0 }
  0xe9   : > { %v2101_v36 = vpop.f32.mrb[1].mxu0 }
  0xea   : > { %v458_v37 = vpop.f32.mrb[2].mxu0  ;;  %v2322_v36 = vld [vmem:[%s2658_s4 + $0x20] sm:$0xff]  }
  0xeb   : > { %v2102_v38 = vpop.f32.mrb[3].mxu0 }
  0xf0   : > { %v463_v39 = vpop.f32.mrb[4].mxu0 }
  0xf1   : > { %v2105_v40 = vpop.f32.mrb[5].mxu0  ;;  %2115 = vmatprep.mubr.msk.f32.mxu1 %vm478_vm12, %v463_v39 }
  0xf2   : > { %v466_v41 = vpop.f32.mrb[6].mxu0 }
  0xf3   : > { %v2106_v42 = vpop.f32.mrb[7].mxu0  ;;  %2116 = vmatmul.mubr.msk.f32.vlgmr.msra.gmra.mrb[0].mxu1 %vm478_vm12, %v466_v41 }
  0xf4   : > { %2244 = vmatpush3.bf16.msk.msra.mxu1 %vm2440_vm8, %v2337_v11  ;;  %2122 = vmatprep.mubr.msk.f32.mxu1 %vm478_vm12, %v455_v35  ;;  %v2321_v35 = vld [vmem:[%s2658_s4 + $0x18] sm:$0xff]  }
  0xf5   : > { %2246 = vmatprep.subr.msk.bf16.mxu1 %vm2450_vm11, %v2337_v11 }
  0xf8   : > { %v471_v43 = vpop.f32.mrb[8].mxu0 }
  0xf9   : > { %v2109_v44 = vpop.f32.mrb[9].mxu0 }
  0xfa   : > { %v474_v45 = vpop.f32.mrb[10].mxu0 }
  0xfb   : > { %2123 = vmatmul.mubr.msk.f32.vlgmr.msra.gmra.mrb[0].mxu1 %vm478_vm12, %v458_v37  ;;  %v2110_v46 = vpop.f32.mrb[11].mxu0  ;;  %v2323_v37 = vld [vmem:[%s2658_s4 + $0x28] sm:$0xff]  }
  0xfc   : > { %2248 = vmatpush3.bf16.msk.msra.mxu1 %vm2450_vm11, %v2337_v11  ;;  %2129 = vmatprep.mubr.msk.f32.mxu1 %vm478_vm12, %v471_v43 }
  0xfd   : > { %2132 = vmatprep.subr.bf16.mxu1 %v2335_v0 }
 0x103   : > { %2130 = vmatmul.mubr.msk.f32.vlgmr.msra.gmra.mrb[0].mxu1 %vm478_vm12, %v474_v45 }
 0x104   : > { %2134 = vmatprep.mubr.msk.bf16.mxu1 %vm2336_vm0, %v2335_v0 }
 0x1d6   : > { %v2131_v50 = vpop.f32.mrb[0].mxu1 }
 0x1d7   : > { %v737_v51 = vmul.f32 %v2131_v50, %v734_v49  ;;  %v713_v52 = vpop.f32.mrb[1].mxu1  ;;  %v1472_v49 = vpop.permute.xlu1 %1471 }
 0x1d8   : > { %v736_v54 = vmul.f32 %v729_v47, %v713_v52  ;;  %v1467_v50 = vpop.permute.xlu0 %1466 }
 0x1d9   : > { %v751_v55 = vadd.f32 %v748_v53, %v737_v51 }
 0x1da   : > { %v750_v56 = vadd.f32 %v743_v48, %v736_v54 }
 0x1db   : > { %vm753_vm13 = vcmp.ge.f32.partialorder %v751_v55, 0.0  ;;  %v755_v57 = vmul.f32 0.2, %v751_v55  ;;  %v1487_v54 = vpop.permute.xlu1 %1486 }
 0x1dc   : > { %vm752_vm14 = vcmp.ge.f32.partialorder %v750_v56, 0.0  ;;  %v754_v58 = vmul.f32 0.2, %v750_v56 }
 0x1dd   : > { %v2520_v59 = vsel %vm753_vm13, %v751_v55, %v755_v57 }
 0x1de   : > { %v2522_v60 = vsel %vm752_vm14, %v750_v56, %v754_v58  ;;  %v1482_v56 = vpop.permute.xlu0 %1481 }
 0x1df   : > { %v764_v61 = vpack.c.bf16 %v2520_v59, %v2522_v60  ;;  %v1842_v14 = vpop.permute.xlu1 %1841 }
 0x1e1   : > { %2133 = vmatpush3.bf16.msra.mxu1 %v764_v61 }
 0x1e2   : > { %2262 = vmatprep.subr.msk.bf16.mxu1 %vm2424_vm5, %v2337_v11 }
 0x1e4   : > { %2135 = vmatmul.mubr.msk.bf16.vlgmr.msra.gmra.mrb[4].mxu1 %vm478_vm12, %v2318_v62 }
 0x1e5   : > { %2138 = vmatprep.mubr.msk.bf16.mxu1 %vm2336_vm0, %v2335_v0  ;;  %2264 = vmatpush3.bf16.msk.msra.mxu1 %vm2424_vm5, %v2337_v11 }
 0x1e6   : > { %2266 = vmatprep.subr.msk.bf16.mxu1 %vm2440_vm8, %v2337_v11 }
 0x1ec   : > { %2139 = vmatmul.mubr.msk.bf16.gmra.mrb[8].mxu1 %vm478_vm12, %v2319_v63 }
 0x1ed   : > { %2142 = vmatprep.mubr.msk.bf16.mxu1 %vm2336_vm0, %v2335_v0 }
 0x1f4   : > { %2143 = vmatmul.mubr.msk.bf16.gmra.mrb[12].mxu1 %vm478_vm12, %v2320_v1 }
 0x2b7   : > { %v823_v2 = vpop.f32.mrb[4].mxu1 }
 0x2b8   : > { %v2136_v3 = vpop.f32.mrb[5].mxu1 }
 0x2b9   : > { %v826_v4 = vpop.f32.mrb[6].mxu1 }
 0x2ba   : > { %v2137_v5 = vpop.f32.mrb[7].mxu1 }
 0x2bb   : > { %v2324_v5 = vld [vmem:[%s2661_s7] sm:$0xff]  }
 0x2bf   : > { %v831_v6 = vpop.f32.mrb[8].mxu1 }
 0x2c0   : > { %v2140_v7 = vpop.f32.mrb[9].mxu1  ;;  %2150 = vmatprep.mubr.msk.f32.mxu0 %vm478_vm12, %v831_v6  ;;  %v2325_v6 = vld [vmem:[%s2661_s7 + $0x8] sm:$0xff]  }
 0x2c1   : > { %v834_v8 = vpop.f32.mrb[10].mxu1  ;;  %v2326_v7 = vld [vmem:[%s2661_s7 + $0x10] sm:$0xff]  }
 0x2c2   : > { %v2141_v9 = vpop.f32.mrb[11].mxu1  ;;  %2151 = vmatmul.mubr.msk.f32.vlgmr.msra.gmra.mrb[12].mxu0 %vm478_vm12, %v834_v8 }
 0x2c3   : > { %2256 = vmatpush3.bf16.msk.msra.mxu0 %vm2440_vm8, %v2337_v11  ;;  %2157 = vmatprep.mubr.msk.f32.mxu0 %vm478_vm12, %v823_v2 }
 0x2c4   : > { %2258 = vmatprep.subr.msk.bf16.mxu0 %vm2450_vm11, %v2337_v11 }
 0x2c7   : > { %v839_v12 = vpop.f32.mrb[12].mxu1 }
 0x2c8   : > { %v2144_v13 = vpop.f32.mrb[13].mxu1 }
 0x2c9   : > { %v842_v15 = vpop.f32.mrb[14].mxu1 }
 0x2ca   : > { %2158 = vmatmul.mubr.msk.f32.vlgmr.msra.gmra.mrb[12].mxu0 %vm478_vm12, %v826_v4  ;;  %v2145_v16 = vpop.f32.mrb[15].mxu1 }
 0x2cb   : > { %2260 = vmatpush3.bf16.msk.msra.mxu0 %vm2450_vm11, %v2337_v11  ;;  %2164 = vmatprep.mubr.msk.f32.mxu0 %vm478_vm12, %v839_v12 }
 0x2cc   : > { %2167 = vmatprep.subr.bf16.mxu0 %v2335_v0 }
 0x2d2   : > { %2165 = vmatmul.mubr.msk.f32.vlgmr.msra.gmra.mrb[12].mxu0 %vm478_vm12, %v842_v15 }
 0x2d3   : > { %2169 = vmatprep.mubr.msk.bf16.mxu0 %vm2336_vm0, %v2335_v0 }
 0x3a5   : > { %v2166_v20 = vpop.f32.mrb[12].mxu0 }
 0x3a6   : > { %v1104_v21 = vmul.f32 %v2166_v20, %v1101_v18  ;;  %v1080_v22 = vpop.f32.mrb[13].mxu0 }
 0x3a7   : > { %v1103_v24 = vmul.f32 %v1096_v19, %v1080_v22 }
 0x3a8   : > { %v1118_v26 = vadd.f32 %v1115_v23, %v1104_v21  ;;  %v1837_v23 = vpop.permute.xlu0 %1836 }
 0x3a9   : > { %v1117_v27 = vadd.f32 %v1110_v25, %v1103_v24 }
 0x3aa   : > { %v1120_v28 = vadd.f32 %v1118_v26, %v2520_v59 }
 0x3ab   : > { %v1119_v29 = vadd.f32 %v1117_v27, %v2522_v60  ;;  %v1856_v27 = vpop.permute.xlu1 %1855 }
 0x3ac   : > { %vm1122_vm15 = vcmp.ge.f32.partialorder %v1120_v28, 0.0  ;;  %v1124_v30 = vmul.f32 0.2, %v1120_v28 }
 0x3ad   : > { %vm1121_vm1 = vcmp.ge.f32.partialorder %v1119_v29, 0.0  ;;  %v1123_v31 = vmul.f32 0.2, %v1119_v29 }
 0x3ae   : > { %v1126_v32 = vsel %vm1122_vm15, %v1120_v28, %v1124_v30 }
 0x3af   : > { %v1125_v33 = vsel %vm1121_vm1, %v1119_v29, %v1123_v31  ;;  %v1851_v29 = vpop.permute.xlu0 %1850 }
 0x3b0   : > { %v1134_v34 = vpack.c.bf16 %v1126_v32, %v1125_v33 }
 0x3b2   : > { %2168 = vmatpush3.bf16.msra.mxu0 %v1134_v34 }
 0x3b3   : > { %2274 = vmatprep.subr.msk.bf16.mxu0 %vm2424_vm5, %v2337_v11 }
 0x3b5   : > { %2170 = vmatmul.mubr.msk.bf16.vlgmr.msra.gmra.mrb[16].mxu0 %vm478_vm12, %v2321_v35 }
 0x3b6   : > { %2173 = vmatprep.mubr.msk.bf16.mxu0 %vm2336_vm0, %v2335_v0  ;;  %2276 = vmatpush3.bf16.msk.msra.mxu0 %vm2424_vm5, %v2337_v11 }
 0x3b7   : > { %2278 = vmatprep.subr.msk.bf16.mxu0 %vm2440_vm8, %v2337_v11 }
 0x3bd   : > { %2174 = vmatmul.mubr.msk.bf16.gmra.mrb[20].mxu0 %vm478_vm12, %v2322_v36 }
 0x3be   : > { %2177 = vmatprep.mubr.msk.bf16.mxu0 %vm2336_vm0, %v2335_v0 }
 0x3c5   : > { %2178 = vmatmul.mubr.msk.bf16.gmra.mrb[24].mxu0 %vm478_vm12, %v2323_v37 }
 0x488   : > { %v1193_v10 = vpop.f32.mrb[16].mxu0 }
 0x489   : > { %v2171_v38 = vpop.f32.mrb[17].mxu0 }
 0x48a   : > { %v1196_v39 = vpop.f32.mrb[18].mxu0 }
 0x48b   : > { %v2172_v40 = vpop.f32.mrb[19].mxu0 }
 0x490   : > { %v1201_v41 = vpop.f32.mrb[20].mxu0 }
 0x491   : > { %v2175_v42 = vpop.f32.mrb[21].mxu0  ;;  %2185 = vmatprep.mubr.msk.f32.mxu1 %vm478_vm12, %v1201_v41 }
 0x492   : > { %v1204_v43 = vpop.f32.mrb[22].mxu0 }
 0x493   : > { %v2176_v44 = vpop.f32.mrb[23].mxu0  ;;  %2186 = vmatmul.mubr.msk.f32.vlgmr.msra.gmra.mrb[2].mxu1 %vm478_vm12, %v1204_v43 }
 0x494   : > { %2268 = vmatpush3.bf16.msk.msra.mxu1 %vm2440_vm8, %v2337_v11  ;;  %2192 = vmatprep.mubr.msk.f32.mxu1 %vm478_vm12, %v1193_v10 }
 0x495   : > { %2270 = vmatprep.subr.msk.bf16.mxu1 %vm2450_vm11, %v2337_v11 }
 0x498   : > { %v1209_v45 = vpop.f32.mrb[24].mxu0 }
 0x499   : > { %v2179_v46 = vpop.f32.mrb[25].mxu0 }
 0x49a   : > { %v1212_v47 = vpop.f32.mrb[26].mxu0 }
 0x49b   : > { %2193 = vmatmul.mubr.msk.f32.vlgmr.msra.gmra.mrb[2].mxu1 %vm478_vm12, %v1196_v39  ;;  %v2180_v48 = vpop.f32.mrb[27].mxu0 }
 0x49c   : > { %2272 = vmatpush3.bf16.msk.msra.mxu1 %vm2450_vm11, %v2337_v11  ;;  %2199 = vmatprep.mubr.msk.f32.mxu1 %vm478_vm12, %v1209_v45 }
 0x49d   : > { %2202 = vmatprep.subr.bf16.mxu1 %v2335_v0 }
 0x4a3   : > { %2200 = vmatmul.mubr.msk.f32.vlgmr.msra.gmra.mrb[2].mxu1 %vm478_vm12, %v1212_v47 }
 0x4a4   : > { %2204 = vmatprep.mubr.msk.bf16.mxu1 %vm2336_vm0, %v2335_v0 }
 0x576   : > { %v2201_v51 = vpop.f32.mrb[2].mxu1 }
 0x577   : > { %v1475_v52 = vmul.f32 %v2201_v51, %v1472_v49  ;;  %v1450_v53 = vpop.f32.mrb[3].mxu1 }
 0x578   : > { %v1474_v55 = vmul.f32 %v1467_v50, %v1450_v53 }
 0x579   : > { %v1490_v57 = vadd.f32 %v1487_v54, %v1475_v52 }
 0x57a   : > { %v1489_v58 = vadd.f32 %v1482_v56, %v1474_v55 }
 0x57b   : > { %v1492_v61 = vadd.f32 %v1490_v57, %v1126_v32 }
 0x57c   : > { %v1491_v62 = vadd.f32 %v1489_v58, %v1125_v33 }
 0x57d   : > { %vm1494_vm2 = vcmp.ge.f32.partialorder %v1492_v61, 0.0  ;;  %v1496_v63 = vmul.f32 0.2, %v1492_v61 }
 0x57e   : > { %vm1493_vm3 = vcmp.ge.f32.partialorder %v1491_v62, 0.0  ;;  %v1495_v1 = vmul.f32 0.2, %v1491_v62 }
 0x57f   : > { %v1498_v2 = vsel %vm1494_vm2, %v1492_v61, %v1496_v63 }
 0x580   : > { %v1497_v3 = vsel %vm1493_vm3, %v1491_v62, %v1495_v1 }
 0x581   : > { %v1505_v4 = vpack.c.bf16 %v1498_v2, %v1497_v3 }
 0x583   : > { %2203 = vmatpush3.bf16.msra.mxu1 %v1505_v4 }
 0x586   : > { %2205 = vmatmul.mubr.msk.bf16.vlgmr.msra.gmra.mrb[16].mxu1 %vm478_vm12, %v2324_v5 }
 0x587   : > { %2208 = vmatprep.mubr.msk.bf16.mxu1 %vm2336_vm0, %v2335_v0 }
 0x58e   : > { %2209 = vmatmul.mubr.msk.bf16.gmra.mrb[20].mxu1 %vm478_vm12, %v2325_v6 }
 0x58f   : > { %2212 = vmatprep.mubr.msk.bf16.mxu1 %vm2336_vm0, %v2335_v0  ;;  %vm1872_vm0 = vcmask 125952  }
 0x596   : > { %2213 = vmatmul.mubr.msk.bf16.gmra.mrb[24].mxu1 %vm478_vm12, %v2326_v7 }
 0x659   : > { %v1564_v8 = vpop.f32.mrb[16].mxu1 }
 0x65a   : > { %v2206_v9 = vpop.f32.mrb[17].mxu1 }
 0x65b   : > { %v1567_v12 = vpop.f32.mrb[18].mxu1 }
 0x65c   : > { %v2207_v13 = vpop.f32.mrb[19].mxu1 }
 0x661   : > { %v1572_v15 = vpop.f32.mrb[20].mxu1 }
 0x662   : > { %v2210_v16 = vpop.f32.mrb[21].mxu1  ;;  %2220 = vmatprep.mubr.msk.f32.mxu0 %vm478_vm12, %v1572_v15 }
 0x663   : > { %v1575_v18 = vpop.f32.mrb[22].mxu1 }
 0x664   : > { %v2211_v19 = vpop.f32.mrb[23].mxu1  ;;  %2221 = vmatmul.mubr.msk.f32.vlgmr.msra.gmra.mrb[14].mxu0 %vm478_vm12, %v1575_v18 }
 0x665   : > { %2280 = vmatpush3.bf16.msk.msra.mxu0 %vm2440_vm8, %v2337_v11  ;;  %2227 = vmatprep.mubr.msk.f32.mxu0 %vm478_vm12, %v1564_v8 }
 0x666   : > { %2282 = vmatprep.subr.msk.bf16.mxu0 %vm2450_vm11, %v2337_v11 }
 0x669   : > { %v1580_v0 = vpop.f32.mrb[24].mxu1 }
 0x66a   : > { %v2214_v20 = vpop.f32.mrb[25].mxu1 }
 0x66b   : > { %v1583_v21 = vpop.f32.mrb[26].mxu1 }
 0x66c   : > { %2228 = vmatmul.mubr.msk.f32.vlgmr.msra.gmra.mrb[14].mxu0 %vm478_vm12, %v1567_v12  ;;  %v2215_v22 = vpop.f32.mrb[27].mxu1 }
 0x66d   : > { %2284 = vmatpush3.bf16.msk.msra.mxu0 %vm2450_vm11, %v2337_v11  ;;  %2234 = vmatprep.mubr.msk.f32.mxu0 %vm478_vm12, %v1580_v0 }
 0x674   : > { %2235 = vmatmul.mubr.msk.f32.vlgmr.msra.gmra.mrb[14].mxu0 %vm478_vm12, %v1583_v21 }
 0x747   : > { %v2236_v24 = vpop.f32.mrb[14].mxu0 }
 0x748   : > { %v1845_v25 = vmul.f32 %v2236_v24, %v1842_v14  ;;  %v1821_v26 = vpop.f32.mrb[15].mxu0 }
 0x749   : > { %v1844_v28 = vmul.f32 %v1837_v23, %v1821_v26 }
 0x74a   : > { %v1859_v30 = vadd.f32 %v1856_v27, %v1845_v25 }
 0x74b   : > { %v1858_v31 = vadd.f32 %v1851_v29, %v1844_v28 }
 0x74c   : > { %v1861_v32 = vadd.f32 %v1859_v30, %v2520_v59 }
 0x74d   : > { %v1860_v17 = vadd.f32 %v1858_v31, %v2522_v60 }
 0x74e   : > { %v1863_v11 = vmax.f32 %v1861_v32, 0.0 }
 0x74f   : > { %v1862_v33 = vmax.f32 %v1860_v17, 0.0 }
 0x750   : > { %v2032_v34 = vpack.c.bf16 %v1863_v11, %v1863_v11 }
 0x751   : > { %v2031_v35 = vpack.c.bf16 %v1862_v33, %v1862_v33 }
 0x752   : > { %1874 = vst.msk [vmem:[%s356_s24 + $0x4] sm:$0xf] %vm1872_vm0, %v2032_v34 }
 0x753   : > { %1873 = vst.msk [vmem:[%s356_s24] sm:$0xf] %vm1872_vm0, %v2031_v35 }
 0x754 PF: > { %s20_s13 = sadd.s32 1, %s2333_s13  }
 0x755   : > { %p17_p4 = scmp.ge.s32.totalorder %s20_s13, 4  }
 0x757   :  { %19 = sbr.rel (!%p17_p4) target bundleno = 1 (0x1), region = 93 }

// kernel: vqvae_forward.8
= control target key start
LH: loop header
LB: loop body
LE: loop exit
PB: predicated region body
PF: predicated region fallthrough
CT: control target
= control target key end

     0   :  { %s4107_s21 = smov 0   ;;  %s4628_s0 = inlined_call_operand.vmem [shape: bf16[2,16,16], index: 0, kind: input, shape index: {}]   ;;  %s4629_s1 = inlined_call_operand.vmem [shape: bf16[128,16], index: 1, kind: input, shape index: {}]   ;;  %s4630_s2 = inlined_call_operand.vmem [shape: f32[32,1], index: 2, kind: input, shape index: {}]   ;;  %s4631_s3 = inlined_call_operand.vmem [shape: f32[32,1], index: 3, kind: input, shape index: {}]   ;;  %s4632_s4 = inlined_call_operand.vmem [shape: bf16[128,16], index: 4, kind: input, shape index: {}]   ;;  %s4633_s5 = inlined_call_operand.vmem [shape: f32[32,1], index: 5, kind: input, shape index: {}]   ;;  %s4634_s6 = inlined_call_operand.vmem [shape: bf16[2,96,32], index: 6, kind: input, shape index: {}]   ;;  %s4635_s7 = inlined_call_operand.vmem [shape: f32[2,32,1], index: 7, kind: input, shape index: {}]   ;;  %s4636_s8 = inlined_call_operand.vmem [shape: f32[2,32,1], index: 8, kind: input, shape index: {}]   ;;  %s4637_s9 = inlined_call_operand.vmem [shape: bf16[96,32], index: 9, kind: input, shape index: {}]   ;;  %s4638_s10 = inlined_call_operand.vmem [shape: f32[32,1], index: 10, kind: input, shape index: {}]   ;;  %s4639_s11 = inlined_call_operand.vmem [shape: f32[32,1], index: 11, kind: input, shape index: {}]   ;;  %s4640_s12 = inlined_call_operand.vmem [shape: bf16[2,32,8], index: 12, kind: output, shape index: {}]  }
   0x1 LB: > { %s3318_s22 = sadd.s32 4294967295, %s4037_s21   ;;  %p3322_p0 = scmp.ge.s32.totalorder %s4037_s21, 1  ;;  %s4037_s21 = sphi %s4107_s21, %s22_s21  }
   0x2   : > { %p362_p1 = scmp.lt.s32.totalorder %s4037_s21, 3 }
   0x4   : > { %p363_p2 = pnand %p3322_p0, %p362_p1 }
   0x5   : > { %p404_p3 = scmp.lt.s32.totalorder (!%p363_p2), %s3318_s22, 1  ;;  %v3997_v0 = vld [vmem:[%s4629_s1] sm:$0xff] (!%p363_p2)   ;;  %vm515_vm0 = vcmask (!%p363_p2), 130048   ;;  %v3998_v2 = vld [vmem:[%s4629_s1 + $0x8] sm:$0xff] (!%p363_p2)   ;;  %v3999_v3 = vld [vmem:[%s4629_s1 + $0x10] sm:$0xff] (!%p363_p2)   ;;  %v417_v17 = vlaneseq (!%p363_p2)  ;;  %v4040_v33 = vmov (!%p363_p2), 0  }
   0x6   : > { %366 = sbr.rel (%p363_p2) target bundleno = 1939 (0x793), region = 68  ;;  %3669 = vmatprep.mubr.msk.bf16.mxu0 (!%p363_p2), %vm515_vm0, %v3997_v0  ;;  %v4000_v4 = vld [vmem:[%s4629_s1 + $0x18] sm:$0xff] (!%p363_p2)   ;;  %v4001_v5 = vld [vmem:[%s4629_s1 + $0x20] sm:$0xff] (!%p363_p2)   ;;  %v4002_v6 = vld [vmem:[%s4629_s1 + $0x28] sm:$0xff] (!%p363_p2)   ;;  %v4039_v23 = vmov (!%p363_p2), 1.0|1.0   ;;  %3995 = vset.pattern.permute.xlu1 (!%p363_p2), %v4040_v33 }
   0x7   : > { %v4003_v7 = vld [vmem:[%s4629_s1 + $0x30] sm:$0xff] (!%p363_p2)   ;;  %v4004_v8 = vld [vmem:[%s4629_s1 + $0x38] sm:$0xff] (!%p363_p2)   ;;  %v4005_v9 = vld [vmem:[%s4632_s4] sm:$0xff] (!%p363_p2)   ;;  %v4185_v18 = vshrl.u32 (!%p363_p2), %v417_v17, 7  ;;  %v4187_v19 = vand.u32 (!%p363_p2), 127, %v417_v17  ;;  %3994 = vset.pattern.permute.xlu0 (!%p363_p2), %v4040_v33  ;;  %vm1759_vm13 = vcmask (!%p363_p2), 261120  }
   0x8   : > { %v4006_v10 = vld [vmem:[%s4632_s4 + $0x8] sm:$0xff] (!%p363_p2)   ;;  %v4007_v11 = vld [vmem:[%s4632_s4 + $0x10] sm:$0xff] (!%p363_p2)   ;;  %v4008_v12 = vld [vmem:[%s4632_s4 + $0x18] sm:$0xff] (!%p363_p2)  }
   0x9   : > { %v4009_v13 = vld [vmem:[%s4632_s4 + $0x20] sm:$0xff] (!%p363_p2)   ;;  %v4010_v14 = vld [vmem:[%s4632_s4 + $0x28] sm:$0xff] (!%p363_p2)   ;;  %v4011_v15 = vld [vmem:[%s4632_s4 + $0x30] sm:$0xff] (!%p363_p2)   ;;  %v419_v20 = vadd.s32 (!%p363_p2), 8, %v4185_v18  ;;  %v424_v21 = vmul.u32 (!%p363_p2), 2, %v4187_v19  ;;  %v4203_v24 = vadd.s32 (!%p363_p2), 1, %v4185_v18 }
   0xa   : > { %v4012_v16 = vld [vmem:[%s4632_s4 + $0x38] sm:$0xff] (!%p363_p2)   ;;  %v4214_v27 = vadd.s32 (!%p363_p2), 4294967295, %v4185_v18  ;;  %v445_v30 = vadd.s32 (!%p363_p2), 4294967294, %v4185_v18  ;;  %v1061_v34 = vld [vmem:[%s4631_s3] sm:$0xff] (!%p363_p2)  ;;  %v1062_v36 = vld [vmem:[%s4631_s3 + $0x8] sm:$0xff] (!%p363_p2) }
   0xb   : > { %vm431_vm1 = vcmp.eq.s32.totalorder (!%p363_p2), %v4185_v18, %v424_v21  ;;  %vm432_vm2 = vcmp.eq.s32.totalorder (!%p363_p2), %v419_v20, %v424_v21  ;;  %v423_v25 = vadd.s32 (!%p363_p2), 1, %v419_v20  ;;  %vm425_vm4 = vcmp.eq.s32.totalorder (!%p363_p2), %v4203_v24, %v424_v21  ;;  %v1033_v35 = vld [vmem:[%s4630_s2] sm:$0xff] (!%p363_p2)  ;;  %1067 = vperm.xlu1 (!%p363_p2), %3995, %v1061_v34   ;;  %v1034_v37 = vld [vmem:[%s4630_s2 + $0x8] sm:$0xff] (!%p363_p2)  ;;  %v1036_v40 = vld [vmem:[%s4630_s2 + $0x18] sm:$0xff] (!%p363_p2) }
   0xc   : > { %vm4192_vm3 = vmpackc.low (!%p363_p2), %vm432_vm2, %vm431_vm1  ;;  %v438_v28 = vadd.s32 (!%p363_p2), 4294967295, %v419_v20  ;;  %vm439_vm7 = vcmp.eq.s32.totalorder (!%p363_p2), %v4214_v27, %v424_v21  ;;  %v446_v31 = vadd.s32 (!%p363_p2), 4294967294, %v419_v20  ;;  %vm447_vm10 = vcmp.eq.s32.totalorder (!%p363_p2), %v445_v30, %v424_v21  ;;  %1039 = vperm.xlu0 (!%p363_p2), %3994, %v1033_v35   ;;  %v1663_v38 = vld [vmem:[%s4633_s5 + $0x8] sm:$0xff] (!%p363_p2)  ;;  %v1662_v39 = vld [vmem:[%s4633_s5] sm:$0xff] (!%p363_p2) }
   0xd   : > { %s4656_s22 = smov (!%p404_p3, %s3318_s22), 1  ;;  %3904 = vmatprep.subr.msk.bf16.mxu1 %vm4192_vm3, %v4039_v23  ;;  %vm426_vm5 = vcmp.eq.s32.totalorder %v423_v25, %v424_v21  ;;  %v1035_v41 = vld [vmem:[%s4630_s2 + $0x10] sm:$0xff]  ;;  %v1064_v42 = vld [vmem:[%s4631_s3 + $0x18] sm:$0xff]  ;;  %v2156_v46 = vld [vmem:[%s4635_s7 + $0x8] sm:$0xff]  ;;  %vm4443_vm2 = vcmp.eq.s32.totalorder %v4185_v18, %v4187_v19 }
   0xe   : > { %s3526_s25 = sshll.u32 %s4656_s22, 3  ;;  %3906 = vmatpush3.bf16.msk.msra.mxu1 %vm4192_vm3, %v4039_v23  ;;  %vm4206_vm6 = vmpackc.low %vm426_vm5, %vm425_vm4  ;;  %vm440_vm8 = vcmp.eq.s32.totalorder %v438_v28, %v424_v21  ;;  %vm448_vm11 = vcmp.eq.s32.totalorder %v446_v31, %v424_v21  ;;  %v1063_v43 = vld [vmem:[%s4631_s3 + $0x10] sm:$0xff]  ;;  %v1665_v44 = vld [vmem:[%s4633_s5 + $0x18] sm:$0xff]  ;;  %vm1859_vm4 = vcmask 64512   ;;  %vm4465_vm5 = vcmp.eq.s32.totalorder %v4214_v27, %v4187_v19  ;;  %s3527_s23 = sshll.u32 %s4656_s22, 4 }
   0xf   : > { %s408_s28 = scalar_lea.vmem %s4628_s0, %s3526_s25  ;;  %3908 = vmatprep.subr.msk.bf16.mxu1 %vm4206_vm6, %v4039_v23  ;;  %vm4217_vm9 = vmpackc.low %vm440_vm8, %vm439_vm7  ;;  %1072 = vperm.xlu1 %3995, %v1062_v36   ;;  %v1664_v45 = vld [vmem:[%s4633_s5 + $0x10] sm:$0xff]  ;;  %v2155_v47 = vld [vmem:[%s4635_s7] sm:$0xff]  ;;  %s413_s26 = scalar_lea.vmem %s4640_s12, %s3527_s23 }
  0x10   : > { %v3996_v1 = vld [vmem:[%s408_s28] sm:$0xff]   ;;  %vm4222_vm12 = vmpackc.low %vm448_vm11, %vm447_vm10  ;;  %1044 = vperm.xlu0 %3994, %v1034_v37   ;;  %v2184_v48 = vld [vmem:[%s4636_s8 + $0x8] sm:$0xff] }
  0x11   : > { %3667 = vmatprep.subr.bf16.mxu0 %v3996_v1  ;;  %v2183_v49 = vld [vmem:[%s4636_s8] sm:$0xff]  ;;  %v2158_v50 = vld [vmem:[%s4635_s7 + $0x18] sm:$0xff]  ;;  %v2157_v51 = vld [vmem:[%s4635_s7 + $0x10] sm:$0xff] }
  0x12   : > { %3668 = vmatpush3.bf16.msra.mxu0 %v3996_v1  ;;  %v2186_v52 = vld [vmem:[%s4636_s8 + $0x18] sm:$0xff]  ;;  %v2185_v53 = vld [vmem:[%s4636_s8 + $0x10] sm:$0xff]  ;;  %v3486_v54 = vld [vmem:[%s4635_s7 + $0x28] sm:$0xff] }
  0x13   : > { %3725 = vmatprep.subr.bf16.mxu0 %v3996_v1  ;;  %1673 = vperm.xlu1 %3995, %v1663_v38   ;;  %v3485_v55 = vld [vmem:[%s4635_s7 + $0x20] sm:$0xff]  ;;  %v3490_v56 = vld [vmem:[%s4636_s8 + $0x28] sm:$0xff]  ;;  %v3488_v58 = vld [vmem:[%s4635_s7 + $0x38] sm:$0xff] }
  0x14   : > { %1668 = vperm.xlu0 %3994, %v1662_v39   ;;  %v3489_v57 = vld [vmem:[%s4636_s8 + $0x20] sm:$0xff]  ;;  %v3487_v59 = vld [vmem:[%s4635_s7 + $0x30] sm:$0xff]  ;;  %v3492_v60 = vld [vmem:[%s4636_s8 + $0x38] sm:$0xff] }
  0x15   : > { %3670 = vmatmul.mubr.msk.bf16.vlgmr.msra.gmra.mrb[0].mxu0 %vm515_vm0, %v3998_v2  ;;  %v3491_v61 = vld [vmem:[%s4636_s8 + $0x30] sm:$0xff]  ;;  %v3179_v62 = vld [vmem:[%s4638_s10 + $0x8] sm:$0xff]  ;;  %v3178_v63 = vld [vmem:[%s4638_s10] sm:$0xff] }
  0x16   : > { %3673 = vmatprep.mubr.msk.bf16.mxu0 %vm515_vm0, %v3999_v3  ;;  %3726 = vmatpush3.bf16.msra.mxu0 %v3996_v1  ;;  %v3181_v0 = vld [vmem:[%s4638_s10 + $0x18] sm:$0xff]  ;;  %v3180_v1 = vld [vmem:[%s4638_s10 + $0x10] sm:$0xff]  ;;  %v4013_v29 = vld [vmem:[%s4634_s6] sm:$0xff]  }
  0x17   : > { %1054 = vperm.xlu1 %3995, %v1036_v40  }
  0x18   : > { %1049 = vperm.xlu0 %3994, %v1035_v41  }
  0x1b   : > { %1082 = vperm.xlu1 %3995, %v1064_v42  }
  0x1c   : > { %1077 = vperm.xlu0 %3994, %v1063_v43  }
  0x1d   : > { %3674 = vmatmul.mubr.msk.bf16.gmra.mrb[4].mxu0 %vm515_vm0, %v4000_v4 }
  0x1e   : > { %3677 = vmatprep.mubr.msk.bf16.mxu0 %vm515_vm0, %v4001_v5  ;;  %v3207_v5 = vld [vmem:[%s4639_s11 + $0x8] sm:$0xff] }
  0x1f   : > { %1683 = vperm.xlu1 %3995, %v1665_v44  }
  0x20   : > { %1678 = vperm.xlu0 %3994, %v1664_v45  }
  0x23   : > { %2166 = vperm.xlu1 %3995, %v2156_v46  }
  0x24   : > { %2161 = vperm.xlu0 %3994, %v2155_v47  }
  0x25   : > { %3678 = vmatmul.mubr.msk.bf16.gmra.mrb[8].mxu0 %vm515_vm0, %v4002_v6  ;;  %v3206_v6 = vld [vmem:[%s4639_s11] sm:$0xff] }
  0x26   : > { %3681 = vmatprep.mubr.msk.bf16.mxu0 %vm515_vm0, %v4003_v7 }
  0x27   : > { %2194 = vperm.xlu1 %3995, %v2184_v48  }
  0x28   : > { %2189 = vperm.xlu0 %3994, %v2183_v49  }
  0x2b   : > { %2176 = vperm.xlu1 %3995, %v2158_v50  }
  0x2c   : > { %2171 = vperm.xlu0 %3994, %v2157_v51  }
  0x2d   : > { %3682 = vmatmul.mubr.msk.bf16.gmra.mrb[12].mxu0 %vm515_vm0, %v4004_v8  ;;  %v3209_v8 = vld [vmem:[%s4639_s11 + $0x18] sm:$0xff] }
  0x2e   : > { %3727 = vmatprep.mubr.msk.bf16.mxu0 %vm515_vm0, %v4005_v9  ;;  %v3208_v9 = vld [vmem:[%s4639_s11 + $0x10] sm:$0xff] }
  0x2f   : > { %2204 = vperm.xlu1 %3995, %v2186_v52  }
  0x30   : > { %2199 = vperm.xlu0 %3994, %v2185_v53  }
  0x33   : > { %2678 = vperm.xlu1 %3995, %v3486_v54  }
  0x34   : > { %2673 = vperm.xlu0 %3994, %v3485_v55  }
  0x35   : > { %3728 = vmatmul.mubr.msk.bf16.vlgmr.msra.gmra.mrb[16].mxu0 %vm515_vm0, %v4006_v10 }
  0x36   : > { %3731 = vmatprep.mubr.msk.bf16.mxu0 %vm515_vm0, %v4007_v11 }
  0x37   : > { %2707 = vperm.xlu1 %3995, %v3490_v56  }
  0x38   : > { %2702 = vperm.xlu0 %3994, %v3489_v57  }
  0x3b   : > { %2688 = vperm.xlu1 %3995, %v3488_v58  }
  0x3c   : > { %2683 = vperm.xlu0 %3994, %v3487_v59  }
  0x3d   : > { %3732 = vmatmul.mubr.msk.bf16.gmra.mrb[20].mxu0 %vm515_vm0, %v4008_v12 }
  0x3e   : > { %3735 = vmatprep.mubr.msk.bf16.mxu0 %vm515_vm0, %v4009_v13 }
  0x3f   : > { %2717 = vperm.xlu1 %3995, %v3492_v60  }
  0x40   : > { %2712 = vperm.xlu0 %3994, %v3491_v61  }
  0x43   : > { %3189 = vperm.xlu1 %3995, %v3179_v62  }
  0x44   : > { %3184 = vperm.xlu0 %3994, %v3178_v63  }
  0x45   : > { %3736 = vmatmul.mubr.msk.bf16.gmra.mrb[24].mxu0 %vm515_vm0, %v4010_v14 }
  0x46   : > { %3739 = vmatprep.mubr.msk.bf16.mxu0 %vm515_vm0, %v4011_v15 }
  0x47   : > { %3199 = vperm.xlu1 %3995, %v3181_v0  }
  0x48   : > { %3194 = vperm.xlu0 %3994, %v3180_v1  }
  0x4b   : > { %3217 = vperm.xlu1 %3995, %v3207_v5  }
  0x4c   : > { %3212 = vperm.xlu0 %3994, %v3206_v6  }
  0x4d   : > { %3740 = vmatmul.mubr.msk.bf16.gmra.mrb[28].mxu0 %vm515_vm0, %v4012_v16 }
  0x4e   : > { %3787 = vmatprep.mubr.msk.bf16.mxu0 %vm1759_vm13, %v4013_v29 }
  0x4f   : > { %3227 = vperm.xlu1 %3995, %v3209_v8  }
  0x50   : > { %3222 = vperm.xlu0 %3994, %v3208_v9  }
  0x8a   : > { %v1068_v47 = vpop.permute.xlu1 %1067 }
  0x8b   : > { %v1040_v48 = vpop.permute.xlu0 %1039 }
  0x8e   : > { %v1073_v49 = vpop.permute.xlu1 %1072 }
  0x8f   : > { %v1045_v50 = vpop.permute.xlu0 %1044 }
  0x92   : > { %v1674_v51 = vpop.permute.xlu1 %1673 }
  0x93   : > { %v1669_v52 = vpop.permute.xlu0 %1668 }
  0x96   : > { %v1055_v53 = vpop.permute.xlu1 %1054 }
  0x97   : > { %v1050_v54 = vpop.permute.xlu0 %1049 }
  0x9a   : > { %v1083_v56 = vpop.permute.xlu1 %1082 }
  0x9b   : > { %v1078_v58 = vpop.permute.xlu0 %1077 }
  0xe8   : > { %v3671_v2 = vpop.f32.mrb[0].mxu0 }
  0xe9   : > { %v574_v3 = vpop.f32.mrb[1].mxu0 }
  0xea   : > { %v3672_v4 = vpop.f32.mrb[2].mxu0 }
  0xeb   : > { %v577_v7 = vpop.f32.mrb[3].mxu0 }
  0xf0   : > { %v3675_v10 = vpop.f32.mrb[4].mxu0 }
  0xf1   : > { %v590_v11 = vpop.f32.mrb[5].mxu0 }
  0xf2   : > { %v3676_v12 = vpop.f32.mrb[6].mxu0  ;;  %3689 = vmatprep.mubr.msk.f32.mxu1 %vm515_vm0, %v590_v11 }
  0xf3   : > { %v593_v13 = vpop.f32.mrb[7].mxu0 }
  0xf4   : > { %3690 = vmatmul.mubr.msk.f32.vlgmr.msra.gmra.mrb[0].mxu1 %vm515_vm0, %v593_v13 }
  0xf5   : > { %3692 = vmatprep.mubr.msk.f32.mxu1 %vm515_vm0, %v3675_v10  ;;  %3910 = vmatpush3.bf16.msk.msra.mxu1 %vm4206_vm6, %v4039_v23 }
  0xf6   : > { %3912 = vmatprep.subr.msk.bf16.mxu1 %vm4217_vm9, %v4039_v23 }
  0xf8   : > { %v3679_v14 = vpop.f32.mrb[8].mxu0  ;;  %3693 = vmatmul.mubr.msk.f32.gmra.mrb[2].mxu1 %vm515_vm0, %v3676_v12 }
  0xf9   : > { %v606_v15 = vpop.f32.mrb[9].mxu0  ;;  %3699 = vmatprep.mubr.msk.f32.mxu1 %vm515_vm0, %v574_v3 }
  0xfa   : > { %v3680_v16 = vpop.f32.mrb[10].mxu0 }
  0xfb   : > { %v609_v17 = vpop.f32.mrb[11].mxu0 }
  0xfc   : > { %3700 = vmatmul.mubr.msk.f32.vlgmr.msra.gmra.mrb[0].mxu1 %vm515_vm0, %v577_v7  ;;  %v1679_v7 = vpop.permute.xlu0 %1678 }
  0xfd   : > { %3702 = vmatprep.mubr.msk.f32.mxu1 %vm515_vm0, %v3671_v2  ;;  %3914 = vmatpush3.bf16.msk.msra.mxu1 %vm4217_vm9, %v4039_v23 }
  0xfe   : > { %3916 = vmatprep.subr.msk.bf16.mxu1 %vm4222_vm12, %v4039_v23 }
 0x100   : > { %v3683_v20 = vpop.f32.mrb[12].mxu0  ;;  %3703 = vmatmul.mubr.msk.f32.gmra.mrb[2].mxu1 %vm515_vm0, %v3672_v4  ;;  %v1684_v4 = vpop.permute.xlu1 %1683 }
 0x101   : > { %v622_v21 = vpop.f32.mrb[13].mxu0  ;;  %3709 = vmatprep.mubr.msk.f32.mxu1 %vm515_vm0, %v606_v15 }
 0x102   : > { %v3684_v25 = vpop.f32.mrb[14].mxu0 }
 0x103   : > { %v625_v28 = vpop.f32.mrb[15].mxu0 }
 0x104   : > { %3710 = vmatmul.mubr.msk.f32.vlgmr.msra.gmra.mrb[0].mxu1 %vm515_vm0, %v609_v17 }
 0x105   : > { %3712 = vmatprep.mubr.msk.f32.mxu1 %vm515_vm0, %v3679_v14  ;;  %3918 = vmatpush3.bf16.msk.msra.mxu1 %vm4222_vm12, %v4039_v23 }
 0x106   : > { %3920 = vmatprep.subr.msk.bf16.mxu1 %vm4192_vm3, %v4039_v23 }
 0x108   : > { %3713 = vmatmul.mubr.msk.f32.gmra.mrb[2].mxu1 %vm515_vm0, %v3680_v16  ;;  %v3729_v30 = vpop.f32.mrb[16].mxu0 }
 0x109   : > { %3719 = vmatprep.mubr.msk.f32.mxu1 %vm515_vm0, %v622_v21  ;;  %v1203_v31 = vpop.f32.mrb[17].mxu0 }
 0x10a   : > { %v3730_v33 = vpop.f32.mrb[18].mxu0 }
 0x10b   : > { %v1206_v34 = vpop.f32.mrb[19].mxu0 }
 0x10c   : > { %3720 = vmatmul.mubr.msk.f32.vlgmr.msra.gmra.mrb[0].mxu1 %vm515_vm0, %v625_v28 }
 0x10d   : > { %3722 = vmatprep.mubr.msk.f32.mxu1 %vm515_vm0, %v3683_v20  ;;  %3922 = vmatpush3.bf16.msk.msra.mxu1 %vm4192_vm3, %v4039_v23  ;;  %vm4455_vm3 = vcmp.eq.s32.totalorder %v4203_v24, %v4187_v19 }
 0x10e   : > { %3924 = vmatprep.subr.msk.bf16.mxu1 %vm4206_vm6, %v4039_v23 }
 0x110   : > { %3723 = vmatmul.mubr.msk.f32.gmra.mrb[2].mxu1 %vm515_vm0, %v3684_v25  ;;  %v3733_v35 = vpop.f32.mrb[20].mxu0 }
 0x111   : > { %v1219_v36 = vpop.f32.mrb[21].mxu0 }
 0x112   : > { %v3734_v37 = vpop.f32.mrb[22].mxu0  ;;  %3747 = vmatprep.mubr.msk.f32.mxu1 %vm515_vm0, %v1219_v36  ;;  %v4016_v36 = vld [vmem:[%s4634_s6 + $0x18] sm:$0xff]  }
 0x113   : > { %v1222_v38 = vpop.f32.mrb[23].mxu0 }
 0x114   : > { %3748 = vmatmul.mubr.msk.f32.vlgmr.msra.gmra.mrb[4].mxu1 %vm515_vm0, %v1222_v38  ;;  %v4018_v38 = vld [vmem:[%s4634_s6 + $0x28] sm:$0xff]  }
 0x115   : > { %3750 = vmatprep.mubr.msk.f32.mxu1 %vm515_vm0, %v3733_v35  ;;  %3926 = vmatpush3.bf16.msk.msra.mxu1 %vm4206_vm6, %v4039_v23  ;;  %v4015_v35 = vld [vmem:[%s4634_s6 + $0x10] sm:$0xff]  }
 0x116   : > { %3928 = vmatprep.subr.msk.bf16.mxu1 %vm4217_vm9, %v4039_v23 }
 0x118   : > { %3751 = vmatmul.mubr.msk.f32.gmra.mrb[6].mxu1 %vm515_vm0, %v3734_v37  ;;  %v3737_v22 = vpop.f32.mrb[24].mxu0  ;;  %v4017_v37 = vld [vmem:[%s4634_s6 + $0x20] sm:$0xff]  }
 0x119   : > { %3757 = vmatprep.mubr.msk.f32.mxu1 %vm515_vm0, %v1203_v31  ;;  %v1235_v39 = vpop.f32.mrb[25].mxu0 }
 0x11a   : > { %v3738_v40 = vpop.f32.mrb[26].mxu0 }
 0x11b   : > { %v1238_v41 = vpop.f32.mrb[27].mxu0 }
 0x11c   : > { %3758 = vmatmul.mubr.msk.f32.vlgmr.msra.gmra.mrb[4].mxu1 %vm515_vm0, %v1206_v34  ;;  %v4014_v34 = vld [vmem:[%s4634_s6 + $0x8] sm:$0xff]  }
 0x11d   : > { %3760 = vmatprep.mubr.msk.f32.mxu1 %vm515_vm0, %v3729_v30  ;;  %3930 = vmatpush3.bf16.msk.msra.mxu1 %vm4217_vm9, %v4039_v23 }
 0x11e   : > { %3932 = vmatprep.subr.msk.bf16.mxu1 %vm4222_vm12, %v4039_v23 }
 0x120   : > { %3761 = vmatmul.mubr.msk.f32.gmra.mrb[6].mxu1 %vm515_vm0, %v3730_v33  ;;  %v3741_v26 = vpop.f32.mrb[28].mxu0 }
 0x121   : > { %3767 = vmatprep.mubr.msk.f32.mxu1 %vm515_vm0, %v1235_v39  ;;  %v1251_v42 = vpop.f32.mrb[29].mxu0  ;;  %v4041_v39 = vmov 1.0  }
 0x122   : > { %v3742_v43 = vpop.f32.mrb[30].mxu0 }
 0x123   : > { %v1254_v44 = vpop.f32.mrb[31].mxu0 }
 0x124   : > { %3768 = vmatmul.mubr.msk.f32.vlgmr.msra.gmra.mrb[4].mxu1 %vm515_vm0, %v1238_v41 }
 0x125   : > { %3770 = vmatprep.mubr.msk.f32.mxu1 %vm515_vm0, %v3737_v22  ;;  %3934 = vmatpush3.bf16.msk.msra.mxu1 %vm4222_vm12, %v4039_v23 }
 0x126   : > { %3799 = vmatprep.subr.msk.mxu1 %vm4443_vm2, %v4041_v39 }
 0x128   : > { %3771 = vmatmul.mubr.msk.f32.gmra.mrb[6].mxu1 %vm515_vm0, %v3738_v40 }
 0x129   : > { %3777 = vmatprep.mubr.msk.f32.mxu1 %vm515_vm0, %v1251_v42 }
 0x12c   : > { %3778 = vmatmul.mubr.msk.f32.vlgmr.msra.gmra.mrb[4].mxu1 %vm515_vm0, %v1254_v44 }
 0x12d   : > { %3780 = vmatprep.mubr.msk.f32.mxu1 %vm515_vm0, %v3741_v26  ;;  %3800 = vmatpush3.msk.msra.mxu1 %vm4443_vm2, %v4041_v39 }
 0x12e   : > { %3807 = vmatprep.subr.msk.mxu1 %vm4455_vm3, %v4041_v39 }
 0x130   : > { %3781 = vmatmul.mubr.msk.f32.gmra.mrb[6].mxu1 %vm515_vm0, %v3742_v43 }
 0x1df   : > { %v3721_v45 = vpop.f32.mrb[0].mxu1 }
 0x1e0   : > { %v1010_v32 = vpop.f32.mrb[1].mxu1  ;;  %v1058_v55 = vmul.f32 %v3721_v45, %v1045_v50 }
 0x1e1   : > { %v1057_v57 = vmul.f32 %v1040_v48, %v1010_v32  ;;  %v2162_v48 = vpop.permute.xlu0 %2161 }
 0x1e2   : > { %v1086_v60 = vadd.f32 %v1073_v49, %v1058_v55 }
 0x1e3   : > { %v3724_v23 = vpop.f32.mrb[2].mxu1  ;;  %v1085_v0 = vadd.f32 %v1068_v47, %v1057_v57  ;;  %v2167_v47 = vpop.permute.xlu1 %2166 }
 0x1e4   : > { %v1020_v46 = vpop.f32.mrb[3].mxu1  ;;  %v1060_v61 = vmul.f32 %v3724_v23, %v1055_v53 }
 0x1e5   : > { %v1059_v1 = vmul.f32 %v1050_v54, %v1020_v46  ;;  %v4019_v46 = vld [vmem:[%s4634_s6 + $0x30] sm:$0xff]   ;;  %v2190_v50 = vpop.permute.xlu0 %2189 }
 0x1e6   : > { %v1088_v8 = vadd.f32 %v1083_v56, %v1060_v61 }
 0x1e7   : > { %v1087_v12 = vadd.f32 %v1078_v58, %v1059_v1  ;;  %v2195_v49 = vpop.permute.xlu1 %2194 }
 0x1e9   : > { %v2172_v53 = vpop.permute.xlu0 %2171 }
 0x1ff   : > { %v3779_v59 = vpop.f32.mrb[4].mxu1 }
 0x200   : > { %v1687_v62 = vadd.f32 %v3779_v59, %v1674_v51  ;;  %v1639_v63 = vpop.f32.mrb[5].mxu1  ;;  %v2177_v51 = vpop.permute.xlu1 %2176 }
 0x201   : > { %v1686_v2 = vadd.f32 %v1669_v52, %v1639_v63 }
 0x202   : > { %v1691_v3 = vadd.f32 %v1687_v62, %v1086_v60 }
 0x203   : > { %v1690_v5 = vadd.f32 %v1686_v2, %v1085_v0  ;;  %v3782_v6 = vpop.f32.mrb[6].mxu1  ;;  %v2200_v2 = vpop.permute.xlu0 %2199 }
 0x204   : > { %vm1695_vm14 = vcmp.ge.f32.partialorder %v1691_v3, 0.0  ;;  %v1699_v9 = vmul.f32 0.2, %v1691_v3  ;;  %v1689_v10 = vadd.f32 %v3782_v6, %v1684_v4  ;;  %v1649_v11 = vpop.f32.mrb[7].mxu1  ;;  %v2205_v63 = vpop.permute.xlu1 %2204 }
 0x205   : > { %vm1694_vm15 = vcmp.ge.f32.partialorder %v1690_v5, 0.0  ;;  %v1698_v13 = vmul.f32 0.2, %v1690_v5  ;;  %v1688_v14 = vadd.f32 %v1679_v7, %v1649_v11 }
 0x206   : > { %v1693_v15 = vadd.f32 %v1689_v10, %v1088_v8  ;;  %v4409_v16 = vsel %vm1695_vm14, %v1691_v3, %v1699_v9 }
 0x207   : > { %v1692_v17 = vadd.f32 %v1688_v14, %v1087_v12  ;;  %v4411_v20 = vsel %vm1694_vm15, %v1690_v5, %v1698_v13 }
 0x208   : > { %vm1697_vm0 = vcmp.ge.f32.partialorder %v1693_v15, 0.0  ;;  %v1701_v21 = vmul.f32 0.2, %v1693_v15  ;;  %v1727_v25 = vpack.c.bf16 %v4409_v16, %v4411_v20 }
 0x209   : > { %vm1696_vm1 = vcmp.ge.f32.partialorder %v1692_v17, 0.0  ;;  %v1700_v28 = vmul.f32 0.2, %v1692_v17 }
 0x20a   : > { %3783 = vmatprep.subr.bf16.mxu0 %v1727_v25  ;;  %v4415_v30 = vsel %vm1697_vm0, %v1693_v15, %v1701_v21  ;;  %v4020_v21 = vld [vmem:[%s4634_s6 + $0x38] sm:$0xff]  }
 0x20b   : > { %3784 = vmatpush3.bf16.msra.mxu0 %v1727_v25  ;;  %v4417_v31 = vsel %vm1696_vm1, %v1692_v17, %v1700_v28  ;;  %v4021_v25 = vld [vmem:[%s4634_s6 + $0x40] sm:$0xff]   ;;  %v4022_v28 = vld [vmem:[%s4634_s6 + $0x48] sm:$0xff]  }
 0x20c   : > { %v1728_v33 = vpack.c.bf16 %v4415_v30, %v4417_v31 }
 0x20e   : > { %3785 = vmatprep.subr.bf16.mxu0 %v1728_v33 }
 0x20f   : > { %3786 = vmatpush3.bf16.msra.mxu0 %v1728_v33  ;;  %v4023_v33 = vld [vmem:[%s4634_s6 + $0x50] sm:$0xff]  }
 0x212   : > { %3788 = vmatmul.mubr.msk.bf16.vlgmr.msra.gmra.mrb[32].mxu0 %vm1759_vm13, %v4014_v34  ;;  %v4024_v34 = vld [vmem:[%s4634_s6 + $0x58] sm:$0xff]  }
 0x213   : > { %3791 = vmatprep.mubr.msk.bf16.mxu0 %vm1759_vm13, %v4015_v35 }
 0x21a   : > { %3792 = vmatmul.mubr.msk.bf16.gmra.mrb[36].mxu0 %vm1759_vm13, %v4016_v36 }
 0x21b   : > { %3795 = vmatprep.mubr.msk.bf16.mxu0 %vm1759_vm13, %v4017_v37 }
 0x222   : > { %3796 = vmatmul.mubr.msk.bf16.gmra.mrb[40].mxu0 %vm1759_vm13, %v4018_v38 }
 0x223   : > { %3827 = vmatprep.mubr.msk.bf16.mxu0 %vm1759_vm13, %v4019_v46 }
 0x2e5   : > { %v3789_v18 = vpop.f32.mrb[32].mxu0 }
 0x2e6   : > { %v1812_v41 = vpop.f32.mrb[33].mxu0 }
 0x2e7   : > { %v3790_v26 = vpop.f32.mrb[34].mxu0 }
 0x2e8   : > { %v1815_v42 = vpop.f32.mrb[35].mxu0 }
 0x2ed   : > { %v3793_v43 = vpop.f32.mrb[36].mxu0 }
 0x2ee   : > { %v1828_v44 = vpop.f32.mrb[37].mxu0 }
 0x2ef   : > { %v3794_v29 = vpop.f32.mrb[38].mxu0  ;;  %3801 = vmatprep.mubr.msk.f32.mxu1 %vm1859_vm4, %v1828_v44 }
 0x2f0   : > { %v1831_v45 = vpop.f32.mrb[39].mxu0 }
 0x2f1   : > { %3802 = vmatmul.mubr.msk.f32.vlgmr.msra.gmra.mrb[8].mxu1 %vm1859_vm4, %v1831_v45 }
 0x2f2   : > { %3804 = vmatprep.mubr.msk.f32.mxu1 %vm1859_vm4, %v3793_v43  ;;  %3808 = vmatpush3.msk.msra.mxu1 %vm4455_vm3, %v4041_v39 }
 0x2f3   : > { %3815 = vmatprep.subr.msk.mxu1 %vm4465_vm5, %v4041_v39 }
 0x2f5   : > { %3805 = vmatmul.mubr.msk.f32.gmra.mrb[10].mxu1 %vm1859_vm4, %v3794_v29  ;;  %v3797_v32 = vpop.f32.mrb[40].mxu0 }
 0x2f6   : > { %3809 = vmatprep.mubr.msk.f32.mxu1 %vm1859_vm4, %v1812_v41  ;;  %v1844_v19 = vpop.f32.mrb[41].mxu0 }
 0x2f7   : > { %v3798_v27 = vpop.f32.mrb[42].mxu0 }
 0x2f8   : > { %v1847_v23 = vpop.f32.mrb[43].mxu0 }
 0x2f9   : > { %3810 = vmatmul.mubr.msk.f32.vlgmr.msra.gmra.mrb[8].mxu1 %vm1859_vm4, %v1815_v42 }
 0x2fa   : > { %3812 = vmatprep.mubr.msk.f32.mxu1 %vm1859_vm4, %v3789_v18  ;;  %3816 = vmatpush3.msk.msra.mxu1 %vm4465_vm5, %v4041_v39 }
 0x2fb   : > { %3839 = vmatprep.subr.msk.mxu1 %vm4443_vm2, %v4041_v39 }
 0x2fd   : > { %3813 = vmatmul.mubr.msk.f32.gmra.mrb[10].mxu1 %vm1859_vm4, %v3790_v26 }
 0x2fe   : > { %3817 = vmatprep.mubr.msk.f32.mxu1 %vm1859_vm4, %v1844_v19  ;;  %v2679_v19 = vpop.permute.xlu1 %2678 }
 0x301   : > { %3818 = vmatmul.mubr.msk.f32.vlgmr.msra.gmra.mrb[8].mxu1 %vm1859_vm4, %v1847_v23 }
 0x302   : > { %3820 = vmatprep.mubr.msk.f32.mxu1 %vm1859_vm4, %v3797_v32  ;;  %3840 = vmatpush3.msk.msra.mxu1 %vm4443_vm2, %v4041_v39  ;;  %v4025_v32 = vld [vmem:[%s4637_s9] sm:$0xff]   ;;  %v2708_v23 = vpop.permute.xlu1 %2707 }
 0x303   : > { %3847 = vmatprep.subr.msk.mxu1 %vm4455_vm3, %v4041_v39 }
 0x305   : > { %3821 = vmatmul.mubr.msk.f32.gmra.mrb[10].mxu1 %vm1859_vm4, %v3798_v27  ;;  %v2674_v27 = vpop.permute.xlu0 %2673 }
 0x309   : > { %v2703_v46 = vpop.permute.xlu0 %2702 }
 0x30d   : > { %v2684_v22 = vpop.permute.xlu0 %2683 }
 0x3d4   : > { %v3819_v52 = vpop.f32.mrb[8].mxu1 }
 0x3d5   : > { %v2180_v54 = vmul.f32 %v3819_v52, %v2167_v47  ;;  %v2132_v55 = vpop.f32.mrb[9].mxu1  ;;  %v2689_v47 = vpop.permute.xlu1 %2688 }
 0x3d6   : > { %v2179_v56 = vmul.f32 %v2162_v48, %v2132_v55 }
 0x3d7   : > { %v2208_v57 = vadd.f32 %v2195_v49, %v2180_v54 }
 0x3d8   : > { %v2207_v58 = vadd.f32 %v2190_v50, %v2179_v56  ;;  %v3822_v59 = vpop.f32.mrb[10].mxu1 }
 0x3d9   : > { %v2212_v60 = vadd.f32 %v2208_v57, %v4409_v16  ;;  %v2182_v61 = vmul.f32 %v3822_v59, %v2177_v51  ;;  %v2142_v62 = vpop.f32.mrb[11].mxu1 }
 0x3da   : > { %v2211_v0 = vadd.f32 %v2207_v58, %v4411_v20  ;;  %v2181_v1 = vmul.f32 %v2172_v53, %v2142_v62  ;;  %v2718_v58 = vpop.permute.xlu1 %2717 }
 0x3db   : > { %v2220_v3 = vmul.f32 0.2, %v2212_v60  ;;  %v2210_v4 = vadd.f32 %v2205_v63, %v2182_v61  ;;  %vm2216_vm6 = vcmp.ge.f32.partialorder %v2212_v60, 0.0  ;;  %v2713_v61 = vpop.permute.xlu0 %2712 }
 0x3dc   : > { %v2219_v5 = vmul.f32 0.2, %v2211_v0  ;;  %v2209_v6 = vadd.f32 %v2200_v2, %v2181_v1  ;;  %vm2215_vm7 = vcmp.ge.f32.partialorder %v2211_v0, 0.0 }
 0x3dd   : > { %v2214_v7 = vadd.f32 %v2210_v4, %v4415_v30  ;;  %v4505_v8 = vsel %vm2216_vm6, %v2212_v60, %v2220_v3 }
 0x3de   : > { %v2213_v9 = vadd.f32 %v2209_v6, %v4417_v31  ;;  %v4508_v10 = vsel %vm2215_vm7, %v2211_v0, %v2219_v5  ;;  %v3190_v40 = vpop.permute.xlu1 %3189 }
 0x3df   : > { %v2222_v11 = vmul.f32 0.2, %v2214_v7  ;;  %v2240_v12 = vpack.c.bf16 %v4505_v8, %v4508_v10  ;;  %vm2218_vm8 = vcmp.ge.f32.partialorder %v2214_v7, 0.0 }
 0x3e0   : > { %v2221_v13 = vmul.f32 0.2, %v2213_v9  ;;  %vm2217_vm9 = vcmp.ge.f32.partialorder %v2213_v9, 0.0 }
 0x3e1   : > { %3823 = vmatprep.subr.bf16.mxu0 %v2240_v12  ;;  %v4512_v14 = vsel %vm2218_vm8, %v2214_v7, %v2222_v11 }
 0x3e2   : > { %3824 = vmatpush3.bf16.msra.mxu0 %v2240_v12  ;;  %v4514_v15 = vsel %vm2217_vm9, %v2213_v9, %v2221_v13  ;;  %v4026_v12 = vld [vmem:[%s4637_s9 + $0x8] sm:$0xff]   ;;  %v4027_v13 = vld [vmem:[%s4637_s9 + $0x10] sm:$0xff]  }
 0x3e3   : > { %v2241_v17 = vpack.c.bf16 %v4512_v14, %v4514_v15 }
 0x3e5   : > { %3825 = vmatprep.subr.bf16.mxu0 %v2241_v17 }
 0x3e6   : > { %3826 = vmatpush3.bf16.msra.mxu0 %v2241_v17  ;;  %v4030_v17 = vld [vmem:[%s4637_s9 + $0x28] sm:$0xff]  }
 0x3e9   : > { %3828 = vmatmul.mubr.msk.bf16.vlgmr.msra.gmra.mrb[44].mxu0 %vm1759_vm13, %v4020_v21 }
 0x3ea   : > { %3831 = vmatprep.mubr.msk.bf16.mxu0 %vm1759_vm13, %v4021_v25 }
 0x3f1   : > { %3832 = vmatmul.mubr.msk.bf16.gmra.mrb[48].mxu0 %vm1759_vm13, %v4022_v28 }
 0x3f2   : > { %3835 = vmatprep.mubr.msk.bf16.mxu0 %vm1759_vm13, %v4023_v33 }
 0x3f9   : > { %3836 = vmatmul.mubr.msk.bf16.gmra.mrb[52].mxu0 %vm1759_vm13, %v4024_v34 }
 0x3fa   : > { %3867 = vmatprep.mubr.msk.bf16.mxu0 %vm1759_vm13, %v4025_v32 }
 0x4bc   : > { %v3829_v35 = vpop.f32.mrb[44].mxu0 }
 0x4bd   : > { %v2324_v36 = vpop.f32.mrb[45].mxu0 }
 0x4be   : > { %v3830_v37 = vpop.f32.mrb[46].mxu0 }
 0x4bf   : > { %v2327_v38 = vpop.f32.mrb[47].mxu0 }
 0x4c4   : > { %v3833_v18 = vpop.f32.mrb[48].mxu0 }
 0x4c5   : > { %v2340_v41 = vpop.f32.mrb[49].mxu0 }
 0x4c6   : > { %v3834_v26 = vpop.f32.mrb[50].mxu0  ;;  %3841 = vmatprep.mubr.msk.f32.mxu1 %vm1859_vm4, %v2340_v41 }
 0x4c7   : > { %v2343_v42 = vpop.f32.mrb[51].mxu0 }
 0x4c8   : > { %3842 = vmatmul.mubr.msk.f32.vlgmr.msra.gmra.mrb[12].mxu1 %vm1859_vm4, %v2343_v42  ;;  %v3185_v42 = vpop.permute.xlu0 %3184 }
 0x4c9   : > { %3844 = vmatprep.mubr.msk.f32.mxu1 %vm1859_vm4, %v3833_v18  ;;  %3848 = vmatpush3.msk.msra.mxu1 %vm4455_vm3, %v4041_v39 }
 0x4ca   : > { %3855 = vmatprep.subr.msk.mxu1 %vm4465_vm5, %v4041_v39 }
 0x4cc   : > { %3845 = vmatmul.mubr.msk.f32.gmra.mrb[14].mxu1 %vm1859_vm4, %v3834_v26  ;;  %v3837_v43 = vpop.f32.mrb[52].mxu0 }
 0x4cd   : > { %3849 = vmatprep.mubr.msk.f32.mxu1 %vm1859_vm4, %v2324_v36  ;;  %v2356_v44 = vpop.f32.mrb[53].mxu0 }
 0x4ce   : > { %v3838_v29 = vpop.f32.mrb[54].mxu0 }
 0x4cf   : > { %v2359_v45 = vpop.f32.mrb[55].mxu0 }
 0x4d0   : > { %3850 = vmatmul.mubr.msk.f32.vlgmr.msra.gmra.mrb[12].mxu1 %vm1859_vm4, %v2327_v38 }
 0x4d1   : > { %3852 = vmatprep.mubr.msk.f32.mxu1 %vm1859_vm4, %v3829_v35  ;;  %3856 = vmatpush3.msk.msra.mxu1 %vm4465_vm5, %v4041_v39 }
 0x4d2   : > { %3879 = vmatprep.subr.msk.mxu1 %vm4443_vm2, %v4041_v39 }
 0x4d4   : > { %3853 = vmatmul.mubr.msk.f32.gmra.mrb[14].mxu1 %vm1859_vm4, %v3830_v37 }
 0x4d5   : > { %3857 = vmatprep.mubr.msk.f32.mxu1 %vm1859_vm4, %v2356_v44  ;;  %v3195_v44 = vpop.permute.xlu0 %3194 }
 0x4d8   : > { %3858 = vmatmul.mubr.msk.f32.vlgmr.msra.gmra.mrb[12].mxu1 %vm1859_vm4, %v2359_v45 }
 0x4d9   : > { %3860 = vmatprep.mubr.msk.f32.mxu1 %vm1859_vm4, %v3837_v43  ;;  %3880 = vmatpush3.msk.msra.mxu1 %vm4443_vm2, %v4041_v39  ;;  %v3200_v43 = vpop.permute.xlu1 %3199  ;;  %v3213_v32 = vpop.permute.xlu0 %3212 }
 0x4da   : > { %3887 = vmatprep.subr.msk.mxu1 %vm4455_vm3, %v4041_v39 }
 0x4dc   : > { %3861 = vmatmul.mubr.msk.f32.gmra.mrb[14].mxu1 %vm1859_vm4, %v3838_v29 }
 0x4dd   : > { %v3218_v29 = vpop.permute.xlu1 %3217 }
 0x5ab   : > { %v3859_v48 = vpop.f32.mrb[12].mxu1 }
 0x5ac   : > { %v2692_v49 = vmul.f32 %v3859_v48, %v2679_v19  ;;  %v2643_v50 = vpop.f32.mrb[13].mxu1 }
 0x5ad   : > { %v2691_v51 = vmul.f32 %v2674_v27, %v2643_v50 }
 0x5ae   : > { %v2721_v52 = vadd.f32 %v2708_v23, %v2692_v49  ;;  %v3228_v49 = vpop.permute.xlu1 %3227 }
 0x5af   : > { %v2720_v53 = vadd.f32 %v2703_v46, %v2691_v51  ;;  %v3862_v54 = vpop.f32.mrb[14].mxu1 }
 0x5b0   : > { %v2725_v55 = vadd.f32 %v2721_v52, %v4505_v8  ;;  %v2694_v56 = vmul.f32 %v3862_v54, %v2689_v47  ;;  %v2653_v57 = vpop.f32.mrb[15].mxu1  ;;  %v3223_v52 = vpop.permute.xlu0 %3222 }
 0x5b1   : > { %v2724_v59 = vadd.f32 %v2720_v53, %v4508_v10  ;;  %v2693_v60 = vmul.f32 %v2684_v22, %v2653_v57 }
 0x5b2   : > { %v2733_v62 = vmul.f32 0.2, %v2725_v55  ;;  %v2723_v63 = vadd.f32 %v2718_v58, %v2694_v56  ;;  %vm2729_vm10 = vcmp.ge.f32.partialorder %v2725_v55, 0.0 }
 0x5b3   : > { %v2732_v0 = vmul.f32 0.2, %v2724_v59  ;;  %v2722_v1 = vadd.f32 %v2713_v61, %v2693_v60  ;;  %vm2728_vm11 = vcmp.ge.f32.partialorder %v2724_v59, 0.0 }
 0x5b4   : > { %v2727_v2 = vadd.f32 %v2723_v63, %v4512_v14  ;;  %v2737_v3 = vsel %vm2729_vm10, %v2725_v55, %v2733_v62  ;;  %v4028_v14 = vld [vmem:[%s4637_s9 + $0x18] sm:$0xff]  }
 0x5b5   : > { %v2726_v4 = vadd.f32 %v2722_v1, %v4514_v15  ;;  %v2736_v5 = vsel %vm2728_vm11, %v2724_v59, %v2732_v0  ;;  %v4029_v15 = vld [vmem:[%s4637_s9 + $0x20] sm:$0xff]  }
 0x5b6   : > { %v2735_v6 = vmul.f32 0.2, %v2727_v2  ;;  %v2752_v7 = vpack.c.bf16 %v2737_v3, %v2736_v5  ;;  %vm2731_vm12 = vcmp.ge.f32.partialorder %v2727_v2, 0.0 }
 0x5b7   : > { %v2734_v8 = vmul.f32 0.2, %v2726_v4  ;;  %vm2730_vm14 = vcmp.ge.f32.partialorder %v2726_v4, 0.0 }
 0x5b8   : > { %3863 = vmatprep.subr.bf16.mxu0 %v2752_v7  ;;  %v2739_v9 = vsel %vm2731_vm12, %v2727_v2, %v2735_v6 }
 0x5b9   : > { %3864 = vmatpush3.bf16.msra.mxu0 %v2752_v7  ;;  %v2738_v10 = vsel %vm2730_vm14, %v2726_v4, %v2734_v8 }
 0x5ba   : > { %v2753_v11 = vpack.c.bf16 %v2739_v9, %v2738_v10 }
 0x5bc   : > { %3865 = vmatprep.subr.bf16.mxu0 %v2753_v11 }
 0x5bd   : > { %3866 = vmatpush3.bf16.msra.mxu0 %v2753_v11 }
 0x5c0   : > { %3868 = vmatmul.mubr.msk.bf16.vlgmr.msra.gmra.mrb[56].mxu0 %vm1759_vm13, %v4026_v12 }
 0x5c1   : > { %3871 = vmatprep.mubr.msk.bf16.mxu0 %vm1759_vm13, %v4027_v13 }
 0x5c8   : > { %3872 = vmatmul.mubr.msk.bf16.gmra.mrb[60].mxu0 %vm1759_vm13, %v4028_v14 }
 0x5c9   : > { %3875 = vmatprep.mubr.msk.bf16.mxu0 %vm1759_vm13, %v4029_v15 }
 0x5d0   : > { %3876 = vmatmul.mubr.msk.bf16.gmra.mrb[64].mxu0 %vm1759_vm13, %v4030_v17  ;;  %vm3258_vm13 = vcmask 60416  }
 0x693   : > { %v3869_v21 = vpop.f32.mrb[56].mxu0 }
 0x694   : > { %v2836_v25 = vpop.f32.mrb[57].mxu0 }
 0x695   : > { %v3870_v28 = vpop.f32.mrb[58].mxu0 }
 0x696   : > { %v2839_v33 = vpop.f32.mrb[59].mxu0 }
 0x69b   : > { %v3873_v34 = vpop.f32.mrb[60].mxu0 }
 0x69c   : > { %v2852_v35 = vpop.f32.mrb[61].mxu0 }
 0x69d   : > { %v3874_v36 = vpop.f32.mrb[62].mxu0  ;;  %3881 = vmatprep.mubr.msk.f32.mxu1 %vm1859_vm4, %v2852_v35 }
 0x69e   : > { %v2855_v37 = vpop.f32.mrb[63].mxu0 }
 0x69f   : > { %3882 = vmatmul.mubr.msk.f32.vlgmr.msra.gmra.mrb[16].mxu1 %vm1859_vm4, %v2855_v37 }
 0x6a0   : > { %3884 = vmatprep.mubr.msk.f32.mxu1 %vm1859_vm4, %v3873_v34  ;;  %3888 = vmatpush3.msk.msra.mxu1 %vm4455_vm3, %v4041_v39 }
 0x6a1   : > { %3895 = vmatprep.subr.msk.mxu1 %vm4465_vm5, %v4041_v39 }
 0x6a3   : > { %3885 = vmatmul.mubr.msk.f32.gmra.mrb[18].mxu1 %vm1859_vm4, %v3874_v36  ;;  %v3877_v38 = vpop.f32.mrb[64].mxu0 }
 0x6a4   : > { %3889 = vmatprep.mubr.msk.f32.mxu1 %vm1859_vm4, %v2836_v25  ;;  %v2868_v18 = vpop.f32.mrb[65].mxu0 }
 0x6a5   : > { %v3878_v41 = vpop.f32.mrb[66].mxu0 }
 0x6a6   : > { %v2871_v26 = vpop.f32.mrb[67].mxu0 }
 0x6a7   : > { %3890 = vmatmul.mubr.msk.f32.vlgmr.msra.gmra.mrb[16].mxu1 %vm1859_vm4, %v2839_v33 }
 0x6a8   : > { %3892 = vmatprep.mubr.msk.f32.mxu1 %vm1859_vm4, %v3869_v21  ;;  %3896 = vmatpush3.msk.msra.mxu1 %vm4465_vm5, %v4041_v39 }
 0x6ab   : > { %3893 = vmatmul.mubr.msk.f32.gmra.mrb[18].mxu1 %vm1859_vm4, %v3870_v28 }
 0x6ac   : > { %3897 = vmatprep.mubr.msk.f32.mxu1 %vm1859_vm4, %v2868_v18 }
 0x6af   : > { %3898 = vmatmul.mubr.msk.f32.vlgmr.msra.gmra.mrb[16].mxu1 %vm1859_vm4, %v2871_v26 }
 0x6b0   : > { %3900 = vmatprep.mubr.msk.f32.mxu1 %vm1859_vm4, %v3877_v38 }
 0x6b3   : > { %3901 = vmatmul.mubr.msk.f32.gmra.mrb[18].mxu1 %vm1859_vm4, %v3878_v41 }
 0x782   : > { %v3899_v45 = vpop.f32.mrb[16].mxu1 }
 0x783   : > { %v3203_v24 = vmul.f32 %v3899_v45, %v3190_v40  ;;  %v3155_v39 = vpop.f32.mrb[17].mxu1 }
 0x784   : > { %v3202_v19 = vmul.f32 %v3185_v42, %v3155_v39 }
 0x785   : > { %v3231_v27 = vadd.f32 %v3218_v29, %v3203_v24 }
 0x786   : > { %v3230_v23 = vadd.f32 %v3213_v32, %v3202_v19  ;;  %v3902_v46 = vpop.f32.mrb[18].mxu1 }
 0x787   : > { %v3235_v47 = vadd.f32 %v3231_v27, %v4409_v16  ;;  %v3205_v48 = vmul.f32 %v3902_v46, %v3200_v43  ;;  %v3165_v22 = vpop.f32.mrb[19].mxu1 }
 0x788   : > { %v3234_v50 = vadd.f32 %v3230_v23, %v4411_v20  ;;  %v3204_v51 = vmul.f32 %v3195_v44, %v3165_v22 }
 0x789   : > { %v3239_v53 = vmax.f32 %v3235_v47, 0.0  ;;  %v3233_v54 = vadd.f32 %v3228_v49, %v3205_v48 }
 0x78a   : > { %v3238_v55 = vmax.f32 %v3234_v50, 0.0  ;;  %v3232_v56 = vadd.f32 %v3223_v52, %v3204_v51 }
 0x78b   : > { %v3529_v57 = vpack.c.bf16 %v3239_v53, %v3239_v53  ;;  %v3237_v58 = vadd.f32 %v3233_v54, %v4415_v30 }
 0x78c   : > { %v3528_v16 = vpack.c.bf16 %v3238_v55, %v3238_v55  ;;  %v3236_v59 = vadd.f32 %v3232_v56, %v4417_v31 }
 0x78d   : > { %3260 = vst.msk [vmem:[%s413_s26 + $0x4] sm:$0xf] %vm3258_vm13, %v3529_v57  ;;  %v3241_v60 = vmax.f32 %v3237_v58, 0.0 }
 0x78e   : > { %3259 = vst.msk [vmem:[%s413_s26] sm:$0xf] %vm3258_vm13, %v3528_v16  ;;  %v3240_v20 = vmax.f32 %v3236_v59, 0.0 }
 0x78f   : > { %v3531_v61 = vpack.c.bf16 %v3241_v60, %v3241_v60 }
 0x790   : > { %v3530_v62 = vpack.c.bf16 %v3240_v20, %v3240_v20 }
 0x791   : > { %3262 = vst.msk [vmem:[%s413_s26 + $0xc] sm:$0xf] %vm3258_vm13, %v3531_v61 }
 0x792   : > { %3261 = vst.msk [vmem:[%s413_s26 + $0x8] sm:$0xf] %vm3258_vm13, %v3530_v62 }
 0x793 PF: > { %s22_s21 = sadd.s32 1, %s4037_s21  }
 0x794   : > { %p19_p4 = scmp.ge.s32.totalorder %s22_s21, 4  }
 0x796   :  { %21 = sbr.rel (!%p19_p4) target bundleno = 1 (0x1), region = 101 }

// kernel: vqvae_forward.9
= control target key start
LH: loop header
LB: loop body
LE: loop exit
PB: predicated region body
PF: predicated region fallthrough
CT: control target
= control target key end

     0   :  { %s6314_s29 = smov 0   ;;  %s7266_s0 = inlined_call_operand.vmem [shape: bf16[2,32,8], index: 0, kind: input, shape index: {}]   ;;  %s7267_s1 = inlined_call_operand.vmem [shape: bf16[256,32], index: 1, kind: input, shape index: {}]   ;;  %s7268_s2 = inlined_call_operand.vmem [shape: f32[64,1], index: 2, kind: input, shape index: {}]   ;;  %s7269_s3 = inlined_call_operand.vmem [shape: f32[64,1], index: 3, kind: input, shape index: {}]   ;;  %s7270_s4 = inlined_call_operand.vmem [shape: bf16[256,32], index: 4, kind: input, shape index: {}]   ;;  %s7271_s5 = inlined_call_operand.vmem [shape: f32[64,1], index: 5, kind: input, shape index: {}]   ;;  %s7272_s6 = inlined_call_operand.vmem [shape: bf16[2,192,64], index: 6, kind: input, shape index: {}]   ;;  %s7273_s7 = inlined_call_operand.vmem [shape: f32[2,64,1], index: 7, kind: input, shape index: {}]   ;;  %s7274_s8 = inlined_call_operand.vmem [shape: f32[2,64,1], index: 8, kind: input, shape index: {}]   ;;  %s7275_s9 = inlined_call_operand.vmem [shape: bf16[192,64], index: 9, kind: input, shape index: {}]   ;;  %s7276_s10 = inlined_call_operand.vmem [shape: f32[64,1], index: 10, kind: input, shape index: {}]   ;;  %s7277_s11 = inlined_call_operand.vmem [shape: f32[64,1], index: 11, kind: input, shape index: {}]   ;;  %s7278_s12 = inlined_call_operand.vmem [shape: bf16[64,64], index: 12, kind: input, shape index: {}]   ;;  %s7279_s13 = inlined_call_operand.vmem [shape: f32[64,1], index: 13, kind: input, shape index: {}]   ;;  %s7280_s14 = inlined_call_operand.vmem [shape: f32[2,64,4], index: 14, kind: output, shape index: {}]  }
   0x1 LB: > { %s5017_s30 = sadd.s32 4294967295, %s6234_s29   ;;  %p5021_p0 = scmp.ge.s32.totalorder %s6234_s29, 1  ;;  %s6234_s29 = sphi %s6314_s29, %s24_s29  }
   0x2   : > { %p412_p1 = scmp.lt.s32.totalorder %s6234_s29, 3 }
   0x4   : > { %p413_p2 = pnand %p5021_p0, %p412_p1 }
   0x5   : > { %p458_p3 = scmp.lt.s32.totalorder (!%p413_p2), %s5017_s30, 1  ;;  %v6156_v0 = vld [vmem:[%s7267_s1] sm:$0xff] (!%p413_p2)   ;;  %vm617_vm0 = vcmask (!%p413_p2), 261120   ;;  %v6157_v3 = vld [vmem:[%s7267_s1 + $0x8] sm:$0xff] (!%p413_p2)   ;;  %v6158_v4 = vld [vmem:[%s7267_s1 + $0x10] sm:$0xff] (!%p413_p2)   ;;  %v473_v18 = vlaneseq (!%p413_p2)  ;;  %v6236_v23 = vmov (!%p413_p2), 1.0  }
   0x6   : > { %416 = sbr.rel (%p413_p2) target bundleno = 2571 (0xa0b), region = 76  ;;  %5625 = vmatprep.mubr.msk.bf16.mxu0 (!%p413_p2), %vm617_vm0, %v6156_v0  ;;  %v6159_v5 = vld [vmem:[%s7267_s1 + $0x18] sm:$0xff] (!%p413_p2)   ;;  %v6160_v6 = vld [vmem:[%s7267_s1 + $0x20] sm:$0xff] (!%p413_p2)   ;;  %v6161_v7 = vld [vmem:[%s7267_s1 + $0x28] sm:$0xff] (!%p413_p2)   ;;  %v6237_v27 = vmov (!%p413_p2), 0   ;;  %vm827_vm3 = vcmask (!%p413_p2), 64512  }
   0x7   : > { %v6162_v8 = vld [vmem:[%s7267_s1 + $0x30] sm:$0xff] (!%p413_p2)   ;;  %v6163_v9 = vld [vmem:[%s7267_s1 + $0x38] sm:$0xff] (!%p413_p2)   ;;  %v6164_v10 = vld [vmem:[%s7267_s1 + $0x40] sm:$0xff] (!%p413_p2)   ;;  %v6400_v19 = vand.u32 (!%p413_p2), 127, %v473_v18  ;;  %v6402_v20 = vshrl.u32 (!%p413_p2), %v473_v18, 7  ;;  %6153 = vset.pattern.permute.xlu1 (!%p413_p2), %v6237_v27  ;;  %6152 = vset.pattern.permute.xlu0 (!%p413_p2), %v6237_v27  ;;  %vm2510_vm6 = vcmask (!%p413_p2), 523264  }
   0x8   : > { %v6165_v11 = vld [vmem:[%s7267_s1 + $0x48] sm:$0xff] (!%p413_p2)   ;;  %v6166_v12 = vld [vmem:[%s7267_s1 + $0x50] sm:$0xff] (!%p413_p2)   ;;  %v6167_v13 = vld [vmem:[%s7267_s1 + $0x58] sm:$0xff] (!%p413_p2)  }
   0x9   : > { %v6168_v14 = vld [vmem:[%s7267_s1 + $0x60] sm:$0xff] (!%p413_p2)   ;;  %v6169_v15 = vld [vmem:[%s7267_s1 + $0x68] sm:$0xff] (!%p413_p2)   ;;  %v6170_v16 = vld [vmem:[%s7267_s1 + $0x70] sm:$0xff] (!%p413_p2)   ;;  %v6405_v21 = vmul.u32 (!%p413_p2), 2, %v6400_v19  ;;  %v6429_v24 = vadd.s32 (!%p413_p2), 1, %v6402_v20  ;;  %v6492_v50 = vadd.s32 (!%p413_p2), 4294967295, %v6402_v20  ;;  %vm2416_vm15 = vcmp.eq.s32.totalorder (!%p413_p2), %v6402_v20, %v6400_v19 }
   0xa   : > { %v6171_v17 = vld [vmem:[%s7267_s1 + $0x78] sm:$0xff] (!%p413_p2)   ;;  %v1416_v25 = vld [vmem:[%s7269_s3] sm:$0xff] (!%p413_p2)  ;;  %v1417_v28 = vld [vmem:[%s7269_s3 + $0x8] sm:$0xff] (!%p413_p2) }
   0xb   : > { %vm6409_vm1 = vcmp.eq.s32.totalorder (!%p413_p2), %v6402_v20, %v6405_v21  ;;  %vm479_vm2 = vcmp.eq.s32.totalorder (!%p413_p2), %v6429_v24, %v6405_v21  ;;  %v1360_v26 = vld [vmem:[%s7268_s2] sm:$0xff] (!%p413_p2)  ;;  %1426 = vperm.xlu1 (!%p413_p2), %6153, %v1416_v25   ;;  %v1361_v29 = vld [vmem:[%s7268_s2 + $0x8] sm:$0xff] (!%p413_p2)  ;;  %v1363_v32 = vld [vmem:[%s7268_s2 + $0x18] sm:$0xff] (!%p413_p2)  ;;  %vm486_vm4 = vcmp.eq.s32.totalorder (!%p413_p2), %v6492_v50, %v6405_v21 }
   0xc   : > { %6043 = vmatprep.subr.msk.mxu1 (!%p413_p2), %vm6409_vm1, %v6236_v23  ;;  %1370 = vperm.xlu0 (!%p413_p2), %6152, %v1360_v26   ;;  %v2326_v30 = vld [vmem:[%s7271_s5 + $0x8] sm:$0xff] (!%p413_p2)  ;;  %v2325_v31 = vld [vmem:[%s7271_s5] sm:$0xff] (!%p413_p2)  ;;  %v1362_v33 = vld [vmem:[%s7268_s2 + $0x10] sm:$0xff] (!%p413_p2) }
   0xd   : > { %s7284_s30 = smov (!%p458_p3, %s5017_s30), 1  ;;  %6044 = vmatpush3.msk.msra.mxu1 %vm6409_vm1, %v6236_v23  ;;  %v1419_v34 = vld [vmem:[%s7269_s3 + $0x18] sm:$0xff]  ;;  %v1418_v35 = vld [vmem:[%s7269_s3 + $0x10] sm:$0xff]  ;;  %v1365_v42 = vld [vmem:[%s7268_s2 + $0x28] sm:$0xff] }
   0xe   : > { %s5374_s17 = sshll.u32 %s7284_s30, 4  ;;  %5671 = vmatprep.subr.msk.mxu1 %vm479_vm2, %v6236_v23  ;;  %v2328_v40 = vld [vmem:[%s7271_s5 + $0x18] sm:$0xff]  ;;  %v2327_v41 = vld [vmem:[%s7271_s5 + $0x10] sm:$0xff]  ;;  %v1364_v43 = vld [vmem:[%s7268_s2 + $0x20] sm:$0xff]  ;;  %s5375_s15 = sshll.u32 %s7284_s30, 6 }
   0xf   : > { %s462_s20 = scalar_lea.vmem %s7266_s0, %s5374_s17  ;;  %1431 = vperm.xlu1 %6153, %v1417_v28   ;;  %v1421_v47 = vld [vmem:[%s7269_s3 + $0x28] sm:$0xff]  ;;  %v1420_v48 = vld [vmem:[%s7269_s3 + $0x20] sm:$0xff]  ;;  %v1367_v56 = vld [vmem:[%s7268_s2 + $0x38] sm:$0xff]  ;;  %s467_s18 = scalar_lea.vmem %s7280_s14, %s5375_s15 }
  0x10   : > { %v6332_v1 = vld [vmem:[%s462_s20] sm:$0xff]   ;;  %v6334_v2 = vld [vmem:[%s462_s20 + $0x8] sm:$0xff]   ;;  %1375 = vperm.xlu0 %6152, %v1361_v29   ;;  %v1366_v58 = vld [vmem:[%s7268_s2 + $0x30] sm:$0xff] }
  0x11   : > { %5621 = vmatprep.subr.bf16.mxu0 %v6332_v1  ;;  %v2330_v51 = vld [vmem:[%s7271_s5 + $0x28] sm:$0xff]  ;;  %v2329_v52 = vld [vmem:[%s7271_s5 + $0x20] sm:$0xff]  ;;  %v1423_v59 = vld [vmem:[%s7269_s3 + $0x38] sm:$0xff] }
  0x12   : > { %5622 = vmatpush3.bf16.msra.mxu0 %v6332_v1  ;;  %v1422_v60 = vld [vmem:[%s7269_s3 + $0x30] sm:$0xff]  ;;  %v6172_v25 = vld [vmem:[%s7270_s4] sm:$0xff]   ;;  %v6175_v26 = vld [vmem:[%s7270_s4 + $0x18] sm:$0xff]  }
  0x13   : > { %5623 = vmatprep.subr.bf16.mxu0 %v6334_v2  ;;  %2340 = vperm.xlu1 %6153, %v2326_v30   ;;  %v6176_v27 = vld [vmem:[%s7270_s4 + $0x20] sm:$0xff]   ;;  %v6177_v28 = vld [vmem:[%s7270_s4 + $0x28] sm:$0xff]   ;;  %v6178_v29 = vld [vmem:[%s7270_s4 + $0x30] sm:$0xff]  }
  0x14   : > { %2335 = vperm.xlu0 %6152, %v2325_v31   ;;  %v6179_v30 = vld [vmem:[%s7270_s4 + $0x38] sm:$0xff]   ;;  %v6180_v31 = vld [vmem:[%s7270_s4 + $0x40] sm:$0xff]  }
  0x16   : > { %5624 = vmatpush3.bf16.msra.mxu0 %v6334_v2 }
  0x17   : > { %5657 = vmatprep.subr.msk.mxu0 %vm6409_vm1, %v6236_v23  ;;  %1385 = vperm.xlu1 %6153, %v1363_v32   ;;  %v6181_v32 = vld [vmem:[%s7270_s4 + $0x48] sm:$0xff]  }
  0x18   : > { %1380 = vperm.xlu0 %6152, %v1362_v33   ;;  %v6182_v33 = vld [vmem:[%s7270_s4 + $0x50] sm:$0xff]  }
  0x19   : > { %5626 = vmatmul.mubr.msk.bf16.vlgmr.msra.gmra.mrb[0].mxu0 %vm617_vm0, %v6157_v3  ;;  %v6537_v3 = vadd.s32 4294967294, %v6402_v20 }
  0x1a   : > { %5629 = vmatprep.mubr.msk.bf16.mxu0 %vm617_vm0, %v6158_v4  ;;  %5658 = vmatpush3.msk.msra.mxu0 %vm6409_vm1, %v6236_v23 }
  0x1b   : > { %5749 = vmatprep.subr.msk.mxu0 %vm6409_vm1, %v6236_v23  ;;  %1441 = vperm.xlu1 %6153, %v1419_v34   ;;  %vm490_vm5 = vcmp.eq.s32.totalorder %v6537_v3, %v6405_v21  ;;  %v6183_v34 = vld [vmem:[%s7270_s4 + $0x58] sm:$0xff]   ;;  %v6188_v21 = vld [vmem:[%s7272_s6] sm:$0xff]  }
  0x1c   : > { %1436 = vperm.xlu0 %6152, %v1418_v35   ;;  %v6184_v35 = vld [vmem:[%s7270_s4 + $0x60] sm:$0xff]  }
  0x1f   : > { %2350 = vperm.xlu1 %6153, %v2328_v40   ;;  %v2331_v40 = vld [vmem:[%s7271_s5 + $0x30] sm:$0xff] }
  0x20   : > { %2345 = vperm.xlu0 %6152, %v2327_v41   ;;  %v3083_v41 = vld [vmem:[%s7273_s7 + $0x8] sm:$0xff] }
  0x21   : > { %5630 = vmatmul.mubr.msk.bf16.gmra.mrb[4].mxu0 %vm617_vm0, %v6159_v5 }
  0x22   : > { %5633 = vmatprep.mubr.msk.bf16.mxu0 %vm617_vm0, %v6160_v6 }
  0x23   : > { %1395 = vperm.xlu1 %6153, %v1365_v42   ;;  %v3082_v42 = vld [vmem:[%s7273_s7] sm:$0xff] }
  0x24   : > { %1390 = vperm.xlu0 %6152, %v1364_v43   ;;  %v3139_v43 = vld [vmem:[%s7274_s8 + $0x8] sm:$0xff] }
  0x27   : > { %1451 = vperm.xlu1 %6153, %v1421_v47   ;;  %v3141_v47 = vld [vmem:[%s7274_s8 + $0x18] sm:$0xff] }
  0x28   : > { %1446 = vperm.xlu0 %6152, %v1420_v48   ;;  %v3140_v48 = vld [vmem:[%s7274_s8 + $0x10] sm:$0xff] }
  0x29   : > { %5634 = vmatmul.mubr.msk.bf16.gmra.mrb[8].mxu0 %vm617_vm0, %v6161_v7 }
  0x2a   : > { %5637 = vmatprep.mubr.msk.bf16.mxu0 %vm617_vm0, %v6162_v8 }
  0x2b   : > { %2360 = vperm.xlu1 %6153, %v2330_v51   ;;  %v3086_v51 = vld [vmem:[%s7273_s7 + $0x20] sm:$0xff] }
  0x2c   : > { %2355 = vperm.xlu0 %6152, %v2329_v52   ;;  %v3143_v52 = vld [vmem:[%s7274_s8 + $0x28] sm:$0xff] }
  0x2f   : > { %1405 = vperm.xlu1 %6153, %v1367_v56   ;;  %v3145_v56 = vld [vmem:[%s7274_s8 + $0x38] sm:$0xff] }
  0x30   : > { %1400 = vperm.xlu0 %6152, %v1366_v58   ;;  %v5298_v58 = vld [vmem:[%s7273_s7 + $0x48] sm:$0xff] }
  0x31   : > { %5638 = vmatmul.mubr.msk.bf16.gmra.mrb[12].mxu0 %vm617_vm0, %v6163_v9 }
  0x32   : > { %5641 = vmatprep.mubr.msk.bf16.mxu0 %vm617_vm0, %v6164_v10 }
  0x33   : > { %1461 = vperm.xlu1 %6153, %v1423_v59   ;;  %v5297_v59 = vld [vmem:[%s7273_s7 + $0x40] sm:$0xff] }
  0x34   : > { %1456 = vperm.xlu0 %6152, %v1422_v60   ;;  %v5306_v60 = vld [vmem:[%s7274_s8 + $0x48] sm:$0xff] }
  0x38   : > { %2365 = vperm.xlu0 %6152, %v2331_v40  }
  0x39   : > { %5642 = vmatmul.mubr.msk.bf16.gmra.mrb[16].mxu0 %vm617_vm0, %v6165_v11 }
  0x3a   : > { %5645 = vmatprep.mubr.msk.bf16.mxu0 %vm617_vm0, %v6166_v12 }
  0x3c   : > { %3092 = vperm.xlu0 %6152, %v3082_v42   ;;  %v4814_v42 = vld [vmem:[%s7279_s13 + $0x28] sm:$0xff] }
  0x41   : > { %5646 = vmatmul.mubr.msk.bf16.gmra.mrb[20].mxu0 %vm617_vm0, %v6167_v13 }
  0x42   : > { %5649 = vmatprep.mubr.msk.bf16.mxu0 %vm617_vm0, %v6168_v14 }
  0x49   : > { %5650 = vmatmul.mubr.msk.bf16.gmra.mrb[24].mxu0 %vm617_vm0, %v6169_v15 }
  0x4a   : > { %5653 = vmatprep.mubr.msk.bf16.mxu0 %vm617_vm0, %v6170_v16 }
  0x51   : > { %5654 = vmatmul.mubr.msk.bf16.gmra.mrb[28].mxu0 %vm617_vm0, %v6171_v17 }
  0x8b   : > { %v1371_v3 = vpop.permute.xlu0 %1370 }
  0xec   : > { %v6467_v36 = vpop.f32.mrb[0].mxu0 }
  0xed   : > { %v700_v37 = vpop.f32.mrb[1].mxu0 }
  0xee   : > { %v6469_v38 = vpop.f32.mrb[2].mxu0 }
  0xef   : > { %v703_v39 = vpop.f32.mrb[3].mxu0 }
  0xf4   : > { %v6483_v44 = vpop.f32.mrb[4].mxu0 }
  0xf5   : > { %v716_v45 = vpop.f32.mrb[5].mxu0 }
  0xf6   : > { %v5632_v46 = vpop.f32.mrb[6].mxu0 }
  0xf7   : > { %v719_v49 = vpop.f32.mrb[7].mxu0 }
  0xfc   : > { %v5635_v53 = vpop.f32.mrb[8].mxu0 }
  0xfd   : > { %v732_v54 = vpop.f32.mrb[9].mxu0  ;;  %5662 = vmatprep.mubr.msk.f32.mxu1 %vm827_vm3, %v5635_v53  ;;  %v3142_v53 = vld [vmem:[%s7274_s8 + $0x20] sm:$0xff] }
  0xfe   : > { %v5636_v55 = vpop.f32.mrb[10].mxu0  ;;  %5659 = vmatprep.mubr.msk.f32.mxu0 %vm827_vm3, %v732_v54  ;;  %v3089_v54 = vld [vmem:[%s7273_s7 + $0x38] sm:$0xff] }
  0xff   : > { %v735_v57 = vpop.f32.mrb[11].mxu0  ;;  %5663 = vmatmul.mubr.msk.f32.vlgmr.msra.gmra.mrb[0].mxu1 %vm827_vm3, %v5636_v55  ;;  %v3088_v55 = vld [vmem:[%s7273_s7 + $0x30] sm:$0xff] }
 0x100   : > { %5660 = vmatmul.mubr.msk.f32.vlgmr.msra.gmra.mrb[32].mxu0 %vm827_vm3, %v735_v57  ;;  %5672 = vmatpush3.msk.msra.mxu1 %vm479_vm2, %v6236_v23  ;;  %v3144_v57 = vld [vmem:[%s7274_s8 + $0x30] sm:$0xff] }
 0x101   : > { %5685 = vmatprep.subr.msk.mxu1 %vm486_vm4, %v6236_v23  ;;  %5750 = vmatpush3.msk.msra.mxu0 %vm6409_vm1, %v6236_v23  ;;  %vm2413_vm1 = vcmp.eq.s32.totalorder %v6429_v24, %v6400_v19 }
 0x102   : > { %5763 = vmatprep.subr.msk.mxu0 %vm479_vm2, %v6236_v23 }
 0x104   : > { %v5639_v61 = vpop.f32.mrb[12].mxu0 }
 0x105   : > { %v748_v62 = vpop.f32.mrb[13].mxu0 }
 0x106   : > { %v5640_v63 = vpop.f32.mrb[14].mxu0  ;;  %5665 = vmatprep.mubr.msk.f32.mxu1 %vm827_vm3, %v748_v62  ;;  %v5300_v62 = vld [vmem:[%s7273_s7 + $0x58] sm:$0xff] }
 0x107   : > { %v751_v0 = vpop.f32.mrb[15].mxu0 }
 0x108   : > { %5666 = vmatmul.mubr.msk.f32.gmra.mrb[2].mxu1 %vm827_vm3, %v751_v0  ;;  %v5308_v0 = vld [vmem:[%s7274_s8 + $0x58] sm:$0xff] }
 0x109   : > { %5668 = vmatprep.mubr.msk.f32.mxu1 %vm827_vm3, %v5639_v61  ;;  %v5305_v61 = vld [vmem:[%s7274_s8 + $0x40] sm:$0xff] }
 0x10c   : > { %5669 = vmatmul.mubr.msk.f32.gmra.mrb[4].mxu1 %vm827_vm3, %v5640_v63  ;;  %v5643_v4 = vpop.f32.mrb[16].mxu0  ;;  %v5299_v63 = vld [vmem:[%s7273_s7 + $0x50] sm:$0xff] }
 0x10d   : > { %5673 = vmatprep.mubr.msk.f32.mxu1 %vm827_vm3, %v700_v37  ;;  %v764_v5 = vpop.f32.mrb[17].mxu0  ;;  %v6186_v37 = vld [vmem:[%s7270_s4 + $0x70] sm:$0xff]  }
 0x10e   : > { %v5644_v6 = vpop.f32.mrb[18].mxu0 }
 0x10f   : > { %v767_v7 = vpop.f32.mrb[19].mxu0 }
 0x110   : > { %5674 = vmatmul.mubr.msk.f32.vlgmr.msra.gmra.mrb[6].mxu1 %vm827_vm3, %v703_v39  ;;  %v2332_v39 = vld [vmem:[%s7271_s5 + $0x38] sm:$0xff] }
 0x111   : > { %5676 = vmatprep.mubr.msk.f32.mxu1 %vm827_vm3, %v6467_v36  ;;  %5686 = vmatpush3.msk.msra.mxu1 %vm486_vm4, %v6236_v23  ;;  %v6185_v36 = vld [vmem:[%s7270_s4 + $0x68] sm:$0xff]  }
 0x112   : > { %5699 = vmatprep.subr.msk.mxu1 %vm490_vm5, %v6236_v23  ;;  %2370 = vperm.xlu1 %6153, %v2332_v39  }
 0x114   : > { %5677 = vmatmul.mubr.msk.f32.gmra.mrb[0].mxu1 %vm827_vm3, %v6469_v38  ;;  %v5647_v8 = vpop.f32.mrb[20].mxu0  ;;  %v6187_v38 = vld [vmem:[%s7270_s4 + $0x78] sm:$0xff]  }
 0x115   : > { %5679 = vmatprep.mubr.msk.f32.mxu1 %vm827_vm3, %v716_v45  ;;  %v780_v9 = vpop.f32.mrb[21].mxu0  ;;  %v3085_v45 = vld [vmem:[%s7273_s7 + $0x18] sm:$0xff] }
 0x116   : > { %v5648_v10 = vpop.f32.mrb[22].mxu0  ;;  %3097 = vperm.xlu1 %6153, %v3083_v41  }
 0x117   : > { %v783_v11 = vpop.f32.mrb[23].mxu0 }
 0x118   : > { %5680 = vmatmul.mubr.msk.f32.gmra.mrb[2].mxu1 %vm827_vm3, %v719_v49  ;;  %v3087_v49 = vld [vmem:[%s7273_s7 + $0x28] sm:$0xff] }
 0x119   : > { %5682 = vmatprep.mubr.msk.f32.mxu1 %vm827_vm3, %v6483_v44  ;;  %v3138_v44 = vld [vmem:[%s7274_s8] sm:$0xff] }
 0x11a   : > { %3153 = vperm.xlu1 %6153, %v3139_v43   ;;  %3148 = vperm.xlu0 %6152, %v3138_v44   ;;  %v4813_v43 = vld [vmem:[%s7279_s13 + $0x20] sm:$0xff] }
 0x11c   : > { %5683 = vmatmul.mubr.msk.f32.gmra.mrb[4].mxu1 %vm827_vm3, %v5632_v46  ;;  %v5651_v12 = vpop.f32.mrb[24].mxu0  ;;  %v3084_v46 = vld [vmem:[%s7273_s7 + $0x10] sm:$0xff] }
 0x11d   : > { %5687 = vmatprep.mubr.msk.f32.mxu1 %vm827_vm3, %v764_v5  ;;  %v796_v13 = vpop.f32.mrb[25].mxu0  ;;  %v5302_v5 = vld [vmem:[%s7273_s7 + $0x68] sm:$0xff] }
 0x11e   : > { %v5652_v14 = vpop.f32.mrb[26].mxu0  ;;  %3107 = vperm.xlu1 %6153, %v3085_v45   ;;  %3102 = vperm.xlu0 %6152, %v3084_v46   ;;  %v4816_v46 = vld [vmem:[%s7279_s13 + $0x38] sm:$0xff] }
 0x11f   : > { %v799_v15 = vpop.f32.mrb[27].mxu0 }
 0x120   : > { %5688 = vmatmul.mubr.msk.f32.vlgmr.msra.gmra.mrb[6].mxu1 %vm827_vm3, %v767_v7 }
 0x121   : > { %5690 = vmatprep.mubr.msk.f32.mxu1 %vm827_vm3, %v5643_v4  ;;  %5700 = vmatpush3.msk.msra.mxu1 %vm490_vm5, %v6236_v23  ;;  %v5307_v4 = vld [vmem:[%s7274_s8 + $0x50] sm:$0xff] }
 0x122   : > { %5713 = vmatprep.subr.bf16.mxu1 %v6332_v1  ;;  %3163 = vperm.xlu1 %6153, %v3141_v47   ;;  %v4815_v47 = vld [vmem:[%s7279_s13 + $0x30] sm:$0xff] }
 0x123   : > { %3158 = vperm.xlu0 %6152, %v3140_v48  }
 0x124   : > { %5691 = vmatmul.mubr.msk.f32.gmra.mrb[0].mxu1 %vm827_vm3, %v5644_v6  ;;  %v5655_v16 = vpop.f32.mrb[28].mxu0  ;;  %v5301_v6 = vld [vmem:[%s7273_s7 + $0x60] sm:$0xff] }
 0x125   : > { %5693 = vmatprep.mubr.msk.f32.mxu1 %vm827_vm3, %v780_v9  ;;  %v812_v17 = vpop.f32.mrb[29].mxu0  ;;  %v5309_v9 = vld [vmem:[%s7274_s8 + $0x60] sm:$0xff] }
 0x126   : > { %v5656_v18 = vpop.f32.mrb[30].mxu0  ;;  %3117 = vperm.xlu1 %6153, %v3087_v49  }
 0x127   : > { %v815_v22 = vpop.f32.mrb[31].mxu0  ;;  %3112 = vperm.xlu0 %6152, %v3086_v51  }
 0x128   : > { %5694 = vmatmul.mubr.msk.f32.gmra.mrb[2].mxu1 %vm827_vm3, %v783_v11  ;;  %v5304_v11 = vld [vmem:[%s7273_s7 + $0x78] sm:$0xff] }
 0x129   : > { %5696 = vmatprep.mubr.msk.f32.mxu1 %vm827_vm3, %v5647_v8  ;;  %v5310_v8 = vld [vmem:[%s7274_s8 + $0x68] sm:$0xff] }
 0x12a   : > { %3173 = vperm.xlu1 %6153, %v3143_v52  }
 0x12b   : > { %3168 = vperm.xlu0 %6152, %v3142_v53  }
 0x12c   : > { %5697 = vmatmul.mubr.msk.f32.gmra.mrb[4].mxu1 %vm827_vm3, %v5648_v10 }
 0x12d   : > { %5701 = vmatprep.mubr.msk.f32.mxu1 %vm827_vm3, %v796_v13  ;;  %v5312_v13 = vld [vmem:[%s7274_s8 + $0x78] sm:$0xff] }
 0x12e   : > { %3127 = vperm.xlu1 %6153, %v3089_v54  }
 0x12f   : > { %3122 = vperm.xlu0 %6152, %v3088_v55  }
 0x130   : > { %5702 = vmatmul.mubr.msk.f32.vlgmr.msra.gmra.mrb[6].mxu1 %vm827_vm3, %v799_v15  ;;  %v4670_v15 = vld [vmem:[%s7276_s10 + $0x8] sm:$0xff] }
 0x131   : > { %5704 = vmatprep.mubr.msk.f32.mxu1 %vm827_vm3, %v5651_v12  ;;  %5714 = vmatpush3.bf16.msra.mxu1 %v6332_v1  ;;  %v6173_v1 = vld [vmem:[%s7270_s4 + $0x8] sm:$0xff]   ;;  %v5303_v12 = vld [vmem:[%s7273_s7 + $0x70] sm:$0xff] }
 0x132   : > { %5715 = vmatprep.subr.bf16.mxu1 %v6334_v2  ;;  %3183 = vperm.xlu1 %6153, %v3145_v56  }
 0x133   : > { %3178 = vperm.xlu0 %6152, %v3144_v57  }
 0x134   : > { %5705 = vmatmul.mubr.msk.f32.gmra.mrb[0].mxu1 %vm827_vm3, %v5652_v14  ;;  %v5311_v14 = vld [vmem:[%s7274_s8 + $0x70] sm:$0xff] }
 0x135   : > { %5707 = vmatprep.mubr.msk.f32.mxu1 %vm827_vm3, %v812_v17  ;;  %5716 = vmatpush3.bf16.msra.mxu1 %v6334_v2  ;;  %v6174_v2 = vld [vmem:[%s7270_s4 + $0x10] sm:$0xff]   ;;  %v4726_v17 = vld [vmem:[%s7277_s11 + $0x8] sm:$0xff] }
 0x136   : > { %3891 = vperm.xlu1 %6153, %v5298_v58  }
 0x137   : > { %3886 = vperm.xlu0 %6152, %v5297_v59  }
 0x138   : > { %5708 = vmatmul.mubr.msk.f32.gmra.mrb[2].mxu1 %vm827_vm3, %v815_v22  ;;  %v4672_v22 = vld [vmem:[%s7276_s10 + $0x18] sm:$0xff] }
 0x139   : > { %5710 = vmatprep.mubr.msk.f32.mxu1 %vm827_vm3, %v5655_v16  ;;  %v4669_v16 = vld [vmem:[%s7276_s10] sm:$0xff] }
 0x13a   : > { %3948 = vperm.xlu1 %6153, %v5306_v60  }
 0x13b   : > { %3943 = vperm.xlu0 %6152, %v5305_v61  }
 0x13c   : > { %5711 = vmatmul.mubr.msk.f32.gmra.mrb[4].mxu1 %vm827_vm3, %v5656_v18  ;;  %v4725_v18 = vld [vmem:[%s7277_s11] sm:$0xff] }
 0x13d   : > { %5717 = vmatprep.mubr.msk.bf16.mxu1 %vm617_vm0, %v6172_v25  ;;  %v4671_v25 = vld [vmem:[%s7276_s10 + $0x10] sm:$0xff] }
 0x13e   : > { %3901 = vperm.xlu1 %6153, %v5300_v62  }
 0x13f   : > { %3896 = vperm.xlu0 %6152, %v5299_v63  }
 0x140   : > { %5718 = vmatmul.mubr.msk.bf16.vlgmr.msra.gmra.mrb[8].mxu1 %vm617_vm0, %v6173_v1  ;;  %v4728_v1 = vld [vmem:[%s7277_s11 + $0x18] sm:$0xff] }
 0x141   : > { %5721 = vmatprep.mubr.msk.bf16.mxu1 %vm617_vm0, %v6174_v2  ;;  %v4727_v2 = vld [vmem:[%s7277_s11 + $0x10] sm:$0xff] }
 0x142   : > { %3958 = vperm.xlu1 %6153, %v5308_v0  }
 0x143   : > { %3953 = vperm.xlu0 %6152, %v5307_v4  }
 0x146   : > { %3911 = vperm.xlu1 %6153, %v5302_v5  }
 0x147   : > { %3906 = vperm.xlu0 %6152, %v5301_v6  }
 0x148   : > { %5722 = vmatmul.mubr.msk.bf16.gmra.mrb[12].mxu1 %vm617_vm0, %v6175_v26  ;;  %v4674_v26 = vld [vmem:[%s7276_s10 + $0x28] sm:$0xff] }
 0x149   : > { %5725 = vmatprep.mubr.msk.bf16.mxu1 %vm617_vm0, %v6176_v27  ;;  %v4673_v27 = vld [vmem:[%s7276_s10 + $0x20] sm:$0xff] }
 0x14a   : > { %3968 = vperm.xlu1 %6153, %v5310_v8  }
 0x14b   : > { %3963 = vperm.xlu0 %6152, %v5309_v9  }
 0x14e   : > { %3921 = vperm.xlu1 %6153, %v5304_v11  }
 0x14f   : > { %3916 = vperm.xlu0 %6152, %v5303_v12  }
 0x150   : > { %5726 = vmatmul.mubr.msk.bf16.gmra.mrb[16].mxu1 %vm617_vm0, %v6177_v28  ;;  %v4730_v28 = vld [vmem:[%s7277_s11 + $0x28] sm:$0xff] }
 0x151   : > { %5729 = vmatprep.mubr.msk.bf16.mxu1 %vm617_vm0, %v6178_v29  ;;  %v4729_v29 = vld [vmem:[%s7277_s11 + $0x20] sm:$0xff] }
 0x152   : > { %3978 = vperm.xlu1 %6153, %v5312_v13  }
 0x153   : > { %3973 = vperm.xlu0 %6152, %v5311_v14  }
 0x156   : > { %4684 = vperm.xlu1 %6153, %v4670_v15  }
 0x157   : > { %4679 = vperm.xlu0 %6152, %v4669_v16  }
 0x158   : > { %5730 = vmatmul.mubr.msk.bf16.gmra.mrb[20].mxu1 %vm617_vm0, %v6179_v30  ;;  %v4676_v30 = vld [vmem:[%s7276_s10 + $0x38] sm:$0xff] }
 0x159   : > { %5733 = vmatprep.mubr.msk.bf16.mxu1 %vm617_vm0, %v6180_v31  ;;  %v4675_v31 = vld [vmem:[%s7276_s10 + $0x30] sm:$0xff] }
 0x15a   : > { %4740 = vperm.xlu1 %6153, %v4726_v17  }
 0x15b   : > { %4735 = vperm.xlu0 %6152, %v4725_v18  }
 0x15e   : > { %4694 = vperm.xlu1 %6153, %v4672_v22  }
 0x15f   : > { %4689 = vperm.xlu0 %6152, %v4671_v25  }
 0x160   : > { %5734 = vmatmul.mubr.msk.bf16.gmra.mrb[24].mxu1 %vm617_vm0, %v6181_v32  ;;  %v4732_v32 = vld [vmem:[%s7277_s11 + $0x38] sm:$0xff] }
 0x161   : > { %5737 = vmatprep.mubr.msk.bf16.mxu1 %vm617_vm0, %v6182_v33  ;;  %v4731_v33 = vld [vmem:[%s7277_s11 + $0x30] sm:$0xff] }
 0x162   : > { %4750 = vperm.xlu1 %6153, %v4728_v1  }
 0x163   : > { %4745 = vperm.xlu0 %6152, %v4727_v2  }
 0x166   : > { %4704 = vperm.xlu1 %6153, %v4674_v26  }
 0x167   : > { %4699 = vperm.xlu0 %6152, %v4673_v27  }
 0x168   : > { %5738 = vmatmul.mubr.msk.bf16.gmra.mrb[28].mxu1 %vm617_vm0, %v6183_v34  ;;  %v4810_v34 = vld [vmem:[%s7279_s13 + $0x8] sm:$0xff] }
 0x169   : > { %5741 = vmatprep.mubr.msk.bf16.mxu1 %vm617_vm0, %v6184_v35  ;;  %v4809_v35 = vld [vmem:[%s7279_s13] sm:$0xff] }
 0x16a   : > { %4760 = vperm.xlu1 %6153, %v4730_v28   ;;  %v1376_v28 = vpop.permute.xlu0 %1375 }
 0x16b   : > { %4755 = vperm.xlu0 %6152, %v4729_v29  }
 0x16e   : > { %4714 = vperm.xlu1 %6153, %v4676_v30   ;;  %v2336_v30 = vpop.permute.xlu0 %2335 }
 0x16f   : > { %4709 = vperm.xlu0 %6152, %v4675_v31  }
 0x170   : > { %5742 = vmatmul.mubr.msk.bf16.gmra.mrb[32].mxu1 %vm617_vm0, %v6185_v36  ;;  %v4812_v36 = vld [vmem:[%s7279_s13 + $0x18] sm:$0xff] }
 0x171   : > { %5745 = vmatprep.mubr.msk.bf16.mxu1 %vm617_vm0, %v6186_v37  ;;  %v4811_v37 = vld [vmem:[%s7279_s13 + $0x10] sm:$0xff] }
 0x172   : > { %4770 = vperm.xlu1 %6153, %v4732_v32   ;;  %v1381_v32 = vpop.permute.xlu0 %1380 }
 0x173   : > { %4765 = vperm.xlu0 %6152, %v4731_v33  }
 0x176   : > { %4824 = vperm.xlu1 %6153, %v4810_v34   ;;  %v1437_v34 = vpop.permute.xlu0 %1436 }
 0x177   : > { %4819 = vperm.xlu0 %6152, %v4809_v35  }
 0x178   : > { %5746 = vmatmul.mubr.msk.bf16.gmra.mrb[36].mxu1 %vm617_vm0, %v6187_v38  ;;  %vm2701_vm0 = vcmask 1043456  }
 0x179   : > { %5813 = vmatprep.mubr.msk.bf16.mxu1 %vm2510_vm6, %v6188_v21 }
 0x17a   : > { %4834 = vperm.xlu1 %6153, %v4812_v36   ;;  %v2346_v36 = vpop.permute.xlu0 %2345 }
 0x17b   : > { %4829 = vperm.xlu0 %6152, %v4811_v37  }
 0x17e   : > { %4844 = vperm.xlu1 %6153, %v4814_v42  }
 0x17f   : > { %4839 = vperm.xlu0 %6152, %v4813_v43  }
 0x182   : > { %4854 = vperm.xlu1 %6153, %v4816_v46  }
 0x183   : > { %4849 = vperm.xlu0 %6152, %v4815_v47  }
 0x1d3   : > { %v5661_v7 = vpop.f32.mrb[32].mxu0 }
 0x1d4   : > { %v918_v10 = vpop.f32.mrb[33].mxu0 }
 0x203   : > { %v5703_v38 = vpop.f32.mrb[6].mxu1 }
 0x204   : > { %v6811_v39 = vadd.f32 %v5703_v38, %v5661_v7  ;;  %v1313_v40 = vpop.f32.mrb[7].mxu1  ;;  %v1391_v38 = vpop.permute.xlu0 %1390 }
 0x205   : > { %v6813_v41 = vadd.f32 %v1313_v40, %v918_v10 }
 0x206   : > { %v1409_v46 = vmul.f32 %v6811_v39, %v1376_v28 }
 0x207   : > { %v6821_v44 = vpop.f32.mrb[0].mxu1 }
 0x208   : > { %v6823_v45 = vpop.f32.mrb[1].mxu1  ;;  %v1447_v42 = vpop.permute.xlu0 %1446 }
 0x20b   : > { %v6831_v48 = vpop.f32.mrb[2].mxu1 }
 0x20c   : > { %v6833_v49 = vpop.f32.mrb[3].mxu1  ;;  %v2356_v47 = vpop.permute.xlu0 %2355 }
 0x20d   : > { %v1412_v39 = vmul.f32 %v1391_v38, %v6833_v49 }
 0x20f   : > { %v6835_v51 = vpop.f32.mrb[4].mxu1 }
 0x210   : > { %v6837_v52 = vpop.f32.mrb[5].mxu1 }
 0x213   : > { %v5719_v53 = vpop.f32.mrb[8].mxu1 }
 0x214   : > { %v1666_v54 = vpop.f32.mrb[9].mxu1 }
 0x215   : > { %v5720_v55 = vpop.f32.mrb[10].mxu1 }
 0x216   : > { %v1669_v56 = vpop.f32.mrb[11].mxu1 }
 0x21b   : > { %v5723_v57 = vpop.f32.mrb[12].mxu1 }
 0x21c   : > { %v1682_v58 = vpop.f32.mrb[13].mxu1 }
 0x21d   : > { %v5724_v59 = vpop.f32.mrb[14].mxu1 }
 0x21e   : > { %v1685_v60 = vpop.f32.mrb[15].mxu1 }
 0x223   : > { %v5727_v61 = vpop.f32.mrb[16].mxu1 }
 0x224   : > { %v1698_v62 = vpop.f32.mrb[17].mxu1 }
 0x225   : > { %v5728_v63 = vpop.f32.mrb[18].mxu1  ;;  %5751 = vmatprep.mubr.msk.f32.mxu0 %vm827_vm3, %v1698_v62 }
 0x226   : > { %v1701_v0 = vpop.f32.mrb[19].mxu1 }
 0x227   : > { %5752 = vmatmul.mubr.msk.f32.vlgmr.msra.gmra.mrb[34].mxu0 %vm827_vm3, %v1701_v0  ;;  %v1401_v0 = vpop.permute.xlu0 %1400 }
 0x228   : > { %5754 = vmatprep.mubr.msk.f32.mxu0 %vm827_vm3, %v5727_v61  ;;  %5764 = vmatpush3.msk.msra.mxu0 %vm479_vm2, %v6236_v23  ;;  %vm2419_vm2 = vcmp.eq.s32.totalorder %v6492_v50, %v6400_v19 }
 0x229   : > { %5777 = vmatprep.subr.msk.mxu0 %vm486_vm4, %v6236_v23 }
 0x22b   : > { %v5731_v4 = vpop.f32.mrb[20].mxu1  ;;  %5755 = vmatmul.mubr.msk.f32.gmra.mrb[36].mxu0 %vm827_vm3, %v5728_v63 }
 0x22c   : > { %v1714_v5 = vpop.f32.mrb[21].mxu1 }
 0x22d   : > { %v5732_v6 = vpop.f32.mrb[22].mxu1  ;;  %5757 = vmatprep.mubr.msk.f32.mxu0 %vm827_vm3, %v1714_v5 }
 0x22e   : > { %v1717_v7 = vpop.f32.mrb[23].mxu1 }
 0x22f   : > { %5758 = vmatmul.mubr.msk.f32.gmra.mrb[38].mxu0 %vm827_vm3, %v1717_v7 }
 0x230   : > { %5760 = vmatprep.mubr.msk.f32.mxu0 %vm827_vm3, %v5731_v4 }
 0x233   : > { %5761 = vmatmul.mubr.msk.f32.gmra.mrb[40].mxu0 %vm827_vm3, %v5732_v6  ;;  %v5735_v8 = vpop.f32.mrb[24].mxu1 }
 0x234   : > { %5765 = vmatprep.mubr.msk.f32.mxu0 %vm827_vm3, %v1666_v54  ;;  %v1730_v9 = vpop.f32.mrb[25].mxu1 }
 0x235   : > { %v5736_v10 = vpop.f32.mrb[26].mxu1 }
 0x236   : > { %v1733_v11 = vpop.f32.mrb[27].mxu1 }
 0x237   : > { %5766 = vmatmul.mubr.msk.f32.vlgmr.msra.gmra.mrb[34].mxu0 %vm827_vm3, %v1669_v56 }
 0x238   : > { %5768 = vmatprep.mubr.msk.f32.mxu0 %vm827_vm3, %v5719_v53  ;;  %5778 = vmatpush3.msk.msra.mxu0 %vm486_vm4, %v6236_v23  ;;  %v1408_v53 = vmul.f32 %v6813_v41, %v1371_v3 }
 0x239   : > { %5791 = vmatprep.subr.msk.mxu0 %vm490_vm5, %v6236_v23 }
 0x23b   : > { %5769 = vmatmul.mubr.msk.f32.gmra.mrb[36].mxu0 %vm827_vm3, %v5720_v55  ;;  %v5739_v12 = vpop.f32.mrb[28].mxu1 }
 0x23c   : > { %5771 = vmatprep.mubr.msk.f32.mxu0 %vm827_vm3, %v1682_v58  ;;  %v1746_v13 = vpop.f32.mrb[29].mxu1 }
 0x23d   : > { %v5740_v14 = vpop.f32.mrb[30].mxu1 }
 0x23e   : > { %v1749_v15 = vpop.f32.mrb[31].mxu1 }
 0x23f   : > { %5772 = vmatmul.mubr.msk.f32.gmra.mrb[38].mxu0 %vm827_vm3, %v1685_v60 }
 0x240   : > { %5774 = vmatprep.mubr.msk.f32.mxu0 %vm827_vm3, %v5723_v57 }
 0x243   : > { %5775 = vmatmul.mubr.msk.f32.gmra.mrb[40].mxu0 %vm827_vm3, %v5724_v59  ;;  %v5743_v16 = vpop.f32.mrb[32].mxu1  ;;  %v1410_v59 = vmul.f32 %v1381_v32, %v6823_v45 }
 0x244   : > { %5779 = vmatprep.mubr.msk.f32.mxu0 %vm827_vm3, %v1730_v9  ;;  %v1762_v17 = vpop.f32.mrb[33].mxu1 }
 0x245   : > { %v5744_v18 = vpop.f32.mrb[34].mxu1  ;;  %v1466_v9 = vadd.f32 %v1437_v34, %v1410_v59  ;;  %v6190_v59 = vld [vmem:[%s7272_s6 + $0x10] sm:$0xff]  }
 0x246   : > { %v1765_v22 = vpop.f32.mrb[35].mxu1 }
 0x247   : > { %5780 = vmatmul.mubr.msk.f32.vlgmr.msra.gmra.mrb[34].mxu0 %vm827_vm3, %v1733_v11 }
 0x248   : > { %5782 = vmatprep.mubr.msk.f32.mxu0 %vm827_vm3, %v5735_v8  ;;  %5792 = vmatpush3.msk.msra.mxu0 %vm490_vm5, %v6236_v23  ;;  %v1427_v23 = vpop.permute.xlu1 %1426 }
 0x249   : > { %v1464_v61 = vadd.f32 %v1427_v23, %v1408_v53 }
 0x24b   : > { %5783 = vmatmul.mubr.msk.f32.gmra.mrb[36].mxu0 %vm827_vm3, %v5736_v10  ;;  %v5747_v25 = vpop.f32.mrb[36].mxu1 }
 0x24c   : > { %5785 = vmatprep.mubr.msk.f32.mxu0 %vm827_vm3, %v1746_v13  ;;  %v1778_v1 = vpop.f32.mrb[37].mxu1  ;;  %v1432_v27 = vpop.permute.xlu1 %1431 }
 0x24d   : > { %v5748_v2 = vpop.f32.mrb[38].mxu1  ;;  %v1465_v56 = vadd.f32 %v1432_v27, %v1409_v46 }
 0x24e   : > { %v1781_v26 = vpop.f32.mrb[39].mxu1 }
 0x24f   : > { %5786 = vmatmul.mubr.msk.f32.gmra.mrb[38].mxu0 %vm827_vm3, %v1749_v15 }
 0x250   : > { %5788 = vmatprep.mubr.msk.f32.mxu0 %vm827_vm3, %v5739_v12  ;;  %v2341_v29 = vpop.permute.xlu1 %2340 }
 0x253   : > { %5789 = vmatmul.mubr.msk.f32.gmra.mrb[40].mxu0 %vm827_vm3, %v5740_v14 }
 0x254   : > { %5793 = vmatprep.mubr.msk.f32.mxu0 %vm827_vm3, %v1762_v17  ;;  %v1386_v31 = vpop.permute.xlu1 %1385 }
 0x255   : > { %v1411_v55 = vmul.f32 %v6821_v44, %v1386_v31 }
 0x257   : > { %5794 = vmatmul.mubr.msk.f32.vlgmr.msra.gmra.mrb[34].mxu0 %vm827_vm3, %v1765_v22 }
 0x258   : > { %5796 = vmatprep.mubr.msk.f32.mxu0 %vm827_vm3, %v5743_v16  ;;  %v1442_v33 = vpop.permute.xlu1 %1441 }
 0x259   : > { %v1467_v41 = vadd.f32 %v1442_v33, %v1411_v55 }
 0x25b   : > { %5797 = vmatmul.mubr.msk.f32.gmra.mrb[36].mxu0 %vm827_vm3, %v5744_v18  ;;  %v1457_v18 = vpop.permute.xlu0 %1456 }
 0x25c   : > { %5799 = vmatprep.mubr.msk.f32.mxu0 %vm827_vm3, %v1778_v1  ;;  %v2351_v35 = vpop.permute.xlu1 %2350 }
 0x25f   : > { %5800 = vmatmul.mubr.msk.f32.gmra.mrb[38].mxu0 %vm827_vm3, %v1781_v26  ;;  %v1414_v26 = vmul.f32 %v1401_v0, %v6837_v52  ;;  %v2366_v32 = vpop.permute.xlu0 %2365  ;;  %v6195_v0 = vld [vmem:[%s7272_s6 + $0x38] sm:$0xff]  }
 0x260   : > { %5802 = vmatprep.mubr.msk.f32.mxu0 %vm827_vm3, %v5747_v25  ;;  %v1396_v37 = vpop.permute.xlu1 %1395 }
 0x261   : > { %v1413_v63 = vmul.f32 %v6831_v48, %v1396_v37  ;;  %v1468_v48 = vadd.f32 %v1447_v42, %v1412_v39  ;;  %v6197_v39 = vld [vmem:[%s7272_s6 + $0x48] sm:$0xff]  }
 0x263   : > { %5803 = vmatmul.mubr.msk.f32.gmra.mrb[40].mxu0 %vm827_vm3, %v5748_v2  ;;  %vm2676_vm3 = vcmask 31744  }
 0x264   : > { %v1452_v40 = vpop.permute.xlu1 %1451 }
 0x265   : > { %v1469_v11 = vadd.f32 %v1452_v40, %v1413_v63  ;;  %v6194_v63 = vld [vmem:[%s7272_s6 + $0x30] sm:$0xff]  }
 0x268   : > { %v2361_v43 = vpop.permute.xlu1 %2360 }
 0x26c   : > { %v1406_v60 = vpop.permute.xlu1 %1405 }
 0x26d   : > { %v1415_v14 = vmul.f32 %v6835_v51, %v1406_v60  ;;  %v6191_v60 = vld [vmem:[%s7272_s6 + $0x18] sm:$0xff]  }
 0x270   : > { %v1462_v15 = vpop.permute.xlu1 %1461 }
 0x271   : > { %v1471_v27 = vadd.f32 %v1462_v15, %v1415_v14 }
 0x274   : > { %v2371_v28 = vpop.permute.xlu1 %2370 }
 0x32a   : > { %v5795_v54 = vpop.f32.mrb[34].mxu0 }
 0x32b   : > { %v2374_v57 = vadd.f32 %v5795_v54, %v2341_v29  ;;  %v2278_v58 = vpop.f32.mrb[35].mxu0 }
 0x32c   : > { %v2373_v62 = vadd.f32 %v2336_v30, %v2278_v58  ;;  %v6189_v58 = vld [vmem:[%s7272_s6 + $0x8] sm:$0xff]  }
 0x32d   : > { %v2382_v4 = vadd.f32 %v2374_v57, %v1465_v56 }
 0x32e   : > { %v2381_v5 = vadd.f32 %v2373_v62, %v1464_v61  ;;  %v5798_v6 = vpop.f32.mrb[36].mxu0  ;;  %v6192_v61 = vld [vmem:[%s7272_s6 + $0x20] sm:$0xff]   ;;  %v6193_v62 = vld [vmem:[%s7272_s6 + $0x28] sm:$0xff]  }
 0x32f   : > { %vm2390_vm7 = vcmp.ge.f32.partialorder %v2382_v4, 0.0  ;;  %v2398_v7 = vmul.f32 0.2, %v2382_v4  ;;  %v2376_v44 = vadd.f32 %v5798_v6, %v2351_v35  ;;  %v2288_v8 = vpop.f32.mrb[37].mxu0  ;;  %v6199_v6 = vld [vmem:[%s7272_s6 + $0x58] sm:$0xff]  }
 0x330   : > { %vm2389_vm8 = vcmp.ge.f32.partialorder %v2381_v5, 0.0  ;;  %v2397_v10 = vmul.f32 0.2, %v2381_v5  ;;  %v2375_v45 = vadd.f32 %v2346_v36, %v2288_v8  ;;  %v1470_v36 = vadd.f32 %v1457_v18, %v1414_v26 }
 0x331   : > { %v2384_v12 = vadd.f32 %v2376_v44, %v1467_v41  ;;  %v6901_v13 = vsel %vm2390_vm7, %v2382_v4, %v2398_v7  ;;  %v6196_v4 = vld [vmem:[%s7272_s6 + $0x40] sm:$0xff]   ;;  %v6238_v41 = vmov 0.0  }
 0x332   : > { %v2383_v49 = vadd.f32 %v2375_v45, %v1466_v9  ;;  %v5801_v16 = vpop.f32.mrb[38].mxu0  ;;  %v6904_v17 = vsel %vm2389_vm8, %v2381_v5, %v2397_v10  ;;  %v6198_v5 = vld [vmem:[%s7272_s6 + $0x50] sm:$0xff]   ;;  %v6973_v7 = vsel %vm2416_vm15, 1.0, %v6238_v41  ;;  %v6981_v44 = vsel %vm2413_vm1, 1.0, %v6238_v41 }
 0x333   : > { %vm2392_vm9 = vcmp.ge.f32.partialorder %v2384_v12, 0.0  ;;  %v2400_v22 = vmul.f32 0.2, %v2384_v12  ;;  %v2378_v25 = vadd.f32 %v5801_v16, %v2361_v43  ;;  %v2298_v1 = vpop.f32.mrb[39].mxu0  ;;  %v2446_v2 = vpack.c.bf16 %v6901_v13, %v6904_v17  ;;  %5837 = vmatprep.subr.msk.mxu0 %vm2701_vm0, %v6973_v7 }
 0x334   : > { %vm2391_vm10 = vcmp.ge.f32.partialorder %v2383_v49, 0.0  ;;  %v2399_v21 = vmul.f32 0.2, %v2383_v49  ;;  %v2377_v23 = vadd.f32 %v2356_v47, %v2298_v1  ;;  %5838 = vmatpush3.msk.msra.mxu0 %vm2701_vm0, %v6973_v7  ;;  %v6987_v20 = vsel %vm2419_vm2, 1.0, %v6238_v41 }
 0x335   : > { %v2386_v3 = vadd.f32 %v2378_v25, %v1469_v11  ;;  %5805 = vmatprep.subr.bf16.mxu1 %v2446_v2  ;;  %v6909_v51 = vsel %vm2392_vm9, %v2384_v12, %v2400_v22  ;;  %5851 = vmatprep.subr.msk.mxu0 %vm2701_vm0, %v6981_v44 }
 0x336   : > { %v2385_v29 = vadd.f32 %v2377_v23, %v1468_v48  ;;  %v5804_v30 = vpop.f32.mrb[40].mxu0  ;;  %5806 = vmatpush3.bf16.msra.mxu1 %v2446_v2  ;;  %v6911_v31 = vsel %vm2391_vm10, %v2383_v49, %v2399_v21 }
 0x337   : > { %vm2394_vm11 = vcmp.ge.f32.partialorder %v2386_v3, 0.0  ;;  %v2402_v33 = vmul.f32 0.2, %v2386_v3  ;;  %v2380_v34 = vadd.f32 %v5804_v30, %v2371_v28  ;;  %v2308_v35 = vpop.f32.mrb[41].mxu0  ;;  %v2447_v52 = vpack.c.bf16 %v6909_v51, %v6911_v31  ;;  %v6200_v28 = vld [vmem:[%s7272_s6 + $0x60] sm:$0xff]   ;;  %v3093_v30 = vpop.permute.xlu0 %3092 }
 0x338   : > { %vm2393_vm12 = vcmp.ge.f32.partialorder %v2385_v29, 0.0  ;;  %v2401_v37 = vmul.f32 0.2, %v2385_v29  ;;  %v2379_v38 = vadd.f32 %v2366_v32, %v2308_v35 }
 0x339   : > { %v2388_v40 = vadd.f32 %v2380_v34, %v1471_v27  ;;  %5807 = vmatprep.subr.bf16.mxu1 %v2447_v52  ;;  %v6915_v42 = vsel %vm2394_vm11, %v2386_v3, %v2402_v33 }
 0x33a   : > { %v2387_v43 = vadd.f32 %v2379_v38, %v1470_v36  ;;  %5808 = vmatpush3.bf16.msra.mxu1 %v2447_v52  ;;  %v6917_v46 = vsel %vm2393_vm12, %v2385_v29, %v2401_v37  ;;  %v3098_v29 = vpop.permute.xlu1 %3097 }
 0x33b   : > { %vm2396_vm13 = vcmp.ge.f32.partialorder %v2388_v40, 0.0  ;;  %v2404_v47 = vmul.f32 0.2, %v2388_v40  ;;  %v2448_v53 = vpack.c.bf16 %v6915_v42, %v6917_v46  ;;  %v3149_v33 = vpop.permute.xlu0 %3148 }
 0x33c   : > { %vm2395_vm14 = vcmp.ge.f32.partialorder %v2387_v43, 0.0  ;;  %v2403_v54 = vmul.f32 0.2, %v2387_v43 }
 0x33d   : > { %5809 = vmatprep.subr.bf16.mxu1 %v2448_v53  ;;  %v6921_v55 = vsel %vm2396_vm13, %v2388_v40, %v2404_v47 }
 0x33e   : > { %5810 = vmatpush3.bf16.msra.mxu1 %v2448_v53  ;;  %v6923_v56 = vsel %vm2395_vm14, %v2387_v43, %v2403_v54  ;;  %v3154_v32 = vpop.permute.xlu1 %3153 }
 0x33f   : > { %v2449_v57 = vpack.c.bf16 %v6921_v55, %v6923_v56  ;;  %v3103_v35 = vpop.permute.xlu0 %3102 }
 0x341   : > { %5811 = vmatprep.subr.bf16.mxu1 %v2449_v57 }
 0x342   : > { %5812 = vmatpush3.bf16.msra.mxu1 %v2449_v57  ;;  %v3108_v34 = vpop.permute.xlu1 %3107 }
 0x343   : > { %v3159_v36 = vpop.permute.xlu0 %3158 }
 0x345   : > { %5814 = vmatmul.mubr.msk.bf16.vlgmr.msra.gmra.mrb[40].mxu1 %vm2510_vm6, %v6189_v58 }
 0x346   : > { %5817 = vmatprep.mubr.msk.bf16.mxu1 %vm2510_vm6, %v6190_v59  ;;  %v3164_v52 = vpop.permute.xlu1 %3163 }
 0x347   : > { %v3113_v38 = vpop.permute.xlu0 %3112 }
 0x34a   : > { %v3118_v37 = vpop.permute.xlu1 %3117 }
 0x34b   : > { %v3169_v57 = vpop.permute.xlu0 %3168 }
 0x34d   : > { %5818 = vmatmul.mubr.msk.bf16.gmra.mrb[44].mxu1 %vm2510_vm6, %v6191_v60 }
 0x34e   : > { %5821 = vmatprep.mubr.msk.bf16.mxu1 %vm2510_vm6, %v6192_v61  ;;  %v3174_v53 = vpop.permute.xlu1 %3173 }
 0x355   : > { %5822 = vmatmul.mubr.msk.bf16.gmra.mrb[48].mxu1 %vm2510_vm6, %v6193_v62 }
 0x356   : > { %5825 = vmatprep.mubr.msk.bf16.mxu1 %vm2510_vm6, %v6194_v63 }
 0x35d   : > { %5826 = vmatmul.mubr.msk.bf16.gmra.mrb[52].mxu1 %vm2510_vm6, %v6195_v0 }
 0x35e   : > { %5829 = vmatprep.mubr.msk.bf16.mxu1 %vm2510_vm6, %v6196_v4 }
 0x365   : > { %5830 = vmatmul.mubr.msk.bf16.gmra.mrb[56].mxu1 %vm2510_vm6, %v6197_v39 }
 0x366   : > { %5833 = vmatprep.mubr.msk.bf16.mxu1 %vm2510_vm6, %v6198_v5 }
 0x36d   : > { %5834 = vmatmul.mubr.msk.bf16.gmra.mrb[60].mxu1 %vm2510_vm6, %v6199_v6  ;;  %v3128_v6 = vpop.permute.xlu1 %3127 }
 0x36e   : > { %5887 = vmatprep.mubr.msk.bf16.mxu1 %vm2510_vm6, %v6200_v28 }
 0x418   : > { %v5815_v8 = vpop.f32.mrb[40].mxu1 }
 0x419   : > { %v2581_v9 = vpop.f32.mrb[41].mxu1 }
 0x41a   : > { %v5816_v10 = vpop.f32.mrb[42].mxu1 }
 0x41b   : > { %v2584_v45 = vpop.f32.mrb[43].mxu1 }
 0x420   : > { %v5819_v11 = vpop.f32.mrb[44].mxu1 }
 0x421   : > { %v2597_v12 = vpop.f32.mrb[45].mxu1 }
 0x422   : > { %v5820_v48 = vpop.f32.mrb[46].mxu1 }
 0x423   : > { %v2600_v14 = vpop.f32.mrb[47].mxu1 }
 0x428   : > { %v5823_v24 = vpop.f32.mrb[48].mxu1 }
 0x429   : > { %v2613_v15 = vpop.f32.mrb[49].mxu1 }
 0x42a   : > { %v5824_v49 = vpop.f32.mrb[50].mxu1  ;;  %5839 = vmatprep.mubr.msk.f32.mxu0 %vm2676_vm3, %v2613_v15 }
 0x42b   : > { %v2616_v16 = vpop.f32.mrb[51].mxu1 }
 0x42c   : > { %5840 = vmatmul.mubr.msk.f32.vlgmr.msra.gmra.mrb[42].mxu0 %vm2676_vm3, %v2616_v16 }
 0x42d   : > { %5842 = vmatprep.mubr.msk.f32.mxu0 %vm2676_vm3, %v5823_v24  ;;  %5852 = vmatpush3.msk.msra.mxu0 %vm2701_vm0, %v6981_v44 }
 0x42e   : > { %5865 = vmatprep.subr.msk.mxu0 %vm2701_vm0, %v6987_v20 }
 0x430   : > { %v5827_v19 = vpop.f32.mrb[52].mxu1  ;;  %5843 = vmatmul.mubr.msk.f32.gmra.mrb[44].mxu0 %vm2676_vm3, %v5824_v49 }
 0x431   : > { %v2629_v50 = vpop.f32.mrb[53].mxu1 }
 0x432   : > { %v5828_v18 = vpop.f32.mrb[54].mxu1  ;;  %5845 = vmatprep.mubr.msk.f32.mxu0 %vm2676_vm3, %v2629_v50 }
 0x433   : > { %v2632_v22 = vpop.f32.mrb[55].mxu1 }
 0x434   : > { %5846 = vmatmul.mubr.msk.f32.gmra.mrb[46].mxu0 %vm2676_vm3, %v2632_v22 }
 0x435   : > { %5848 = vmatprep.mubr.msk.f32.mxu0 %vm2676_vm3, %v5827_v19 }
 0x438   : > { %5849 = vmatmul.mubr.msk.f32.gmra.mrb[48].mxu0 %vm2676_vm3, %v5828_v18  ;;  %v5831_v25 = vpop.f32.mrb[56].mxu1 }
 0x439   : > { %5853 = vmatprep.mubr.msk.f32.mxu0 %vm2676_vm3, %v2581_v9  ;;  %v2645_v1 = vpop.f32.mrb[57].mxu1 }
 0x43a   : > { %v5832_v2 = vpop.f32.mrb[58].mxu1 }
 0x43b   : > { %v2648_v26 = vpop.f32.mrb[59].mxu1 }
 0x43c   : > { %5854 = vmatmul.mubr.msk.f32.vlgmr.msra.gmra.mrb[42].mxu0 %vm2676_vm3, %v2584_v45 }
 0x43d   : > { %5856 = vmatprep.mubr.msk.f32.mxu0 %vm2676_vm3, %v5815_v8  ;;  %5866 = vmatpush3.msk.msra.mxu0 %vm2701_vm0, %v6987_v20 }
 0x43e   : > { %5911 = vmatprep.subr.msk.mxu0 %vm2701_vm0, %v6973_v7 }
 0x440   : > { %5857 = vmatmul.mubr.msk.f32.gmra.mrb[44].mxu0 %vm2676_vm3, %v5816_v10  ;;  %v5835_v21 = vpop.f32.mrb[60].mxu1  ;;  %v3123_v10 = vpop.permute.xlu0 %3122 }
 0x441   : > { %5859 = vmatprep.mubr.msk.f32.mxu0 %vm2676_vm3, %v2597_v12  ;;  %v2661_v23 = vpop.f32.mrb[61].mxu1 }
 0x442   : > { %v5836_v3 = vpop.f32.mrb[62].mxu1 }
 0x443   : > { %v2664_v27 = vpop.f32.mrb[63].mxu1 }
 0x444   : > { %5860 = vmatmul.mubr.msk.f32.gmra.mrb[46].mxu0 %vm2676_vm3, %v2600_v14  ;;  %v3179_v28 = vpop.permute.xlu0 %3178 }
 0x445   : > { %5862 = vmatprep.mubr.msk.f32.mxu0 %vm2676_vm3, %v5819_v11 }
 0x448   : > { %5863 = vmatmul.mubr.msk.f32.gmra.mrb[48].mxu0 %vm2676_vm3, %v5820_v48 }
 0x449   : > { %5867 = vmatprep.mubr.msk.f32.mxu0 %vm2676_vm3, %v2645_v1 }
 0x44c   : > { %5868 = vmatmul.mubr.msk.f32.vlgmr.msra.gmra.mrb[42].mxu0 %vm2676_vm3, %v2648_v26 }
 0x44d   : > { %5870 = vmatprep.mubr.msk.f32.mxu0 %vm2676_vm3, %v5831_v25  ;;  %5912 = vmatpush3.msk.msra.mxu0 %vm2701_vm0, %v6973_v7 }
 0x44e   : > { %5925 = vmatprep.subr.msk.mxu0 %vm2701_vm0, %v6981_v44 }
 0x450   : > { %5871 = vmatmul.mubr.msk.f32.gmra.mrb[44].mxu0 %vm2676_vm3, %v5832_v2 }
 0x451   : > { %5873 = vmatprep.mubr.msk.f32.mxu0 %vm2676_vm3, %v2661_v23 }
 0x454   : > { %5874 = vmatmul.mubr.msk.f32.gmra.mrb[46].mxu0 %vm2676_vm3, %v2664_v27 }
 0x455   : > { %5876 = vmatprep.mubr.msk.f32.mxu0 %vm2676_vm3, %v5835_v21  ;;  %v3184_v21 = vpop.permute.xlu1 %3183 }
 0x458   : > { %5877 = vmatmul.mubr.msk.f32.gmra.mrb[48].mxu0 %vm2676_vm3, %v5836_v3 }
 0x51f   : > { %v5869_v40 = vpop.f32.mrb[42].mxu0 }
 0x520   : > { %v3131_v43 = vmul.f32 %v5869_v40, %v3098_v29  ;;  %v3035_v47 = vpop.f32.mrb[43].mxu0 }
 0x521   : > { %v3130_v54 = vmul.f32 %v3093_v30, %v3035_v47 }
 0x522   : > { %v3187_v58 = vadd.f32 %v3154_v32, %v3131_v43 }
 0x523   : > { %v3186_v59 = vadd.f32 %v3149_v33, %v3130_v54  ;;  %v5872_v60 = vpop.f32.mrb[44].mxu0 }
 0x524   : > { %v3195_v61 = vadd.f32 %v3187_v58, %v6901_v13  ;;  %v3133_v62 = vmul.f32 %v5872_v60, %v3108_v34  ;;  %v3045_v63 = vpop.f32.mrb[45].mxu0  ;;  %v6202_v58 = vld [vmem:[%s7272_s6 + $0x70] sm:$0xff]   ;;  %v6204_v60 = vld [vmem:[%s7272_s6 + $0x80] sm:$0xff]  }
 0x525   : > { %v3194_v0 = vadd.f32 %v3186_v59, %v6904_v17  ;;  %v3132_v4 = vmul.f32 %v3103_v35, %v3045_v63  ;;  %v6203_v59 = vld [vmem:[%s7272_s6 + $0x78] sm:$0xff]  }
 0x526   : > { %v3211_v39 = vmul.f32 0.2, %v3195_v61  ;;  %v3189_v5 = vadd.f32 %v3164_v52, %v3133_v62  ;;  %vm3203_vm4 = vcmp.ge.f32.partialorder %v3195_v61, 0.0  ;;  %v6206_v62 = vld [vmem:[%s7272_s6 + $0x90] sm:$0xff]   ;;  %v6207_v63 = vld [vmem:[%s7272_s6 + $0x98] sm:$0xff]  }
 0x527   : > { %v3210_v41 = vmul.f32 0.2, %v3194_v0  ;;  %v3188_v8 = vadd.f32 %v3159_v36, %v3132_v4  ;;  %v5875_v9 = vpop.f32.mrb[46].mxu0  ;;  %vm3202_vm5 = vcmp.ge.f32.partialorder %v3194_v0, 0.0  ;;  %v6209_v4 = vld [vmem:[%s7272_s6 + $0xa8] sm:$0xff]  }
 0x528   : > { %v3197_v45 = vadd.f32 %v3189_v5, %v6909_v51  ;;  %v3135_v11 = vmul.f32 %v5875_v9, %v3118_v37  ;;  %v3055_v12 = vpop.f32.mrb[47].mxu0  ;;  %v7032_v48 = vsel %vm3203_vm4, %v3195_v61, %v3211_v39  ;;  %v6205_v61 = vld [vmem:[%s7272_s6 + $0x88] sm:$0xff]   ;;  %v6210_v39 = vld [vmem:[%s7272_s6 + $0xb0] sm:$0xff]   ;;  %v6211_v5 = vld [vmem:[%s7272_s6 + $0xb8] sm:$0xff]  }
 0x529   : > { %v3196_v14 = vadd.f32 %v3188_v8, %v6911_v31  ;;  %v3134_v24 = vmul.f32 %v3113_v38, %v3055_v12  ;;  %v7035_v15 = vsel %vm3202_vm5, %v3194_v0, %v3210_v41  ;;  %v6208_v0 = vld [vmem:[%s7272_s6 + $0xa0] sm:$0xff]  }
 0x52a   : > { %v3213_v49 = vmul.f32 0.2, %v3197_v45  ;;  %v3191_v16 = vadd.f32 %v3174_v53, %v3135_v11  ;;  %v3251_v19 = vpack.c.bf16 %v7032_v48, %v7035_v15  ;;  %vm3205_vm7 = vcmp.ge.f32.partialorder %v3197_v45, 0.0 }
 0x52b   : > { %v3212_v50 = vmul.f32 0.2, %v3196_v14  ;;  %v3190_v18 = vadd.f32 %v3169_v57, %v3134_v24  ;;  %v5878_v22 = vpop.f32.mrb[48].mxu0  ;;  %vm3204_vm8 = vcmp.ge.f32.partialorder %v3196_v14, 0.0  ;;  %v6201_v57 = vld [vmem:[%s7272_s6 + $0x68] sm:$0xff]  }
 0x52c   : > { %v3199_v25 = vadd.f32 %v3191_v16, %v6915_v42  ;;  %v3137_v1 = vmul.f32 %v5878_v22, %v3128_v6  ;;  %v3065_v2 = vpop.f32.mrb[49].mxu0  ;;  %5879 = vmatprep.subr.bf16.mxu1 %v3251_v19  ;;  %v7040_v26 = vsel %vm3205_vm7, %v3197_v45, %v3213_v49 }
 0x52d   : > { %v3198_v23 = vadd.f32 %v3190_v18, %v6917_v46  ;;  %v3136_v3 = vmul.f32 %v3123_v10, %v3065_v2  ;;  %5880 = vmatpush3.bf16.msra.mxu1 %v3251_v19  ;;  %v7043_v27 = vsel %vm3204_vm8, %v3196_v14, %v3212_v50 }
 0x52e   : > { %v3215_v29 = vmul.f32 0.2, %v3199_v25  ;;  %v3193_v30 = vadd.f32 %v3184_v21, %v3137_v1  ;;  %v3252_v32 = vpack.c.bf16 %v7040_v26, %v7043_v27  ;;  %vm3207_vm9 = vcmp.ge.f32.partialorder %v3199_v25, 0.0 }
 0x52f   : > { %v3214_v33 = vmul.f32 0.2, %v3198_v23  ;;  %v3192_v34 = vadd.f32 %v3179_v28, %v3136_v3  ;;  %vm3206_vm10 = vcmp.ge.f32.partialorder %v3198_v23, 0.0 }
 0x530   : > { %v3201_v35 = vadd.f32 %v3193_v30, %v6921_v55  ;;  %5881 = vmatprep.subr.bf16.mxu1 %v3252_v32  ;;  %v7048_v52 = vsel %vm3207_vm9, %v3199_v25, %v3215_v29  ;;  %v6212_v30 = vld [vmem:[%s7275_s9] sm:$0xff]  }
 0x531   : > { %v3200_v36 = vadd.f32 %v3192_v34, %v6923_v56  ;;  %5882 = vmatpush3.bf16.msra.mxu1 %v3252_v32  ;;  %v7051_v37 = vsel %vm3206_vm10, %v3198_v23, %v3214_v33  ;;  %v3887_v32 = vpop.permute.xlu0 %3886 }
 0x532   : > { %v3217_v38 = vmul.f32 0.2, %v3201_v35  ;;  %v3253_v40 = vpack.c.bf16 %v7048_v52, %v7051_v37  ;;  %vm3209_vm11 = vcmp.ge.f32.partialorder %v3201_v35, 0.0 }
 0x533   : > { %v3216_v43 = vmul.f32 0.2, %v3200_v36  ;;  %vm3208_vm12 = vcmp.ge.f32.partialorder %v3200_v36, 0.0 }
 0x534   : > { %5883 = vmatprep.subr.bf16.mxu1 %v3253_v40  ;;  %v7055_v47 = vsel %vm3209_vm11, %v3201_v35, %v3217_v38 }
 0x535   : > { %5884 = vmatpush3.bf16.msra.mxu1 %v3253_v40  ;;  %v7057_v53 = vsel %vm3208_vm12, %v3200_v36, %v3216_v43  ;;  %v3944_v34 = vpop.permute.xlu0 %3943 }
 0x536   : > { %v3254_v54 = vpack.c.bf16 %v7055_v47, %v7057_v53 }
 0x538   : > { %5885 = vmatprep.subr.bf16.mxu1 %v3254_v54 }
 0x539   : > { %5886 = vmatpush3.bf16.msra.mxu1 %v3254_v54  ;;  %v3897_v36 = vpop.permute.xlu0 %3896 }
 0x53c   : > { %5888 = vmatmul.mubr.msk.bf16.vlgmr.msra.gmra.mrb[64].mxu1 %vm2510_vm6, %v6201_v57 }
 0x53d   : > { %5891 = vmatprep.mubr.msk.bf16.mxu1 %vm2510_vm6, %v6202_v58  ;;  %v3954_v40 = vpop.permute.xlu0 %3953 }
 0x541   : > { %v3907_v54 = vpop.permute.xlu0 %3906 }
 0x544   : > { %5892 = vmatmul.mubr.msk.bf16.gmra.mrb[68].mxu1 %vm2510_vm6, %v6203_v59 }
 0x545   : > { %5895 = vmatprep.mubr.msk.bf16.mxu1 %vm2510_vm6, %v6204_v60 }
 0x54c   : > { %5896 = vmatmul.mubr.msk.bf16.gmra.mrb[72].mxu1 %vm2510_vm6, %v6205_v61 }
 0x54d   : > { %5899 = vmatprep.mubr.msk.bf16.mxu1 %vm2510_vm6, %v6206_v62  ;;  %v3964_v62 = vpop.permute.xlu0 %3963 }
 0x554   : > { %5900 = vmatmul.mubr.msk.bf16.gmra.mrb[76].mxu1 %vm2510_vm6, %v6207_v63 }
 0x555   : > { %5903 = vmatprep.mubr.msk.bf16.mxu1 %vm2510_vm6, %v6208_v0 }
 0x55c   : > { %5904 = vmatmul.mubr.msk.bf16.gmra.mrb[80].mxu1 %vm2510_vm6, %v6209_v4 }
 0x55d   : > { %5907 = vmatprep.mubr.msk.bf16.mxu1 %vm2510_vm6, %v6210_v39 }
 0x564   : > { %5908 = vmatmul.mubr.msk.bf16.gmra.mrb[84].mxu1 %vm2510_vm6, %v6211_v5 }
 0x565   : > { %5961 = vmatprep.mubr.msk.bf16.mxu1 %vm2510_vm6, %v6212_v30 }
 0x60f   : > { %v5889_v6 = vpop.f32.mrb[64].mxu1 }
 0x610   : > { %v3385_v41 = vpop.f32.mrb[65].mxu1 }
 0x611   : > { %v5890_v8 = vpop.f32.mrb[66].mxu1 }
 0x612   : > { %v3388_v9 = vpop.f32.mrb[67].mxu1 }
 0x617   : > { %v5893_v10 = vpop.f32.mrb[68].mxu1 }
 0x618   : > { %v3401_v45 = vpop.f32.mrb[69].mxu1 }
 0x619   : > { %v5894_v11 = vpop.f32.mrb[70].mxu1 }
 0x61a   : > { %v3404_v12 = vpop.f32.mrb[71].mxu1 }
 0x61f   : > { %v5897_v14 = vpop.f32.mrb[72].mxu1 }
 0x620   : > { %v3417_v24 = vpop.f32.mrb[73].mxu1 }
 0x621   : > { %v5898_v49 = vpop.f32.mrb[74].mxu1  ;;  %5913 = vmatprep.mubr.msk.f32.mxu0 %vm2676_vm3, %v3417_v24  ;;  %v3917_v24 = vpop.permute.xlu0 %3916 }
 0x622   : > { %v3420_v16 = vpop.f32.mrb[75].mxu1 }
 0x623   : > { %5914 = vmatmul.mubr.msk.f32.vlgmr.msra.gmra.mrb[50].mxu0 %vm2676_vm3, %v3420_v16 }
 0x624   : > { %5916 = vmatprep.mubr.msk.f32.mxu0 %vm2676_vm3, %v5897_v14  ;;  %5926 = vmatpush3.msk.msra.mxu0 %vm2701_vm0, %v6981_v44 }
 0x625   : > { %5939 = vmatprep.subr.msk.mxu0 %vm2701_vm0, %v6987_v20 }
 0x627   : > { %v5901_v19 = vpop.f32.mrb[76].mxu1  ;;  %5917 = vmatmul.mubr.msk.f32.gmra.mrb[52].mxu0 %vm2676_vm3, %v5898_v49 }
 0x628   : > { %v3433_v50 = vpop.f32.mrb[77].mxu1 }
 0x629   : > { %v5902_v18 = vpop.f32.mrb[78].mxu1  ;;  %5919 = vmatprep.mubr.msk.f32.mxu0 %vm2676_vm3, %v3433_v50 }
 0x62a   : > { %v3436_v22 = vpop.f32.mrb[79].mxu1 }
 0x62b   : > { %5920 = vmatmul.mubr.msk.f32.gmra.mrb[54].mxu0 %vm2676_vm3, %v3436_v22 }
 0x62c   : > { %5922 = vmatprep.mubr.msk.f32.mxu0 %vm2676_vm3, %v5901_v19 }
 0x62f   : > { %5923 = vmatmul.mubr.msk.f32.gmra.mrb[56].mxu0 %vm2676_vm3, %v5902_v18  ;;  %v5905_v25 = vpop.f32.mrb[80].mxu1 }
 0x630   : > { %5927 = vmatprep.mubr.msk.f32.mxu0 %vm2676_vm3, %v3385_v41  ;;  %v3449_v1 = vpop.f32.mrb[81].mxu1 }
 0x631   : > { %v5906_v2 = vpop.f32.mrb[82].mxu1 }
 0x632   : > { %v3452_v21 = vpop.f32.mrb[83].mxu1 }
 0x633   : > { %5928 = vmatmul.mubr.msk.f32.vlgmr.msra.gmra.mrb[50].mxu0 %vm2676_vm3, %v3388_v9 }
 0x634   : > { %5930 = vmatprep.mubr.msk.f32.mxu0 %vm2676_vm3, %v5889_v6  ;;  %5940 = vmatpush3.msk.msra.mxu0 %vm2701_vm0, %v6987_v20 }
 0x635   : > { %5985 = vmatprep.subr.msk.mxu0 %vm2701_vm0, %v6973_v7 }
 0x637   : > { %5931 = vmatmul.mubr.msk.f32.gmra.mrb[52].mxu0 %vm2676_vm3, %v5890_v8  ;;  %v5909_v23 = vpop.f32.mrb[84].mxu1 }
 0x638   : > { %5933 = vmatprep.mubr.msk.f32.mxu0 %vm2676_vm3, %v3401_v45  ;;  %v3465_v3 = vpop.f32.mrb[85].mxu1 }
 0x639   : > { %v5910_v28 = vpop.f32.mrb[86].mxu1 }
 0x63a   : > { %v3468_v29 = vpop.f32.mrb[87].mxu1 }
 0x63b   : > { %5934 = vmatmul.mubr.msk.f32.gmra.mrb[54].mxu0 %vm2676_vm3, %v3404_v12 }
 0x63c   : > { %5936 = vmatprep.mubr.msk.f32.mxu0 %vm2676_vm3, %v5893_v10 }
 0x63f   : > { %5937 = vmatmul.mubr.msk.f32.gmra.mrb[56].mxu0 %vm2676_vm3, %v5894_v11 }
 0x640   : > { %5941 = vmatprep.mubr.msk.f32.mxu0 %vm2676_vm3, %v3449_v1 }
 0x643   : > { %5942 = vmatmul.mubr.msk.f32.vlgmr.msra.gmra.mrb[50].mxu0 %vm2676_vm3, %v3452_v21 }
 0x644   : > { %5944 = vmatprep.mubr.msk.f32.mxu0 %vm2676_vm3, %v5905_v25  ;;  %5986 = vmatpush3.msk.msra.mxu0 %vm2701_vm0, %v6973_v7  ;;  %v3892_v7 = vpop.permute.xlu1 %3891 }
 0x645   : > { %5999 = vmatprep.subr.msk.mxu0 %vm2701_vm0, %v6981_v44 }
 0x647   : > { %5945 = vmatmul.mubr.msk.f32.gmra.mrb[52].mxu0 %vm2676_vm3, %v5906_v2 }
 0x648   : > { %5947 = vmatprep.mubr.msk.f32.mxu0 %vm2676_vm3, %v3465_v3  ;;  %v3949_v33 = vpop.permute.xlu1 %3948 }
 0x64b   : > { %5948 = vmatmul.mubr.msk.f32.gmra.mrb[54].mxu0 %vm2676_vm3, %v3468_v29 }
 0x64c   : > { %5950 = vmatprep.mubr.msk.f32.mxu0 %vm2676_vm3, %v5909_v23  ;;  %v3902_v35 = vpop.permute.xlu1 %3901 }
 0x64f   : > { %5951 = vmatmul.mubr.msk.f32.gmra.mrb[56].mxu0 %vm2676_vm3, %v5910_v28 }
 0x650   : > { %v3959_v38 = vpop.permute.xlu1 %3958 }
 0x654   : > { %v3912_v43 = vpop.permute.xlu1 %3911 }
 0x658   : > { %v3969_v60 = vpop.permute.xlu1 %3968 }
 0x65c   : > { %v3922_v45 = vpop.permute.xlu1 %3921 }
 0x660   : > { %v3979_v30 = vpop.permute.xlu1 %3978 }
 0x716   : > { %v5943_v57 = vpop.f32.mrb[50].mxu0 }
 0x717   : > { %v3925_v58 = vmul.f32 %v5943_v57, %v3892_v7  ;;  %v3828_v59 = vpop.f32.mrb[51].mxu0 }
 0x718   : > { %v3924_v61 = vmul.f32 %v3887_v32, %v3828_v59 }
 0x719   : > { %v3982_v63 = vadd.f32 %v3949_v33, %v3925_v58  ;;  %v3974_v33 = vpop.permute.xlu0 %3973 }
 0x71a   : > { %v3981_v0 = vadd.f32 %v3944_v34, %v3924_v61  ;;  %v5946_v4 = vpop.f32.mrb[52].mxu0 }
 0x71b   : > { %v3990_v39 = vadd.f32 %v3982_v63, %v7032_v48  ;;  %v3927_v5 = vmul.f32 %v5946_v4, %v3902_v35  ;;  %v3838_v6 = vpop.f32.mrb[53].mxu0  ;;  %v6215_v63 = vld [vmem:[%s7275_s9 + $0x18] sm:$0xff]   ;;  %v6217_v4 = vld [vmem:[%s7275_s9 + $0x28] sm:$0xff]  }
 0x71c   : > { %v3989_v41 = vadd.f32 %v3981_v0, %v7035_v15  ;;  %v3926_v8 = vmul.f32 %v3897_v36, %v3838_v6  ;;  %v6216_v0 = vld [vmem:[%s7275_s9 + $0x20] sm:$0xff]  }
 0x71d   : > { %v4006_v9 = vmul.f32 0.2, %v3990_v39  ;;  %v3984_v10 = vadd.f32 %v3959_v38, %v3927_v5  ;;  %vm3998_vm13 = vcmp.ge.f32.partialorder %v3990_v39, 0.0  ;;  %v6219_v5 = vld [vmem:[%s7275_s9 + $0x38] sm:$0xff]   ;;  %v6220_v6 = vld [vmem:[%s7275_s9 + $0x40] sm:$0xff]  }
 0x71e   : > { %v4005_v11 = vmul.f32 0.2, %v3989_v41  ;;  %v3983_v12 = vadd.f32 %v3954_v40, %v3926_v8  ;;  %v5949_v14 = vpop.f32.mrb[54].mxu0  ;;  %vm3997_vm14 = vcmp.ge.f32.partialorder %v3989_v41, 0.0  ;;  %v6222_v8 = vld [vmem:[%s7275_s9 + $0x50] sm:$0xff]  }
 0x71f   : > { %v3992_v49 = vadd.f32 %v3984_v10, %v7040_v26  ;;  %v3929_v16 = vmul.f32 %v5949_v14, %v3912_v43  ;;  %v3848_v19 = vpop.f32.mrb[55].mxu0  ;;  %v4014_v50 = vsel %vm3998_vm13, %v3990_v39, %v4006_v9  ;;  %v6218_v39 = vld [vmem:[%s7275_s9 + $0x30] sm:$0xff]   ;;  %v6223_v9 = vld [vmem:[%s7275_s9 + $0x58] sm:$0xff]  }
 0x720   : > { %v3991_v48 = vadd.f32 %v3983_v12, %v7043_v27  ;;  %v3928_v18 = vmul.f32 %v3907_v54, %v3848_v19  ;;  %v4013_v22 = vsel %vm3997_vm14, %v3989_v41, %v4005_v11  ;;  %v6221_v41 = vld [vmem:[%s7275_s9 + $0x48] sm:$0xff]  }
 0x721   : > { %v4008_v15 = vmul.f32 0.2, %v3992_v49  ;;  %v3986_v25 = vadd.f32 %v3969_v60, %v3929_v16  ;;  %v4045_v1 = vpack.c.bf16 %v4014_v50, %v4013_v22  ;;  %vm4000_vm15 = vcmp.ge.f32.partialorder %v3992_v49, 0.0 }
 0x722   : > { %v4007_v2 = vmul.f32 0.2, %v3991_v48  ;;  %v3985_v21 = vadd.f32 %v3964_v62, %v3928_v18  ;;  %v5952_v23 = vpop.f32.mrb[56].mxu0  ;;  %vm3999_vm1 = vcmp.ge.f32.partialorder %v3991_v48, 0.0 }
 0x723   : > { %v3994_v3 = vadd.f32 %v3986_v25, %v7048_v52  ;;  %v3931_v28 = vmul.f32 %v5952_v23, %v3922_v45  ;;  %v3858_v29 = vpop.f32.mrb[57].mxu0  ;;  %5953 = vmatprep.subr.bf16.mxu1 %v4045_v1  ;;  %v4016_v26 = vsel %vm4000_vm15, %v3992_v49, %v4008_v15 }
 0x724   : > { %v3993_v7 = vadd.f32 %v3985_v21, %v7051_v37  ;;  %v3930_v27 = vmul.f32 %v3917_v24, %v3858_v29  ;;  %5954 = vmatpush3.bf16.msra.mxu1 %v4045_v1  ;;  %v4015_v32 = vsel %vm3999_vm1, %v3991_v48, %v4007_v2 }
 0x725   : > { %v4010_v34 = vmul.f32 0.2, %v3994_v3  ;;  %v3988_v35 = vadd.f32 %v3979_v30, %v3931_v28  ;;  %v4046_v36 = vpack.c.bf16 %v4016_v26, %v4015_v32  ;;  %vm4002_vm2 = vcmp.ge.f32.partialorder %v3994_v3, 0.0  ;;  %v4685_v30 = vpop.permute.xlu1 %4684 }
 0x726   : > { %v4009_v38 = vmul.f32 0.2, %v3993_v7  ;;  %v3987_v40 = vadd.f32 %v3974_v33, %v3930_v27  ;;  %vm4001_vm4 = vcmp.ge.f32.partialorder %v3993_v7, 0.0 }
 0x727   : > { %v3996_v52 = vadd.f32 %v3988_v35, %v7055_v47  ;;  %5955 = vmatprep.subr.bf16.mxu1 %v4046_v36  ;;  %v4018_v43 = vsel %vm4002_vm2, %v3994_v3, %v4010_v34  ;;  %v6213_v47 = vld [vmem:[%s7275_s9 + $0x8] sm:$0xff]  }
 0x728   : > { %v3995_v54 = vadd.f32 %v3987_v40, %v7057_v53  ;;  %5956 = vmatpush3.bf16.msra.mxu1 %v4046_v36  ;;  %v4017_v57 = vsel %vm4001_vm4, %v3993_v7, %v4009_v38  ;;  %v6214_v53 = vld [vmem:[%s7275_s9 + $0x10] sm:$0xff]   ;;  %v4680_v7 = vpop.permute.xlu0 %4679 }
 0x729   : > { %v4012_v37 = vmul.f32 0.2, %v3996_v52  ;;  %v4047_v58 = vpack.c.bf16 %v4018_v43, %v4017_v57  ;;  %vm4004_vm5 = vcmp.ge.f32.partialorder %v3996_v52, 0.0  ;;  %v4741_v27 = vpop.permute.xlu1 %4740 }
 0x72a   : > { %v4011_v59 = vmul.f32 0.2, %v3995_v54  ;;  %vm4003_vm7 = vcmp.ge.f32.partialorder %v3995_v54, 0.0 }
 0x72b   : > { %5957 = vmatprep.subr.bf16.mxu1 %v4047_v58  ;;  %v4020_v60 = vsel %vm4004_vm5, %v3996_v52, %v4012_v37 }
 0x72c   : > { %5958 = vmatpush3.bf16.msra.mxu1 %v4047_v58  ;;  %v4019_v61 = vsel %vm4003_vm7, %v3995_v54, %v4011_v59  ;;  %v4736_v32 = vpop.permute.xlu0 %4735 }
 0x72d   : > { %v4048_v62 = vpack.c.bf16 %v4020_v60, %v4019_v61  ;;  %v4695_v33 = vpop.permute.xlu1 %4694 }
 0x72f   : > { %5959 = vmatprep.subr.bf16.mxu1 %v4048_v62 }
 0x730   : > { %5960 = vmatpush3.bf16.msra.mxu1 %v4048_v62  ;;  %v4690_v34 = vpop.permute.xlu0 %4689 }
 0x731   : > { %v4751_v35 = vpop.permute.xlu1 %4750 }
 0x733   : > { %5962 = vmatmul.mubr.msk.bf16.vlgmr.msra.gmra.mrb[88].mxu1 %vm2510_vm6, %v6213_v47 }
 0x734   : > { %5965 = vmatprep.mubr.msk.bf16.mxu1 %vm2510_vm6, %v6214_v53  ;;  %v4746_v36 = vpop.permute.xlu0 %4745 }
 0x735   : > { %v4705_v38 = vpop.permute.xlu1 %4704 }
 0x738   : > { %v4700_v40 = vpop.permute.xlu0 %4699 }
 0x739   : > { %v4761_v57 = vpop.permute.xlu1 %4760 }
 0x73b   : > { %5966 = vmatmul.mubr.msk.bf16.gmra.mrb[92].mxu1 %vm2510_vm6, %v6215_v63 }
 0x73c   : > { %5969 = vmatprep.mubr.msk.bf16.mxu1 %vm2510_vm6, %v6216_v0  ;;  %v4756_v58 = vpop.permute.xlu0 %4755 }
 0x743   : > { %5970 = vmatmul.mubr.msk.bf16.gmra.mrb[96].mxu1 %vm2510_vm6, %v6217_v4 }
 0x744   : > { %5973 = vmatprep.mubr.msk.bf16.mxu1 %vm2510_vm6, %v6218_v39 }
 0x74b   : > { %5974 = vmatmul.mubr.msk.bf16.gmra.mrb[100].mxu1 %vm2510_vm6, %v6219_v5  ;;  %v4715_v5 = vpop.permute.xlu1 %4714 }
 0x74c   : > { %5977 = vmatprep.mubr.msk.bf16.mxu1 %vm2510_vm6, %v6220_v6 }
 0x753   : > { %5978 = vmatmul.mubr.msk.bf16.gmra.mrb[104].mxu1 %vm2510_vm6, %v6221_v41 }
 0x754   : > { %5981 = vmatprep.mubr.msk.bf16.mxu1 %vm2510_vm6, %v6222_v8 }
 0x75b   : > { %5982 = vmatmul.mubr.msk.bf16.gmra.mrb[108].mxu1 %vm2510_vm6, %v6223_v9  ;;  %v4710_v9 = vpop.permute.xlu0 %4709 }
 0x806   : > { %v5963_v10 = vpop.f32.mrb[88].mxu1 }
 0x807   : > { %v4179_v45 = vpop.f32.mrb[89].mxu1 }
 0x808   : > { %v5964_v11 = vpop.f32.mrb[90].mxu1 }
 0x809   : > { %v4182_v12 = vpop.f32.mrb[91].mxu1 }
 0x80e   : > { %v5967_v14 = vpop.f32.mrb[92].mxu1 }
 0x80f   : > { %v4195_v24 = vpop.f32.mrb[93].mxu1 }
 0x810   : > { %v5968_v49 = vpop.f32.mrb[94].mxu1 }
 0x811   : > { %v4198_v16 = vpop.f32.mrb[95].mxu1 }
 0x816   : > { %v5971_v19 = vpop.f32.mrb[96].mxu1 }
 0x817   : > { %v4211_v50 = vpop.f32.mrb[97].mxu1 }
 0x818   : > { %v5972_v48 = vpop.f32.mrb[98].mxu1  ;;  %5987 = vmatprep.mubr.msk.f32.mxu0 %vm2676_vm3, %v4211_v50 }
 0x819   : > { %v4214_v18 = vpop.f32.mrb[99].mxu1 }
 0x81a   : > { %5988 = vmatmul.mubr.msk.f32.vlgmr.msra.gmra.mrb[58].mxu0 %vm2676_vm3, %v4214_v18 }
 0x81b   : > { %5990 = vmatprep.mubr.msk.f32.mxu0 %vm2676_vm3, %v5971_v19  ;;  %6000 = vmatpush3.msk.msra.mxu0 %vm2701_vm0, %v6981_v44 }
 0x81c   : > { %6013 = vmatprep.subr.msk.mxu0 %vm2701_vm0, %v6987_v20 }
 0x81e   : > { %v5975_v22 = vpop.f32.mrb[100].mxu1  ;;  %5991 = vmatmul.mubr.msk.f32.gmra.mrb[60].mxu0 %vm2676_vm3, %v5972_v48 }
 0x81f   : > { %v4227_v15 = vpop.f32.mrb[101].mxu1 }
 0x820   : > { %v5976_v25 = vpop.f32.mrb[102].mxu1  ;;  %5993 = vmatprep.mubr.msk.f32.mxu0 %vm2676_vm3, %v4227_v15 }
 0x821   : > { %v4230_v1 = vpop.f32.mrb[103].mxu1 }
 0x822   : > { %5994 = vmatmul.mubr.msk.f32.gmra.mrb[62].mxu0 %vm2676_vm3, %v4230_v1  ;;  %v4766_v1 = vpop.permute.xlu0 %4765 }
 0x823   : > { %5996 = vmatprep.mubr.msk.f32.mxu0 %vm2676_vm3, %v5975_v22  ;;  %v4771_v22 = vpop.permute.xlu1 %4770 }
 0x826   : > { %5997 = vmatmul.mubr.msk.f32.gmra.mrb[64].mxu0 %vm2676_vm3, %v5976_v25  ;;  %v5979_v2 = vpop.f32.mrb[104].mxu1 }
 0x827   : > { %6001 = vmatprep.mubr.msk.f32.mxu0 %vm2676_vm3, %v4179_v45  ;;  %v4243_v44 = vpop.f32.mrb[105].mxu1 }
 0x828   : > { %v5980_v21 = vpop.f32.mrb[106].mxu1 }
 0x829   : > { %v4246_v23 = vpop.f32.mrb[107].mxu1 }
 0x82a   : > { %6002 = vmatmul.mubr.msk.f32.vlgmr.msra.gmra.mrb[58].mxu0 %vm2676_vm3, %v4182_v12 }
 0x82b   : > { %6004 = vmatprep.mubr.msk.f32.mxu0 %vm2676_vm3, %v5963_v10  ;;  %6014 = vmatpush3.msk.msra.mxu0 %vm2701_vm0, %v6987_v20  ;;  %v6224_v20 = vld [vmem:[%s7278_s12] sm:$0xff]  }
 0x82c   : > { %6035 = vmatprep.mubr.msk.bf16.mxu1 %vm2510_vm6, %v6224_v20  ;;  %v4820_v20 = vpop.permute.xlu0 %4819 }
 0x82e   : > { %6005 = vmatmul.mubr.msk.f32.gmra.mrb[60].mxu0 %vm2676_vm3, %v5964_v11  ;;  %v5983_v3 = vpop.f32.mrb[108].mxu1 }
 0x82f   : > { %6007 = vmatprep.mubr.msk.f32.mxu0 %vm2676_vm3, %v4195_v24  ;;  %v4259_v28 = vpop.f32.mrb[109].mxu1 }
 0x830   : > { %v5984_v29 = vpop.f32.mrb[110].mxu1 }
 0x831   : > { %v4262_v26 = vpop.f32.mrb[111].mxu1 }
 0x832   : > { %6008 = vmatmul.mubr.msk.f32.gmra.mrb[62].mxu0 %vm2676_vm3, %v4198_v16 }
 0x833   : > { %6010 = vmatprep.mubr.msk.f32.mxu0 %vm2676_vm3, %v5967_v14 }
 0x836   : > { %6011 = vmatmul.mubr.msk.f32.gmra.mrb[64].mxu0 %vm2676_vm3, %v5968_v49 }
 0x837   : > { %6015 = vmatprep.mubr.msk.f32.mxu0 %vm2676_vm3, %v4243_v44 }
 0x83a   : > { %6016 = vmatmul.mubr.msk.f32.vlgmr.msra.gmra.mrb[58].mxu0 %vm2676_vm3, %v4246_v23 }
 0x83b   : > { %6018 = vmatprep.mubr.msk.f32.mxu0 %vm2676_vm3, %v5979_v2 }
 0x83e   : > { %6019 = vmatmul.mubr.msk.f32.gmra.mrb[60].mxu0 %vm2676_vm3, %v5980_v21 }
 0x83f   : > { %6021 = vmatprep.mubr.msk.f32.mxu0 %vm2676_vm3, %v4259_v28 }
 0x842   : > { %6022 = vmatmul.mubr.msk.f32.gmra.mrb[62].mxu0 %vm2676_vm3, %v4262_v26  ;;  %v6225_v26 = vld [vmem:[%s7278_s12 + $0x8] sm:$0xff]  }
 0x843   : > { %6024 = vmatprep.mubr.msk.f32.mxu0 %vm2676_vm3, %v5983_v3 }
 0x846   : > { %6025 = vmatmul.mubr.msk.f32.gmra.mrb[64].mxu0 %vm2676_vm3, %v5984_v29 }
 0x90d   : > { %v6017_v52 = vpop.f32.mrb[58].mxu0 }
 0x90e   : > { %v4718_v43 = vmul.f32 %v6017_v52, %v4685_v30  ;;  %v4622_v54 = vpop.f32.mrb[59].mxu0  ;;  %v4825_v30 = vpop.permute.xlu1 %4824 }
 0x90f   : > { %v4717_v37 = vmul.f32 %v4680_v7, %v4622_v54  ;;  %v4830_v7 = vpop.permute.xlu0 %4829 }
 0x910   : > { %v4774_v59 = vadd.f32 %v4741_v27, %v4718_v43 }
 0x911   : > { %v4773_v60 = vadd.f32 %v4736_v32, %v4717_v37  ;;  %v6020_v61 = vpop.f32.mrb[60].mxu0 }
 0x912   : > { %v4782_v62 = vadd.f32 %v4774_v59, %v6901_v13  ;;  %v4720_v47 = vmul.f32 %v6020_v61, %v4695_v33  ;;  %v4632_v53 = vpop.f32.mrb[61].mxu0  ;;  %v4835_v27 = vpop.permute.xlu1 %4834 }
 0x913   : > { %v4781_v63 = vadd.f32 %v4773_v60, %v6904_v17  ;;  %v4719_v0 = vmul.f32 %v4690_v34, %v4632_v53 }
 0x914   : > { %v4790_v4 = vmax.f32 %v4782_v62, 0.0  ;;  %v4776_v39 = vadd.f32 %v4751_v35, %v4720_v47  ;;  %v4840_v35 = vpop.permute.xlu0 %4839 }
 0x915   : > { %v4789_v6 = vmax.f32 %v4781_v63, 0.0  ;;  %v4775_v41 = vadd.f32 %v4746_v36, %v4719_v0  ;;  %v6023_v8 = vpop.f32.mrb[62].mxu0 }
 0x916   : > { %v4784_v10 = vadd.f32 %v4776_v39, %v6909_v51  ;;  %v4722_v45 = vmul.f32 %v6023_v8, %v4705_v38  ;;  %v4642_v11 = vpop.f32.mrb[63].mxu0  ;;  %v4845_v43 = vpop.permute.xlu1 %4844 }
 0x917   : > { %v4783_v12 = vadd.f32 %v4775_v41, %v6911_v31  ;;  %v4721_v14 = vmul.f32 %v4700_v40, %v4642_v11  ;;  %v4805_v13 = vpack.c.bf16 %v4790_v4, %v4789_v6 }
 0x918   : > { %v4792_v24 = vmax.f32 %v4784_v10, 0.0  ;;  %v4778_v49 = vadd.f32 %v4761_v57, %v4722_v45  ;;  %v4850_v57 = vpop.permute.xlu0 %4849 }
 0x919   : > { %v4791_v16 = vmax.f32 %v4783_v12, 0.0  ;;  %v4777_v17 = vadd.f32 %v4756_v58, %v4721_v14  ;;  %v6026_v19 = vpop.f32.mrb[64].mxu0  ;;  %6027 = vmatprep.subr.bf16.mxu1 %v4805_v13 }
 0x91a   : > { %v4786_v50 = vadd.f32 %v4778_v49, %v6915_v42  ;;  %v4724_v48 = vmul.f32 %v6026_v19, %v4715_v5  ;;  %v4652_v18 = vpop.f32.mrb[65].mxu0  ;;  %6028 = vmatpush3.bf16.msra.mxu1 %v4805_v13  ;;  %v4855_v60 = vpop.permute.xlu1 %4854 }
 0x91b   : > { %v4785_v51 = vadd.f32 %v4777_v17, %v6917_v46  ;;  %v4723_v15 = vmul.f32 %v4710_v9, %v4652_v18  ;;  %v4806_v25 = vpack.c.bf16 %v4792_v24, %v4791_v16 }
 0x91c   : > { %v4794_v31 = vmax.f32 %v4786_v50, 0.0  ;;  %v4780_v2 = vadd.f32 %v4771_v22, %v4724_v48 }
 0x91d   : > { %v4793_v44 = vmax.f32 %v4785_v51, 0.0  ;;  %v4779_v21 = vadd.f32 %v4766_v1, %v4723_v15  ;;  %6029 = vmatprep.subr.bf16.mxu1 %v4806_v25 }
 0x91e   : > { %v4788_v23 = vadd.f32 %v4780_v2, %v6921_v55  ;;  %6030 = vmatpush3.bf16.msra.mxu1 %v4806_v25  ;;  %v6226_v55 = vld [vmem:[%s7278_s12 + $0x10] sm:$0xff]  }
 0x91f   : > { %v4787_v3 = vadd.f32 %v4779_v21, %v6923_v56  ;;  %v4807_v42 = vpack.c.bf16 %v4794_v31, %v4793_v44  ;;  %v6227_v56 = vld [vmem:[%s7278_s12 + $0x18] sm:$0xff]  }
 0x920   : > { %v4796_v28 = vmax.f32 %v4788_v23, 0.0 }
 0x921   : > { %v4795_v29 = vmax.f32 %v4787_v3, 0.0  ;;  %6031 = vmatprep.subr.bf16.mxu1 %v4807_v42 }
 0x922   : > { %6032 = vmatpush3.bf16.msra.mxu1 %v4807_v42 }
 0x923   : > { %v4808_v46 = vpack.c.bf16 %v4796_v28, %v4795_v29 }
 0x925   : > { %6033 = vmatprep.subr.bf16.mxu1 %v4808_v46 }
 0x926   : > { %6034 = vmatpush3.bf16.msra.mxu1 %v4808_v46 }
 0x929   : > { %6036 = vmatmul.mubr.msk.bf16.vlgmr.msra.gmra.mrb[112].mxu1 %vm2510_vm6, %v6225_v26 }
 0x92a   : > { %6039 = vmatprep.mubr.msk.bf16.mxu1 %vm2510_vm6, %v6226_v55 }
 0x931   : > { %6040 = vmatmul.mubr.msk.bf16.gmra.mrb[116].mxu1 %vm2510_vm6, %v6227_v56 }
 0x9fc   : > { %v6037_v32 = vpop.f32.mrb[112].mxu1 }
 0x9fd   : > { %v4932_v33 = vadd.f32 %v6037_v32, %v4830_v7  ;;  %v4923_v34 = vpop.f32.mrb[113].mxu1 }
 0x9fe   : > { %v4924_v36 = vadd.f32 %v4923_v34, %v4820_v20  ;;  %v6038_v38 = vpop.f32.mrb[114].mxu1 }
 0x9ff   : > { %4956 = vst.msk [vmem:[%s467_s18 + $0x10] sm:$0xff] %vm2676_vm3, %v4932_v33  ;;  %v4935_v40 = vadd.f32 %v6038_v38, %v4835_v27  ;;  %v4926_v52 = vpop.f32.mrb[115].mxu1 }
 0xa00   : > { %4954 = vst.msk [vmem:[%s467_s18] sm:$0xff] %vm2676_vm3, %v4924_v36  ;;  %v4927_v54 = vadd.f32 %v4926_v52, %v4825_v30 }
 0xa01   : > { %4957 = vst.msk [vmem:[%s467_s18 + $0x18] sm:$0xff] %vm2676_vm3, %v4935_v40 }
 0xa02   : > { %4955 = vst.msk [vmem:[%s467_s18 + $0x8] sm:$0xff] %vm2676_vm3, %v4927_v54 }
 0xa04   : > { %v6041_v37 = vpop.f32.mrb[116].mxu1 }
 0xa05   : > { %v4948_v58 = vadd.f32 %v6041_v37, %v4850_v57  ;;  %v4939_v59 = vpop.f32.mrb[117].mxu1 }
 0xa06   : > { %v4940_v61 = vadd.f32 %v4939_v59, %v4840_v35  ;;  %v6042_v62 = vpop.f32.mrb[118].mxu1 }
 0xa07   : > { %4960 = vst.msk [vmem:[%s467_s18 + $0x30] sm:$0xff] %vm2676_vm3, %v4948_v58  ;;  %v4951_v47 = vadd.f32 %v6042_v62, %v4855_v60  ;;  %v4942_v53 = vpop.f32.mrb[119].mxu1 }
 0xa08   : > { %4958 = vst.msk [vmem:[%s467_s18 + $0x20] sm:$0xff] %vm2676_vm3, %v4940_v61  ;;  %v4943_v63 = vadd.f32 %v4942_v53, %v4845_v43 }
 0xa09   : > { %4961 = vst.msk [vmem:[%s467_s18 + $0x38] sm:$0xff] %vm2676_vm3, %v4951_v47 }
 0xa0a   : > { %4959 = vst.msk [vmem:[%s467_s18 + $0x28] sm:$0xff] %vm2676_vm3, %v4943_v63 }
 0xa0b PF: > { %s24_s29 = sadd.s32 1, %s6234_s29  }
 0xa0c   : > { %p21_p4 = scmp.ge.s32.totalorder %s24_s29, 4  }
 0xa0e   :  { %23 = sbr.rel (!%p21_p4) target bundleno = 1 (0x1), region = 109 }

// kernel: vqvae_forward.11
= control target key start
LH: loop header
LB: loop body
LE: loop exit
PB: predicated region body
PF: predicated region fallthrough
CT: control target
= control target key end

     0   :  { %s3783_s30 = smov 0   ;;  %s4343_s0 = inlined_call_operand.vmem [shape: bf16[2,64,4], index: 0, kind: input, shape index: {}]   ;;  %s4344_s1 = inlined_call_operand.vmem [shape: bf16[64,64], index: 1, kind: input, shape index: {}]   ;;  %s4345_s2 = inlined_call_operand.vmem [shape: f32[64,1], index: 2, kind: input, shape index: {}]   ;;  %s4346_s3 = inlined_call_operand.vmem [shape: bf16[2,192,64], index: 3, kind: input, shape index: {}]   ;;  %s4347_s4 = inlined_call_operand.vmem [shape: f32[2,64,1], index: 4, kind: input, shape index: {}]   ;;  %s4348_s5 = inlined_call_operand.vmem [shape: f32[2,64,1], index: 5, kind: input, shape index: {}]   ;;  %s4349_s6 = inlined_call_operand.vmem [shape: bf16[192,64], index: 6, kind: input, shape index: {}]   ;;  %s4350_s7 = inlined_call_operand.vmem [shape: f32[64,1], index: 7, kind: input, shape index: {}]   ;;  %s4351_s8 = inlined_call_operand.vmem [shape: f32[64,1], index: 8, kind: input, shape index: {}]   ;;  %s4352_s9 = inlined_call_operand.vmem [shape: bf16[2,64,4], index: 9, kind: output, shape index: {}]  }
   0x1 LB: > { %s3005_s10 = sadd.s32 4294967295, %s3729_s30   ;;  %p3009_p0 = scmp.ge.s32.totalorder %s3729_s30, 1  ;;  %s3729_s30 = sphi %s3783_s30, %s19_s30  }
   0x2   : > { %p287_p1 = scmp.lt.s32.totalorder %s3729_s30, 3 }
   0x4   : > { %p288_p2 = pnand %p3009_p0, %p287_p1 }
   0x5   : > { %v350_v0 = vld [vmem:[%s4345_s2] sm:$0xff] (!%p288_p2)  ;;  %v352_v1 = vld [vmem:[%s4345_s2 + $0x10] sm:$0xff] (!%p288_p2)  ;;  %p323_p3 = scmp.lt.s32.totalorder (!%p288_p2), %s3005_s10, 1  ;;  %v3731_v2 = vmov (!%p288_p2), 0   ;;  %v351_v3 = vld [vmem:[%s4345_s2 + $0x8] sm:$0xff] (!%p288_p2)  ;;  %vm442_vm0 = vcmask (!%p288_p2), 523264  }
   0x6   : > { %291 = sbr.rel (%p288_p2) target bundleno = 1767 (0x6e7), region = 56  ;;  %3677 = vset.pattern.permute.xlu0 (!%p288_p2), %v3731_v2  ;;  %3678 = vset.pattern.permute.xlu1 (!%p288_p2), %v3731_v2  ;;  %v353_v4 = vld [vmem:[%s4345_s2 + $0x18] sm:$0xff] (!%p288_p2)  ;;  %v3683_v5 = vld [vmem:[%s4344_s1] sm:$0xff] (!%p288_p2)   ;;  %v355_v7 = vld [vmem:[%s4345_s2 + $0x28] sm:$0xff] (!%p288_p2)  ;;  %vm813_vm2 = vcmask (!%p288_p2), 1043456   ;;  %vm788_vm5 = vcmask (!%p288_p2), 31744  }
   0x7   : > { %360 = vperm.xlu0 (!%p288_p2), %3677, %v350_v0   ;;  %370 = vperm.xlu1 (!%p288_p2), %3678, %v352_v1   ;;  %v354_v6 = vld [vmem:[%s4345_s2 + $0x20] sm:$0xff] (!%p288_p2)  ;;  %v356_v10 = vld [vmem:[%s4345_s2 + $0x30] sm:$0xff] (!%p288_p2)  ;;  %v357_v11 = vld [vmem:[%s4345_s2 + $0x38] sm:$0xff] (!%p288_p2) }
   0x8   : > { %3387 = vmatprep.mubr.msk.bf16.mxu0 (!%p288_p2), %vm442_vm0, %v3683_v5  ;;  %v1194_v13 = vld [vmem:[%s4347_s4] sm:$0xff] (!%p288_p2)  ;;  %v1195_v14 = vld [vmem:[%s4347_s4 + $0x8] sm:$0xff] (!%p288_p2)  ;;  %v3685_v19 = vld [vmem:[%s4344_s1 + $0x10] sm:$0xff] (!%p288_p2)  }
   0x9   : > { %v1250_v16 = vld [vmem:[%s4348_s5] sm:$0xff] (!%p288_p2)  ;;  %v1251_v17 = vld [vmem:[%s4348_s5 + $0x8] sm:$0xff] (!%p288_p2)  ;;  %v1196_v20 = vld [vmem:[%s4347_s4 + $0x10] sm:$0xff] (!%p288_p2) }
   0xa   : > { %v3684_v18 = vld [vmem:[%s4344_s1 + $0x8] sm:$0xff] (!%p288_p2)   ;;  %v1197_v21 = vld [vmem:[%s4347_s4 + $0x18] sm:$0xff] (!%p288_p2)  ;;  %v1252_v22 = vld [vmem:[%s4348_s5 + $0x10] sm:$0xff] (!%p288_p2) }
   0xb   : > { %365 = vperm.xlu0 (!%p288_p2), %3677, %v351_v3   ;;  %375 = vperm.xlu1 (!%p288_p2), %3678, %v353_v4   ;;  %v1253_v23 = vld [vmem:[%s4348_s5 + $0x18] sm:$0xff] (!%p288_p2)  ;;  %v1198_v25 = vld [vmem:[%s4347_s4 + $0x20] sm:$0xff] (!%p288_p2)  ;;  %v1199_v26 = vld [vmem:[%s4347_s4 + $0x28] sm:$0xff] (!%p288_p2) }
   0xc   : > { %v3686_v24 = vld [vmem:[%s4344_s1 + $0x18] sm:$0xff] (!%p288_p2)   ;;  %v1254_v27 = vld [vmem:[%s4348_s5 + $0x20] sm:$0xff] (!%p288_p2)  ;;  %v1255_v28 = vld [vmem:[%s4348_s5 + $0x28] sm:$0xff] (!%p288_p2) }
   0xd   : > { %s4354_s10 = smov (!%p323_p3, %s3005_s10), 1  ;;  %v1200_v29 = vld [vmem:[%s4347_s4 + $0x30] sm:$0xff]  ;;  %v1201_v30 = vld [vmem:[%s4347_s4 + $0x38] sm:$0xff]  ;;  %v3155_v33 = vld [vmem:[%s4347_s4 + $0x40] sm:$0xff] }
   0xe   : > { %s3232_s19 = sshll.u32 %s4354_s10, 5  ;;  %v1256_v31 = vld [vmem:[%s4348_s5 + $0x30] sm:$0xff]  ;;  %v1257_v32 = vld [vmem:[%s4348_s5 + $0x38] sm:$0xff]  ;;  %v3156_v34 = vld [vmem:[%s4347_s4 + $0x48] sm:$0xff] }
   0xf   : > { %s327_s24 = scalar_lea.vmem %s4343_s0, %s3232_s19  ;;  %380 = vperm.xlu0 %3677, %v354_v6   ;;  %385 = vperm.xlu1 %3678, %v355_v7   ;;  %v3163_v35 = vld [vmem:[%s4348_s5 + $0x40] sm:$0xff]  ;;  %v3164_v36 = vld [vmem:[%s4348_s5 + $0x48] sm:$0xff]  ;;  %v3157_v37 = vld [vmem:[%s4347_s4 + $0x50] sm:$0xff]  ;;  %s4316_s29 = scalar_lea.vmem %s4352_s9, %s3232_s19 }
  0x10   : > { %v3679_v8 = vld [vmem:[%s327_s24] sm:$0xff]   ;;  %v3680_v9 = vld [vmem:[%s327_s24 + $0x8] sm:$0xff]   ;;  %v3681_v12 = vld [vmem:[%s327_s24 + $0x10] sm:$0xff]  }
  0x11   : > { %3379 = vmatprep.subr.bf16.mxu0 %v3679_v8  ;;  %v3682_v15 = vld [vmem:[%s327_s24 + $0x18] sm:$0xff]   ;;  %v3165_v39 = vld [vmem:[%s4348_s5 + $0x50] sm:$0xff]  ;;  %v3159_v41 = vld [vmem:[%s4347_s4 + $0x60] sm:$0xff] }
  0x12   : > { %3380 = vmatpush3.bf16.msra.mxu0 %v3679_v8  ;;  %v3158_v38 = vld [vmem:[%s4347_s4 + $0x58] sm:$0xff]  ;;  %v3160_v42 = vld [vmem:[%s4347_s4 + $0x68] sm:$0xff]  ;;  %v3167_v43 = vld [vmem:[%s4348_s5 + $0x60] sm:$0xff] }
  0x13   : > { %3381 = vmatprep.subr.bf16.mxu0 %v3680_v9  ;;  %390 = vperm.xlu0 %3677, %v356_v10   ;;  %v3166_v40 = vld [vmem:[%s4348_s5 + $0x58] sm:$0xff]  ;;  %v3168_v44 = vld [vmem:[%s4348_s5 + $0x68] sm:$0xff]  ;;  %v3161_v45 = vld [vmem:[%s4347_s4 + $0x70] sm:$0xff] }
  0x14   : > { %395 = vperm.xlu1 %3678, %v357_v11   ;;  %v3162_v46 = vld [vmem:[%s4347_s4 + $0x78] sm:$0xff]  ;;  %v3169_v47 = vld [vmem:[%s4348_s5 + $0x70] sm:$0xff]  ;;  %v2781_v49 = vld [vmem:[%s4350_s7] sm:$0xff] }
  0x15   : > { %v3170_v48 = vld [vmem:[%s4348_s5 + $0x78] sm:$0xff]  ;;  %v2782_v50 = vld [vmem:[%s4350_s7 + $0x8] sm:$0xff]  ;;  %v2783_v51 = vld [vmem:[%s4350_s7 + $0x10] sm:$0xff] }
  0x16   : > { %3382 = vmatpush3.bf16.msra.mxu0 %v3680_v9  ;;  %v2784_v52 = vld [vmem:[%s4350_s7 + $0x18] sm:$0xff]  ;;  %v2785_v53 = vld [vmem:[%s4350_s7 + $0x20] sm:$0xff]  ;;  %v2786_v54 = vld [vmem:[%s4350_s7 + $0x28] sm:$0xff] }
  0x17   : > { %3383 = vmatprep.subr.bf16.mxu0 %v3681_v12  ;;  %1204 = vperm.xlu0 %3677, %v1194_v13   ;;  %v2787_v55 = vld [vmem:[%s4350_s7 + $0x30] sm:$0xff]  ;;  %v2788_v56 = vld [vmem:[%s4350_s7 + $0x38] sm:$0xff]  ;;  %v2837_v57 = vld [vmem:[%s4351_s8] sm:$0xff] }
  0x18   : > { %1209 = vperm.xlu1 %3678, %v1195_v14   ;;  %v2838_v58 = vld [vmem:[%s4351_s8 + $0x8] sm:$0xff]  ;;  %v2839_v59 = vld [vmem:[%s4351_s8 + $0x10] sm:$0xff]  ;;  %v2840_v60 = vld [vmem:[%s4351_s8 + $0x18] sm:$0xff] }
  0x19   : > { %v2841_v61 = vld [vmem:[%s4351_s8 + $0x20] sm:$0xff]  ;;  %v2842_v62 = vld [vmem:[%s4351_s8 + $0x28] sm:$0xff]  ;;  %v2843_v63 = vld [vmem:[%s4351_s8 + $0x30] sm:$0xff] }
  0x1a   : > { %3384 = vmatpush3.bf16.msra.mxu0 %v3681_v12  ;;  %v2844_v0 = vld [vmem:[%s4351_s8 + $0x38] sm:$0xff]  ;;  %v3687_v1 = vld [vmem:[%s4346_s3] sm:$0xff]  }
  0x1b   : > { %3385 = vmatprep.subr.bf16.mxu0 %v3682_v15  ;;  %1260 = vperm.xlu0 %3677, %v1250_v16  }
  0x1c   : > { %1265 = vperm.xlu1 %3678, %v1251_v17   ;;  %3403 = vmatprep.mubr.msk.bf16.mxu1 %vm442_vm0, %v3687_v1 }
  0x1e   : > { %3386 = vmatpush3.bf16.msra.mxu0 %v3682_v15 }
  0x1f   : > { %1214 = vperm.xlu0 %3677, %v1196_v20  }
  0x20   : > { %1219 = vperm.xlu1 %3678, %v1197_v21  }
  0x21   : > { %3388 = vmatmul.mubr.msk.bf16.vlgmr.msra.gmra.mrb[0].mxu0 %vm442_vm0, %v3684_v18 }
  0x22   : > { %3391 = vmatprep.mubr.msk.bf16.mxu0 %vm442_vm0, %v3685_v19 }
  0x23   : > { %1270 = vperm.xlu0 %3677, %v1252_v22  }
  0x24   : > { %1275 = vperm.xlu1 %3678, %v1253_v23  }
  0x27   : > { %1224 = vperm.xlu0 %3677, %v1198_v25  }
  0x28   : > { %1229 = vperm.xlu1 %3678, %v1199_v26  }
  0x29   : > { %3392 = vmatmul.mubr.msk.bf16.gmra.mrb[4].mxu0 %vm442_vm0, %v3686_v24 }
  0x2b   : > { %1280 = vperm.xlu0 %3677, %v1254_v27  }
  0x2c   : > { %1285 = vperm.xlu1 %3678, %v1255_v28  }
  0x2f   : > { %1234 = vperm.xlu0 %3677, %v1200_v29  }
  0x30   : > { %1239 = vperm.xlu1 %3678, %v1201_v30   ;;  %v3688_v30 = vld [vmem:[%s4346_s3 + $0x8] sm:$0xff]  }
  0x33   : > { %1290 = vperm.xlu0 %3677, %v1256_v31   ;;  %v3689_v31 = vld [vmem:[%s4346_s3 + $0x10] sm:$0xff]  }
  0x34   : > { %1295 = vperm.xlu1 %3678, %v1257_v32   ;;  %v3690_v32 = vld [vmem:[%s4346_s3 + $0x18] sm:$0xff]  }
  0x37   : > { %1998 = vperm.xlu0 %3677, %v3155_v33   ;;  %v3691_v33 = vld [vmem:[%s4346_s3 + $0x20] sm:$0xff]  }
  0x38   : > { %2003 = vperm.xlu1 %3678, %v3156_v34   ;;  %v3692_v34 = vld [vmem:[%s4346_s3 + $0x28] sm:$0xff]  }
  0x3b   : > { %2055 = vperm.xlu0 %3677, %v3163_v35   ;;  %v3693_v35 = vld [vmem:[%s4346_s3 + $0x30] sm:$0xff]  }
  0x3c   : > { %2060 = vperm.xlu1 %3678, %v3164_v36   ;;  %v3694_v36 = vld [vmem:[%s4346_s3 + $0x38] sm:$0xff]  }
  0x3f   : > { %2008 = vperm.xlu0 %3677, %v3157_v37   ;;  %v3695_v37 = vld [vmem:[%s4346_s3 + $0x40] sm:$0xff]  }
  0x40   : > { %2013 = vperm.xlu1 %3678, %v3158_v38   ;;  %v3696_v38 = vld [vmem:[%s4346_s3 + $0x48] sm:$0xff]  }
  0x43   : > { %2065 = vperm.xlu0 %3677, %v3165_v39   ;;  %v3697_v39 = vld [vmem:[%s4346_s3 + $0x50] sm:$0xff]  }
  0x44   : > { %2070 = vperm.xlu1 %3678, %v3166_v40   ;;  %v3698_v40 = vld [vmem:[%s4346_s3 + $0x58] sm:$0xff]  }
  0x47   : > { %2018 = vperm.xlu0 %3677, %v3159_v41   ;;  %v520_v41 = vlaneseq }
  0x48   : > { %2023 = vperm.xlu1 %3678, %v3160_v42  }
  0x49   : > { %v521_v42 = vshrl.u32 %v520_v41, 7 }
  0x4b   : > { %2075 = vperm.xlu0 %3677, %v3167_v43   ;;  %v523_v43 = vand.u32 127, %v520_v41 }
  0x4c   : > { %2080 = vperm.xlu1 %3678, %v3168_v44   ;;  %v3732_v44 = vmov 0.0  }
  0x4d   : > { %vm528_vm1 = vcmp.eq.s32.totalorder %v521_v42, %v523_v43 }
  0x4f   : > { %2028 = vperm.xlu0 %3677, %v3161_v45   ;;  %v4055_v45 = vsel %vm528_vm1, 1.0, %v3732_v44 }
  0x50   : > { %2033 = vperm.xlu1 %3678, %v3162_v46   ;;  %3427 = vmatprep.subr.msk.mxu0 %vm813_vm2, %v4055_v45  ;;  %v524_v46 = vadd.s32 1, %v521_v42 }
  0x51   : > { %3428 = vmatpush3.msk.msra.mxu0 %vm813_vm2, %v4055_v45 }
  0x52   : > { %vm525_vm3 = vcmp.eq.s32.totalorder %v524_v46, %v523_v43 }
  0x53   : > { %2085 = vperm.xlu0 %3677, %v3169_v47   ;;  %v4061_v47 = vsel %vm525_vm3, 1.0, %v3732_v44 }
  0x54   : > { %2090 = vperm.xlu1 %3678, %v3170_v48   ;;  %3441 = vmatprep.subr.msk.mxu0 %vm813_vm2, %v4061_v47  ;;  %v531_v48 = vadd.s32 4294967295, %v521_v42 }
  0x56   : > { %vm532_vm4 = vcmp.eq.s32.totalorder %v531_v48, %v523_v43 }
  0x57   : > { %2791 = vperm.xlu0 %3677, %v2781_v49   ;;  %v4065_v49 = vsel %vm532_vm4, 1.0, %v3732_v44 }
  0x58   : > { %2796 = vperm.xlu1 %3678, %v2782_v50  }
  0x5b   : > { %2801 = vperm.xlu0 %3677, %v2783_v51  }
  0x5c   : > { %2806 = vperm.xlu1 %3678, %v2784_v52  }
  0x5f   : > { %2811 = vperm.xlu0 %3677, %v2785_v53  }
  0x60   : > { %2816 = vperm.xlu1 %3678, %v2786_v54  }
  0x63   : > { %2821 = vperm.xlu0 %3677, %v2787_v55  }
  0x64   : > { %2826 = vperm.xlu1 %3678, %v2788_v56  }
  0x67   : > { %2847 = vperm.xlu0 %3677, %v2837_v57  }
  0x68   : > { %2852 = vperm.xlu1 %3678, %v2838_v58  }
  0x6b   : > { %2857 = vperm.xlu0 %3677, %v2839_v59  }
  0x6c   : > { %2862 = vperm.xlu1 %3678, %v2840_v60  }
  0x6f   : > { %2867 = vperm.xlu0 %3677, %v2841_v61  }
  0x70   : > { %2872 = vperm.xlu1 %3678, %v2842_v62  }
  0x73   : > { %2877 = vperm.xlu0 %3677, %v2843_v63  }
  0x74   : > { %2882 = vperm.xlu1 %3678, %v2844_v0  }
  0x86   : > { %v371_v2 = vpop.permute.xlu1 %370  ;;  %v361_v3 = vpop.permute.xlu0 %360 }
  0x8a   : > { %v376_v4 = vpop.permute.xlu1 %375  ;;  %v366_v6 = vpop.permute.xlu0 %365 }
  0x8e   : > { %v386_v13 = vpop.permute.xlu1 %385  ;;  %v381_v16 = vpop.permute.xlu0 %380 }
  0x92   : > { %v391_v26 = vpop.permute.xlu0 %390 }
  0x93   : > { %v396_v21 = vpop.permute.xlu1 %395 }
  0xf4   : > { %v3389_v5 = vpop.f32.mrb[0].mxu0 }
  0xf5   : > { %v489_v7 = vpop.f32.mrb[1].mxu0  ;;  %v3993_v14 = vadd.f32 %v3389_v5, %v371_v2 }
  0xf6   : > { %v3390_v8 = vpop.f32.mrb[2].mxu0  ;;  %v3987_v10 = vadd.f32 %v489_v7, %v361_v3 }
  0xf7   : > { %v492_v9 = vpop.f32.mrb[3].mxu0  ;;  %v3989_v11 = vadd.f32 %v3390_v8, %v376_v4 }
  0xf8   : > { %v3991_v12 = vadd.f32 %v492_v9, %v366_v6 }
  0xf9   : > { %v560_v18 = vpack.c.bf16 %v3989_v11, %v3993_v14 }
  0xfa   : > { %v559_v15 = vpack.c.bf16 %v3991_v12, %v3987_v10 }
  0xfc   : > { %v3393_v17 = vpop.f32.mrb[4].mxu0  ;;  %3395 = vmatprep.subr.bf16.mxu1 %v559_v15 }
  0xfd   : > { %v505_v19 = vpop.f32.mrb[5].mxu0  ;;  %3396 = vmatpush3.bf16.msra.mxu1 %v559_v15  ;;  %v4005_v27 = vadd.f32 %v3393_v17, %v391_v26  ;;  %v1210_v15 = vpop.permute.xlu1 %1209 }
  0xfe   : > { %v3394_v20 = vpop.f32.mrb[6].mxu0  ;;  %3397 = vmatprep.subr.bf16.mxu1 %v560_v18  ;;  %v3999_v23 = vadd.f32 %v505_v19, %v381_v16  ;;  %v1205_v16 = vpop.permute.xlu0 %1204 }
  0xff   : > { %v508_v22 = vpop.f32.mrb[7].mxu0  ;;  %v4001_v24 = vadd.f32 %v3394_v20, %v396_v21 }
 0x100   : > { %v4003_v25 = vadd.f32 %v508_v22, %v386_v13  ;;  %v3699_v13 = vld [vmem:[%s4346_s3 + $0x60] sm:$0xff]  }
 0x101   : > { %3398 = vmatpush3.bf16.msra.mxu1 %v560_v18  ;;  %v562_v29 = vpack.c.bf16 %v4001_v24, %v4005_v27  ;;  %v1266_v17 = vpop.permute.xlu1 %1265 }
 0x102   : > { %v561_v28 = vpack.c.bf16 %v4003_v25, %v3999_v23  ;;  %v1261_v18 = vpop.permute.xlu0 %1260 }
 0x104   : > { %3399 = vmatprep.subr.bf16.mxu1 %v561_v28 }
 0x105   : > { %3400 = vmatpush3.bf16.msra.mxu1 %v561_v28  ;;  %v1220_v19 = vpop.permute.xlu1 %1219 }
 0x106   : > { %3401 = vmatprep.subr.bf16.mxu1 %v562_v29  ;;  %v1215_v20 = vpop.permute.xlu0 %1214 }
 0x109   : > { %3402 = vmatpush3.bf16.msra.mxu1 %v562_v29  ;;  %v1276_v21 = vpop.permute.xlu1 %1275 }
 0x10a   : > { %v1271_v22 = vpop.permute.xlu0 %1270 }
 0x10c   : > { %3404 = vmatmul.mubr.msk.bf16.vlgmr.msra.gmra.mrb[0].mxu1 %vm442_vm0, %v3688_v30 }
 0x10d   : > { %3407 = vmatprep.mubr.msk.bf16.mxu1 %vm442_vm0, %v3689_v31  ;;  %v1230_v26 = vpop.permute.xlu1 %1229 }
 0x10e   : > { %v1225_v28 = vpop.permute.xlu0 %1224 }
 0x114   : > { %3408 = vmatmul.mubr.msk.bf16.gmra.mrb[4].mxu1 %vm442_vm0, %v3690_v32  ;;  %v1286_v32 = vpop.permute.xlu1 %1285 }
 0x115   : > { %3411 = vmatprep.mubr.msk.bf16.mxu1 %vm442_vm0, %v3691_v33 }
 0x118   : > { %v1240_v46 = vpop.permute.xlu1 %1239 }
 0x11c   : > { %3412 = vmatmul.mubr.msk.bf16.gmra.mrb[8].mxu1 %vm442_vm0, %v3692_v34  ;;  %v1281_v34 = vpop.permute.xlu0 %1280 }
 0x11d   : > { %3415 = vmatprep.mubr.msk.bf16.mxu1 %vm442_vm0, %v3693_v35 }
 0x124   : > { %3416 = vmatmul.mubr.msk.bf16.gmra.mrb[12].mxu1 %vm442_vm0, %v3694_v36 }
 0x125   : > { %3419 = vmatprep.mubr.msk.bf16.mxu1 %vm442_vm0, %v3695_v37 }
 0x12c   : > { %3420 = vmatmul.mubr.msk.bf16.gmra.mrb[16].mxu1 %vm442_vm0, %v3696_v38 }
 0x12d   : > { %3423 = vmatprep.mubr.msk.bf16.mxu1 %vm442_vm0, %v3697_v39 }
 0x134   : > { %3424 = vmatmul.mubr.msk.bf16.gmra.mrb[20].mxu1 %vm442_vm0, %v3698_v40 }
 0x135   : > { %3477 = vmatprep.mubr.msk.bf16.mxu1 %vm442_vm0, %v3699_v13 }
 0x1df   : > { %v3405_v50 = vpop.f32.mrb[0].mxu1 }
 0x1e0   : > { %v693_v51 = vpop.f32.mrb[1].mxu1 }
 0x1e1   : > { %v3406_v52 = vpop.f32.mrb[2].mxu1 }
 0x1e2   : > { %v696_v53 = vpop.f32.mrb[3].mxu1 }
 0x1e7   : > { %v3409_v54 = vpop.f32.mrb[4].mxu1 }
 0x1e8   : > { %v709_v55 = vpop.f32.mrb[5].mxu1 }
 0x1e9   : > { %v3410_v56 = vpop.f32.mrb[6].mxu1 }
 0x1ea   : > { %v712_v57 = vpop.f32.mrb[7].mxu1 }
 0x1ef   : > { %v3413_v58 = vpop.f32.mrb[8].mxu1 }
 0x1f0   : > { %v725_v59 = vpop.f32.mrb[9].mxu1 }
 0x1f1   : > { %v3414_v60 = vpop.f32.mrb[10].mxu1  ;;  %3429 = vmatprep.mubr.msk.f32.mxu0 %vm788_vm5, %v725_v59 }
 0x1f2   : > { %v728_v61 = vpop.f32.mrb[11].mxu1 }
 0x1f3   : > { %3430 = vmatmul.mubr.msk.f32.vlgmr.msra.gmra.mrb[8].mxu0 %vm788_vm5, %v728_v61 }
 0x1f4   : > { %3432 = vmatprep.mubr.msk.f32.mxu0 %vm788_vm5, %v3413_v58  ;;  %3442 = vmatpush3.msk.msra.mxu0 %vm813_vm2, %v4061_v47 }
 0x1f5   : > { %3455 = vmatprep.subr.msk.mxu0 %vm813_vm2, %v4065_v49 }
 0x1f7   : > { %v3417_v62 = vpop.f32.mrb[12].mxu1  ;;  %3433 = vmatmul.mubr.msk.f32.gmra.mrb[10].mxu0 %vm788_vm5, %v3414_v60 }
 0x1f8   : > { %v741_v63 = vpop.f32.mrb[13].mxu1 }
 0x1f9   : > { %v3418_v0 = vpop.f32.mrb[14].mxu1  ;;  %3435 = vmatprep.mubr.msk.f32.mxu0 %vm788_vm5, %v741_v63 }
 0x1fa   : > { %v744_v1 = vpop.f32.mrb[15].mxu1 }
 0x1fb   : > { %3436 = vmatmul.mubr.msk.f32.gmra.mrb[12].mxu0 %vm788_vm5, %v744_v1 }
 0x1fc   : > { %3438 = vmatprep.mubr.msk.f32.mxu0 %vm788_vm5, %v3417_v62 }
 0x1ff   : > { %3439 = vmatmul.mubr.msk.f32.gmra.mrb[14].mxu0 %vm788_vm5, %v3418_v0  ;;  %v3421_v2 = vpop.f32.mrb[16].mxu1 }
 0x200   : > { %3443 = vmatprep.mubr.msk.f32.mxu0 %vm788_vm5, %v693_v51  ;;  %v757_v3 = vpop.f32.mrb[17].mxu1 }
 0x201   : > { %v3422_v4 = vpop.f32.mrb[18].mxu1 }
 0x202   : > { %v760_v5 = vpop.f32.mrb[19].mxu1 }
 0x203   : > { %3444 = vmatmul.mubr.msk.f32.vlgmr.msra.gmra.mrb[8].mxu0 %vm788_vm5, %v696_v53 }
 0x204   : > { %3446 = vmatprep.mubr.msk.f32.mxu0 %vm788_vm5, %v3405_v50  ;;  %3456 = vmatpush3.msk.msra.mxu0 %vm813_vm2, %v4065_v49 }
 0x205   : > { %3501 = vmatprep.subr.msk.mxu0 %vm813_vm2, %v4055_v45 }
 0x207   : > { %3447 = vmatmul.mubr.msk.f32.gmra.mrb[10].mxu0 %vm788_vm5, %v3406_v52  ;;  %v3425_v6 = vpop.f32.mrb[20].mxu1  ;;  %v1235_v52 = vpop.permute.xlu0 %1234 }
 0x208   : > { %3449 = vmatprep.mubr.msk.f32.mxu0 %vm788_vm5, %v709_v55  ;;  %v773_v7 = vpop.f32.mrb[21].mxu1 }
 0x209   : > { %v3426_v8 = vpop.f32.mrb[22].mxu1 }
 0x20a   : > { %v776_v9 = vpop.f32.mrb[23].mxu1 }
 0x20b   : > { %3450 = vmatmul.mubr.msk.f32.gmra.mrb[12].mxu0 %vm788_vm5, %v712_v57  ;;  %v1291_v13 = vpop.permute.xlu0 %1290 }
 0x20c   : > { %3452 = vmatprep.mubr.msk.f32.mxu0 %vm788_vm5, %v3409_v54 }
 0x20f   : > { %3453 = vmatmul.mubr.msk.f32.gmra.mrb[14].mxu0 %vm788_vm5, %v3410_v56 }
 0x210   : > { %3457 = vmatprep.mubr.msk.f32.mxu0 %vm788_vm5, %v757_v3 }
 0x213   : > { %3458 = vmatmul.mubr.msk.f32.vlgmr.msra.gmra.mrb[8].mxu0 %vm788_vm5, %v760_v5 }
 0x214   : > { %3460 = vmatprep.mubr.msk.f32.mxu0 %vm788_vm5, %v3421_v2  ;;  %3502 = vmatpush3.msk.msra.mxu0 %vm813_vm2, %v4055_v45 }
 0x215   : > { %3515 = vmatprep.subr.msk.mxu0 %vm813_vm2, %v4061_v47 }
 0x217   : > { %3461 = vmatmul.mubr.msk.f32.gmra.mrb[10].mxu0 %vm788_vm5, %v3422_v4 }
 0x218   : > { %3463 = vmatprep.mubr.msk.f32.mxu0 %vm788_vm5, %v773_v7 }
 0x21b   : > { %3464 = vmatmul.mubr.msk.f32.gmra.mrb[12].mxu0 %vm788_vm5, %v776_v9 }
 0x21c   : > { %3466 = vmatprep.mubr.msk.f32.mxu0 %vm788_vm5, %v3425_v6  ;;  %v1296_v6 = vpop.permute.xlu1 %1295 }
 0x21f   : > { %3467 = vmatmul.mubr.msk.f32.gmra.mrb[14].mxu0 %vm788_vm5, %v3426_v8 }
 0x2e6   : > { %v3459_v29 = vpop.f32.mrb[8].mxu0 }
 0x2e7   : > { %v1243_v30 = vmul.f32 %v3459_v29, %v1210_v15  ;;  %v1147_v31 = vpop.f32.mrb[9].mxu0 }
 0x2e8   : > { %v1242_v33 = vmul.f32 %v1205_v16, %v1147_v31 }
 0x2e9   : > { %v1299_v35 = vadd.f32 %v1266_v17, %v1243_v30 }
 0x2ea   : > { %v1298_v36 = vadd.f32 %v1261_v18, %v1242_v33  ;;  %v3462_v37 = vpop.f32.mrb[10].mxu0 }
 0x2eb   : > { %v1307_v38 = vadd.f32 %v1299_v35, %v3991_v12  ;;  %v1245_v39 = vmul.f32 %v3462_v37, %v1220_v19  ;;  %v1157_v40 = vpop.f32.mrb[11].mxu0  ;;  %v3701_v35 = vld [vmem:[%s4346_s3 + $0x70] sm:$0xff]   ;;  %v3703_v37 = vld [vmem:[%s4346_s3 + $0x80] sm:$0xff]  }
 0x2ec   : > { %v1306_v41 = vadd.f32 %v1298_v36, %v3987_v10  ;;  %v1244_v42 = vmul.f32 %v1215_v20, %v1157_v40  ;;  %v3702_v36 = vld [vmem:[%s4346_s3 + $0x78] sm:$0xff]  }
 0x2ed   : > { %v1323_v43 = vmul.f32 0.2, %v1307_v38  ;;  %v1301_v44 = vadd.f32 %v1276_v21, %v1245_v39  ;;  %vm1315_vm6 = vcmp.ge.f32.partialorder %v1307_v38, 0.0  ;;  %v3705_v39 = vld [vmem:[%s4346_s3 + $0x90] sm:$0xff]   ;;  %v3706_v40 = vld [vmem:[%s4346_s3 + $0x98] sm:$0xff]  }
 0x2ee   : > { %v1322_v48 = vmul.f32 0.2, %v1306_v41  ;;  %v1300_v50 = vadd.f32 %v1271_v22, %v1244_v42  ;;  %v3465_v51 = vpop.f32.mrb[12].mxu0  ;;  %vm1314_vm7 = vcmp.ge.f32.partialorder %v1306_v41, 0.0  ;;  %v3708_v42 = vld [vmem:[%s4346_s3 + $0xa8] sm:$0xff]  }
 0x2ef   : > { %v1309_v53 = vadd.f32 %v1301_v44, %v3989_v11  ;;  %v1247_v54 = vmul.f32 %v3465_v51, %v1230_v26  ;;  %v1167_v55 = vpop.f32.mrb[13].mxu0  ;;  %v4110_v56 = vsel %vm1315_vm6, %v1307_v38, %v1323_v43  ;;  %v3704_v38 = vld [vmem:[%s4346_s3 + $0x88] sm:$0xff]   ;;  %v3709_v43 = vld [vmem:[%s4346_s3 + $0xb0] sm:$0xff]   ;;  %v3710_v44 = vld [vmem:[%s4346_s3 + $0xb8] sm:$0xff]  }
 0x2f0   : > { %v1308_v57 = vadd.f32 %v1300_v50, %v3993_v14  ;;  %v1246_v58 = vmul.f32 %v1225_v28, %v1167_v55  ;;  %v4113_v59 = vsel %vm1314_vm7, %v1306_v41, %v1322_v48  ;;  %v3707_v41 = vld [vmem:[%s4346_s3 + $0xa0] sm:$0xff]  }
 0x2f1   : > { %v1325_v60 = vmul.f32 0.2, %v1309_v53  ;;  %v1303_v61 = vadd.f32 %v1286_v32, %v1247_v54  ;;  %v1363_v62 = vpack.c.bf16 %v4110_v56, %v4113_v59  ;;  %vm1317_vm8 = vcmp.ge.f32.partialorder %v1309_v53, 0.0 }
 0x2f2   : > { %v1324_v63 = vmul.f32 0.2, %v1308_v57  ;;  %v1302_v0 = vadd.f32 %v1281_v34, %v1246_v58  ;;  %v3468_v1 = vpop.f32.mrb[14].mxu0  ;;  %vm1316_vm9 = vcmp.ge.f32.partialorder %v1308_v57, 0.0  ;;  %v3700_v34 = vld [vmem:[%s4346_s3 + $0x68] sm:$0xff]  }
 0x2f3   : > { %v1311_v2 = vadd.f32 %v1303_v61, %v4003_v25  ;;  %v1249_v3 = vmul.f32 %v3468_v1, %v1240_v46  ;;  %v1177_v4 = vpop.f32.mrb[15].mxu0  ;;  %3469 = vmatprep.subr.bf16.mxu1 %v1363_v62  ;;  %v4118_v5 = vsel %vm1317_vm8, %v1309_v53, %v1325_v60 }
 0x2f4   : > { %v1310_v7 = vadd.f32 %v1302_v0, %v3999_v23  ;;  %v1248_v8 = vmul.f32 %v1235_v52, %v1177_v4  ;;  %3470 = vmatpush3.bf16.msra.mxu1 %v1363_v62  ;;  %v4121_v9 = vsel %vm1316_vm9, %v1308_v57, %v1324_v63 }
 0x2f5   : > { %v1327_v15 = vmul.f32 0.2, %v1311_v2  ;;  %v1305_v16 = vadd.f32 %v1296_v6, %v1249_v3  ;;  %v1364_v17 = vpack.c.bf16 %v4118_v5, %v4121_v9  ;;  %vm1319_vm10 = vcmp.ge.f32.partialorder %v1311_v2, 0.0 }
 0x2f6   : > { %v1326_v18 = vmul.f32 0.2, %v1310_v7  ;;  %v1304_v19 = vadd.f32 %v1291_v13, %v1248_v8  ;;  %vm1318_vm11 = vcmp.ge.f32.partialorder %v1310_v7, 0.0 }
 0x2f7   : > { %v1313_v20 = vadd.f32 %v1305_v16, %v4001_v24  ;;  %3471 = vmatprep.subr.bf16.mxu1 %v1364_v17  ;;  %v4126_v21 = vsel %vm1319_vm10, %v1311_v2, %v1327_v15  ;;  %v3711_v16 = vld [vmem:[%s4349_s6] sm:$0xff]  }
 0x2f8   : > { %v1312_v22 = vadd.f32 %v1304_v19, %v4005_v27  ;;  %3472 = vmatpush3.bf16.msra.mxu1 %v1364_v17  ;;  %v4129_v26 = vsel %vm1318_vm11, %v1310_v7, %v1326_v18  ;;  %v2004_v17 = vpop.permute.xlu1 %2003  ;;  %v1999_v18 = vpop.permute.xlu0 %1998 }
 0x2f9   : > { %v1329_v28 = vmul.f32 0.2, %v1313_v20  ;;  %v1365_v29 = vpack.c.bf16 %v4126_v21, %v4129_v26  ;;  %vm1321_vm12 = vcmp.ge.f32.partialorder %v1313_v20, 0.0 }
 0x2fa   : > { %v1328_v30 = vmul.f32 0.2, %v1312_v22  ;;  %vm1320_vm13 = vcmp.ge.f32.partialorder %v1312_v22, 0.0 }
 0x2fb   : > { %3473 = vmatprep.subr.bf16.mxu1 %v1365_v29  ;;  %v4133_v31 = vsel %vm1321_vm12, %v1313_v20, %v1329_v28 }
 0x2fc   : > { %3474 = vmatpush3.bf16.msra.mxu1 %v1365_v29  ;;  %v4135_v32 = vsel %vm1320_vm13, %v1312_v22, %v1328_v30  ;;  %v2061_v19 = vpop.permute.xlu1 %2060  ;;  %v2056_v20 = vpop.permute.xlu0 %2055 }
 0x2fd   : > { %v1366_v33 = vpack.c.bf16 %v4133_v31, %v4135_v32 }
 0x2ff   : > { %3475 = vmatprep.subr.bf16.mxu1 %v1366_v33 }
 0x300   : > { %3476 = vmatpush3.bf16.msra.mxu1 %v1366_v33  ;;  %v2014_v22 = vpop.permute.xlu1 %2013  ;;  %v2009_v28 = vpop.permute.xlu0 %2008 }
 0x303   : > { %3478 = vmatmul.mubr.msk.bf16.vlgmr.msra.gmra.mrb[24].mxu1 %vm442_vm0, %v3700_v34 }
 0x304   : > { %3481 = vmatprep.mubr.msk.bf16.mxu1 %vm442_vm0, %v3701_v35  ;;  %v2071_v29 = vpop.permute.xlu1 %2070  ;;  %v2066_v30 = vpop.permute.xlu0 %2065 }
 0x308   : > { %v2024_v33 = vpop.permute.xlu1 %2023  ;;  %v2019_v34 = vpop.permute.xlu0 %2018 }
 0x30b   : > { %3482 = vmatmul.mubr.msk.bf16.gmra.mrb[28].mxu1 %vm442_vm0, %v3702_v36 }
 0x30c   : > { %3485 = vmatprep.mubr.msk.bf16.mxu1 %vm442_vm0, %v3703_v37 }
 0x313   : > { %3486 = vmatmul.mubr.msk.bf16.gmra.mrb[32].mxu1 %vm442_vm0, %v3704_v38  ;;  %v2081_v38 = vpop.permute.xlu1 %2080 }
 0x314   : > { %3489 = vmatprep.mubr.msk.bf16.mxu1 %vm442_vm0, %v3705_v39 }
 0x31b   : > { %3490 = vmatmul.mubr.msk.bf16.gmra.mrb[36].mxu1 %vm442_vm0, %v3706_v40  ;;  %v2076_v40 = vpop.permute.xlu0 %2075 }
 0x31c   : > { %3493 = vmatprep.mubr.msk.bf16.mxu1 %vm442_vm0, %v3707_v41 }
 0x323   : > { %3494 = vmatmul.mubr.msk.bf16.gmra.mrb[40].mxu1 %vm442_vm0, %v3708_v42 }
 0x324   : > { %3497 = vmatprep.mubr.msk.bf16.mxu1 %vm442_vm0, %v3709_v43 }
 0x32b   : > { %3498 = vmatmul.mubr.msk.bf16.gmra.mrb[44].mxu1 %vm442_vm0, %v3710_v44 }
 0x32c   : > { %3551 = vmatprep.mubr.msk.bf16.mxu1 %vm442_vm0, %v3711_v16 }
 0x3d6   : > { %v3479_v46 = vpop.f32.mrb[24].mxu1 }
 0x3d7   : > { %v1497_v48 = vpop.f32.mrb[25].mxu1 }
 0x3d8   : > { %v3480_v50 = vpop.f32.mrb[26].mxu1 }
 0x3d9   : > { %v1500_v51 = vpop.f32.mrb[27].mxu1 }
 0x3de   : > { %v3483_v52 = vpop.f32.mrb[28].mxu1 }
 0x3df   : > { %v1513_v53 = vpop.f32.mrb[29].mxu1 }
 0x3e0   : > { %v3484_v54 = vpop.f32.mrb[30].mxu1 }
 0x3e1   : > { %v1516_v55 = vpop.f32.mrb[31].mxu1 }
 0x3e6   : > { %v3487_v57 = vpop.f32.mrb[32].mxu1 }
 0x3e7   : > { %v1529_v58 = vpop.f32.mrb[33].mxu1 }
 0x3e8   : > { %v3488_v60 = vpop.f32.mrb[34].mxu1  ;;  %3503 = vmatprep.mubr.msk.f32.mxu0 %vm788_vm5, %v1529_v58 }
 0x3e9   : > { %v1532_v61 = vpop.f32.mrb[35].mxu1 }
 0x3ea   : > { %3504 = vmatmul.mubr.msk.f32.vlgmr.msra.gmra.mrb[16].mxu0 %vm788_vm5, %v1532_v61 }
 0x3eb   : > { %3506 = vmatprep.mubr.msk.f32.mxu0 %vm788_vm5, %v3487_v57  ;;  %3516 = vmatpush3.msk.msra.mxu0 %vm813_vm2, %v4061_v47 }
 0x3ec   : > { %3529 = vmatprep.subr.msk.mxu0 %vm813_vm2, %v4065_v49 }
 0x3ee   : > { %v3491_v62 = vpop.f32.mrb[36].mxu1  ;;  %3507 = vmatmul.mubr.msk.f32.gmra.mrb[18].mxu0 %vm788_vm5, %v3488_v60  ;;  %v2029_v60 = vpop.permute.xlu0 %2028 }
 0x3ef   : > { %v1545_v63 = vpop.f32.mrb[37].mxu1 }
 0x3f0   : > { %v3492_v0 = vpop.f32.mrb[38].mxu1  ;;  %3509 = vmatprep.mubr.msk.f32.mxu0 %vm788_vm5, %v1545_v63 }
 0x3f1   : > { %v1548_v1 = vpop.f32.mrb[39].mxu1 }
 0x3f2   : > { %3510 = vmatmul.mubr.msk.f32.gmra.mrb[20].mxu0 %vm788_vm5, %v1548_v1 }
 0x3f3   : > { %3512 = vmatprep.mubr.msk.f32.mxu0 %vm788_vm5, %v3491_v62 }
 0x3f6   : > { %3513 = vmatmul.mubr.msk.f32.gmra.mrb[22].mxu0 %vm788_vm5, %v3492_v0  ;;  %v3495_v2 = vpop.f32.mrb[40].mxu1 }
 0x3f7   : > { %3517 = vmatprep.mubr.msk.f32.mxu0 %vm788_vm5, %v1497_v48  ;;  %v1561_v3 = vpop.f32.mrb[41].mxu1 }
 0x3f8   : > { %v3496_v4 = vpop.f32.mrb[42].mxu1 }
 0x3f9   : > { %v1564_v6 = vpop.f32.mrb[43].mxu1 }
 0x3fa   : > { %3518 = vmatmul.mubr.msk.f32.vlgmr.msra.gmra.mrb[16].mxu0 %vm788_vm5, %v1500_v51 }
 0x3fb   : > { %3520 = vmatprep.mubr.msk.f32.mxu0 %vm788_vm5, %v3479_v46  ;;  %3530 = vmatpush3.msk.msra.mxu0 %vm813_vm2, %v4065_v49 }
 0x3fc   : > { %3575 = vmatprep.subr.msk.mxu0 %vm813_vm2, %v4055_v45 }
 0x3fe   : > { %3521 = vmatmul.mubr.msk.f32.gmra.mrb[18].mxu0 %vm788_vm5, %v3480_v50  ;;  %v3499_v7 = vpop.f32.mrb[44].mxu1 }
 0x3ff   : > { %3523 = vmatprep.mubr.msk.f32.mxu0 %vm788_vm5, %v1513_v53  ;;  %v1577_v8 = vpop.f32.mrb[45].mxu1 }
 0x400   : > { %v3500_v13 = vpop.f32.mrb[46].mxu1 }
 0x401   : > { %v1580_v15 = vpop.f32.mrb[47].mxu1 }
 0x402   : > { %3524 = vmatmul.mubr.msk.f32.gmra.mrb[20].mxu0 %vm788_vm5, %v1516_v55 }
 0x403   : > { %3526 = vmatprep.mubr.msk.f32.mxu0 %vm788_vm5, %v3483_v52 }
 0x406   : > { %3527 = vmatmul.mubr.msk.f32.gmra.mrb[22].mxu0 %vm788_vm5, %v3484_v54  ;;  %v2034_v54 = vpop.permute.xlu1 %2033 }
 0x407   : > { %3531 = vmatprep.mubr.msk.f32.mxu0 %vm788_vm5, %v1561_v3 }
 0x40a   : > { %3532 = vmatmul.mubr.msk.f32.vlgmr.msra.gmra.mrb[16].mxu0 %vm788_vm5, %v1564_v6 }
 0x40b   : > { %3534 = vmatprep.mubr.msk.f32.mxu0 %vm788_vm5, %v3495_v2  ;;  %3576 = vmatpush3.msk.msra.mxu0 %vm813_vm2, %v4055_v45 }
 0x40c   : > { %3589 = vmatprep.subr.msk.mxu0 %vm813_vm2, %v4061_v47 }
 0x40e   : > { %3535 = vmatmul.mubr.msk.f32.gmra.mrb[18].mxu0 %vm788_vm5, %v3496_v4 }
 0x40f   : > { %3537 = vmatprep.mubr.msk.f32.mxu0 %vm788_vm5, %v1577_v8 }
 0x412   : > { %3538 = vmatmul.mubr.msk.f32.gmra.mrb[20].mxu0 %vm788_vm5, %v1580_v15 }
 0x413   : > { %3540 = vmatprep.mubr.msk.f32.mxu0 %vm788_vm5, %v3499_v7 }
 0x416   : > { %3541 = vmatmul.mubr.msk.f32.gmra.mrb[22].mxu0 %vm788_vm5, %v3500_v13 }
 0x4dd   : > { %v3533_v35 = vpop.f32.mrb[16].mxu0 }
 0x4de   : > { %v2037_v36 = vmul.f32 %v3533_v35, %v2004_v17  ;;  %v1940_v37 = vpop.f32.mrb[17].mxu0  ;;  %v2091_v17 = vpop.permute.xlu1 %2090 }
 0x4df   : > { %v2036_v39 = vmul.f32 %v1999_v18, %v1940_v37 }
 0x4e0   : > { %v2094_v41 = vadd.f32 %v2061_v19, %v2037_v36 }
 0x4e1   : > { %v2093_v42 = vadd.f32 %v2056_v20, %v2036_v39  ;;  %v3536_v43 = vpop.f32.mrb[18].mxu0  ;;  %v2086_v20 = vpop.permute.xlu0 %2085 }
 0x4e2   : > { %v2102_v44 = vadd.f32 %v2094_v41, %v4110_v56  ;;  %v2039_v46 = vmul.f32 %v3536_v43, %v2014_v22  ;;  %v1950_v48 = vpop.f32.mrb[19].mxu0  ;;  %v3715_v43 = vld [vmem:[%s4349_s6 + $0x20] sm:$0xff]  }
 0x4e3   : > { %v2101_v50 = vadd.f32 %v2093_v42, %v4113_v59  ;;  %v2038_v51 = vmul.f32 %v2009_v28, %v1950_v48  ;;  %v3714_v42 = vld [vmem:[%s4349_s6 + $0x18] sm:$0xff]   ;;  %v3719_v48 = vld [vmem:[%s4349_s6 + $0x40] sm:$0xff]  }
 0x4e4   : > { %v2118_v52 = vmul.f32 0.2, %v2102_v44  ;;  %v2096_v53 = vadd.f32 %v2071_v29, %v2039_v46  ;;  %vm2110_vm14 = vcmp.ge.f32.partialorder %v2102_v44, 0.0  ;;  %v3718_v46 = vld [vmem:[%s4349_s6 + $0x38] sm:$0xff]  }
 0x4e5   : > { %v2117_v55 = vmul.f32 0.2, %v2101_v50  ;;  %v2095_v57 = vadd.f32 %v2066_v30, %v2038_v51  ;;  %v3539_v58 = vpop.f32.mrb[20].mxu0  ;;  %vm2109_vm15 = vcmp.ge.f32.partialorder %v2101_v50, 0.0  ;;  %v3721_v51 = vld [vmem:[%s4349_s6 + $0x50] sm:$0xff]  }
 0x4e6   : > { %v2104_v61 = vadd.f32 %v2096_v53, %v4118_v5  ;;  %v2041_v62 = vmul.f32 %v3539_v58, %v2024_v33  ;;  %v1960_v63 = vpop.f32.mrb[21].mxu0  ;;  %v2126_v0 = vsel %vm2110_vm14, %v2102_v44, %v2118_v52  ;;  %v3716_v44 = vld [vmem:[%s4349_s6 + $0x28] sm:$0xff]   ;;  %v3722_v52 = vld [vmem:[%s4349_s6 + $0x58] sm:$0xff]  }
 0x4e7   : > { %v2103_v56 = vadd.f32 %v2095_v57, %v4121_v9  ;;  %v2040_v1 = vmul.f32 %v2019_v34, %v1960_v63  ;;  %v2125_v2 = vsel %vm2109_vm15, %v2101_v50, %v2117_v55  ;;  %v3720_v50 = vld [vmem:[%s4349_s6 + $0x48] sm:$0xff]  }
 0x4e8   : > { %v2120_v59 = vmul.f32 0.2, %v2104_v61  ;;  %v2098_v3 = vadd.f32 %v2081_v38, %v2041_v62  ;;  %v2157_v4 = vpack.c.bf16 %v2126_v0, %v2125_v2  ;;  %vm2112_vm1 = vcmp.ge.f32.partialorder %v2104_v61, 0.0 }
 0x4e9   : > { %v2119_v6 = vmul.f32 0.2, %v2103_v56  ;;  %v2097_v7 = vadd.f32 %v2076_v40, %v2040_v1  ;;  %v3542_v8 = vpop.f32.mrb[22].mxu0  ;;  %vm2111_vm3 = vcmp.ge.f32.partialorder %v2103_v56, 0.0 }
 0x4ea   : > { %v2106_v13 = vadd.f32 %v2098_v3, %v4126_v21  ;;  %v2043_v15 = vmul.f32 %v3542_v8, %v2034_v54  ;;  %v1970_v16 = vpop.f32.mrb[23].mxu0  ;;  %3543 = vmatprep.subr.bf16.mxu1 %v2157_v4  ;;  %v2128_v5 = vsel %vm2112_vm1, %v2104_v61, %v2120_v59 }
 0x4eb   : > { %v2105_v18 = vadd.f32 %v2097_v7, %v4129_v26  ;;  %v2042_v9 = vmul.f32 %v2029_v60, %v1970_v16  ;;  %3544 = vmatpush3.bf16.msra.mxu1 %v2157_v4  ;;  %v2127_v19 = vsel %vm2111_vm3, %v2103_v56, %v2119_v6 }
 0x4ec   : > { %v2122_v22 = vmul.f32 0.2, %v2106_v13  ;;  %v2100_v28 = vadd.f32 %v2091_v17, %v2043_v15  ;;  %v2158_v29 = vpack.c.bf16 %v2128_v5, %v2127_v19  ;;  %vm2114_vm4 = vcmp.ge.f32.partialorder %v2106_v13, 0.0  ;;  %v2797_v5 = vpop.permute.xlu1 %2796  ;;  %v2792_v17 = vpop.permute.xlu0 %2791 }
 0x4ed   : > { %v2121_v30 = vmul.f32 0.2, %v2105_v18  ;;  %v2099_v33 = vadd.f32 %v2086_v20, %v2042_v9  ;;  %vm2113_vm6 = vcmp.ge.f32.partialorder %v2105_v18, 0.0 }
 0x4ee   : > { %v2108_v21 = vadd.f32 %v2100_v28, %v4133_v31  ;;  %3545 = vmatprep.subr.bf16.mxu1 %v2158_v29  ;;  %v2130_v34 = vsel %vm2114_vm4, %v2106_v13, %v2122_v22  ;;  %v3712_v31 = vld [vmem:[%s4349_s6 + $0x8] sm:$0xff]  }
 0x4ef   : > { %v2107_v35 = vadd.f32 %v2099_v33, %v4135_v32  ;;  %3546 = vmatpush3.bf16.msra.mxu1 %v2158_v29  ;;  %v2129_v36 = vsel %vm2113_vm6, %v2105_v18, %v2121_v30  ;;  %v3713_v32 = vld [vmem:[%s4349_s6 + $0x10] sm:$0xff]  }
 0x4f0   : > { %v2124_v26 = vmul.f32 0.2, %v2108_v21  ;;  %v2159_v37 = vpack.c.bf16 %v2130_v34, %v2129_v36  ;;  %vm2116_vm7 = vcmp.ge.f32.partialorder %v2108_v21, 0.0  ;;  %v2807_v18 = vpop.permute.xlu1 %2806  ;;  %v2802_v9 = vpop.permute.xlu0 %2801 }
 0x4f1   : > { %v2123_v38 = vmul.f32 0.2, %v2107_v35  ;;  %vm2115_vm8 = vcmp.ge.f32.partialorder %v2107_v35, 0.0 }
 0x4f2   : > { %3547 = vmatprep.subr.bf16.mxu1 %v2159_v37  ;;  %v2132_v39 = vsel %vm2116_vm7, %v2108_v21, %v2124_v26 }
 0x4f3   : > { %3548 = vmatpush3.bf16.msra.mxu1 %v2159_v37  ;;  %v2131_v40 = vsel %vm2115_vm8, %v2107_v35, %v2123_v38 }
 0x4f4   : > { %v2160_v41 = vpack.c.bf16 %v2132_v39, %v2131_v40  ;;  %v2817_v22 = vpop.permute.xlu1 %2816  ;;  %v2812_v28 = vpop.permute.xlu0 %2811 }
 0x4f6   : > { %3549 = vmatprep.subr.bf16.mxu1 %v2160_v41 }
 0x4f7   : > { %3550 = vmatpush3.bf16.msra.mxu1 %v2160_v41 }
 0x4f8   : > { %3617 = vmatprep.subr.msk.mxu1 %vm813_vm2, %v4055_v45  ;;  %v2827_v33 = vpop.permute.xlu1 %2826  ;;  %v2822_v21 = vpop.permute.xlu0 %2821 }
 0x4fa   : > { %3552 = vmatmul.mubr.msk.bf16.vlgmr.msra.gmra.mrb[48].mxu1 %vm442_vm0, %v3712_v31 }
 0x4fb   : > { %3555 = vmatprep.mubr.msk.bf16.mxu1 %vm442_vm0, %v3713_v32  ;;  %3618 = vmatpush3.msk.msra.mxu1 %vm813_vm2, %v4055_v45  ;;  %v3717_v45 = vld [vmem:[%s4349_s6 + $0x30] sm:$0xff]  }
 0x4fc   : > { %v2853_v34 = vpop.permute.xlu1 %2852  ;;  %v2848_v35 = vpop.permute.xlu0 %2847 }
 0x500   : > { %v2863_v40 = vpop.permute.xlu1 %2862  ;;  %v2858_v32 = vpop.permute.xlu0 %2857 }
 0x502   : > { %3556 = vmatmul.mubr.msk.bf16.gmra.mrb[52].mxu1 %vm442_vm0, %v3714_v42 }
 0x503   : > { %3559 = vmatprep.mubr.msk.bf16.mxu1 %vm442_vm0, %v3715_v43 }
 0x50a   : > { %3560 = vmatmul.mubr.msk.bf16.gmra.mrb[56].mxu1 %vm442_vm0, %v3716_v44 }
 0x50b   : > { %3563 = vmatprep.mubr.msk.bf16.mxu1 %vm442_vm0, %v3717_v45 }
 0x512   : > { %3564 = vmatmul.mubr.msk.bf16.gmra.mrb[60].mxu1 %vm442_vm0, %v3718_v46 }
 0x513   : > { %3567 = vmatprep.mubr.msk.bf16.mxu1 %vm442_vm0, %v3719_v48 }
 0x51a   : > { %3568 = vmatmul.mubr.msk.bf16.gmra.mrb[64].mxu1 %vm442_vm0, %v3720_v50 }
 0x51b   : > { %3571 = vmatprep.mubr.msk.bf16.mxu1 %vm442_vm0, %v3721_v51 }
 0x522   : > { %3572 = vmatmul.mubr.msk.bf16.gmra.mrb[68].mxu1 %vm442_vm0, %v3722_v52  ;;  %vm2941_vm0 = vcmask 27648  }
 0x5cd   : > { %v3553_v53 = vpop.f32.mrb[48].mxu1 }
 0x5ce   : > { %v2291_v54 = vpop.f32.mrb[49].mxu1 }
 0x5cf   : > { %v3554_v55 = vpop.f32.mrb[50].mxu1 }
 0x5d0   : > { %v2294_v57 = vpop.f32.mrb[51].mxu1 }
 0x5d5   : > { %v3557_v58 = vpop.f32.mrb[52].mxu1 }
 0x5d6   : > { %v2307_v60 = vpop.f32.mrb[53].mxu1 }
 0x5d7   : > { %v3558_v61 = vpop.f32.mrb[54].mxu1 }
 0x5d8   : > { %v2310_v62 = vpop.f32.mrb[55].mxu1 }
 0x5dd   : > { %v3561_v63 = vpop.f32.mrb[56].mxu1 }
 0x5de   : > { %v2323_v0 = vpop.f32.mrb[57].mxu1 }
 0x5df   : > { %v3562_v56 = vpop.f32.mrb[58].mxu1  ;;  %3577 = vmatprep.mubr.msk.f32.mxu0 %vm788_vm5, %v2323_v0 }
 0x5e0   : > { %v2326_v1 = vpop.f32.mrb[59].mxu1 }
 0x5e1   : > { %3578 = vmatmul.mubr.msk.f32.vlgmr.msra.gmra.mrb[24].mxu0 %vm788_vm5, %v2326_v1 }
 0x5e2   : > { %3580 = vmatprep.mubr.msk.f32.mxu0 %vm788_vm5, %v3561_v63  ;;  %3590 = vmatpush3.msk.msra.mxu0 %vm813_vm2, %v4061_v47 }
 0x5e3   : > { %3603 = vmatprep.subr.msk.mxu0 %vm813_vm2, %v4065_v49 }
 0x5e5   : > { %3581 = vmatmul.mubr.msk.f32.gmra.mrb[26].mxu0 %vm788_vm5, %v3562_v56  ;;  %v3565_v2 = vpop.f32.mrb[60].mxu1 }
 0x5e6   : > { %3591 = vmatprep.mubr.msk.f32.mxu0 %vm788_vm5, %v2291_v54  ;;  %v2339_v59 = vpop.f32.mrb[61].mxu1 }
 0x5e7   : > { %v3566_v3 = vpop.f32.mrb[62].mxu1  ;;  %3583 = vmatprep.mubr.msk.f32.mxu1 %vm788_vm5, %v2339_v59 }
 0x5e8   : > { %v2342_v4 = vpop.f32.mrb[63].mxu1 }
 0x5e9   : > { %3592 = vmatmul.mubr.msk.f32.vlgmr.msra.gmra.mrb[24].mxu0 %vm788_vm5, %v2294_v57  ;;  %3584 = vmatmul.mubr.msk.f32.vlgmr.msra.gmra.mrb[72].mxu1 %vm788_vm5, %v2342_v4  ;;  %v2873_v57 = vpop.permute.xlu1 %2872 }
 0x5ea   : > { %3594 = vmatprep.mubr.msk.f32.mxu0 %vm788_vm5, %v3553_v53  ;;  %3604 = vmatpush3.msk.msra.mxu0 %vm813_vm2, %v4065_v49 }
 0x5eb   : > { %3586 = vmatprep.mubr.msk.f32.mxu1 %vm788_vm5, %v3565_v2 }
 0x5ed   : > { %3595 = vmatmul.mubr.msk.f32.gmra.mrb[26].mxu0 %vm788_vm5, %v3554_v55  ;;  %v3569_v47 = vpop.f32.mrb[64].mxu1  ;;  %3587 = vmatmul.mubr.msk.f32.gmra.mrb[74].mxu1 %vm788_vm5, %v3566_v3 }
 0x5ee   : > { %3597 = vmatprep.mubr.msk.f32.mxu0 %vm788_vm5, %v2307_v60  ;;  %v2355_v6 = vpop.f32.mrb[65].mxu1 }
 0x5ef   : > { %v3570_v7 = vpop.f32.mrb[66].mxu1 }
 0x5f0   : > { %v2358_v8 = vpop.f32.mrb[67].mxu1 }
 0x5f1   : > { %3598 = vmatmul.mubr.msk.f32.gmra.mrb[28].mxu0 %vm788_vm5, %v2310_v62  ;;  %v2868_v62 = vpop.permute.xlu0 %2867 }
 0x5f2   : > { %3600 = vmatprep.mubr.msk.f32.mxu0 %vm788_vm5, %v3557_v58 }
 0x5f5   : > { %3601 = vmatmul.mubr.msk.f32.gmra.mrb[30].mxu0 %vm788_vm5, %v3558_v61  ;;  %v3573_v13 = vpop.f32.mrb[68].mxu1 }
 0x5f6   : > { %3605 = vmatprep.mubr.msk.f32.mxu0 %vm788_vm5, %v2355_v6  ;;  %v2371_v49 = vpop.f32.mrb[69].mxu1 }
 0x5f7   : > { %v3574_v15 = vpop.f32.mrb[70].mxu1 }
 0x5f8   : > { %v2374_v16 = vpop.f32.mrb[71].mxu1 }
 0x5f9   : > { %3606 = vmatmul.mubr.msk.f32.vlgmr.msra.gmra.mrb[24].mxu0 %vm788_vm5, %v2358_v8 }
 0x5fa   : > { %3608 = vmatprep.mubr.msk.f32.mxu0 %vm788_vm5, %v3569_v47 }
 0x5fd   : > { %3609 = vmatmul.mubr.msk.f32.gmra.mrb[26].mxu0 %vm788_vm5, %v3570_v7 }
 0x5fe   : > { %3611 = vmatprep.mubr.msk.f32.mxu0 %vm788_vm5, %v2371_v49 }
 0x601   : > { %3612 = vmatmul.mubr.msk.f32.gmra.mrb[28].mxu0 %vm788_vm5, %v2374_v16  ;;  %v2878_v16 = vpop.permute.xlu0 %2877 }
 0x602   : > { %3614 = vmatprep.mubr.msk.f32.mxu0 %vm788_vm5, %v3573_v13  ;;  %v2883_v13 = vpop.permute.xlu1 %2882 }
 0x605   : > { %3615 = vmatmul.mubr.msk.f32.gmra.mrb[30].mxu0 %vm788_vm5, %v3574_v15 }
 0x6bc   : > { %v3585_v19 = vpop.f32.mrb[72].mxu1 }
 0x6bd   : > { %v2496_v20 = vpop.f32.mrb[73].mxu1 }
 0x6c0   : > { %v3588_v29 = vpop.f32.mrb[74].mxu1 }
 0x6c1   : > { %v2506_v30 = vpop.f32.mrb[75].mxu1 }
 0x6cc   : > { %v3607_v36 = vpop.f32.mrb[24].mxu0 }
 0x6cd   : > { %v2830_v26 = vmul.f32 %v3607_v36, %v2797_v5  ;;  %v2734_v37 = vpop.f32.mrb[25].mxu0 }
 0x6ce   : > { %v2829_v38 = vmul.f32 %v2792_v17, %v2734_v37 }
 0x6cf   : > { %v2886_v39 = vadd.f32 %v2853_v34, %v2830_v26 }
 0x6d0   : > { %v2885_v41 = vadd.f32 %v2848_v35, %v2829_v38  ;;  %v3610_v31 = vpop.f32.mrb[26].mxu0 }
 0x6d1   : > { %v2894_v42 = vadd.f32 %v2886_v39, %v3991_v12  ;;  %v2832_v43 = vmul.f32 %v3610_v31, %v2807_v18  ;;  %v2744_v44 = vpop.f32.mrb[27].mxu0 }
 0x6d2   : > { %v2893_v45 = vadd.f32 %v2885_v41, %v3987_v10  ;;  %v2831_v46 = vmul.f32 %v2802_v9, %v2744_v44 }
 0x6d3   : > { %v2902_v48 = vmax.f32 %v2894_v42, 0.0  ;;  %v2888_v50 = vadd.f32 %v2863_v40, %v2832_v43 }
 0x6d4   : > { %v2901_v51 = vmax.f32 %v2893_v45, 0.0  ;;  %v2887_v52 = vadd.f32 %v2858_v32, %v2831_v46  ;;  %v3613_v53 = vpop.f32.mrb[28].mxu0 }
 0x6d5   : > { %v3235_v12 = vpack.c.bf16 %v2902_v48, %v2902_v48  ;;  %v2896_v54 = vadd.f32 %v2888_v50, %v3989_v11  ;;  %v3619_v55 = vadd.f32 %v3613_v53, %v3585_v19  ;;  %v2754_v10 = vpop.f32.mrb[29].mxu0 }
 0x6d6   : > { %v3234_v58 = vpack.c.bf16 %v2901_v51, %v2901_v51  ;;  %v2895_v60 = vadd.f32 %v2887_v52, %v3993_v14  ;;  %v3620_v61 = vadd.f32 %v2754_v10, %v2496_v20 }
 0x6d7   : > { %2943 = vst.msk [vmem:[%s4316_s29 + $0x4] sm:$0xf] %vm2941_vm0, %v3235_v12  ;;  %v2904_v63 = vmax.f32 %v2896_v54, 0.0  ;;  %v2834_v0 = vmul.f32 %v3619_v55, %v2817_v22 }
 0x6d8   : > { %2942 = vst.msk [vmem:[%s4316_s29] sm:$0xf] %vm2941_vm0, %v3234_v58  ;;  %v2903_v56 = vmax.f32 %v2895_v60, 0.0  ;;  %v2833_v1 = vmul.f32 %v3620_v61, %v2812_v28  ;;  %v3616_v2 = vpop.f32.mrb[30].mxu0 }
 0x6d9   : > { %v3237_v11 = vpack.c.bf16 %v2904_v63, %v2904_v63  ;;  %v2890_v59 = vadd.f32 %v2873_v57, %v2834_v0  ;;  %v3621_v3 = vadd.f32 %v3616_v2, %v3588_v29  ;;  %v2764_v4 = vpop.f32.mrb[31].mxu0 }
 0x6da   : > { %v3236_v47 = vpack.c.bf16 %v2903_v56, %v2903_v56  ;;  %v2889_v6 = vadd.f32 %v2868_v62, %v2833_v1  ;;  %v3622_v14 = vadd.f32 %v2764_v4, %v2506_v30 }
 0x6db   : > { %2945 = vst.msk [vmem:[%s4316_s29 + $0xc] sm:$0xf] %vm2941_vm0, %v3237_v11  ;;  %v2898_v7 = vadd.f32 %v2890_v59, %v4003_v25  ;;  %v2836_v8 = vmul.f32 %v3621_v3, %v2827_v33 }
 0x6dc   : > { %2944 = vst.msk [vmem:[%s4316_s29 + $0x8] sm:$0xf] %vm2941_vm0, %v3236_v47  ;;  %v2897_v49 = vadd.f32 %v2889_v6, %v3999_v23  ;;  %v2835_v15 = vmul.f32 %v3622_v14, %v2822_v21 }
 0x6dd   : > { %v2906_v5 = vmax.f32 %v2898_v7, 0.0  ;;  %v2892_v17 = vadd.f32 %v2883_v13, %v2836_v8 }
 0x6de   : > { %v2905_v18 = vmax.f32 %v2897_v49, 0.0  ;;  %v2891_v9 = vadd.f32 %v2878_v16, %v2835_v15 }
 0x6df   : > { %v3239_v19 = vpack.c.bf16 %v2906_v5, %v2906_v5  ;;  %v2900_v20 = vadd.f32 %v2892_v17, %v4001_v24 }
 0x6e0   : > { %v3238_v22 = vpack.c.bf16 %v2905_v18, %v2905_v18  ;;  %v2899_v25 = vadd.f32 %v2891_v9, %v4005_v27 }
 0x6e1   : > { %2947 = vst.msk [vmem:[%s4316_s29 + $0x14] sm:$0xf] %vm2941_vm0, %v3239_v19  ;;  %v2908_v28 = vmax.f32 %v2900_v20, 0.0 }
 0x6e2   : > { %2946 = vst.msk [vmem:[%s4316_s29 + $0x10] sm:$0xf] %vm2941_vm0, %v3238_v22  ;;  %v2907_v23 = vmax.f32 %v2899_v25, 0.0 }
 0x6e3   : > { %v3241_v29 = vpack.c.bf16 %v2908_v28, %v2908_v28 }
 0x6e4   : > { %v3240_v30 = vpack.c.bf16 %v2907_v23, %v2907_v23 }
 0x6e5   : > { %2949 = vst.msk [vmem:[%s4316_s29 + $0x1c] sm:$0xf] %vm2941_vm0, %v3241_v29 }
 0x6e6   : > { %2948 = vst.msk [vmem:[%s4316_s29 + $0x18] sm:$0xf] %vm2941_vm0, %v3240_v30 }
 0x6e7 PF: > { %s19_s30 = sadd.s32 1, %s3729_s30  }
 0x6e8   : > { %p16_p4 = scmp.ge.s32.totalorder %s19_s30, 4  }
 0x6ea   :  { %18 = sbr.rel (!%p16_p4) target bundleno = 1 (0x1), region = 89 }

// kernel: vqvae_forward.12
= control target key start
LH: loop header
LB: loop body
LE: loop exit
PB: predicated region body
PF: predicated region fallthrough
CT: control target
= control target key end

     0   :  { %s3580_s21 = smov 0   ;;  %s4051_s0 = inlined_call_operand.vmem [shape: bf16[2,64,4], index: 0, kind: input, shape index: {}]   ;;  %s4052_s1 = inlined_call_operand.vmem [shape: bf16[128,64], index: 1, kind: input, shape index: {}]   ;;  %s4053_s2 = inlined_call_operand.vmem [shape: f32[32,1], index: 2, kind: input, shape index: {}]   ;;  %s4054_s3 = inlined_call_operand.vmem [shape: f32[32,1], index: 3, kind: input, shape index: {}]   ;;  %s4055_s4 = inlined_call_operand.vmem [shape: bf16[32,64], index: 4, kind: input, shape index: {}]   ;;  %s4056_s5 = inlined_call_operand.vmem [shape: f32[32,1], index: 5, kind: input, shape index: {}]   ;;  %s4057_s6 = inlined_call_operand.vmem [shape: bf16[2,96,32], index: 6, kind: input, shape index: {}]   ;;  %s4058_s7 = inlined_call_operand.vmem [shape: f32[2,32,1], index: 7, kind: input, shape index: {}]   ;;  %s4059_s8 = inlined_call_operand.vmem [shape: f32[2,32,1], index: 8, kind: input, shape index: {}]   ;;  %s4060_s9 = inlined_call_operand.vmem [shape: bf16[96,32], index: 9, kind: input, shape index: {}]   ;;  %s4061_s10 = inlined_call_operand.vmem [shape: f32[32,1], index: 10, kind: input, shape index: {}]   ;;  %s4062_s11 = inlined_call_operand.vmem [shape: f32[32,1], index: 11, kind: input, shape index: {}]   ;;  %s4063_s12 = inlined_call_operand.vmem [shape: bf16[2,32,8], index: 12, kind: output, shape index: {}]  }
   0x1 LB: > { %s2935_s22 = sadd.s32 4294967295, %s3510_s21   ;;  %p2939_p0 = scmp.ge.s32.totalorder %s3510_s21, 1  ;;  %s3510_s21 = sphi %s3580_s21, %s22_s21  }
   0x2   : > { %p362_p1 = scmp.lt.s32.totalorder %s3510_s21, 3 }
   0x4   : > { %p363_p2 = pnand %p2939_p0, %p362_p1 }
   0x5   : > { %p404_p3 = scmp.lt.s32.totalorder (!%p363_p2), %s2935_s22, 1  ;;  %v3476_v0 = vld [vmem:[%s4052_s1] sm:$0xff] (!%p363_p2)   ;;  %vm523_vm0 = vcmask (!%p363_p2), 523264   ;;  %v3477_v5 = vld [vmem:[%s4052_s1 + $0x8] sm:$0xff] (!%p363_p2)   ;;  %v3478_v6 = vld [vmem:[%s4052_s1 + $0x10] sm:$0xff] (!%p363_p2)   ;;  %v423_v12 = vlaneseq (!%p363_p2)  ;;  %v3512_v16 = vmov (!%p363_p2), 0.0  }
   0x6   : > { %366 = sbr.rel (%p363_p2) target bundleno = 2152 (0x868), region = 68  ;;  %3233 = vmatprep.mubr.msk.bf16.mxu0 (!%p363_p2), %vm523_vm0, %v3476_v0  ;;  %v3479_v7 = vld [vmem:[%s4052_s1 + $0x18] sm:$0xff] (!%p363_p2)   ;;  %v3480_v8 = vld [vmem:[%s4052_s1 + $0x20] sm:$0xff] (!%p363_p2)   ;;  %v3481_v9 = vld [vmem:[%s4052_s1 + $0x28] sm:$0xff] (!%p363_p2)   ;;  %vm658_vm2 = vcmask (!%p363_p2), 1043456   ;;  %v3513_v27 = vmov (!%p363_p2), 0  }
   0x7   : > { %v3482_v10 = vld [vmem:[%s4052_s1 + $0x30] sm:$0xff] (!%p363_p2)   ;;  %v3483_v11 = vld [vmem:[%s4052_s1 + $0x38] sm:$0xff] (!%p363_p2)   ;;  %v3642_v13 = vshrl.u32 (!%p363_p2), %v423_v12, 7  ;;  %v3644_v14 = vand.u32 (!%p363_p2), 127, %v423_v12  ;;  %v1116_v25 = vld [vmem:[%s4056_s5] sm:$0xff] (!%p363_p2)  ;;  %3470 = vset.pattern.permute.xlu0 (!%p363_p2), %v3513_v27  ;;  %3471 = vset.pattern.permute.xlu1 (!%p363_p2), %v3513_v27  ;;  %vm645_vm6 = vcmask (!%p363_p2), 31744  }
   0x8   : > { %v1118_v26 = vld [vmem:[%s4056_s5 + $0x10] sm:$0xff] (!%p363_p2)  ;;  %1122 = vperm.xlu0 (!%p363_p2), %3470, %v1116_v25   ;;  %v1117_v28 = vld [vmem:[%s4056_s5 + $0x8] sm:$0xff] (!%p363_p2)  ;;  %v1119_v29 = vld [vmem:[%s4056_s5 + $0x18] sm:$0xff] (!%p363_p2)  ;;  %vm1376_vm7 = vcmask (!%p363_p2), 261120   ;;  %vm1476_vm14 = vcmask (!%p363_p2), 64512  }
   0x9   : > { %v427_v15 = vmul.u32 (!%p363_p2), 2, %v3642_v13  ;;  %1132 = vperm.xlu1 (!%p363_p2), %3471, %v1118_v26   ;;  %v1055_v30 = vld [vmem:[%s4053_s2] sm:$0xff] (!%p363_p2)  ;;  %v1056_v31 = vld [vmem:[%s4053_s2 + $0x8] sm:$0xff] (!%p363_p2)  ;;  %v1057_v34 = vld [vmem:[%s4053_s2 + $0x10] sm:$0xff] (!%p363_p2)  ;;  %vm3856_vm12 = vcmp.eq.s32.totalorder (!%p363_p2), %v3642_v13, %v3644_v14 }
   0xa   : > { %v1083_v32 = vld [vmem:[%s4054_s3] sm:$0xff] (!%p363_p2)  ;;  %v1084_v33 = vld [vmem:[%s4054_s3 + $0x8] sm:$0xff] (!%p363_p2)  ;;  %v1058_v35 = vld [vmem:[%s4053_s2 + $0x18] sm:$0xff] (!%p363_p2) }
   0xb   : > { %vm432_vm1 = vcmp.eq.s32.totalorder (!%p363_p2), %v427_v15, %v3644_v14  ;;  %v428_v18 = vadd.s32 (!%p363_p2), 4294967295, %v427_v15  ;;  %v435_v20 = vadd.s32 (!%p363_p2), 1, %v427_v15  ;;  %v439_v23 = vadd.s32 (!%p363_p2), 2, %v427_v15  ;;  %v1085_v36 = vld [vmem:[%s4054_s3 + $0x10] sm:$0xff] (!%p363_p2)  ;;  %v1086_v37 = vld [vmem:[%s4054_s3 + $0x18] sm:$0xff] (!%p363_p2)  ;;  %v1772_v38 = vld [vmem:[%s4058_s7] sm:$0xff] (!%p363_p2) }
   0xc   : > { %v2945_v17 = vsel (!%p363_p2), %vm432_vm1, 1.0, %v3512_v16  ;;  %1127 = vperm.xlu0 (!%p363_p2), %3470, %v1117_v28   ;;  %v1773_v39 = vld [vmem:[%s4058_s7 + $0x8] sm:$0xff] (!%p363_p2)  ;;  %v1800_v40 = vld [vmem:[%s4059_s8] sm:$0xff] (!%p363_p2)  ;;  %v1774_v42 = vld [vmem:[%s4058_s7 + $0x10] sm:$0xff] (!%p363_p2) }
   0xd   : > { %s4071_s22 = smov (!%p404_p3, %s2935_s22), 1  ;;  %3249 = vmatprep.subr.msk.mxu1 %vm658_vm2, %v2945_v17  ;;  %vm429_vm3 = vcmp.eq.s32.totalorder %v428_v18, %v3644_v14  ;;  %vm436_vm4 = vcmp.eq.s32.totalorder %v435_v20, %v3644_v14  ;;  %vm440_vm5 = vcmp.eq.s32.totalorder %v439_v23, %v3644_v14  ;;  %1137 = vperm.xlu1 %3471, %v1119_v29   ;;  %v1801_v41 = vld [vmem:[%s4059_s8 + $0x8] sm:$0xff]  ;;  %v1775_v43 = vld [vmem:[%s4058_s7 + $0x18] sm:$0xff]  ;;  %v1802_v44 = vld [vmem:[%s4059_s8 + $0x10] sm:$0xff] }
   0xe   : > { %s3107_s25 = sshll.u32 %s4071_s22, 5  ;;  %3250 = vmatpush3.msk.msra.mxu1 %vm658_vm2, %v2945_v17  ;;  %v3651_v19 = vsel %vm429_vm3, 1.0, %v3512_v16  ;;  %v3656_v21 = vsel %vm436_vm4, 1.0, %v3512_v16  ;;  %v3662_v24 = vsel %vm440_vm5, 1.0, %v3512_v16  ;;  %v1803_v45 = vld [vmem:[%s4059_s8 + $0x18] sm:$0xff]  ;;  %v3066_v46 = vld [vmem:[%s4058_s7 + $0x20] sm:$0xff] }
   0xf   : > { %s408_s28 = scalar_lea.vmem %s4051_s0, %s3107_s25  ;;  %3257 = vmatprep.subr.msk.mxu1 %vm658_vm2, %v3651_v19  ;;  %v1111_v22 = vadd.f32 %v3656_v21, %v2945_v17  ;;  %v3067_v47 = vld [vmem:[%s4058_s7 + $0x28] sm:$0xff]  ;;  %v3070_v48 = vld [vmem:[%s4059_s8 + $0x20] sm:$0xff]  ;;  %v3068_v50 = vld [vmem:[%s4058_s7 + $0x30] sm:$0xff]  ;;  %s3108_s27 = sshll.u32 %s4071_s22, 4 }
  0x10   : > { %v3598_v1 = vld [vmem:[%s408_s28] sm:$0xff]   ;;  %v3600_v2 = vld [vmem:[%s408_s28 + $0x8] sm:$0xff]   ;;  %v3605_v3 = vld [vmem:[%s408_s28 + $0x10] sm:$0xff]   ;;  %1061 = vperm.xlu0 %3470, %v1055_v30   ;;  %s413_s30 = scalar_lea.vmem %s4063_s12, %s3108_s27 }
  0x11   : > { %3225 = vmatprep.subr.bf16.mxu0 %v3598_v1  ;;  %v3607_v4 = vld [vmem:[%s408_s28 + $0x18] sm:$0xff]   ;;  %1066 = vperm.xlu1 %3471, %v1056_v31   ;;  %v3071_v49 = vld [vmem:[%s4059_s8 + $0x28] sm:$0xff]  ;;  %v3072_v52 = vld [vmem:[%s4059_s8 + $0x30] sm:$0xff] }
  0x12   : > { %3226 = vmatpush3.bf16.msra.mxu0 %v3598_v1  ;;  %v3069_v51 = vld [vmem:[%s4058_s7 + $0x38] sm:$0xff]  ;;  %v2795_v54 = vld [vmem:[%s4061_s10] sm:$0xff]  ;;  %v2796_v55 = vld [vmem:[%s4061_s10 + $0x8] sm:$0xff] }
  0x13   : > { %3227 = vmatprep.subr.bf16.mxu0 %v3600_v2  ;;  %v3073_v53 = vld [vmem:[%s4059_s8 + $0x38] sm:$0xff]  ;;  %v2797_v56 = vld [vmem:[%s4061_s10 + $0x10] sm:$0xff]  ;;  %v2823_v58 = vld [vmem:[%s4062_s11] sm:$0xff] }
  0x14   : > { %1089 = vperm.xlu0 %3470, %v1083_v32   ;;  %v2798_v57 = vld [vmem:[%s4061_s10 + $0x18] sm:$0xff]  ;;  %v2824_v59 = vld [vmem:[%s4062_s11 + $0x8] sm:$0xff]  ;;  %v2825_v60 = vld [vmem:[%s4062_s11 + $0x10] sm:$0xff] }
  0x15   : > { %1094 = vperm.xlu1 %3471, %v1084_v33   ;;  %v2826_v61 = vld [vmem:[%s4062_s11 + $0x18] sm:$0xff]  ;;  %v3484_v20 = vld [vmem:[%s4055_s4] sm:$0xff]  }
  0x16   : > { %3228 = vmatpush3.bf16.msra.mxu0 %v3600_v2 }
  0x17   : > { %3229 = vmatprep.subr.bf16.mxu0 %v3605_v3 }
  0x18   : > { %1071 = vperm.xlu0 %3470, %v1057_v34   ;;  %v3486_v34 = vld [vmem:[%s4057_s6] sm:$0xff]  }
  0x19   : > { %1076 = vperm.xlu1 %3471, %v1058_v35  }
  0x1a   : > { %3230 = vmatpush3.bf16.msra.mxu0 %v3605_v3 }
  0x1b   : > { %3231 = vmatprep.subr.bf16.mxu0 %v3607_v4 }
  0x1c   : > { %1099 = vperm.xlu0 %3470, %v1085_v36  }
  0x1d   : > { %1104 = vperm.xlu1 %3471, %v1086_v37  }
  0x1e   : > { %3232 = vmatpush3.bf16.msra.mxu0 %v3607_v4 }
  0x1f   : > { %3293 = vmatprep.subr.msk.mxu0 %vm658_vm2, %v1111_v22 }
  0x20   : > { %1778 = vperm.xlu0 %3470, %v1772_v38  }
  0x21   : > { %3234 = vmatmul.mubr.msk.bf16.vlgmr.msra.gmra.mrb[0].mxu0 %vm523_vm0, %v3477_v5  ;;  %1783 = vperm.xlu1 %3471, %v1773_v39  }
  0x22   : > { %3237 = vmatprep.mubr.msk.bf16.mxu0 %vm523_vm0, %v3478_v6  ;;  %3294 = vmatpush3.msk.msra.mxu0 %vm658_vm2, %v1111_v22 }
  0x24   : > { %1806 = vperm.xlu0 %3470, %v1800_v40  }
  0x25   : > { %1811 = vperm.xlu1 %3471, %v1801_v41  }
  0x28   : > { %1788 = vperm.xlu0 %3470, %v1774_v42  }
  0x29   : > { %3238 = vmatmul.mubr.msk.bf16.gmra.mrb[4].mxu0 %vm523_vm0, %v3479_v7  ;;  %1793 = vperm.xlu1 %3471, %v1775_v43  }
  0x2a   : > { %3241 = vmatprep.mubr.msk.bf16.mxu0 %vm523_vm0, %v3480_v8 }
  0x2c   : > { %1816 = vperm.xlu0 %3470, %v1802_v44  }
  0x2d   : > { %1821 = vperm.xlu1 %3471, %v1803_v45  }
  0x30   : > { %2290 = vperm.xlu0 %3470, %v3066_v46  }
  0x31   : > { %3242 = vmatmul.mubr.msk.bf16.gmra.mrb[8].mxu0 %vm523_vm0, %v3481_v9  ;;  %2295 = vperm.xlu1 %3471, %v3067_v47  }
  0x32   : > { %3245 = vmatprep.mubr.msk.bf16.mxu0 %vm523_vm0, %v3482_v10 }
  0x34   : > { %2319 = vperm.xlu0 %3470, %v3070_v48  }
  0x35   : > { %2324 = vperm.xlu1 %3471, %v3071_v49  }
  0x38   : > { %2300 = vperm.xlu0 %3470, %v3068_v50  }
  0x39   : > { %3246 = vmatmul.mubr.msk.bf16.gmra.mrb[12].mxu0 %vm523_vm0, %v3483_v11  ;;  %2305 = vperm.xlu1 %3471, %v3069_v51  }
  0x3c   : > { %2329 = vperm.xlu0 %3470, %v3072_v52  }
  0x3d   : > { %2334 = vperm.xlu1 %3471, %v3073_v53  }
  0x40   : > { %2801 = vperm.xlu0 %3470, %v2795_v54  }
  0x41   : > { %2806 = vperm.xlu1 %3471, %v2796_v55  }
  0x44   : > { %2811 = vperm.xlu0 %3470, %v2797_v56  }
  0x45   : > { %2816 = vperm.xlu1 %3471, %v2798_v57  }
  0x48   : > { %2829 = vperm.xlu0 %3470, %v2823_v58  }
  0x49   : > { %2834 = vperm.xlu1 %3471, %v2824_v59  }
  0x4c   : > { %2839 = vperm.xlu0 %3470, %v2825_v60  }
  0x4d   : > { %2844 = vperm.xlu1 %3471, %v2826_v61  }
  0x88   : > { %v1133_v26 = vpop.permute.xlu1 %1132 }
  0xf4   : > { %v3235_v62 = vpop.f32.mrb[0].mxu0 }
  0xf5   : > { %v582_v63 = vpop.f32.mrb[1].mxu0 }
  0xf6   : > { %v3236_v0 = vpop.f32.mrb[2].mxu0 }
  0xf7   : > { %v585_v5 = vpop.f32.mrb[3].mxu0 }
  0xfc   : > { %v3239_v6 = vpop.f32.mrb[4].mxu0 }
  0xfd   : > { %v598_v7 = vpop.f32.mrb[5].mxu0 }
  0xfe   : > { %v3240_v8 = vpop.f32.mrb[6].mxu0  ;;  %3251 = vmatprep.mubr.msk.f32.mxu1 %vm645_vm6, %v598_v7 }
  0xff   : > { %v601_v9 = vpop.f32.mrb[7].mxu0 }
 0x100   : > { %3252 = vmatmul.mubr.msk.f32.vlgmr.msra.gmra.mrb[0].mxu1 %vm645_vm6, %v601_v9  ;;  %v3487_v9 = vld [vmem:[%s4057_s6 + $0x8] sm:$0xff]  }
 0x101   : > { %3254 = vmatprep.mubr.msk.f32.mxu1 %vm645_vm6, %v3239_v6  ;;  %3258 = vmatpush3.msk.msra.mxu1 %vm658_vm2, %v3651_v19 }
 0x102   : > { %3265 = vmatprep.subr.msk.mxu1 %vm658_vm2, %v3656_v21 }
 0x104   : > { %3255 = vmatmul.mubr.msk.f32.gmra.mrb[2].mxu1 %vm645_vm6, %v3240_v8  ;;  %v3243_v10 = vpop.f32.mrb[8].mxu0 }
 0x105   : > { %3259 = vmatprep.mubr.msk.f32.mxu1 %vm645_vm6, %v582_v63  ;;  %v614_v11 = vpop.f32.mrb[9].mxu0 }
 0x106   : > { %v3244_v12 = vpop.f32.mrb[10].mxu0 }
 0x107   : > { %v617_v15 = vpop.f32.mrb[11].mxu0 }
 0x108   : > { %3260 = vmatmul.mubr.msk.f32.vlgmr.msra.gmra.mrb[0].mxu1 %vm645_vm6, %v585_v5 }
 0x109   : > { %3262 = vmatprep.mubr.msk.f32.mxu1 %vm645_vm6, %v3235_v62  ;;  %3266 = vmatpush3.msk.msra.mxu1 %vm658_vm2, %v3656_v21 }
 0x10a   : > { %3273 = vmatprep.subr.msk.mxu1 %vm658_vm2, %v3662_v24 }
 0x10c   : > { %3263 = vmatmul.mubr.msk.f32.gmra.mrb[2].mxu1 %vm645_vm6, %v3236_v0  ;;  %v3247_v16 = vpop.f32.mrb[12].mxu0 }
 0x10d   : > { %3267 = vmatprep.mubr.msk.f32.mxu1 %vm645_vm6, %v614_v11  ;;  %v630_v17 = vpop.f32.mrb[13].mxu0  ;;  %v3489_v11 = vld [vmem:[%s4057_s6 + $0x18] sm:$0xff]  }
 0x10e   : > { %v3248_v18 = vpop.f32.mrb[14].mxu0 }
 0x10f   : > { %v633_v19 = vpop.f32.mrb[15].mxu0 }
 0x110   : > { %3268 = vmatmul.mubr.msk.f32.vlgmr.msra.gmra.mrb[0].mxu1 %vm645_vm6, %v617_v15  ;;  %v3491_v15 = vld [vmem:[%s4057_s6 + $0x28] sm:$0xff]  }
 0x111   : > { %3270 = vmatprep.mubr.msk.f32.mxu1 %vm645_vm6, %v3243_v10  ;;  %3274 = vmatpush3.msk.msra.mxu1 %vm658_vm2, %v3662_v24  ;;  %v1123_v24 = vpop.permute.xlu0 %1122  ;;  %v3488_v10 = vld [vmem:[%s4057_s6 + $0x10] sm:$0xff]  }
 0x112   : > { %3281 = vmatprep.subr.bf16.mxu1 %v3598_v1 }
 0x114   : > { %3271 = vmatmul.mubr.msk.f32.gmra.mrb[2].mxu1 %vm645_vm6, %v3244_v12  ;;  %v3490_v12 = vld [vmem:[%s4057_s6 + $0x20] sm:$0xff]  }
 0x115   : > { %3275 = vmatprep.mubr.msk.f32.mxu1 %vm645_vm6, %v630_v17  ;;  %v1128_v29 = vpop.permute.xlu0 %1127  ;;  %v3514_v17 = vmov 1.0  }
 0x116   : > { %3317 = vmatprep.subr.msk.mxu0 %vm3856_vm12, %v3514_v17 }
 0x118   : > { %3276 = vmatmul.mubr.msk.f32.vlgmr.msra.gmra.mrb[0].mxu1 %vm645_vm6, %v633_v19 }
 0x119   : > { %3282 = vmatpush3.bf16.msra.mxu1 %v3598_v1  ;;  %3278 = vmatprep.mubr.msk.f32.mxu1 %vm645_vm6, %v3247_v16  ;;  %v3485_v1 = vld [vmem:[%s4055_s4 + $0x8] sm:$0xff]   ;;  %v1062_v36 = vpop.permute.xlu0 %1061 }
 0x11a   : > { %3283 = vmatprep.subr.bf16.mxu1 %v3600_v2 }
 0x11c   : > { %3279 = vmatmul.mubr.msk.f32.gmra.mrb[2].mxu1 %vm645_vm6, %v3248_v18  ;;  %v1321_v18 = vadd.s32 1, %v3642_v13 }
 0x11d   : > { %3284 = vmatpush3.bf16.msra.mxu1 %v3600_v2  ;;  %3289 = vmatprep.mubr.msk.bf16.mxu1 %vm523_vm0, %v3484_v20  ;;  %v1090_v38 = vpop.permute.xlu0 %1089 }
 0x11e   : > { %3285 = vmatprep.subr.bf16.mxu1 %v3605_v3  ;;  %vm3868_vm13 = vcmp.eq.s32.totalorder %v1321_v18, %v3644_v14 }
 0x121   : > { %3286 = vmatpush3.bf16.msra.mxu1 %v3605_v3  ;;  %v1072_v42 = vpop.permute.xlu0 %1071 }
 0x122   : > { %3287 = vmatprep.subr.bf16.mxu1 %v3607_v4 }
 0x125   : > { %3288 = vmatpush3.bf16.msra.mxu1 %v3607_v4  ;;  %v1138_v4 = vpop.permute.xlu1 %1137  ;;  %v1100_v52 = vpop.permute.xlu0 %1099 }
 0x128   : > { %3290 = vmatmul.mubr.msk.bf16.vlgmr.msra.gmra.mrb[4].mxu1 %vm523_vm0, %v3485_v1 }
 0x129   : > { %3305 = vmatprep.mubr.msk.bf16.mxu1 %vm1376_vm7, %v3486_v34  ;;  %v1067_v35 = vpop.permute.xlu1 %1066 }
 0x12d   : > { %v1095_v37 = vpop.permute.xlu1 %1094 }
 0x131   : > { %v1077_v40 = vpop.permute.xlu1 %1076 }
 0x135   : > { %v1105_v50 = vpop.permute.xlu1 %1104 }
 0x1eb   : > { %v3277_v21 = vpop.f32.mrb[0].mxu1 }
 0x1ec   : > { %v1032_v22 = vpop.f32.mrb[1].mxu1  ;;  %v1080_v39 = vmul.f32 %v3277_v21, %v1067_v35 }
 0x1ed   : > { %v1079_v41 = vmul.f32 %v1062_v36, %v1032_v22 }
 0x1ee   : > { %v1108_v44 = vadd.f32 %v1095_v37, %v1080_v39 }
 0x1ef   : > { %v3280_v23 = vpop.f32.mrb[2].mxu1  ;;  %v1107_v47 = vadd.f32 %v1090_v38, %v1079_v41 }
 0x1f0   : > { %v1042_v2 = vpop.f32.mrb[3].mxu1  ;;  %v1082_v43 = vmul.f32 %v3280_v23, %v1077_v40  ;;  %v1328_v23 = vadd.s32 4294967295, %v3642_v13 }
 0x1f1   : > { %v1081_v45 = vmul.f32 %v1072_v42, %v1042_v2 }
 0x1f2   : > { %v1110_v54 = vadd.f32 %v1105_v50, %v1082_v43  ;;  %vm3878_vm15 = vcmp.eq.s32.totalorder %v1328_v23, %v3644_v14 }
 0x1f3   : > { %v1109_v57 = vadd.f32 %v1100_v52, %v1081_v45 }
 0x1fb   : > { %v3291_v25 = vpop.f32.mrb[4].mxu1 }
 0x1fc   : > { %v1190_v27 = vpop.f32.mrb[5].mxu1  ;;  %v1199_v32 = vadd.f32 %v3291_v25, %v1133_v26 }
 0x1fd   : > { %v1191_v28 = vadd.f32 %v1190_v27, %v1123_v24  ;;  %v3292_v3 = vpop.f32.mrb[6].mxu1 }
 0x1fe   : > { %v1193_v30 = vpop.f32.mrb[7].mxu1  ;;  %v1202_v33 = vadd.f32 %v3292_v3, %v1138_v4 }
 0x1ff   : > { %v1194_v31 = vadd.f32 %v1193_v30, %v1128_v29  ;;  %3295 = vmatprep.mubr.msk.f32.mxu0 %vm645_vm6, %v1191_v28  ;;  %v3492_v29 = vld [vmem:[%s4057_s6 + $0x30] sm:$0xff]   ;;  %v1784_v30 = vpop.permute.xlu1 %1783 }
 0x201   : > { %3296 = vmatmul.mubr.msk.f32.vlgmr.msra.gmra.mrb[16].mxu0 %vm645_vm6, %v1194_v31  ;;  %v1779_v31 = vpop.permute.xlu0 %1778 }
 0x202   : > { %3298 = vmatprep.mubr.msk.f32.mxu0 %vm645_vm6, %v1199_v32  ;;  %3318 = vmatpush3.msk.msra.mxu0 %vm3856_vm12, %v3514_v17 }
 0x203   : > { %3325 = vmatprep.subr.msk.mxu0 %vm3868_vm13, %v3514_v17  ;;  %v1812_v32 = vpop.permute.xlu1 %1811 }
 0x205   : > { %3299 = vmatmul.mubr.msk.f32.gmra.mrb[18].mxu0 %vm645_vm6, %v1202_v33  ;;  %v1807_v4 = vpop.permute.xlu0 %1806 }
 0x207   : > { %v1794_v33 = vpop.permute.xlu1 %1793 }
 0x209   : > { %v1789_v35 = vpop.permute.xlu0 %1788 }
 0x20b   : > { %v1822_v45 = vpop.permute.xlu1 %1821 }
 0x2d4   : > { %v3297_v46 = vpop.f32.mrb[16].mxu0 }
 0x2d5   : > { %v1306_v48 = vadd.f32 %v3297_v46, %v1108_v44  ;;  %v1286_v49 = vpop.f32.mrb[17].mxu0 }
 0x2d6   : > { %v1305_v51 = vadd.f32 %v1286_v49, %v1107_v47 }
 0x2d7   : > { %vm1310_vm8 = vcmp.ge.f32.partialorder %v1306_v48, 0.0  ;;  %v1314_v53 = vmul.f32 0.2, %v1306_v48 }
 0x2d8   : > { %vm1309_vm9 = vcmp.ge.f32.partialorder %v1305_v51, 0.0  ;;  %v1313_v55 = vmul.f32 0.2, %v1305_v51  ;;  %v3300_v56 = vpop.f32.mrb[18].mxu0 }
 0x2d9   : > { %v3822_v58 = vsel %vm1310_vm8, %v1306_v48, %v1314_v53  ;;  %v1308_v59 = vadd.f32 %v3300_v56, %v1110_v54  ;;  %v1296_v60 = vpop.f32.mrb[19].mxu0  ;;  %v1817_v48 = vpop.permute.xlu0 %1816 }
 0x2da   : > { %v3824_v61 = vsel %vm1309_vm9, %v1305_v51, %v1313_v55  ;;  %v1307_v62 = vadd.f32 %v1296_v60, %v1109_v57 }
 0x2db   : > { %vm1312_vm10 = vcmp.ge.f32.partialorder %v1308_v59, 0.0  ;;  %v1316_v63 = vmul.f32 0.2, %v1308_v59  ;;  %v1344_v0 = vpack.c.bf16 %v3822_v58, %v3824_v61 }
 0x2dc   : > { %vm1311_vm11 = vcmp.ge.f32.partialorder %v1307_v62, 0.0  ;;  %v1315_v5 = vmul.f32 0.2, %v1307_v62 }
 0x2dd   : > { %v3828_v6 = vsel %vm1312_vm10, %v1308_v59, %v1316_v63  ;;  %3301 = vmatprep.subr.bf16.mxu1 %v1344_v0 }
 0x2de   : > { %v3830_v7 = vsel %vm1311_vm11, %v1307_v62, %v1315_v5  ;;  %3302 = vmatpush3.bf16.msra.mxu1 %v1344_v0  ;;  %v3493_v5 = vld [vmem:[%s4057_s6 + $0x38] sm:$0xff]  }
 0x2df   : > { %v1345_v8 = vpack.c.bf16 %v3828_v6, %v3830_v7 }
 0x2e1   : > { %3303 = vmatprep.subr.bf16.mxu1 %v1345_v8 }
 0x2e2   : > { %3304 = vmatpush3.bf16.msra.mxu1 %v1345_v8  ;;  %v3494_v8 = vld [vmem:[%s4057_s6 + $0x40] sm:$0xff]  }
 0x2e5   : > { %3306 = vmatmul.mubr.msk.bf16.vlgmr.msra.gmra.mrb[8].mxu1 %vm1376_vm7, %v3487_v9  ;;  %v3495_v9 = vld [vmem:[%s4057_s6 + $0x48] sm:$0xff]  }
 0x2e6   : > { %3309 = vmatprep.mubr.msk.bf16.mxu1 %vm1376_vm7, %v3488_v10  ;;  %v3496_v10 = vld [vmem:[%s4057_s6 + $0x50] sm:$0xff]  }
 0x2ed   : > { %3310 = vmatmul.mubr.msk.bf16.gmra.mrb[12].mxu1 %vm1376_vm7, %v3489_v11  ;;  %v3497_v11 = vld [vmem:[%s4057_s6 + $0x58] sm:$0xff]  }
 0x2ee   : > { %3313 = vmatprep.mubr.msk.bf16.mxu1 %vm1376_vm7, %v3490_v12 }
 0x2f5   : > { %3314 = vmatmul.mubr.msk.bf16.gmra.mrb[16].mxu1 %vm1376_vm7, %v3491_v15 }
 0x2f6   : > { %3345 = vmatprep.mubr.msk.bf16.mxu1 %vm1376_vm7, %v3492_v29 }
 0x3b8   : > { %v3307_v20 = vpop.f32.mrb[8].mxu1 }
 0x3b9   : > { %v1429_v1 = vpop.f32.mrb[9].mxu1 }
 0x3ba   : > { %v3308_v21 = vpop.f32.mrb[10].mxu1 }
 0x3bb   : > { %v1432_v22 = vpop.f32.mrb[11].mxu1 }
 0x3c0   : > { %v3311_v2 = vpop.f32.mrb[12].mxu1 }
 0x3c1   : > { %v1445_v24 = vpop.f32.mrb[13].mxu1 }
 0x3c2   : > { %v3312_v25 = vpop.f32.mrb[14].mxu1  ;;  %3319 = vmatprep.mubr.msk.f32.mxu0 %vm1476_vm14, %v1445_v24 }
 0x3c3   : > { %v1448_v26 = vpop.f32.mrb[15].mxu1 }
 0x3c4   : > { %3320 = vmatmul.mubr.msk.f32.vlgmr.msra.gmra.mrb[20].mxu0 %vm1476_vm14, %v1448_v26 }
 0x3c5   : > { %3322 = vmatprep.mubr.msk.f32.mxu0 %vm1476_vm14, %v3311_v2  ;;  %3326 = vmatpush3.msk.msra.mxu0 %vm3868_vm13, %v3514_v17 }
 0x3c6   : > { %3333 = vmatprep.subr.msk.mxu0 %vm3878_vm15, %v3514_v17 }
 0x3c8   : > { %3323 = vmatmul.mubr.msk.f32.gmra.mrb[22].mxu0 %vm1476_vm14, %v3312_v25  ;;  %v3315_v13 = vpop.f32.mrb[16].mxu1 }
 0x3c9   : > { %3327 = vmatprep.mubr.msk.f32.mxu0 %vm1476_vm14, %v1429_v1  ;;  %v1461_v14 = vpop.f32.mrb[17].mxu1 }
 0x3ca   : > { %v3316_v28 = vpop.f32.mrb[18].mxu1 }
 0x3cb   : > { %v1464_v3 = vpop.f32.mrb[19].mxu1 }
 0x3cc   : > { %3328 = vmatmul.mubr.msk.f32.vlgmr.msra.gmra.mrb[20].mxu0 %vm1476_vm14, %v1432_v22 }
 0x3cd   : > { %3330 = vmatprep.mubr.msk.f32.mxu0 %vm1476_vm14, %v3307_v20  ;;  %3334 = vmatpush3.msk.msra.mxu0 %vm3878_vm15, %v3514_v17 }
 0x3ce   : > { %3357 = vmatprep.subr.msk.mxu0 %vm3856_vm12, %v3514_v17 }
 0x3d0   : > { %3331 = vmatmul.mubr.msk.f32.gmra.mrb[22].mxu0 %vm1476_vm14, %v3308_v21 }
 0x3d1   : > { %3335 = vmatprep.mubr.msk.f32.mxu0 %vm1476_vm14, %v1461_v14  ;;  %v2296_v14 = vpop.permute.xlu1 %2295 }
 0x3d4   : > { %3336 = vmatmul.mubr.msk.f32.vlgmr.msra.gmra.mrb[20].mxu0 %vm1476_vm14, %v1464_v3 }
 0x3d5   : > { %3338 = vmatprep.mubr.msk.f32.mxu0 %vm1476_vm14, %v3315_v13  ;;  %3358 = vmatpush3.msk.msra.mxu0 %vm3856_vm12, %v3514_v17  ;;  %v3498_v13 = vld [vmem:[%s4060_s9] sm:$0xff]   ;;  %v2325_v3 = vpop.permute.xlu1 %2324 }
 0x3d6   : > { %3365 = vmatprep.subr.msk.mxu0 %vm3868_vm13, %v3514_v17 }
 0x3d8   : > { %3339 = vmatmul.mubr.msk.f32.gmra.mrb[22].mxu0 %vm1476_vm14, %v3316_v28  ;;  %v2291_v28 = vpop.permute.xlu0 %2290 }
 0x3dc   : > { %v2320_v29 = vpop.permute.xlu0 %2319 }
 0x4a7   : > { %v3337_v34 = vpop.f32.mrb[20].mxu0 }
 0x4a8   : > { %v1797_v36 = vmul.f32 %v3337_v34, %v1784_v30  ;;  %v1749_v37 = vpop.f32.mrb[21].mxu0  ;;  %v2306_v30 = vpop.permute.xlu1 %2305 }
 0x4a9   : > { %v1796_v38 = vmul.f32 %v1779_v31, %v1749_v37 }
 0x4aa   : > { %v1825_v39 = vadd.f32 %v1812_v32, %v1797_v36  ;;  %v2301_v32 = vpop.permute.xlu0 %2300 }
 0x4ab   : > { %v1824_v40 = vadd.f32 %v1807_v4, %v1796_v38  ;;  %v3340_v41 = vpop.f32.mrb[22].mxu0 }
 0x4ac   : > { %v1829_v42 = vadd.f32 %v1825_v39, %v3822_v58  ;;  %v1799_v43 = vmul.f32 %v3340_v41, %v1794_v33  ;;  %v1759_v44 = vpop.f32.mrb[23].mxu0  ;;  %v2335_v41 = vpop.permute.xlu1 %2334 }
 0x4ad   : > { %v1828_v46 = vadd.f32 %v1824_v40, %v3824_v61  ;;  %v1798_v47 = vmul.f32 %v1789_v35, %v1759_v44 }
 0x4ae   : > { %v1837_v49 = vmul.f32 0.2, %v1829_v42  ;;  %v1827_v50 = vadd.f32 %v1822_v45, %v1799_v43  ;;  %vm1833_vm0 = vcmp.ge.f32.partialorder %v1829_v42, 0.0  ;;  %v2330_v44 = vpop.permute.xlu0 %2329 }
 0x4af   : > { %v1836_v51 = vmul.f32 0.2, %v1828_v46  ;;  %v1826_v52 = vadd.f32 %v1817_v48, %v1798_v47  ;;  %vm1832_vm1 = vcmp.ge.f32.partialorder %v1828_v46, 0.0 }
 0x4b0   : > { %v1831_v53 = vadd.f32 %v1827_v50, %v3828_v6  ;;  %v3918_v54 = vsel %vm1833_vm0, %v1829_v42, %v1837_v49 }
 0x4b1   : > { %v1830_v55 = vadd.f32 %v1826_v52, %v3830_v7  ;;  %v3921_v56 = vsel %vm1832_vm1, %v1828_v46, %v1836_v51 }
 0x4b2   : > { %v1839_v57 = vmul.f32 0.2, %v1831_v53  ;;  %v1857_v59 = vpack.c.bf16 %v3918_v54, %v3921_v56  ;;  %vm1835_vm2 = vcmp.ge.f32.partialorder %v1831_v53, 0.0 }
 0x4b3   : > { %v1838_v60 = vmul.f32 0.2, %v1830_v55  ;;  %vm1834_vm3 = vcmp.ge.f32.partialorder %v1830_v55, 0.0 }
 0x4b4   : > { %3341 = vmatprep.subr.bf16.mxu1 %v1857_v59  ;;  %v3925_v62 = vsel %vm1835_vm2, %v1831_v53, %v1839_v57 }
 0x4b5   : > { %3342 = vmatpush3.bf16.msra.mxu1 %v1857_v59  ;;  %v3927_v63 = vsel %vm1834_vm3, %v1830_v55, %v1838_v60  ;;  %v3499_v60 = vld [vmem:[%s4060_s9 + $0x8] sm:$0xff]  }
 0x4b6   : > { %v1858_v0 = vpack.c.bf16 %v3925_v62, %v3927_v63 }
 0x4b8   : > { %3343 = vmatprep.subr.bf16.mxu1 %v1858_v0 }
 0x4b9   : > { %3344 = vmatpush3.bf16.msra.mxu1 %v1858_v0  ;;  %v3502_v0 = vld [vmem:[%s4060_s9 + $0x20] sm:$0xff]  }
 0x4bc   : > { %3346 = vmatmul.mubr.msk.bf16.vlgmr.msra.gmra.mrb[20].mxu1 %vm1376_vm7, %v3493_v5  ;;  %v3503_v5 = vld [vmem:[%s4060_s9 + $0x28] sm:$0xff]  }
 0x4bd   : > { %3349 = vmatprep.mubr.msk.bf16.mxu1 %vm1376_vm7, %v3494_v8 }
 0x4c4   : > { %3350 = vmatmul.mubr.msk.bf16.gmra.mrb[24].mxu1 %vm1376_vm7, %v3495_v9 }
 0x4c5   : > { %3353 = vmatprep.mubr.msk.bf16.mxu1 %vm1376_vm7, %v3496_v10 }
 0x4cc   : > { %3354 = vmatmul.mubr.msk.bf16.gmra.mrb[28].mxu1 %vm1376_vm7, %v3497_v11 }
 0x4cd   : > { %3385 = vmatprep.mubr.msk.bf16.mxu1 %vm1376_vm7, %v3498_v13 }
 0x58f   : > { %v3347_v12 = vpop.f32.mrb[20].mxu1 }
 0x590   : > { %v1941_v15 = vpop.f32.mrb[21].mxu1 }
 0x591   : > { %v3348_v18 = vpop.f32.mrb[22].mxu1 }
 0x592   : > { %v1944_v20 = vpop.f32.mrb[23].mxu1 }
 0x597   : > { %v3351_v1 = vpop.f32.mrb[24].mxu1 }
 0x598   : > { %v1957_v21 = vpop.f32.mrb[25].mxu1 }
 0x599   : > { %v3352_v22 = vpop.f32.mrb[26].mxu1  ;;  %3359 = vmatprep.mubr.msk.f32.mxu0 %vm1476_vm14, %v1957_v21 }
 0x59a   : > { %v1960_v23 = vpop.f32.mrb[27].mxu1 }
 0x59b   : > { %3360 = vmatmul.mubr.msk.f32.vlgmr.msra.gmra.mrb[24].mxu0 %vm1476_vm14, %v1960_v23 }
 0x59c   : > { %3362 = vmatprep.mubr.msk.f32.mxu0 %vm1476_vm14, %v3351_v1  ;;  %3366 = vmatpush3.msk.msra.mxu0 %vm3868_vm13, %v3514_v17 }
 0x59d   : > { %3373 = vmatprep.subr.msk.mxu0 %vm3878_vm15, %v3514_v17 }
 0x59f   : > { %3363 = vmatmul.mubr.msk.f32.gmra.mrb[26].mxu0 %vm1476_vm14, %v3352_v22  ;;  %v3355_v2 = vpop.f32.mrb[28].mxu1 }
 0x5a0   : > { %3367 = vmatprep.mubr.msk.f32.mxu0 %vm1476_vm14, %v1941_v15  ;;  %v1973_v24 = vpop.f32.mrb[29].mxu1 }
 0x5a1   : > { %v3356_v25 = vpop.f32.mrb[30].mxu1 }
 0x5a2   : > { %v1976_v26 = vpop.f32.mrb[31].mxu1 }
 0x5a3   : > { %3368 = vmatmul.mubr.msk.f32.vlgmr.msra.gmra.mrb[24].mxu0 %vm1476_vm14, %v1944_v20 }
 0x5a4   : > { %3370 = vmatprep.mubr.msk.f32.mxu0 %vm1476_vm14, %v3347_v12  ;;  %3374 = vmatpush3.msk.msra.mxu0 %vm3878_vm15, %v3514_v17 }
 0x5a5   : > { %3397 = vmatprep.subr.msk.mxu0 %vm3856_vm12, %v3514_v17 }
 0x5a7   : > { %3371 = vmatmul.mubr.msk.f32.gmra.mrb[26].mxu0 %vm1476_vm14, %v3348_v18 }
 0x5a8   : > { %3375 = vmatprep.mubr.msk.f32.mxu0 %vm1476_vm14, %v1973_v24  ;;  %v2802_v24 = vpop.permute.xlu0 %2801 }
 0x5ab   : > { %3376 = vmatmul.mubr.msk.f32.vlgmr.msra.gmra.mrb[24].mxu0 %vm1476_vm14, %v1976_v26 }
 0x5ac   : > { %3378 = vmatprep.mubr.msk.f32.mxu0 %vm1476_vm14, %v3355_v2  ;;  %3398 = vmatpush3.msk.msra.mxu0 %vm3856_vm12, %v3514_v17  ;;  %v2807_v2 = vpop.permute.xlu1 %2806  ;;  %v2812_v26 = vpop.permute.xlu0 %2811 }
 0x5ad   : > { %3405 = vmatprep.subr.msk.mxu0 %vm3868_vm13, %v3514_v17 }
 0x5af   : > { %3379 = vmatmul.mubr.msk.f32.gmra.mrb[26].mxu0 %vm1476_vm14, %v3356_v25 }
 0x5b0   : > { %v2817_v25 = vpop.permute.xlu1 %2816 }
 0x67e   : > { %v3377_v31 = vpop.f32.mrb[24].mxu0 }
 0x67f   : > { %v2309_v4 = vmul.f32 %v3377_v31, %v2296_v14  ;;  %v2260_v33 = vpop.f32.mrb[25].mxu0  ;;  %v2835_v14 = vpop.permute.xlu1 %2834 }
 0x680   : > { %v2308_v34 = vmul.f32 %v2291_v28, %v2260_v33 }
 0x681   : > { %v2338_v35 = vadd.f32 %v2325_v3, %v2309_v4  ;;  %v2830_v3 = vpop.permute.xlu0 %2829 }
 0x682   : > { %v2337_v36 = vadd.f32 %v2320_v29, %v2308_v34  ;;  %v3380_v37 = vpop.f32.mrb[26].mxu0 }
 0x683   : > { %v2342_v38 = vadd.f32 %v2338_v35, %v3918_v54  ;;  %v2311_v39 = vmul.f32 %v3380_v37, %v2306_v30  ;;  %v2270_v40 = vpop.f32.mrb[27].mxu0 }
 0x684   : > { %v2341_v42 = vadd.f32 %v2337_v36, %v3921_v56  ;;  %v2310_v43 = vmul.f32 %v2301_v32, %v2270_v40 }
 0x685   : > { %v2350_v45 = vmul.f32 0.2, %v2342_v38  ;;  %v2340_v46 = vadd.f32 %v2335_v41, %v2311_v39  ;;  %vm2346_vm4 = vcmp.ge.f32.partialorder %v2342_v38, 0.0  ;;  %v2840_v41 = vpop.permute.xlu0 %2839 }
 0x686   : > { %v2349_v47 = vmul.f32 0.2, %v2341_v42  ;;  %v2339_v48 = vadd.f32 %v2330_v44, %v2310_v43  ;;  %vm2345_vm5 = vcmp.ge.f32.partialorder %v2341_v42, 0.0 }
 0x687   : > { %v2344_v49 = vadd.f32 %v2340_v46, %v3925_v62  ;;  %v2354_v50 = vsel %vm2346_vm4, %v2342_v38, %v2350_v45  ;;  %v3500_v62 = vld [vmem:[%s4060_s9 + $0x10] sm:$0xff]   ;;  %v2845_v38 = vpop.permute.xlu1 %2844 }
 0x688   : > { %v2343_v51 = vadd.f32 %v2339_v48, %v3927_v63  ;;  %v2353_v52 = vsel %vm2345_vm5, %v2341_v42, %v2349_v47  ;;  %v3501_v63 = vld [vmem:[%s4060_s9 + $0x18] sm:$0xff]  }
 0x689   : > { %v2352_v53 = vmul.f32 0.2, %v2344_v49  ;;  %v2369_v54 = vpack.c.bf16 %v2354_v50, %v2353_v52  ;;  %vm2348_vm6 = vcmp.ge.f32.partialorder %v2344_v49, 0.0 }
 0x68a   : > { %v2351_v55 = vmul.f32 0.2, %v2343_v51  ;;  %vm2347_vm8 = vcmp.ge.f32.partialorder %v2343_v51, 0.0 }
 0x68b   : > { %3381 = vmatprep.subr.bf16.mxu1 %v2369_v54  ;;  %v2356_v56 = vsel %vm2348_vm6, %v2344_v49, %v2352_v53 }
 0x68c   : > { %3382 = vmatpush3.bf16.msra.mxu1 %v2369_v54  ;;  %v2355_v57 = vsel %vm2347_vm8, %v2343_v51, %v2351_v55 }
 0x68d   : > { %v2370_v59 = vpack.c.bf16 %v2356_v56, %v2355_v57 }
 0x68f   : > { %3383 = vmatprep.subr.bf16.mxu1 %v2370_v59 }
 0x690   : > { %3384 = vmatpush3.bf16.msra.mxu1 %v2370_v59 }
 0x691   : > { %3421 = vmatprep.subr.msk.mxu1 %vm3856_vm12, %v3514_v17 }
 0x693   : > { %3386 = vmatmul.mubr.msk.bf16.vlgmr.msra.gmra.mrb[32].mxu1 %vm1376_vm7, %v3499_v60 }
 0x694   : > { %3389 = vmatprep.mubr.msk.bf16.mxu1 %vm1376_vm7, %v3500_v62  ;;  %3422 = vmatpush3.msk.msra.mxu1 %vm3856_vm12, %v3514_v17 }
 0x69b   : > { %3390 = vmatmul.mubr.msk.bf16.gmra.mrb[36].mxu1 %vm1376_vm7, %v3501_v63 }
 0x69c   : > { %3393 = vmatprep.mubr.msk.bf16.mxu1 %vm1376_vm7, %v3502_v0 }
 0x6a3   : > { %3394 = vmatmul.mubr.msk.bf16.gmra.mrb[40].mxu1 %vm1376_vm7, %v3503_v5  ;;  %vm2875_vm7 = vcmask 60416  }
 0x766   : > { %v3387_v16 = vpop.f32.mrb[32].mxu1 }
 0x767   : > { %v2453_v8 = vpop.f32.mrb[33].mxu1 }
 0x768   : > { %v3388_v9 = vpop.f32.mrb[34].mxu1 }
 0x769   : > { %v2456_v10 = vpop.f32.mrb[35].mxu1 }
 0x76e   : > { %v3391_v11 = vpop.f32.mrb[36].mxu1 }
 0x76f   : > { %v2469_v12 = vpop.f32.mrb[37].mxu1  ;;  %3402 = vmatprep.mubr.msk.f32.mxu1 %vm1476_vm14, %v3391_v11 }
 0x770   : > { %v3392_v15 = vpop.f32.mrb[38].mxu1  ;;  %3399 = vmatprep.mubr.msk.f32.mxu0 %vm1476_vm14, %v2469_v12 }
 0x771   : > { %v2472_v18 = vpop.f32.mrb[39].mxu1  ;;  %3403 = vmatmul.mubr.msk.f32.vlgmr.msra.gmra.mrb[44].mxu1 %vm1476_vm14, %v3392_v15 }
 0x772   : > { %3400 = vmatmul.mubr.msk.f32.vlgmr.msra.gmra.mrb[28].mxu0 %vm1476_vm14, %v2472_v18 }
 0x773   : > { %3407 = vmatprep.mubr.msk.f32.mxu0 %vm1476_vm14, %v2453_v8  ;;  %3406 = vmatpush3.msk.msra.mxu0 %vm3868_vm13, %v3514_v17 }
 0x774   : > { %3413 = vmatprep.subr.msk.mxu0 %vm3878_vm15, %v3514_v17 }
 0x776   : > { %v3395_v20 = vpop.f32.mrb[40].mxu1 }
 0x777   : > { %v2485_v1 = vpop.f32.mrb[41].mxu1 }
 0x778   : > { %v3396_v21 = vpop.f32.mrb[42].mxu1 }
 0x779   : > { %v2488_v22 = vpop.f32.mrb[43].mxu1 }
 0x77a   : > { %3408 = vmatmul.mubr.msk.f32.vlgmr.msra.gmra.mrb[28].mxu0 %vm1476_vm14, %v2456_v10 }
 0x77b   : > { %3410 = vmatprep.mubr.msk.f32.mxu0 %vm1476_vm14, %v3387_v16  ;;  %3414 = vmatpush3.msk.msra.mxu0 %vm3878_vm15, %v3514_v17 }
 0x77e   : > { %3411 = vmatmul.mubr.msk.f32.gmra.mrb[30].mxu0 %vm1476_vm14, %v3388_v9 }
 0x77f   : > { %3415 = vmatprep.mubr.msk.f32.mxu0 %vm1476_vm14, %v2485_v1 }
 0x782   : > { %3416 = vmatmul.mubr.msk.f32.vlgmr.msra.gmra.mrb[28].mxu0 %vm1476_vm14, %v2488_v22 }
 0x783   : > { %3418 = vmatprep.mubr.msk.f32.mxu0 %vm1476_vm14, %v3395_v20 }
 0x786   : > { %3419 = vmatmul.mubr.msk.f32.gmra.mrb[30].mxu0 %vm1476_vm14, %v3396_v21 }
 0x844   : > { %v3404_v19 = vpop.f32.mrb[44].mxu1 }
 0x845   : > { %v2588_v23 = vpop.f32.mrb[45].mxu1 }
 0x855   : > { %v3417_v13 = vpop.f32.mrb[28].mxu0 }
 0x856   : > { %v2820_v27 = vmul.f32 %v3417_v13, %v2807_v2  ;;  %v2772_v17 = vpop.f32.mrb[29].mxu0 }
 0x857   : > { %v2819_v28 = vmul.f32 %v2802_v24, %v2772_v17 }
 0x858   : > { %v2848_v29 = vadd.f32 %v2835_v14, %v2820_v27 }
 0x859   : > { %v2847_v30 = vadd.f32 %v2830_v3, %v2819_v28  ;;  %v3420_v31 = vpop.f32.mrb[30].mxu0 }
 0x85a   : > { %v2852_v32 = vadd.f32 %v2848_v29, %v3822_v58  ;;  %v3423_v4 = vadd.f32 %v3420_v31, %v3404_v19  ;;  %v2782_v33 = vpop.f32.mrb[31].mxu0 }
 0x85b   : > { %v2851_v34 = vadd.f32 %v2847_v30, %v3824_v61  ;;  %v3424_v35 = vadd.f32 %v2782_v33, %v2588_v23 }
 0x85c   : > { %v2856_v36 = vmax.f32 %v2852_v32, 0.0  ;;  %v2822_v37 = vmul.f32 %v3423_v4, %v2817_v25 }
 0x85d   : > { %v2855_v39 = vmax.f32 %v2851_v34, 0.0  ;;  %v2821_v40 = vmul.f32 %v3424_v35, %v2812_v26 }
 0x85e   : > { %v3110_v42 = vpack.c.bf16 %v2856_v36, %v2856_v36  ;;  %v2850_v43 = vadd.f32 %v2845_v38, %v2822_v37 }
 0x85f   : > { %v3109_v44 = vpack.c.bf16 %v2855_v39, %v2855_v39  ;;  %v2849_v58 = vadd.f32 %v2840_v41, %v2821_v40 }
 0x860   : > { %2877 = vst.msk [vmem:[%s413_s30 + $0x4] sm:$0xf] %vm2875_vm7, %v3110_v42  ;;  %v2854_v61 = vadd.f32 %v2850_v43, %v3828_v6 }
 0x861   : > { %2876 = vst.msk [vmem:[%s413_s30] sm:$0xf] %vm2875_vm7, %v3109_v44  ;;  %v2853_v45 = vadd.f32 %v2849_v58, %v3830_v7 }
 0x862   : > { %v2858_v46 = vmax.f32 %v2854_v61, 0.0 }
 0x863   : > { %v2857_v47 = vmax.f32 %v2853_v45, 0.0 }
 0x864   : > { %v3112_v48 = vpack.c.bf16 %v2858_v46, %v2858_v46 }
 0x865   : > { %v3111_v49 = vpack.c.bf16 %v2857_v47, %v2857_v47 }
 0x866   : > { %2879 = vst.msk [vmem:[%s413_s30 + $0xc] sm:$0xf] %vm2875_vm7, %v3112_v48 }
 0x867   : > { %2878 = vst.msk [vmem:[%s413_s30 + $0x8] sm:$0xf] %vm2875_vm7, %v3111_v49 }
 0x868 PF: > { %s22_s21 = sadd.s32 1, %s3510_s21  }
 0x869   : > { %p19_p4 = scmp.ge.s32.totalorder %s22_s21, 4  }
 0x86b   :  { %21 = sbr.rel (!%p19_p4) target bundleno = 1 (0x1), region = 101 }

// kernel: vqvae_forward.13
= control target key start
LH: loop header
LB: loop body
LE: loop exit
PB: predicated region body
PF: predicated region fallthrough
CT: control target
= control target key end

     0   :  { %s2870_s29 = smov 0   ;;  %s3195_s0 = inlined_call_operand.vmem [shape: bf16[2,32,8], index: 0, kind: input, shape index: {}]   ;;  %s3196_s1 = inlined_call_operand.vmem [shape: bf16[64,32], index: 1, kind: input, shape index: {}]   ;;  %s3197_s2 = inlined_call_operand.vmem [shape: f32[16,1], index: 2, kind: input, shape index: {}]   ;;  %s3198_s3 = inlined_call_operand.vmem [shape: f32[16,1], index: 3, kind: input, shape index: {}]   ;;  %s3199_s4 = inlined_call_operand.vmem [shape: bf16[16,32], index: 4, kind: input, shape index: {}]   ;;  %s3200_s5 = inlined_call_operand.vmem [shape: f32[16,1], index: 5, kind: input, shape index: {}]   ;;  %s3201_s6 = inlined_call_operand.vmem [shape: bf16[2,48,16], index: 6, kind: input, shape index: {}]   ;;  %s3202_s7 = inlined_call_operand.vmem [shape: f32[2,16,1], index: 7, kind: input, shape index: {}]   ;;  %s3203_s8 = inlined_call_operand.vmem [shape: f32[2,16,1], index: 8, kind: input, shape index: {}]   ;;  %s3204_s9 = inlined_call_operand.vmem [shape: bf16[48,16], index: 9, kind: input, shape index: {}]   ;;  %s3205_s10 = inlined_call_operand.vmem [shape: f32[16,1], index: 10, kind: input, shape index: {}]   ;;  %s3206_s11 = inlined_call_operand.vmem [shape: f32[16,1], index: 11, kind: input, shape index: {}]   ;;  %s3207_s12 = inlined_call_operand.vmem [shape: bf16[6,16], index: 12, kind: input, shape index: {}]   ;;  %s3208_s13 = inlined_call_operand.vmem [shape: f32[6,1], index: 13, kind: input, shape index: {}]   ;;  %s3209_s14 = inlined_call_operand.vmem [shape: f32[2,6,16], index: 14, kind: output, shape index: {}]  }
   0x1 LB: > { %s2355_s30 = sadd.s32 4294967295, %s2788_s29   ;;  %p2359_p0 = scmp.ge.s32.totalorder %s2788_s29, 1  ;;  %s2788_s29 = sphi %s2870_s29, %s24_s29  }
   0x2   : > { %p412_p1 = scmp.lt.s32.totalorder %s2788_s29, 3 }
   0x4   : > { %p413_p2 = pnand %p2359_p0, %p412_p1 }
   0x5   : > { %p457_p3 = scmp.lt.s32.totalorder (!%p413_p2), %s2355_s30, 1  ;;  %v2768_v0 = vld [vmem:[%s3196_s1] sm:$0xff] (!%p413_p2)   ;;  %vm531_vm0 = vcmask (!%p413_p2), 261120   ;;  %v2769_v3 = vld [vmem:[%s3196_s1 + $0x8] sm:$0xff] (!%p413_p2)   ;;  %v2770_v4 = vld [vmem:[%s3196_s1 + $0x10] sm:$0xff] (!%p413_p2)   ;;  %v471_v6 = vlaneseq (!%p413_p2)  ;;  %v2790_v10 = vmov (!%p413_p2), 1.0  }
   0x6   : > { %416 = sbr.rel (%p413_p2) target bundleno = 2319 (0x90f), region = 76  ;;  %2545 = vmatprep.mubr.msk.bf16.mxu0 (!%p413_p2), %vm531_vm0, %v2768_v0  ;;  %v2771_v5 = vld [vmem:[%s3196_s1 + $0x18] sm:$0xff] (!%p413_p2)   ;;  %v969_v12 = vld [vmem:[%s3200_s5] sm:$0xff] (!%p413_p2)  ;;  %v2791_v13 = vmov (!%p413_p2), 0   ;;  %v970_v15 = vld [vmem:[%s3200_s5 + $0x8] sm:$0xff] (!%p413_p2)  ;;  %v2792_v23 = vmov (!%p413_p2), 0.0  }
   0x7   : > { %v2908_v7 = vshrl.u32 (!%p413_p2), %v471_v6, 7  ;;  %v2910_v8 = vand.u32 (!%p413_p2), 127, %v471_v6  ;;  %2764 = vset.pattern.permute.xlu0 (!%p413_p2), %v2791_v13  ;;  %2765 = vset.pattern.permute.xlu1 (!%p413_p2), %v2791_v13  ;;  %v938_v14 = vld [vmem:[%s3197_s2] sm:$0xff] (!%p413_p2)  ;;  %v939_v16 = vld [vmem:[%s3197_s2 + $0x8] sm:$0xff] (!%p413_p2)  ;;  %v2441_v21 = vld [vmem:[%s3202_s7 + $0x10] sm:$0xff] (!%p413_p2)  ;;  %vm609_vm4 = vcmask (!%p413_p2), 64512  }
   0x8   : > { %973 = vperm.xlu0 (!%p413_p2), %2764, %v969_v12   ;;  %942 = vperm.xlu1 (!%p413_p2), %2765, %v938_v14   ;;  %v952_v17 = vld [vmem:[%s3198_s3] sm:$0xff] (!%p413_p2)  ;;  %v953_v18 = vld [vmem:[%s3198_s3 + $0x8] sm:$0xff] (!%p413_p2)  ;;  %v2443_v25 = vld [vmem:[%s3203_s8 + $0x10] sm:$0xff] (!%p413_p2)  ;;  %vm2793_vm6 = vmmov (!%p413_p2), 0   ;;  %vm1164_vm9 = vcmask (!%p413_p2), 130048  }
   0x9   : > { %v475_v9 = vmul.u32 (!%p413_p2), 2, %v2908_v7  ;;  %v1476_v19 = vld [vmem:[%s3202_s7] sm:$0xff] (!%p413_p2)  ;;  %v1477_v41 = vld [vmem:[%s3202_s7 + $0x8] sm:$0xff] (!%p413_p2)  ;;  %v2442_v43 = vld [vmem:[%s3202_s7 + $0x18] sm:$0xff] (!%p413_p2)  ;;  %vm1128_vm10 = vcmp.eq.s32.totalorder (!%p413_p2), %v2908_v7, %v2910_v8 }
   0xa   : > { %v1490_v20 = vld [vmem:[%s3203_s8] sm:$0xff] (!%p413_p2)  ;;  %v1491_v42 = vld [vmem:[%s3203_s8 + $0x8] sm:$0xff] (!%p413_p2)  ;;  %v2444_v44 = vld [vmem:[%s3203_s8 + $0x18] sm:$0xff] (!%p413_p2) }
   0xb   : > { %vm480_vm1 = vcmp.eq.s32.totalorder (!%p413_p2), %v475_v9, %v2910_v8  ;;  %v476_v11 = vadd.s32 (!%p413_p2), 4294967295, %v475_v9  ;;  %v483_v22 = vadd.s32 (!%p413_p2), 1, %v475_v9  ;;  %v2217_v28 = vld [vmem:[%s3205_s10] sm:$0xff] (!%p413_p2)  ;;  %v487_v35 = vadd.s32 (!%p413_p2), 2, %v475_v9  ;;  %v2218_v45 = vld [vmem:[%s3205_s10 + $0x8] sm:$0xff] (!%p413_p2)  ;;  %v2775_v14 = vld [vmem:[%s3201_s6 + $0x10] sm:$0xff] (!%p413_p2)  }
   0xc   : > { %2553 = vmatprep.subr.msk.mxu1 (!%p413_p2), %vm480_vm1, %v2790_v10  ;;  %978 = vperm.xlu0 (!%p413_p2), %2764, %v970_v15   ;;  %v2364_v24 = vsel (!%p413_p2), %vm480_vm1, 1.0, %v2792_v23  ;;  %v2231_v29 = vld [vmem:[%s3206_s11] sm:$0xff] (!%p413_p2)  ;;  %v2232_v46 = vld [vmem:[%s3206_s11 + $0x8] sm:$0xff] (!%p413_p2)  ;;  %v1119_v15 = vadd.s32 (!%p413_p2), 8, %v2908_v7 }
   0xd   : > { %s3217_s30 = smov (!%p457_p3, %s2355_s30), 1  ;;  %2554 = vmatpush3.msk.msra.mxu1 %vm480_vm1, %v2790_v10  ;;  %vm477_vm2 = vcmp.eq.s32.totalorder %v476_v11, %v2910_v8  ;;  %947 = vperm.xlu1 %2765, %v939_v16   ;;  %vm484_vm3 = vcmp.eq.s32.totalorder %v483_v22, %v2910_v8  ;;  %v2251_v30 = vld [vmem:[%s3208_s13] sm:$0x3f]  ;;  %vm488_vm5 = vcmp.eq.s32.totalorder %v487_v35, %v2910_v8  ;;  %v2774_v13 = vld [vmem:[%s3201_s6 + $0x8] sm:$0xff]  }
   0xe   : > { %s2466_s17 = sshll.u32 %s3217_s30, 4  ;;  %2558 = vmatprep.subr.msk.mxu1 %vm477_vm2, %v2790_v10  ;;  %v2365_v26 = vsel %vm484_vm3, 1.0, %v2792_v23  ;;  %v2772_v40 = vld [vmem:[%s3199_s4] sm:$0xff]   ;;  %vm1129_vm11 = vcmp.eq.s32.totalorder %v1119_v15, %v2910_v8 }
   0xf   : > { %s461_s20 = scalar_lea.vmem %s3195_s0, %s2466_s17  ;;  %v966_v27 = vadd.f32 %v2365_v26, %v2364_v24  ;;  %v2773_v12 = vld [vmem:[%s3201_s6] sm:$0xff]   ;;  %vm3049_vm12 = vmpackc.low %vm1129_vm11, %vm1128_vm10  ;;  %v1134_v26 = vadd.s32 4294967295, %v2908_v7  ;;  %s2362_s17 = sshll.u32 %s3217_s30, 3 }
  0x10   : > { %v2888_v1 = vld [vmem:[%s461_s20] sm:$0xff]   ;;  %v2890_v2 = vld [vmem:[%s461_s20 + $0x8] sm:$0xff]   ;;  %956 = vperm.xlu0 %2764, %v952_v17   ;;  %v2794_v17 = vmov 1.0|1.0   ;;  %s465_s20 = scalar_lea.vmem %s3209_s14, %s2362_s17 }
  0x11   : > { %2541 = vmatprep.subr.bf16.mxu0 %v2888_v1  ;;  %961 = vperm.xlu1 %2765, %v953_v18   ;;  %v1120_v18 = vadd.s32 1, %v2908_v7 }
  0x12   : > { %2542 = vmatpush3.bf16.msra.mxu0 %v2888_v1 }
  0x13   : > { %2543 = vmatprep.subr.bf16.mxu0 %v2890_v2  ;;  %vm1122_vm13 = vcmp.eq.s32.totalorder %v1120_v18, %v2910_v8 }
  0x14   : > { %1480 = vperm.xlu0 %2764, %v1476_v19   ;;  %v1121_v19 = vadd.s32 1, %v1119_v15 }
  0x15   : > { %1485 = vperm.xlu1 %2765, %v1477_v41  }
  0x16   : > { %2544 = vmatpush3.bf16.msra.mxu0 %v2890_v2  ;;  %vm1123_vm14 = vcmp.eq.s32.totalorder %v1121_v19, %v2910_v8 }
  0x17   : > { %2581 = vmatprep.subr.mxu0 %v966_v27  ;;  %vm3068_vm15 = vmpackc.low %vm1123_vm14, %vm1122_vm13 }
  0x18   : > { %1494 = vperm.xlu0 %2764, %v1490_v20  }
  0x19   : > { %2546 = vmatmul.mubr.msk.bf16.vlgmr.msra.gmra.mrb[0].mxu0 %vm531_vm0, %v2769_v3  ;;  %1499 = vperm.xlu1 %2765, %v1491_v42  }
  0x1a   : > { %2549 = vmatprep.mubr.msk.bf16.mxu0 %vm531_vm0, %v2770_v4  ;;  %2582 = vmatpush3.msra.mxu0 %v966_v27  ;;  %v1135_v27 = vadd.s32 4294967295, %v1119_v15 }
  0x1b   : > { %2586 = vmatprep.subr.bf16.mxu0 %v2792_v23 }
  0x1c   : > { %1851 = vperm.xlu0 %2764, %v2441_v21   ;;  %vm1137_vm1 = vcmp.eq.s32.totalorder %v1135_v27, %v2910_v8  ;;  %v2779_v27 = vld [vmem:[%s3204_s9] sm:$0xff]  }
  0x1d   : > { %1856 = vperm.xlu1 %2765, %v2442_v43  }
  0x20   : > { %1866 = vperm.xlu0 %2764, %v2443_v25  }
  0x21   : > { %2550 = vmatmul.mubr.msk.bf16.gmra.mrb[4].mxu0 %vm531_vm0, %v2771_v5  ;;  %1871 = vperm.xlu1 %2765, %v2444_v44  }
  0x24   : > { %2221 = vperm.xlu0 %2764, %v2217_v28  }
  0x25   : > { %2226 = vperm.xlu1 %2765, %v2218_v45  }
  0x28   : > { %2235 = vperm.xlu0 %2764, %v2231_v29  }
  0x29   : > { %2240 = vperm.xlu1 %2765, %v2232_v46  }
  0x2c   : > { %2254 = vperm.xlu0 %2764, %v2251_v30  }
  0x87   : > { %v974_v49 = vpop.permute.xlu0 %973  ;;  %v943_v57 = vpop.permute.xlu1 %942 }
  0x8b   : > { %v979_v53 = vpop.permute.xlu0 %978 }
  0x8c   : > { %v948_v58 = vpop.permute.xlu1 %947 }
  0x8f   : > { %v957_v62 = vpop.permute.xlu0 %956 }
  0x90   : > { %v962_v61 = vpop.permute.xlu1 %961 }
  0x94   : > { %v1486_v35 = vpop.permute.xlu1 %1485 }
  0xec   : > { %v2547_v31 = vpop.f32.mrb[0].mxu0 }
  0xed   : > { %v578_v32 = vpop.f32.mrb[1].mxu0  ;;  %2555 = vmatprep.mubr.msk.f32.mxu1 %vm609_vm4, %v2547_v31 }
  0xee   : > { %v2548_v33 = vpop.f32.mrb[2].mxu0 }
  0xef   : > { %v581_v34 = vpop.f32.mrb[3].mxu0  ;;  %2556 = vmatmul.mubr.msk.f32.vlgmr.msra.gmra.mrb[0].mxu1 %vm609_vm4, %v2548_v33 }
  0xf0   : > { %2559 = vmatpush3.msk.msra.mxu1 %vm477_vm2, %v2790_v10  ;;  %2560 = vmatprep.mubr.msk.f32.mxu1 %vm609_vm4, %v578_v32 }
  0xf1   : > { %2563 = vmatprep.subr.msk.mxu1 %vm484_vm3, %v2790_v10 }
  0xf4   : > { %v2551_v36 = vpop.f32.mrb[4].mxu0 }
  0xf5   : > { %v594_v37 = vpop.f32.mrb[5].mxu0 }
  0xf6   : > { %v2552_v38 = vpop.f32.mrb[6].mxu0 }
  0xf7   : > { %2561 = vmatmul.mubr.msk.f32.vlgmr.msra.gmra.mrb[0].mxu1 %vm609_vm4, %v581_v34  ;;  %v597_v39 = vpop.f32.mrb[7].mxu0 }
  0xf8   : > { %2564 = vmatpush3.msk.msra.mxu1 %vm484_vm3, %v2790_v10  ;;  %2565 = vmatprep.mubr.msk.f32.mxu1 %vm609_vm4, %v594_v37 }
  0xf9   : > { %2568 = vmatprep.subr.msk.mxu1 %vm488_vm5, %v2790_v10 }
  0xff   : > { %2566 = vmatmul.mubr.msk.f32.vlgmr.msra.gmra.mrb[0].mxu1 %vm609_vm4, %v597_v39 }
 0x100   : > { %2569 = vmatpush3.msk.msra.mxu1 %vm488_vm5, %v2790_v10  ;;  %2570 = vmatprep.mubr.msk.f32.mxu1 %vm609_vm4, %v2551_v36  ;;  %v1481_v36 = vpop.permute.xlu0 %1480 }
 0x101   : > { %2573 = vmatprep.subr.bf16.mxu1 %v2792_v23 }
 0x104   : > { %v1495_v42 = vpop.permute.xlu0 %1494 }
 0x107   : > { %2571 = vmatmul.mubr.msk.f32.vlgmr.msra.gmra.mrb[0].mxu1 %vm609_vm4, %v2552_v38 }
 0x108   : > { %2574 = vmatpush3.bf16.msra.mxu1 %v2888_v1  ;;  %2577 = vmatprep.mubr.msk.bf16.mxu1 %vm2793_vm6, %v2792_v23 }
 0x109   : > { %2575 = vmatprep.subr.bf16.mxu1 %v2792_v23 }
 0x10c   : > { %2576 = vmatpush3.bf16.msra.mxu1 %v2890_v2 }
 0x10d   : > { %2698 = vmatprep.subr.msk.bf16.mxu1 %vm3049_vm12, %v2794_v17 }
 0x10f   : > { %2578 = vmatmul.mubr.msk.bf16.vlgmr.msra.gmra.mrb[4].mxu1 %vm531_vm0, %v2772_v40  ;;  %vm1136_vm0 = vcmp.eq.s32.totalorder %v1134_v26, %v2910_v8  ;;  %v1500_v40 = vpop.permute.xlu1 %1499 }
 0x110   : > { %2700 = vmatpush3.bf16.msk.msra.mxu1 %vm3049_vm12, %v2794_v17  ;;  %vm3082_vm2 = vmpackc.low %vm1137_vm1, %vm1136_vm0 }
 0x111   : > { %2702 = vmatprep.subr.msk.bf16.mxu1 %vm3068_vm15, %v2794_v17 }
 0x1da   : > { %v2572_v47 = vpop.f32.mrb[0].mxu1 }
 0x1db   : > { %v927_v48 = vpop.f32.mrb[1].mxu1  ;;  %v951_v59 = vmul.f32 %v2572_v47, %v948_v58 }
 0x1dc   : > { %v950_v60 = vmul.f32 %v943_v57, %v927_v48 }
 0x1dd   : > { %v965_v63 = vadd.f32 %v962_v61, %v951_v59 }
 0x1de   : > { %v964_v1 = vadd.f32 %v957_v62, %v950_v60 }
 0x1e2   : > { %v1023_v50 = vpop.f32.mrb[4].mxu1 }
 0x1e3   : > { %v1024_v51 = vadd.f32 %v1023_v50, %v974_v49  ;;  %v2579_v52 = vpop.f32.mrb[5].mxu1 }
 0x1e4   : > { %v1026_v54 = vpop.f32.mrb[6].mxu1  ;;  %v2776_v52 = vld [vmem:[%s3201_s6 + $0x18] sm:$0xff]  }
 0x1e5   : > { %v1027_v55 = vadd.f32 %v1026_v54, %v979_v53  ;;  %v2580_v56 = vpop.f32.mrb[7].mxu1  ;;  %2583 = vmatprep.mubr.msk.f32.mxu0 %vm609_vm4, %v1024_v51  ;;  %v2777_v53 = vld [vmem:[%s3201_s6 + $0x20] sm:$0xff]   ;;  %v2778_v54 = vld [vmem:[%s3201_s6 + $0x28] sm:$0xff]  }
 0x1e7   : > { %2584 = vmatmul.mubr.msk.f32.vlgmr.msra.gmra.mrb[8].mxu0 %vm609_vm4, %v1027_v55 }
 0x1e8   : > { %2588 = vmatprep.mubr.msk.bf16.mxu0 %vm2793_vm6, %v2792_v23 }
 0x2ba   : > { %v2585_v0 = vpop.f32.mrb[8].mxu0 }
 0x2bb   : > { %v1112_v2 = vadd.f32 %v2585_v0, %v965_v63  ;;  %v1102_v3 = vpop.f32.mrb[9].mxu0 }
 0x2bc   : > { %v1111_v4 = vadd.f32 %v1102_v3, %v964_v1  ;;  %v1857_v3 = vpop.permute.xlu1 %1856 }
 0x2bd   : > { %vm1114_vm7 = vcmp.ge.f32.partialorder %v1112_v2, 0.0  ;;  %v1116_v5 = vmul.f32 0.2, %v1112_v2 }
 0x2be   : > { %vm1113_vm8 = vcmp.ge.f32.partialorder %v1111_v4, 0.0  ;;  %v1115_v6 = vmul.f32 0.2, %v1111_v4 }
 0x2bf   : > { %v3023_v9 = vsel %vm1114_vm7, %v1112_v2, %v1116_v5 }
 0x2c0   : > { %v3025_v10 = vsel %vm1113_vm8, %v1111_v4, %v1115_v6  ;;  %v1852_v4 = vpop.permute.xlu0 %1851 }
 0x2c1   : > { %v1148_v11 = vpack.c.bf16 %v3023_v9, %v3025_v10 }
 0x2c3   : > { %2587 = vmatpush3.bf16.msra.mxu0 %v1148_v11 }
 0x2c4   : > { %2710 = vmatprep.subr.msk.bf16.mxu0 %vm3049_vm12, %v2794_v17 }
 0x2c6   : > { %2589 = vmatmul.mubr.msk.bf16.vlgmr.msra.gmra.mrb[12].mxu0 %vm1164_vm9, %v2773_v12  ;;  %v1872_v12 = vpop.permute.xlu1 %1871 }
 0x2c7   : > { %2592 = vmatprep.mubr.msk.bf16.mxu0 %vm2793_vm6, %v2792_v23  ;;  %2712 = vmatpush3.bf16.msk.msra.mxu0 %vm3049_vm12, %v2794_v17 }
 0x2c8   : > { %2714 = vmatprep.subr.msk.bf16.mxu0 %vm3068_vm15, %v2794_v17 }
 0x2ca   : > { %v2227_v20 = vpop.permute.xlu1 %2226 }
 0x2ce   : > { %2593 = vmatmul.mubr.msk.bf16.gmra.mrb[16].mxu0 %vm1164_vm9, %v2774_v13 }
 0x2cf   : > { %2596 = vmatprep.mubr.msk.bf16.mxu0 %vm2793_vm6, %v2792_v23 }
 0x2d6   : > { %2597 = vmatmul.mubr.msk.bf16.gmra.mrb[20].mxu0 %vm1164_vm9, %v2775_v14  ;;  %v1867_v14 = vpop.permute.xlu0 %1866 }
 0x399   : > { %v1208_v21 = vpop.f32.mrb[12].mxu0 }
 0x39a   : > { %v2590_v22 = vpop.f32.mrb[13].mxu0 }
 0x39b   : > { %v1211_v24 = vpop.f32.mrb[14].mxu0 }
 0x39c   : > { %v2591_v25 = vpop.f32.mrb[15].mxu0 }
 0x3a1   : > { %v1216_v28 = vpop.f32.mrb[16].mxu0 }
 0x3a2   : > { %v2594_v29 = vpop.f32.mrb[17].mxu0  ;;  %2604 = vmatprep.mubr.msk.f32.mxu1 %vm1164_vm9, %v1216_v28  ;;  %v2780_v28 = vld [vmem:[%s3204_s9 + $0x8] sm:$0xff]  }
 0x3a3   : > { %v1219_v30 = vpop.f32.mrb[18].mxu0  ;;  %v2781_v29 = vld [vmem:[%s3204_s9 + $0x10] sm:$0xff]  }
 0x3a4   : > { %v2595_v32 = vpop.f32.mrb[19].mxu0  ;;  %2605 = vmatmul.mubr.msk.f32.vlgmr.msra.gmra.mrb[2].mxu1 %vm1164_vm9, %v1219_v30 }
 0x3a5   : > { %2704 = vmatpush3.bf16.msk.msra.mxu1 %vm3068_vm15, %v2794_v17  ;;  %2611 = vmatprep.mubr.msk.f32.mxu1 %vm1164_vm9, %v1208_v21 }
 0x3a6   : > { %2706 = vmatprep.subr.msk.bf16.mxu1 %vm3082_vm2, %v2794_v17 }
 0x3a9   : > { %v1224_v7 = vpop.f32.mrb[20].mxu0 }
 0x3aa   : > { %v2598_v8 = vpop.f32.mrb[21].mxu0 }
 0x3ab   : > { %v1227_v33 = vpop.f32.mrb[22].mxu0 }
 0x3ac   : > { %2612 = vmatmul.mubr.msk.f32.vlgmr.msra.gmra.mrb[2].mxu1 %vm1164_vm9, %v1211_v24  ;;  %v2599_v34 = vpop.f32.mrb[23].mxu0 }
 0x3ad   : > { %2708 = vmatpush3.bf16.msk.msra.mxu1 %vm3082_vm2, %v2794_v17  ;;  %2618 = vmatprep.mubr.msk.f32.mxu1 %vm1164_vm9, %v1224_v7 }
 0x3ae   : > { %2621 = vmatprep.subr.bf16.mxu1 %v2792_v23 }
 0x3b4   : > { %2619 = vmatmul.mubr.msk.f32.vlgmr.msra.gmra.mrb[2].mxu1 %vm1164_vm9, %v1227_v33 }
 0x3b5   : > { %2623 = vmatprep.mubr.msk.bf16.mxu1 %vm2793_vm6, %v2792_v23 }
 0x487   : > { %v2620_v37 = vpop.f32.mrb[2].mxu1 }
 0x488   : > { %v1489_v38 = vmul.f32 %v2620_v37, %v1486_v35  ;;  %v1465_v39 = vpop.f32.mrb[3].mxu1 }
 0x489   : > { %v1488_v41 = vmul.f32 %v1481_v36, %v1465_v39 }
 0x48a   : > { %v1503_v43 = vadd.f32 %v1500_v40, %v1489_v38 }
 0x48b   : > { %v1502_v44 = vadd.f32 %v1495_v42, %v1488_v41  ;;  %v2222_v41 = vpop.permute.xlu0 %2221 }
 0x48c   : > { %v1505_v45 = vadd.f32 %v1503_v43, %v3023_v9 }
 0x48d   : > { %v1504_v46 = vadd.f32 %v1502_v44, %v3025_v10 }
 0x48e   : > { %vm1507_vm3 = vcmp.ge.f32.partialorder %v1505_v45, 0.0  ;;  %v1509_v47 = vmul.f32 0.2, %v1505_v45 }
 0x48f   : > { %vm1506_vm4 = vcmp.ge.f32.partialorder %v1504_v46, 0.0  ;;  %v1508_v48 = vmul.f32 0.2, %v1504_v46 }
 0x490   : > { %v1511_v49 = vsel %vm1507_vm3, %v1505_v45, %v1509_v47  ;;  %v2241_v45 = vpop.permute.xlu1 %2240  ;;  %v2236_v47 = vpop.permute.xlu0 %2235 }
 0x491   : > { %v1510_v50 = vsel %vm1506_vm4, %v1504_v46, %v1508_v48 }
 0x492   : > { %v1519_v51 = vpack.c.bf16 %v1511_v49, %v1510_v50 }
 0x494   : > { %2622 = vmatpush3.bf16.msra.mxu1 %v1519_v51 }
 0x495   : > { %2722 = vmatprep.subr.msk.bf16.mxu1 %vm3049_vm12, %v2794_v17 }
 0x497   : > { %2624 = vmatmul.mubr.msk.bf16.vlgmr.msra.gmra.mrb[8].mxu1 %vm1164_vm9, %v2776_v52 }
 0x498   : > { %2627 = vmatprep.mubr.msk.bf16.mxu1 %vm2793_vm6, %v2792_v23  ;;  %2724 = vmatpush3.bf16.msk.msra.mxu1 %vm3049_vm12, %v2794_v17 }
 0x499   : > { %2726 = vmatprep.subr.msk.bf16.mxu1 %vm3068_vm15, %v2794_v17 }
 0x49f   : > { %2628 = vmatmul.mubr.msk.bf16.gmra.mrb[12].mxu1 %vm1164_vm9, %v2777_v53  ;;  %v2255_v53 = vpop.permute.xlu0 %2254 }
 0x4a0   : > { %2631 = vmatprep.mubr.msk.bf16.mxu1 %vm2793_vm6, %v2792_v23 }
 0x4a7   : > { %2632 = vmatmul.mubr.msk.bf16.gmra.mrb[16].mxu1 %vm1164_vm9, %v2778_v54 }
 0x56a   : > { %v1578_v55 = vpop.f32.mrb[8].mxu1 }
 0x56b   : > { %v2625_v56 = vpop.f32.mrb[9].mxu1 }
 0x56c   : > { %v1581_v57 = vpop.f32.mrb[10].mxu1 }
 0x56d   : > { %v2626_v58 = vpop.f32.mrb[11].mxu1 }
 0x572   : > { %v1586_v59 = vpop.f32.mrb[12].mxu1 }
 0x573   : > { %v2629_v60 = vpop.f32.mrb[13].mxu1  ;;  %2639 = vmatprep.mubr.msk.f32.mxu0 %vm1164_vm9, %v1586_v59 }
 0x574   : > { %v1589_v61 = vpop.f32.mrb[14].mxu1 }
 0x575   : > { %v2630_v62 = vpop.f32.mrb[15].mxu1  ;;  %2640 = vmatmul.mubr.msk.f32.vlgmr.msra.gmra.mrb[10].mxu0 %vm1164_vm9, %v1589_v61 }
 0x576   : > { %2716 = vmatpush3.bf16.msk.msra.mxu0 %vm3068_vm15, %v2794_v17  ;;  %2646 = vmatprep.mubr.msk.f32.mxu0 %vm1164_vm9, %v1578_v55 }
 0x577   : > { %2718 = vmatprep.subr.msk.bf16.mxu0 %vm3082_vm2, %v2794_v17 }
 0x57a   : > { %v1594_v63 = vpop.f32.mrb[16].mxu1 }
 0x57b   : > { %v2633_v0 = vpop.f32.mrb[17].mxu1 }
 0x57c   : > { %v1597_v1 = vpop.f32.mrb[18].mxu1 }
 0x57d   : > { %2647 = vmatmul.mubr.msk.f32.vlgmr.msra.gmra.mrb[10].mxu0 %vm1164_vm9, %v1581_v57  ;;  %v2634_v2 = vpop.f32.mrb[19].mxu1 }
 0x57e   : > { %2720 = vmatpush3.bf16.msk.msra.mxu0 %vm3082_vm2, %v2794_v17  ;;  %2653 = vmatprep.mubr.msk.f32.mxu0 %vm1164_vm9, %v1594_v63 }
 0x57f   : > { %2656 = vmatprep.subr.bf16.mxu0 %v2792_v23 }
 0x585   : > { %2654 = vmatmul.mubr.msk.f32.vlgmr.msra.gmra.mrb[10].mxu0 %vm1164_vm9, %v1597_v1 }
 0x586   : > { %2658 = vmatprep.mubr.msk.bf16.mxu0 %vm2793_vm6, %v2792_v23 }
 0x658   : > { %v2655_v5 = vpop.f32.mrb[10].mxu0 }
 0x659   : > { %v1860_v6 = vmul.f32 %v2655_v5, %v1857_v3  ;;  %v1835_v11 = vpop.f32.mrb[11].mxu0 }
 0x65a   : > { %v1859_v13 = vmul.f32 %v1852_v4, %v1835_v11 }
 0x65b   : > { %v1875_v15 = vadd.f32 %v1872_v12, %v1860_v6 }
 0x65c   : > { %v1874_v16 = vadd.f32 %v1867_v14, %v1859_v13 }
 0x65d   : > { %v1877_v18 = vadd.f32 %v1875_v15, %v1511_v49 }
 0x65e   : > { %v1876_v19 = vadd.f32 %v1874_v16, %v1510_v50 }
 0x65f   : > { %vm1879_vm5 = vcmp.ge.f32.partialorder %v1877_v18, 0.0  ;;  %v1881_v21 = vmul.f32 0.2, %v1877_v18 }
 0x660   : > { %vm1878_vm7 = vcmp.ge.f32.partialorder %v1876_v19, 0.0  ;;  %v1880_v22 = vmul.f32 0.2, %v1876_v19 }
 0x661   : > { %v1883_v24 = vsel %vm1879_vm5, %v1877_v18, %v1881_v21 }
 0x662   : > { %v1882_v25 = vsel %vm1878_vm7, %v1876_v19, %v1880_v22 }
 0x663   : > { %v1890_v26 = vpack.c.bf16 %v1883_v24, %v1882_v25 }
 0x665   : > { %2657 = vmatpush3.bf16.msra.mxu0 %v1890_v26 }
 0x668   : > { %2659 = vmatmul.mubr.msk.bf16.vlgmr.msra.gmra.mrb[24].mxu0 %vm1164_vm9, %v2779_v27 }
 0x669   : > { %2662 = vmatprep.mubr.msk.bf16.mxu0 %vm2793_vm6, %v2792_v23 }
 0x670   : > { %2663 = vmatmul.mubr.msk.bf16.gmra.mrb[28].mxu0 %vm1164_vm9, %v2780_v28 }
 0x671   : > { %2666 = vmatprep.mubr.msk.bf16.mxu0 %vm2793_vm6, %v2792_v23 }
 0x678   : > { %2667 = vmatmul.mubr.msk.bf16.gmra.mrb[32].mxu0 %vm1164_vm9, %v2781_v29 }
 0x73b   : > { %v1949_v30 = vpop.f32.mrb[24].mxu0 }
 0x73c   : > { %v2660_v32 = vpop.f32.mrb[25].mxu0 }
 0x73d   : > { %v1952_v7 = vpop.f32.mrb[26].mxu0 }
 0x73e   : > { %v2661_v8 = vpop.f32.mrb[27].mxu0 }
 0x743   : > { %v1957_v33 = vpop.f32.mrb[28].mxu0 }
 0x744   : > { %v2664_v34 = vpop.f32.mrb[29].mxu0  ;;  %2674 = vmatprep.mubr.msk.f32.mxu1 %vm1164_vm9, %v1957_v33 }
 0x745   : > { %v1960_v35 = vpop.f32.mrb[30].mxu0 }
 0x746   : > { %v2665_v36 = vpop.f32.mrb[31].mxu0  ;;  %2675 = vmatmul.mubr.msk.f32.vlgmr.msra.gmra.mrb[20].mxu1 %vm1164_vm9, %v1960_v35 }
 0x747   : > { %2728 = vmatpush3.bf16.msk.msra.mxu1 %vm3068_vm15, %v2794_v17  ;;  %2681 = vmatprep.mubr.msk.f32.mxu1 %vm1164_vm9, %v1949_v30 }
 0x748   : > { %2730 = vmatprep.subr.msk.bf16.mxu1 %vm3082_vm2, %v2794_v17 }
 0x74b   : > { %v1965_v37 = vpop.f32.mrb[32].mxu0 }
 0x74c   : > { %v2668_v38 = vpop.f32.mrb[33].mxu0 }
 0x74d   : > { %v1968_v39 = vpop.f32.mrb[34].mxu0 }
 0x74e   : > { %2682 = vmatmul.mubr.msk.f32.vlgmr.msra.gmra.mrb[20].mxu1 %vm1164_vm9, %v1952_v7  ;;  %v2669_v40 = vpop.f32.mrb[35].mxu0 }
 0x74f   : > { %2732 = vmatpush3.bf16.msk.msra.mxu1 %vm3082_vm2, %v2794_v17  ;;  %2688 = vmatprep.mubr.msk.f32.mxu1 %vm1164_vm9, %v1965_v37 }
 0x750   : > { %2691 = vmatprep.subr.bf16.mxu1 %v2792_v23 }
 0x756   : > { %2689 = vmatmul.mubr.msk.f32.vlgmr.msra.gmra.mrb[20].mxu1 %vm1164_vm9, %v1968_v39 }
 0x757   : > { %2693 = vmatprep.mubr.msk.bf16.mxu1 %vm2793_vm6, %v2792_v23  ;;  %v2249_v23 = vld [vmem:[%s3207_s12] sm:$0x7]  ;;  %vm2300_vm6 = vcmask 128000  }
 0x829   : > { %v2690_v42 = vpop.f32.mrb[20].mxu1 }
 0x82a   : > { %v2230_v43 = vmul.f32 %v2690_v42, %v2227_v20  ;;  %v2206_v44 = vpop.f32.mrb[21].mxu1 }
 0x82b   : > { %v2229_v46 = vmul.f32 %v2222_v41, %v2206_v44 }
 0x82c   : > { %v2244_v31 = vadd.f32 %v2241_v45, %v2230_v43 }
 0x82d   : > { %v2243_v17 = vadd.f32 %v2236_v47, %v2229_v46 }
 0x82e   : > { %v2246_v48 = vadd.f32 %v2244_v31, %v3023_v9 }
 0x82f   : > { %v2245_v49 = vadd.f32 %v2243_v17, %v3025_v10 }
 0x830   : > { %v2248_v50 = vmax.f32 %v2246_v48, 0.0 }
 0x831   : > { %v2247_v51 = vmax.f32 %v2245_v49, 0.0 }
 0x833   : > { %v2250_v52 = vpack.c.bf16 %v2248_v50, %v2247_v51 }
 0x835   : > { %2692 = vmatpush3.bf16.msra.mxu1 %v2250_v52 }
 0x838   : > { %2694 = vmatmul.mubr.msk.bf16.vlgmr.msra.gmra.mrb[24].mxu1 %vm1164_vm9, %v2249_v23 }
 0x90b   : > { %v2294_v54 = vpop.f32.mrb[24].mxu1 }
 0x90c   : > { %v2295_v9 = vadd.f32 %v2294_v54, %v2255_v53  ;;  %v2695_v10 = vpop.f32.mrb[25].mxu1 }
 0x90d   : > { %v2297_v55 = vpop.f32.mrb[26].mxu1 }
 0x90e   : > { %2301 = vst.msk [vmem:[%s465_s20] sm:$0x3f] %vm2300_vm6, %v2295_v9  ;;  %v2696_v56 = vpop.f32.mrb[27].mxu1 }
 0x90f PF: > { %s24_s29 = sadd.s32 1, %s2788_s29  }
 0x910   : > { %p21_p4 = scmp.ge.s32.totalorder %s24_s29, 4  }
 0x912   :  { %23 = sbr.rel (!%p21_p4) target bundleno = 1 (0x1), region = 109 }

</bundles_post_ra>
